<compile_context>
chip_gen: v7x
topology: tpu7x:2x2x1
jax: 0.10.0
libtpu: 0.0.40
codegen_flags: <defaults>
</compile_context>

<pallas_src>
import numpy as np
import jax
import jax.numpy as jnp
from jax.experimental import pallas as pl
from jax.experimental.pallas import tpu as pltpu

_BN_EPS = 1e-5
_BASE = 8  # base_channels in the PyTorch module


# ----------------------------------------------------------------------------
# In-kernel helpers
# ----------------------------------------------------------------------------

def _banded_conv3x3(x_rows_f32, m_ref, xp_ref, H):
    """One 3x3 conv (padding=1) as 3 banded matmuls.

    x_rows_f32: (H, W*Cin) f32 value (pixel-channel interleaved rows)
    m_ref     : (3, W*Cin, W*Cout) bf16 banded weights (dx taps + W-edge zero
                padding folded in; dy is the leading index)
    xp_ref    : (H+2, W*Cin) f32 VMEM scratch (1-row zero halo top/bottom)
    returns (H, W*Cout) f32 pre-activation.
    """
    WCin = xp_ref.shape[1]
    WCout = m_ref.shape[2]
    # Zero only the two halo rows; the interior is fully overwritten below.
    xp_ref[0:1, :] = jnp.zeros((1, WCin), jnp.float32)
    xp_ref[H + 1:H + 2, :] = jnp.zeros((1, WCin), jnp.float32)
    xp_ref[1:H + 1, :] = x_rows_f32
    acc = jnp.zeros((H, WCout), jnp.float32)
    for dy in range(3):  # static unroll: 3 fat MXU matmuls
        rows = xp_ref[dy:dy + H, :].astype(jnp.bfloat16)
        acc = acc + jnp.dot(rows, m_ref[dy],
                            preferred_element_type=jnp.float32)
    return acc


# ----------------------------------------------------------------------------
# Pallas kernels
# ----------------------------------------------------------------------------

def _double_conv_kernel(x_ref, m1_ref, m2_ref, o_ref, xp1_ref, xp2_ref):
    # x_ref: (1, H, W*Cin) bf16 ; o_ref: (1, H, W*Cout) bf16
    H = x_ref.shape[1]
    h1 = _banded_conv3x3(x_ref[0].astype(jnp.float32), m1_ref, xp1_ref, H)
    h1 = jnp.maximum(h1, 0.0)                                 # ReLU (VPU)
    h2 = _banded_conv3x3(h1, m2_ref, xp2_ref, H)
    h2 = jnp.maximum(h2, 0.0)
    o_ref[...] = h2.reshape(o_ref.shape).astype(o_ref.dtype)  # lane-dense store


def _double_conv_out_kernel(x_ref, m1_ref, m2_ref, mo_ref, bo_ref, o_ref,
                            xp1_ref, xp2_ref):
    # Final stage: double conv + 1x1 conv (block-diag matmul) + sigmoid.
    # mo_ref: (W*Cmid, W) f32 ; bo_ref: (1, 1) f32 ; o_ref: (1, H, W) f32
    H = x_ref.shape[1]
    h1 = _banded_conv3x3(x_ref[0].astype(jnp.float32), m1_ref, xp1_ref, H)
    h1 = jnp.maximum(h1, 0.0)
    h2 = _banded_conv3x3(h1, m2_ref, xp2_ref, H)
    h2 = jnp.maximum(h2, 0.0)                                  # (H, W*Cmid)
    y = jnp.dot(h2, mo_ref[...], preferred_element_type=jnp.float32)
    y = jax.nn.sigmoid(y + bo_ref[...])                        # EUP
    o_ref[...] = y.reshape(o_ref.shape).astype(o_ref.dtype)


# ----------------------------------------------------------------------------
# Pallas wrappers
# ----------------------------------------------------------------------------

def _compiler_params():
    # Batch axis -> both TensorCores on v7x; no oversized VMEM request (usage
    # is ~3 MiB, well under the default scoped limit on v5e/v6e/v7x).
    return pltpu.CompilerParams(dimension_semantics=("parallel",))


def double_conv(x_rows, m1, m2):
    """Fused conv_plus_conv stage in interleaved-row layout.

    x_rows: (N, H, W*Cin) bf16 -> (N, H, W*Cout) bf16.
    Equivalent to [Conv2d(3x3, p=1, no bias) + BatchNorm2d(eval) + ReLU] x 2.
    """
    N, H, WCin = x_rows.shape
    WCmid = m1.shape[2]
    WCout = m2.shape[2]
    return pl.pallas_call(
        _double_conv_kernel,
        out_shape=jax.ShapeDtypeStruct((N, H, WCout), jnp.bfloat16),
        grid_spec=pltpu.PrefetchScalarGridSpec(
            num_scalar_prefetch=0,
            grid=(N,),
            in_specs=[
                pl.BlockSpec((1, H, WCin), lambda n: (n, 0, 0)),
                pl.BlockSpec((3, WCin, WCmid), lambda n: (0, 0, 0)),
                pl.BlockSpec((3, WCmid, WCout), lambda n: (0, 0, 0)),
            ],
            out_specs=pl.BlockSpec((1, H, WCout), lambda n: (n, 0, 0)),
            scratch_shapes=[
                pltpu.VMEM((H + 2, WCin), jnp.float32),
                pltpu.VMEM((H + 2, WCmid), jnp.float32),
            ],
        ),
        compiler_params=_compiler_params(),
    )(x_rows, m1, m2)


def double_conv_out(x_rows, m1, m2, mo, bo):
    """Final fused stage: conv_plus_conv + Conv2d(1x1, bias) + sigmoid.

    x_rows: (N, H, W*Cin) bf16 -> (N, H, W) f32.
    """
    N, H, WCin = x_rows.shape
    WCmid = m1.shape[2]
    WCmid2 = m2.shape[2]
    W = mo.shape[1]
    return pl.pallas_call(
        _double_conv_out_kernel,
        out_shape=jax.ShapeDtypeStruct((N, H, W), jnp.float32),
        grid_spec=pltpu.PrefetchScalarGridSpec(
            num_scalar_prefetch=0,
            grid=(N,),
            in_specs=[
                pl.BlockSpec((1, H, WCin), lambda n: (n, 0, 0)),
                pl.BlockSpec((3, WCin, WCmid), lambda n: (0, 0, 0)),
                pl.BlockSpec((3, WCmid, WCmid2), lambda n: (0, 0, 0)),
                pl.BlockSpec((WCmid2, W), lambda n: (0, 0)),
                pl.BlockSpec((1, 1), lambda n: (0, 0)),
            ],
            out_specs=pl.BlockSpec((1, H, W), lambda n: (n, 0, 0)),
            scratch_shapes=[
                pltpu.VMEM((H + 2, WCin), jnp.float32),
                pltpu.VMEM((H + 2, WCmid), jnp.float32),
            ],
        ),
        compiler_params=_compiler_params(),
    )(x_rows, m1, m2, mo, bo)


# ----------------------------------------------------------------------------
# Plain-JAX glue (cheap, fused by jit): maxpool, nearest upsample, concat
# ----------------------------------------------------------------------------

def maxpool2(x):
    # nn.MaxPool2d(kernel_size=2) in NHWC
    n, h, w, c = x.shape
    return x.reshape(n, h // 2, 2, w // 2, 2, c).max(axis=(2, 4))


def upsample2(x):
    # nn.functional.interpolate(scale_factor=2), default mode='nearest', NHWC
    return jnp.repeat(jnp.repeat(x, 2, axis=1), 2, axis=2)


# ----------------------------------------------------------------------------
# Parameter setup (deterministic, synthetic; BN folded; banded conv weights)
# ----------------------------------------------------------------------------

def _torch_conv3x3_weight(key, cin, cout):
    # PyTorch Conv2d default init layout (Cout, Cin, 3, 3).
    bound = 1.0 / np.sqrt(cin * 9)
    w = jax.random.uniform(key, (cout, cin, 3, 3), jnp.float32, -bound, bound)
    return np.asarray(w)


def _banded_from_conv(wt, width):
    """(Cout, Cin, 3, 3) torch weight -> (3, width*Cin, width*Cout) banded
    matrices implementing the horizontal taps + zero W-edge padding."""
    cout, cin = wt.shape[0], wt.shape[1]
    m = np.zeros((3, width * cin, width * cout), np.float32)
    for dy in range(3):
        for dx in range(3):
            blk = wt[:, :, dy, dx].T  # (Cin, Cout)
            for w in range(width):
                s = w + dx - 1
                if 0 <= s < width:  # taps outside the image == zero padding
                    m[dy, s * cin:(s + 1) * cin, w * cout:(w + 1) * cout] = blk
    return m


def _init_stage(key, cin, cout, width):
    k1, k2 = jax.random.split(key)
    # BatchNorm2d eval fold, PyTorch defaults (gamma=1, beta=0, mean=0, var=1):
    # scale folded into the conv weights; bias is identically 0 -> dropped.
    scale = 1.0 / np.sqrt(1.0 + _BN_EPS)
    m1 = _banded_from_conv(_torch_conv3x3_weight(k1, cin, cout) * scale, width)
    m2 = _banded_from_conv(_torch_conv3x3_weight(k2, cout, cout) * scale, width)
    return dict(m1=jnp.asarray(m1, jnp.bfloat16),
                m2=jnp.asarray(m2, jnp.bfloat16))


def init_unet_params(key, hw=32):
    assert hw % 32 == 0, "spatial size must be divisible by 32 (5 pool stages)"
    bc = _BASE
    keys = jax.random.split(key, 12)
    widths = dict(down1=hw, down2=hw // 2, down3=hw // 4, down4=hw // 8,
                  down5=hw // 16, up5=hw // 16, up4=hw // 8, up3=hw // 4,
                  up2=hw // 2, up1=hw)
    chans = dict(down1=(1, bc), down2=(bc, bc * 2), down3=(bc * 2, bc * 4),
                 down4=(bc * 4, bc * 8), down5=(bc * 8, bc * 16),
                 up5=(bc * 32, bc * 8), up4=(bc * 16, bc * 4),
                 up3=(bc * 8, bc * 2), up2=(bc * 4, bc), up1=(bc * 2, bc))
    names = ["down1", "down2", "down3", "down4", "down5",
             "up1", "up2", "up3", "up4", "up5"]
    params = {}
    for i, name in enumerate(names):
        cin, cout = chans[name]
        params[name] = _init_stage(keys[i], cin, cout, widths[name])
    # out: Conv2d(bc, 1, kernel_size=1) with bias, as a block-diag (W*bc, W).
    bound = 1.0 / np.sqrt(bc)
    wo = np.asarray(jax.random.uniform(keys[10], (bc,), jnp.float32,
                                       -bound, bound))
    mo = np.zeros((hw * bc, hw), np.float32)
    for w in range(hw):
        mo[w * bc:(w + 1) * bc, w] = wo
    params["out_m"] = jnp.asarray(mo)
    params["out_b"] = jax.random.uniform(keys[11], (1, 1), jnp.float32,
                                         -bound, bound)
    return params


# ----------------------------------------------------------------------------
# UNET forward
# ----------------------------------------------------------------------------

def _dc(x4d, p):
    """Run a fused conv_plus_conv stage on an NHWC tensor."""
    n, h, w, c = x4d.shape
    cout = p["m2"].shape[2] // w
    y = double_conv(x4d.reshape(n, h, w * c), p["m1"], p["m2"])
    return y.reshape(n, h, w, cout)


def unet_forward(params, x_nchw):
    """x_nchw: (N, 1, H, W) with H, W divisible by 32. Returns (N, 1, H, W) f32."""
    x = jnp.transpose(x_nchw, (0, 2, 3, 1)).astype(jnp.bfloat16)  # NCHW -> NHWC

    r1 = _dc(x, params["down1"]); x = maxpool2(r1)
    r2 = _dc(x, params["down2"]); x = maxpool2(r2)
    r3 = _dc(x, params["down3"]); x = maxpool2(r3)
    r4 = _dc(x, params["down4"]); x = maxpool2(r4)
    r5 = _dc(x, params["down5"]); x = maxpool2(r5)

    x = jnp.concatenate([upsample2(x), r5], axis=-1); x = _dc(x, params["up5"])
    x = jnp.concatenate([upsample2(x), r4], axis=-1); x = _dc(x, params["up4"])
    x = jnp.concatenate([upsample2(x), r3], axis=-1); x = _dc(x, params["up3"])
    x = jnp.concatenate([upsample2(x), r2], axis=-1); x = _dc(x, params["up2"])
    x = jnp.concatenate([upsample2(x), r1], axis=-1)

    # up1 + out(1x1 conv) + sigmoid, all in one fused kernel.
    n, h, w, c = x.shape
    y = double_conv_out(x.reshape(n, h, w * c),
                        params["up1"]["m1"], params["up1"]["m2"],
                        params["out_m"], params["out_b"])        # (N, H, W) f32
    return y[:, None, :, :]                                       # NCHW


# ----------------------------------------------------------------------------
# Main
# ----------------------------------------------------------------------------

if __name__ == "__main__":
    key = jax.random.PRNGKey(0)
    pkey, xkey = jax.random.split(key)
    params = init_unet_params(pkey, hw=32)

    # Input must be spatially divisible by 32 (5 max-pool stages).
    x = jax.random.normal(xkey, (2, 1, 32, 32), jnp.float32)

    fwd = jax.jit(unet_forward)
    out = jax.block_until_ready(fwd(params, x))

    assert out.shape == (2, 1, 32, 32), out.shape
    assert bool(jnp.all(jnp.isfinite(out)))
    assert bool(jnp.all((out >= 0.0) & (out <= 1.0)))  # sigmoid range
    print("KERNEL_OK")
</pallas_src>

<mosaic_0001>
module attributes {stable_mosaic.version = 11 : i64} {
  func.func @_double_conv_kernel(%arg0: i32, %arg1: memref<1x32x32xbf16, #tpu.memory_space<vmem>>, %arg2: memref<3x32x256xbf16, #tpu.memory_space<vmem>>, %arg3: memref<3x256x256xbf16, #tpu.memory_space<vmem>>, %arg4: memref<1x32x256xbf16, #tpu.memory_space<vmem>>, %arg5: memref<34x32xf32, #tpu.memory_space<vmem>>, %arg6: memref<34x256xf32, #tpu.memory_space<vmem>>) attributes {dimension_semantics = [#tpu.dimension_semantics<parallel>], iteration_bounds = array<i64: 2>, scalar_prefetch = 0 : i64, scratch_operands = 2 : i64, tpu.core_type = #tpu.core_type<tc>, window_params = [{transform_indices = @transform_0, window_bounds = array<i64: 1, 32, 32>}, {pipeline_mode = #tpu.pipeline_mode<synchronous>, transform_indices = @transform_1, window_bounds = array<i64: 3, 32, 256>}, {pipeline_mode = #tpu.pipeline_mode<synchronous>, transform_indices = @transform_2, window_bounds = array<i64: 3, 256, 256>}, {transform_indices = @transform_3, window_bounds = array<i64: 1, 32, 256>}]} {
    %c0 = arith.constant 0 : index
    %c0_0 = arith.constant 0 : index
    %c0_1 = arith.constant 0 : index
    %0 = vector.load %arg1[%c0, %c0_0, %c0_1] : memref<1x32x32xbf16, #tpu.memory_space<vmem>>, vector<1x32x32xbf16>
    %1 = vector.shape_cast %0 : vector<1x32x32xbf16> to vector<32x32xbf16>
    %2 = arith.extf %1 : vector<32x32xbf16> to vector<32x32xf32>
    %cst = arith.constant 0.000000e+00 : f32
    %3 = vector.broadcast %cst : f32 to vector<1x32xf32>
    %c0_2 = arith.constant 0 : index
    %c0_3 = arith.constant 0 : index
    %4 = vector.load %arg5[%c0_2, %c0_3] : memref<34x32xf32, #tpu.memory_space<vmem>>, vector<1x32xf32>
    tpu.vector_store %arg5[%c0_2, %c0_3], %3 {strides = array<i32>} : memref<34x32xf32, #tpu.memory_space<vmem>>, vector<1x32xf32>,
    %cst_4 = arith.constant 0.000000e+00 : f32
    %5 = vector.broadcast %cst_4 : f32 to vector<1x32xf32>
    %c33 = arith.constant 33 : index
    %c0_5 = arith.constant 0 : index
    %6 = vector.load %arg5[%c33, %c0_5] : memref<34x32xf32, #tpu.memory_space<vmem>>, vector<1x32xf32>
    tpu.vector_store %arg5[%c33, %c0_5], %5 {strides = array<i32>} : memref<34x32xf32, #tpu.memory_space<vmem>>, vector<1x32xf32>,
    %c1 = arith.constant 1 : index
    %c0_6 = arith.constant 0 : index
    %7 = vector.load %arg5[%c1, %c0_6] : memref<34x32xf32, #tpu.memory_space<vmem>>, vector<32x32xf32>
    tpu.vector_store %arg5[%c1, %c0_6], %2 {strides = array<i32>} : memref<34x32xf32, #tpu.memory_space<vmem>>, vector<32x32xf32>,
    %cst_7 = arith.constant 0.000000e+00 : f32
    %8 = vector.broadcast %cst_7 : f32 to vector<32x256xf32>
    %c0_8 = arith.constant 0 : index
    %c0_9 = arith.constant 0 : index
    %9 = vector.load %arg5[%c0_8, %c0_9] : memref<34x32xf32, #tpu.memory_space<vmem>>, vector<32x32xf32>
    %10 = arith.truncf %9 : vector<32x32xf32> to vector<32x32xbf16>
    %c0_10 = arith.constant 0 : index
    %c0_11 = arith.constant 0 : index
    %c0_12 = arith.constant 0 : index
    %11 = vector.load %arg2[%c0_10, %c0_11, %c0_12] : memref<3x32x256xbf16, #tpu.memory_space<vmem>>, vector<1x32x256xbf16>
    %12 = vector.shape_cast %11 : vector<1x32x256xbf16> to vector<32x256xbf16>
    %cst_13 = arith.constant dense<0.000000e+00> : vector<32x256xf32>
    %13 = tpu.matmul %10, %12, %cst_13 {dimension_numbers = #tpu.dot_dimension_numbers<[1], [0], [0], [1], [0, 0, 1, 1], [], []>} : vector<32x32xbf16>, vector<32x256xbf16>, vector<32x256xf32> -> vector<32x256xf32>
    %14 = arith.addf %8, %13 : vector<32x256xf32>
    %c1_14 = arith.constant 1 : index
    %c0_15 = arith.constant 0 : index
    %15 = vector.load %arg5[%c1_14, %c0_15] : memref<34x32xf32, #tpu.memory_space<vmem>>, vector<32x32xf32>
    %16 = arith.truncf %15 : vector<32x32xf32> to vector<32x32xbf16>
    %c1_16 = arith.constant 1 : index
    %c0_17 = arith.constant 0 : index
    %c0_18 = arith.constant 0 : index
    %17 = vector.load %arg2[%c1_16, %c0_17, %c0_18] : memref<3x32x256xbf16, #tpu.memory_space<vmem>>, vector<1x32x256xbf16>
    %18 = vector.shape_cast %17 : vector<1x32x256xbf16> to vector<32x256xbf16>
    %cst_19 = arith.constant dense<0.000000e+00> : vector<32x256xf32>
    %19 = tpu.matmul %16, %18, %cst_19 {dimension_numbers = #tpu.dot_dimension_numbers<[1], [0], [0], [1], [0, 0, 1, 1], [], []>} : vector<32x32xbf16>, vector<32x256xbf16>, vector<32x256xf32> -> vector<32x256xf32>
    %20 = arith.addf %14, %19 : vector<32x256xf32>
    %c2 = arith.constant 2 : index
    %c0_20 = arith.constant 0 : index
    %21 = vector.load %arg5[%c2, %c0_20] : memref<34x32xf32, #tpu.memory_space<vmem>>, vector<32x32xf32>
    %22 = arith.truncf %21 : vector<32x32xf32> to vector<32x32xbf16>
    %c2_21 = arith.constant 2 : index
    %c0_22 = arith.constant 0 : index
    %c0_23 = arith.constant 0 : index
    %23 = vector.load %arg2[%c2_21, %c0_22, %c0_23] : memref<3x32x256xbf16, #tpu.memory_space<vmem>>, vector<1x32x256xbf16>
    %24 = vector.shape_cast %23 : vector<1x32x256xbf16> to vector<32x256xbf16>
    %cst_24 = arith.constant dense<0.000000e+00> : vector<32x256xf32>
    %25 = tpu.matmul %22, %24, %cst_24 {dimension_numbers = #tpu.dot_dimension_numbers<[1], [0], [0], [1], [0, 0, 1, 1], [], []>} : vector<32x32xbf16>, vector<32x256xbf16>, vector<32x256xf32> -> vector<32x256xf32>
    %26 = arith.addf %20, %25 : vector<32x256xf32>
    %cst_25 = arith.constant 0.000000e+00 : f32
    %27 = vector.broadcast %cst_25 : f32 to vector<32x256xf32>
    %28 = arith.maximumf %26, %27 : vector<32x256xf32>
    %cst_26 = arith.constant 0.000000e+00 : f32
    %29 = vector.broadcast %cst_26 : f32 to vector<1x256xf32>
    %c0_27 = arith.constant 0 : index
    %c0_28 = arith.constant 0 : index
    %30 = vector.load %arg6[%c0_27, %c0_28] : memref<34x256xf32, #tpu.memory_space<vmem>>, vector<1x256xf32>
    tpu.vector_store %arg6[%c0_27, %c0_28], %29 {strides = array<i32>} : memref<34x256xf32, #tpu.memory_space<vmem>>, vector<1x256xf32>,
    %cst_29 = arith.constant 0.000000e+00 : f32
    %31 = vector.broadcast %cst_29 : f32 to vector<1x256xf32>
    %c33_30 = arith.constant 33 : index
    %c0_31 = arith.constant 0 : index
    %32 = vector.load %arg6[%c33_30, %c0_31] : memref<34x256xf32, #tpu.memory_space<vmem>>, vector<1x256xf32>
    tpu.vector_store %arg6[%c33_30, %c0_31], %31 {strides = array<i32>} : memref<34x256xf32, #tpu.memory_space<vmem>>, vector<1x256xf32>,
    %c1_32 = arith.constant 1 : index
    %c0_33 = arith.constant 0 : index
    %33 = vector.load %arg6[%c1_32, %c0_33] : memref<34x256xf32, #tpu.memory_space<vmem>>, vector<32x256xf32>
    tpu.vector_store %arg6[%c1_32, %c0_33], %28 {strides = array<i32>} : memref<34x256xf32, #tpu.memory_space<vmem>>, vector<32x256xf32>,
    %cst_34 = arith.constant 0.000000e+00 : f32
    %34 = vector.broadcast %cst_34 : f32 to vector<32x256xf32>
    %c0_35 = arith.constant 0 : index
    %c0_36 = arith.constant 0 : index
    %35 = vector.load %arg6[%c0_35, %c0_36] : memref<34x256xf32, #tpu.memory_space<vmem>>, vector<32x256xf32>
    %36 = arith.truncf %35 : vector<32x256xf32> to vector<32x256xbf16>
    %c0_37 = arith.constant 0 : index
    %c0_38 = arith.constant 0 : index
    %c0_39 = arith.constant 0 : index
    %37 = vector.load %arg3[%c0_37, %c0_38, %c0_39] : memref<3x256x256xbf16, #tpu.memory_space<vmem>>, vector<1x256x256xbf16>
    %38 = vector.shape_cast %37 : vector<1x256x256xbf16> to vector<256x256xbf16>
    %cst_40 = arith.constant dense<0.000000e+00> : vector<32x256xf32>
    %39 = tpu.matmul %36, %38, %cst_40 {dimension_numbers = #tpu.dot_dimension_numbers<[1], [0], [0], [1], [0, 0, 1, 1], [], []>} : vector<32x256xbf16>, vector<256x256xbf16>, vector<32x256xf32> -> vector<32x256xf32>
    %40 = arith.addf %34, %39 : vector<32x256xf32>
    %c1_41 = arith.constant 1 : index
    %c0_42 = arith.constant 0 : index
    %41 = vector.load %arg6[%c1_41, %c0_42] : memref<34x256xf32, #tpu.memory_space<vmem>>, vector<32x256xf32>
    %42 = arith.truncf %41 : vector<32x256xf32> to vector<32x256xbf16>
    %c1_43 = arith.constant 1 : index
    %c0_44 = arith.constant 0 : index
    %c0_45 = arith.constant 0 : index
    %43 = vector.load %arg3[%c1_43, %c0_44, %c0_45] : memref<3x256x256xbf16, #tpu.memory_space<vmem>>, vector<1x256x256xbf16>
    %44 = vector.shape_cast %43 : vector<1x256x256xbf16> to vector<256x256xbf16>
    %cst_46 = arith.constant dense<0.000000e+00> : vector<32x256xf32>
    %45 = tpu.matmul %42, %44, %cst_46 {dimension_numbers = #tpu.dot_dimension_numbers<[1], [0], [0], [1], [0, 0, 1, 1], [], []>} : vector<32x256xbf16>, vector<256x256xbf16>, vector<32x256xf32> -> vector<32x256xf32>
    %46 = arith.addf %40, %45 : vector<32x256xf32>
    %c2_47 = arith.constant 2 : index
    %c0_48 = arith.constant 0 : index
    %47 = vector.load %arg6[%c2_47, %c0_48] : memref<34x256xf32, #tpu.memory_space<vmem>>, vector<32x256xf32>
    %48 = arith.truncf %47 : vector<32x256xf32> to vector<32x256xbf16>
    %c2_49 = arith.constant 2 : index
    %c0_50 = arith.constant 0 : index
    %c0_51 = arith.constant 0 : index
    %49 = vector.load %arg3[%c2_49, %c0_50, %c0_51] : memref<3x256x256xbf16, #tpu.memory_space<vmem>>, vector<1x256x256xbf16>
    %50 = vector.shape_cast %49 : vector<1x256x256xbf16> to vector<256x256xbf16>
    %cst_52 = arith.constant dense<0.000000e+00> : vector<32x256xf32>
    %51 = tpu.matmul %48, %50, %cst_52 {dimension_numbers = #tpu.dot_dimension_numbers<[1], [0], [0], [1], [0, 0, 1, 1], [], []>} : vector<32x256xbf16>, vector<256x256xbf16>, vector<32x256xf32> -> vector<32x256xf32>
    %52 = arith.addf %46, %51 : vector<32x256xf32>
    %cst_53 = arith.constant 0.000000e+00 : f32
    %53 = vector.broadcast %cst_53 : f32 to vector<32x256xf32>
    %54 = arith.maximumf %52, %53 : vector<32x256xf32>
    %55 = vector.shape_cast %54 : vector<32x256xf32> to vector<1x32x256xf32>
    %56 = arith.truncf %55 : vector<1x32x256xf32> to vector<1x32x256xbf16>
    %c0_54 = arith.constant 0 : index
    %c0_55 = arith.constant 0 : index
    %c0_56 = arith.constant 0 : index
    %57 = vector.load %arg4[%c0_54, %c0_55, %c0_56] : memref<1x32x256xbf16, #tpu.memory_space<vmem>>, vector<1x32x256xbf16>
    tpu.vector_store %arg4[%c0_54, %c0_55, %c0_56], %56 {strides = array<i32>} : memref<1x32x256xbf16, #tpu.memory_space<vmem>>, vector<1x32x256xbf16>,
    return
  }
  func.func @transform_0(%arg0: i32) -> (i32, i32, i32) {
    %c0_i32 = arith.constant 0 : i32
    %c0_i32_0 = arith.constant 0 : i32
    %c0_i32_1 = arith.constant 0 : i32
    return %arg0, %c0_i32, %c0_i32_0 : i32, i32, i32
  }
  func.func @transform_1(%arg0: i32) -> (i32, i32, i32) {
    %c0_i32 = arith.constant 0 : i32
    %c0_i32_0 = arith.constant 0 : i32
    %c0_i32_1 = arith.constant 0 : i32
    %c0_i32_2 = arith.constant 0 : i32
    return %c0_i32, %c0_i32_0, %c0_i32_1 : i32, i32, i32
  }
  func.func @transform_2(%arg0: i32) -> (i32, i32, i32) {
    %c0_i32 = arith.constant 0 : i32
    %c0_i32_0 = arith.constant 0 : i32
    %c0_i32_1 = arith.constant 0 : i32
    %c0_i32_2 = arith.constant 0 : i32
    return %c0_i32, %c0_i32_0, %c0_i32_1 : i32, i32, i32
  }
  func.func @transform_3(%arg0: i32) -> (i32, i32, i32) {
    %c0_i32 = arith.constant 0 : i32
    %c0_i32_0 = arith.constant 0 : i32
    %c0_i32_1 = arith.constant 0 : i32
    return %arg0, %c0_i32, %c0_i32_0 : i32, i32, i32
  }
}

module attributes {stable_mosaic.version = 11 : i64} {
  func.func @_double_conv_kernel(%arg0: i32, %arg1: memref<1x16x128xbf16, #tpu.memory_space<vmem>>, %arg2: memref<3x128x256xbf16, #tpu.memory_space<vmem>>, %arg3: memref<3x256x256xbf16, #tpu.memory_space<vmem>>, %arg4: memref<1x16x256xbf16, #tpu.memory_space<vmem>>, %arg5: memref<18x128xf32, #tpu.memory_space<vmem>>, %arg6: memref<18x256xf32, #tpu.memory_space<vmem>>) attributes {dimension_semantics = [#tpu.dimension_semantics<parallel>], iteration_bounds = array<i64: 2>, scalar_prefetch = 0 : i64, scratch_operands = 2 : i64, tpu.core_type = #tpu.core_type<tc>, window_params = [{transform_indices = @transform_0, window_bounds = array<i64: 1, 16, 128>}, {pipeline_mode = #tpu.pipeline_mode<synchronous>, transform_indices = @transform_1, window_bounds = array<i64: 3, 128, 256>}, {pipeline_mode = #tpu.pipeline_mode<synchronous>, transform_indices = @transform_2, window_bounds = array<i64: 3, 256, 256>}, {transform_indices = @transform_3, window_bounds = array<i64: 1, 16, 256>}]} {
    %c0 = arith.constant 0 : index
    %c0_0 = arith.constant 0 : index
    %c0_1 = arith.constant 0 : index
    %0 = vector.load %arg1[%c0, %c0_0, %c0_1] : memref<1x16x128xbf16, #tpu.memory_space<vmem>>, vector<1x16x128xbf16>
    %1 = vector.shape_cast %0 : vector<1x16x128xbf16> to vector<16x128xbf16>
    %2 = arith.extf %1 : vector<16x128xbf16> to vector<16x128xf32>
    %cst = arith.constant 0.000000e+00 : f32
    %3 = vector.broadcast %cst : f32 to vector<1x128xf32>
    %c0_2 = arith.constant 0 : index
    %c0_3 = arith.constant 0 : index
    %4 = vector.load %arg5[%c0_2, %c0_3] : memref<18x128xf32, #tpu.memory_space<vmem>>, vector<1x128xf32>
    tpu.vector_store %arg5[%c0_2, %c0_3], %3 {strides = array<i32>} : memref<18x128xf32, #tpu.memory_space<vmem>>, vector<1x128xf32>,
    %cst_4 = arith.constant 0.000000e+00 : f32
    %5 = vector.broadcast %cst_4 : f32 to vector<1x128xf32>
    %c17 = arith.constant 17 : index
    %c0_5 = arith.constant 0 : index
    %6 = vector.load %arg5[%c17, %c0_5] : memref<18x128xf32, #tpu.memory_space<vmem>>, vector<1x128xf32>
    tpu.vector_store %arg5[%c17, %c0_5], %5 {strides = array<i32>} : memref<18x128xf32, #tpu.memory_space<vmem>>, vector<1x128xf32>,
    %c1 = arith.constant 1 : index
    %c0_6 = arith.constant 0 : index
    %7 = vector.load %arg5[%c1, %c0_6] : memref<18x128xf32, #tpu.memory_space<vmem>>, vector<16x128xf32>
    tpu.vector_store %arg5[%c1, %c0_6], %2 {strides = array<i32>} : memref<18x128xf32, #tpu.memory_space<vmem>>, vector<16x128xf32>,
    %cst_7 = arith.constant 0.000000e+00 : f32
    %8 = vector.broadcast %cst_7 : f32 to vector<16x256xf32>
    %c0_8 = arith.constant 0 : index
    %c0_9 = arith.constant 0 : index
    %9 = vector.load %arg5[%c0_8, %c0_9] : memref<18x128xf32, #tpu.memory_space<vmem>>, vector<16x128xf32>
    %10 = arith.truncf %9 : vector<16x128xf32> to vector<16x128xbf16>
    %c0_10 = arith.constant 0 : index
    %c0_11 = arith.constant 0 : index
    %c0_12 = arith.constant 0 : index
    %11 = vector.load %arg2[%c0_10, %c0_11, %c0_12] : memref<3x128x256xbf16, #tpu.memory_space<vmem>>, vector<1x128x256xbf16>
    %12 = vector.shape_cast %11 : vector<1x128x256xbf16> to vector<128x256xbf16>
    %cst_13 = arith.constant dense<0.000000e+00> : vector<16x256xf32>
    %13 = tpu.matmul %10, %12, %cst_13 {dimension_numbers = #tpu.dot_dimension_numbers<[1], [0], [0], [1], [0, 0, 1, 1], [], []>} : vector<16x128xbf16>, vector<128x256xbf16>, vector<16x256xf32> -> vector<16x256xf32>
    %14 = arith.addf %8, %13 : vector<16x256xf32>
    %c1_14 = arith.constant 1 : index
    %c0_15 = arith.constant 0 : index
    %15 = vector.load %arg5[%c1_14, %c0_15] : memref<18x128xf32, #tpu.memory_space<vmem>>, vector<16x128xf32>
    %16 = arith.truncf %15 : vector<16x128xf32> to vector<16x128xbf16>
    %c1_16 = arith.constant 1 : index
    %c0_17 = arith.constant 0 : index
    %c0_18 = arith.constant 0 : index
    %17 = vector.load %arg2[%c1_16, %c0_17, %c0_18] : memref<3x128x256xbf16, #tpu.memory_space<vmem>>, vector<1x128x256xbf16>
    %18 = vector.shape_cast %17 : vector<1x128x256xbf16> to vector<128x256xbf16>
    %cst_19 = arith.constant dense<0.000000e+00> : vector<16x256xf32>
    %19 = tpu.matmul %16, %18, %cst_19 {dimension_numbers = #tpu.dot_dimension_numbers<[1], [0], [0], [1], [0, 0, 1, 1], [], []>} : vector<16x128xbf16>, vector<128x256xbf16>, vector<16x256xf32> -> vector<16x256xf32>
    %20 = arith.addf %14, %19 : vector<16x256xf32>
    %c2 = arith.constant 2 : index
    %c0_20 = arith.constant 0 : index
    %21 = vector.load %arg5[%c2, %c0_20] : memref<18x128xf32, #tpu.memory_space<vmem>>, vector<16x128xf32>
    %22 = arith.truncf %21 : vector<16x128xf32> to vector<16x128xbf16>
    %c2_21 = arith.constant 2 : index
    %c0_22 = arith.constant 0 : index
    %c0_23 = arith.constant 0 : index
    %23 = vector.load %arg2[%c2_21, %c0_22, %c0_23] : memref<3x128x256xbf16, #tpu.memory_space<vmem>>, vector<1x128x256xbf16>
    %24 = vector.shape_cast %23 : vector<1x128x256xbf16> to vector<128x256xbf16>
    %cst_24 = arith.constant dense<0.000000e+00> : vector<16x256xf32>
    %25 = tpu.matmul %22, %24, %cst_24 {dimension_numbers = #tpu.dot_dimension_numbers<[1], [0], [0], [1], [0, 0, 1, 1], [], []>} : vector<16x128xbf16>, vector<128x256xbf16>, vector<16x256xf32> -> vector<16x256xf32>
    %26 = arith.addf %20, %25 : vector<16x256xf32>
    %cst_25 = arith.constant 0.000000e+00 : f32
    %27 = vector.broadcast %cst_25 : f32 to vector<16x256xf32>
    %28 = arith.maximumf %26, %27 : vector<16x256xf32>
    %cst_26 = arith.constant 0.000000e+00 : f32
    %29 = vector.broadcast %cst_26 : f32 to vector<1x256xf32>
    %c0_27 = arith.constant 0 : index
    %c0_28 = arith.constant 0 : index
    %30 = vector.load %arg6[%c0_27, %c0_28] : memref<18x256xf32, #tpu.memory_space<vmem>>, vector<1x256xf32>
    tpu.vector_store %arg6[%c0_27, %c0_28], %29 {strides = array<i32>} : memref<18x256xf32, #tpu.memory_space<vmem>>, vector<1x256xf32>,
    %cst_29 = arith.constant 0.000000e+00 : f32
    %31 = vector.broadcast %cst_29 : f32 to vector<1x256xf32>
    %c17_30 = arith.constant 17 : index
    %c0_31 = arith.constant 0 : index
    %32 = vector.load %arg6[%c17_30, %c0_31] : memref<18x256xf32, #tpu.memory_space<vmem>>, vector<1x256xf32>
    tpu.vector_store %arg6[%c17_30, %c0_31], %31 {strides = array<i32>} : memref<18x256xf32, #tpu.memory_space<vmem>>, vector<1x256xf32>,
    %c1_32 = arith.constant 1 : index
    %c0_33 = arith.constant 0 : index
    %33 = vector.load %arg6[%c1_32, %c0_33] : memref<18x256xf32, #tpu.memory_space<vmem>>, vector<16x256xf32>
    tpu.vector_store %arg6[%c1_32, %c0_33], %28 {strides = array<i32>} : memref<18x256xf32, #tpu.memory_space<vmem>>, vector<16x256xf32>,
    %cst_34 = arith.constant 0.000000e+00 : f32
    %34 = vector.broadcast %cst_34 : f32 to vector<16x256xf32>
    %c0_35 = arith.constant 0 : index
    %c0_36 = arith.constant 0 : index
    %35 = vector.load %arg6[%c0_35, %c0_36] : memref<18x256xf32, #tpu.memory_space<vmem>>, vector<16x256xf32>
    %36 = arith.truncf %35 : vector<16x256xf32> to vector<16x256xbf16>
    %c0_37 = arith.constant 0 : index
    %c0_38 = arith.constant 0 : index
    %c0_39 = arith.constant 0 : index
    %37 = vector.load %arg3[%c0_37, %c0_38, %c0_39] : memref<3x256x256xbf16, #tpu.memory_space<vmem>>, vector<1x256x256xbf16>
    %38 = vector.shape_cast %37 : vector<1x256x256xbf16> to vector<256x256xbf16>
    %cst_40 = arith.constant dense<0.000000e+00> : vector<16x256xf32>
    %39 = tpu.matmul %36, %38, %cst_40 {dimension_numbers = #tpu.dot_dimension_numbers<[1], [0], [0], [1], [0, 0, 1, 1], [], []>} : vector<16x256xbf16>, vector<256x256xbf16>, vector<16x256xf32> -> vector<16x256xf32>
    %40 = arith.addf %34, %39 : vector<16x256xf32>
    %c1_41 = arith.constant 1 : index
    %c0_42 = arith.constant 0 : index
    %41 = vector.load %arg6[%c1_41, %c0_42] : memref<18x256xf32, #tpu.memory_space<vmem>>, vector<16x256xf32>
    %42 = arith.truncf %41 : vector<16x256xf32> to vector<16x256xbf16>
    %c1_43 = arith.constant 1 : index
    %c0_44 = arith.constant 0 : index
    %c0_45 = arith.constant 0 : index
    %43 = vector.load %arg3[%c1_43, %c0_44, %c0_45] : memref<3x256x256xbf16, #tpu.memory_space<vmem>>, vector<1x256x256xbf16>
    %44 = vector.shape_cast %43 : vector<1x256x256xbf16> to vector<256x256xbf16>
    %cst_46 = arith.constant dense<0.000000e+00> : vector<16x256xf32>
    %45 = tpu.matmul %42, %44, %cst_46 {dimension_numbers = #tpu.dot_dimension_numbers<[1], [0], [0], [1], [0, 0, 1, 1], [], []>} : vector<16x256xbf16>, vector<256x256xbf16>, vector<16x256xf32> -> vector<16x256xf32>
    %46 = arith.addf %40, %45 : vector<16x256xf32>
    %c2_47 = arith.constant 2 : index
    %c0_48 = arith.constant 0 : index
    %47 = vector.load %arg6[%c2_47, %c0_48] : memref<18x256xf32, #tpu.memory_space<vmem>>, vector<16x256xf32>
    %48 = arith.truncf %47 : vector<16x256xf32> to vector<16x256xbf16>
    %c2_49 = arith.constant 2 : index
    %c0_50 = arith.constant 0 : index
    %c0_51 = arith.constant 0 : index
    %49 = vector.load %arg3[%c2_49, %c0_50, %c0_51] : memref<3x256x256xbf16, #tpu.memory_space<vmem>>, vector<1x256x256xbf16>
    %50 = vector.shape_cast %49 : vector<1x256x256xbf16> to vector<256x256xbf16>
    %cst_52 = arith.constant dense<0.000000e+00> : vector<16x256xf32>
    %51 = tpu.matmul %48, %50, %cst_52 {dimension_numbers = #tpu.dot_dimension_numbers<[1], [0], [0], [1], [0, 0, 1, 1], [], []>} : vector<16x256xbf16>, vector<256x256xbf16>, vector<16x256xf32> -> vector<16x256xf32>
    %52 = arith.addf %46, %51 : vector<16x256xf32>
    %cst_53 = arith.constant 0.000000e+00 : f32
    %53 = vector.broadcast %cst_53 : f32 to vector<16x256xf32>
    %54 = arith.maximumf %52, %53 : vector<16x256xf32>
    %55 = vector.shape_cast %54 : vector<16x256xf32> to vector<1x16x256xf32>
    %56 = arith.truncf %55 : vector<1x16x256xf32> to vector<1x16x256xbf16>
    %c0_54 = arith.constant 0 : index
    %c0_55 = arith.constant 0 : index
    %c0_56 = arith.constant 0 : index
    %57 = vector.load %arg4[%c0_54, %c0_55, %c0_56] : memref<1x16x256xbf16, #tpu.memory_space<vmem>>, vector<1x16x256xbf16>
    tpu.vector_store %arg4[%c0_54, %c0_55, %c0_56], %56 {strides = array<i32>} : memref<1x16x256xbf16, #tpu.memory_space<vmem>>, vector<1x16x256xbf16>,
    return
  }
  func.func @transform_0(%arg0: i32) -> (i32, i32, i32) {
    %c0_i32 = arith.constant 0 : i32
    %c0_i32_0 = arith.constant 0 : i32
    %c0_i32_1 = arith.constant 0 : i32
    return %arg0, %c0_i32, %c0_i32_0 : i32, i32, i32
  }
  func.func @transform_1(%arg0: i32) -> (i32, i32, i32) {
    %c0_i32 = arith.constant 0 : i32
    %c0_i32_0 = arith.constant 0 : i32
    %c0_i32_1 = arith.constant 0 : i32
    %c0_i32_2 = arith.constant 0 : i32
    return %c0_i32, %c0_i32_0, %c0_i32_1 : i32, i32, i32
  }
  func.func @transform_2(%arg0: i32) -> (i32, i32, i32) {
    %c0_i32 = arith.constant 0 : i32
    %c0_i32_0 = arith.constant 0 : i32
    %c0_i32_1 = arith.constant 0 : i32
    %c0_i32_2 = arith.constant 0 : i32
    return %c0_i32, %c0_i32_0, %c0_i32_1 : i32, i32, i32
  }
  func.func @transform_3(%arg0: i32) -> (i32, i32, i32) {
    %c0_i32 = arith.constant 0 : i32
    %c0_i32_0 = arith.constant 0 : i32
    %c0_i32_1 = arith.constant 0 : i32
    return %arg0, %c0_i32, %c0_i32_0 : i32, i32, i32
  }
}

module attributes {stable_mosaic.version = 11 : i64} {
  func.func @_double_conv_kernel(%arg0: i32, %arg1: memref<1x8x128xbf16, #tpu.memory_space<vmem>>, %arg2: memref<3x128x256xbf16, #tpu.memory_space<vmem>>, %arg3: memref<3x256x256xbf16, #tpu.memory_space<vmem>>, %arg4: memref<1x8x256xbf16, #tpu.memory_space<vmem>>, %arg5: memref<10x128xf32, #tpu.memory_space<vmem>>, %arg6: memref<10x256xf32, #tpu.memory_space<vmem>>) attributes {dimension_semantics = [#tpu.dimension_semantics<parallel>], iteration_bounds = array<i64: 2>, scalar_prefetch = 0 : i64, scratch_operands = 2 : i64, tpu.core_type = #tpu.core_type<tc>, window_params = [{transform_indices = @transform_0, window_bounds = array<i64: 1, 8, 128>}, {pipeline_mode = #tpu.pipeline_mode<synchronous>, transform_indices = @transform_1, window_bounds = array<i64: 3, 128, 256>}, {pipeline_mode = #tpu.pipeline_mode<synchronous>, transform_indices = @transform_2, window_bounds = array<i64: 3, 256, 256>}, {transform_indices = @transform_3, window_bounds = array<i64: 1, 8, 256>}]} {
    %c0 = arith.constant 0 : index
    %c0_0 = arith.constant 0 : index
    %c0_1 = arith.constant 0 : index
    %0 = vector.load %arg1[%c0, %c0_0, %c0_1] : memref<1x8x128xbf16, #tpu.memory_space<vmem>>, vector<1x8x128xbf16>
    %1 = vector.shape_cast %0 : vector<1x8x128xbf16> to vector<8x128xbf16>
    %2 = arith.extf %1 : vector<8x128xbf16> to vector<8x128xf32>
    %cst = arith.constant 0.000000e+00 : f32
    %3 = vector.broadcast %cst : f32 to vector<1x128xf32>
    %c0_2 = arith.constant 0 : index
    %c0_3 = arith.constant 0 : index
    %4 = vector.load %arg5[%c0_2, %c0_3] : memref<10x128xf32, #tpu.memory_space<vmem>>, vector<1x128xf32>
    tpu.vector_store %arg5[%c0_2, %c0_3], %3 {strides = array<i32>} : memref<10x128xf32, #tpu.memory_space<vmem>>, vector<1x128xf32>,
    %cst_4 = arith.constant 0.000000e+00 : f32
    %5 = vector.broadcast %cst_4 : f32 to vector<1x128xf32>
    %c9 = arith.constant 9 : index
    %c0_5 = arith.constant 0 : index
    %6 = vector.load %arg5[%c9, %c0_5] : memref<10x128xf32, #tpu.memory_space<vmem>>, vector<1x128xf32>
    tpu.vector_store %arg5[%c9, %c0_5], %5 {strides = array<i32>} : memref<10x128xf32, #tpu.memory_space<vmem>>, vector<1x128xf32>,
    %c1 = arith.constant 1 : index
    %c0_6 = arith.constant 0 : index
    %7 = vector.load %arg5[%c1, %c0_6] : memref<10x128xf32, #tpu.memory_space<vmem>>, vector<8x128xf32>
    tpu.vector_store %arg5[%c1, %c0_6], %2 {strides = array<i32>} : memref<10x128xf32, #tpu.memory_space<vmem>>, vector<8x128xf32>,
    %cst_7 = arith.constant 0.000000e+00 : f32
    %8 = vector.broadcast %cst_7 : f32 to vector<8x256xf32>
    %c0_8 = arith.constant 0 : index
    %c0_9 = arith.constant 0 : index
    %9 = vector.load %arg5[%c0_8, %c0_9] : memref<10x128xf32, #tpu.memory_space<vmem>>, vector<8x128xf32>
    %10 = arith.truncf %9 : vector<8x128xf32> to vector<8x128xbf16>
    %c0_10 = arith.constant 0 : index
    %c0_11 = arith.constant 0 : index
    %c0_12 = arith.constant 0 : index
    %11 = vector.load %arg2[%c0_10, %c0_11, %c0_12] : memref<3x128x256xbf16, #tpu.memory_space<vmem>>, vector<1x128x256xbf16>
    %12 = vector.shape_cast %11 : vector<1x128x256xbf16> to vector<128x256xbf16>
    %cst_13 = arith.constant dense<0.000000e+00> : vector<8x256xf32>
    %13 = tpu.matmul %10, %12, %cst_13 {dimension_numbers = #tpu.dot_dimension_numbers<[1], [0], [0], [1], [0, 0, 1, 1], [], []>} : vector<8x128xbf16>, vector<128x256xbf16>, vector<8x256xf32> -> vector<8x256xf32>
    %14 = arith.addf %8, %13 : vector<8x256xf32>
    %c1_14 = arith.constant 1 : index
    %c0_15 = arith.constant 0 : index
    %15 = vector.load %arg5[%c1_14, %c0_15] : memref<10x128xf32, #tpu.memory_space<vmem>>, vector<8x128xf32>
    %16 = arith.truncf %15 : vector<8x128xf32> to vector<8x128xbf16>
    %c1_16 = arith.constant 1 : index
    %c0_17 = arith.constant 0 : index
    %c0_18 = arith.constant 0 : index
    %17 = vector.load %arg2[%c1_16, %c0_17, %c0_18] : memref<3x128x256xbf16, #tpu.memory_space<vmem>>, vector<1x128x256xbf16>
    %18 = vector.shape_cast %17 : vector<1x128x256xbf16> to vector<128x256xbf16>
    %cst_19 = arith.constant dense<0.000000e+00> : vector<8x256xf32>
    %19 = tpu.matmul %16, %18, %cst_19 {dimension_numbers = #tpu.dot_dimension_numbers<[1], [0], [0], [1], [0, 0, 1, 1], [], []>} : vector<8x128xbf16>, vector<128x256xbf16>, vector<8x256xf32> -> vector<8x256xf32>
    %20 = arith.addf %14, %19 : vector<8x256xf32>
    %c2 = arith.constant 2 : index
    %c0_20 = arith.constant 0 : index
    %21 = vector.load %arg5[%c2, %c0_20] : memref<10x128xf32, #tpu.memory_space<vmem>>, vector<8x128xf32>
    %22 = arith.truncf %21 : vector<8x128xf32> to vector<8x128xbf16>
    %c2_21 = arith.constant 2 : index
    %c0_22 = arith.constant 0 : index
    %c0_23 = arith.constant 0 : index
    %23 = vector.load %arg2[%c2_21, %c0_22, %c0_23] : memref<3x128x256xbf16, #tpu.memory_space<vmem>>, vector<1x128x256xbf16>
    %24 = vector.shape_cast %23 : vector<1x128x256xbf16> to vector<128x256xbf16>
    %cst_24 = arith.constant dense<0.000000e+00> : vector<8x256xf32>
    %25 = tpu.matmul %22, %24, %cst_24 {dimension_numbers = #tpu.dot_dimension_numbers<[1], [0], [0], [1], [0, 0, 1, 1], [], []>} : vector<8x128xbf16>, vector<128x256xbf16>, vector<8x256xf32> -> vector<8x256xf32>
    %26 = arith.addf %20, %25 : vector<8x256xf32>
    %cst_25 = arith.constant 0.000000e+00 : f32
    %27 = vector.broadcast %cst_25 : f32 to vector<8x256xf32>
    %28 = arith.maximumf %26, %27 : vector<8x256xf32>
    %cst_26 = arith.constant 0.000000e+00 : f32
    %29 = vector.broadcast %cst_26 : f32 to vector<1x256xf32>
    %c0_27 = arith.constant 0 : index
    %c0_28 = arith.constant 0 : index
    %30 = vector.load %arg6[%c0_27, %c0_28] : memref<10x256xf32, #tpu.memory_space<vmem>>, vector<1x256xf32>
    tpu.vector_store %arg6[%c0_27, %c0_28], %29 {strides = array<i32>} : memref<10x256xf32, #tpu.memory_space<vmem>>, vector<1x256xf32>,
    %cst_29 = arith.constant 0.000000e+00 : f32
    %31 = vector.broadcast %cst_29 : f32 to vector<1x256xf32>
    %c9_30 = arith.constant 9 : index
    %c0_31 = arith.constant 0 : index
    %32 = vector.load %arg6[%c9_30, %c0_31] : memref<10x256xf32, #tpu.memory_space<vmem>>, vector<1x256xf32>
    tpu.vector_store %arg6[%c9_30, %c0_31], %31 {strides = array<i32>} : memref<10x256xf32, #tpu.memory_space<vmem>>, vector<1x256xf32>,
    %c1_32 = arith.constant 1 : index
    %c0_33 = arith.constant 0 : index
    %33 = vector.load %arg6[%c1_32, %c0_33] : memref<10x256xf32, #tpu.memory_space<vmem>>, vector<8x256xf32>
    tpu.vector_store %arg6[%c1_32, %c0_33], %28 {strides = array<i32>} : memref<10x256xf32, #tpu.memory_space<vmem>>, vector<8x256xf32>,
    %cst_34 = arith.constant 0.000000e+00 : f32
    %34 = vector.broadcast %cst_34 : f32 to vector<8x256xf32>
    %c0_35 = arith.constant 0 : index
    %c0_36 = arith.constant 0 : index
    %35 = vector.load %arg6[%c0_35, %c0_36] : memref<10x256xf32, #tpu.memory_space<vmem>>, vector<8x256xf32>
    %36 = arith.truncf %35 : vector<8x256xf32> to vector<8x256xbf16>
    %c0_37 = arith.constant 0 : index
    %c0_38 = arith.constant 0 : index
    %c0_39 = arith.constant 0 : index
    %37 = vector.load %arg3[%c0_37, %c0_38, %c0_39] : memref<3x256x256xbf16, #tpu.memory_space<vmem>>, vector<1x256x256xbf16>
    %38 = vector.shape_cast %37 : vector<1x256x256xbf16> to vector<256x256xbf16>
    %cst_40 = arith.constant dense<0.000000e+00> : vector<8x256xf32>
    %39 = tpu.matmul %36, %38, %cst_40 {dimension_numbers = #tpu.dot_dimension_numbers<[1], [0], [0], [1], [0, 0, 1, 1], [], []>} : vector<8x256xbf16>, vector<256x256xbf16>, vector<8x256xf32> -> vector<8x256xf32>
    %40 = arith.addf %34, %39 : vector<8x256xf32>
    %c1_41 = arith.constant 1 : index
    %c0_42 = arith.constant 0 : index
    %41 = vector.load %arg6[%c1_41, %c0_42] : memref<10x256xf32, #tpu.memory_space<vmem>>, vector<8x256xf32>
    %42 = arith.truncf %41 : vector<8x256xf32> to vector<8x256xbf16>
    %c1_43 = arith.constant 1 : index
    %c0_44 = arith.constant 0 : index
    %c0_45 = arith.constant 0 : index
    %43 = vector.load %arg3[%c1_43, %c0_44, %c0_45] : memref<3x256x256xbf16, #tpu.memory_space<vmem>>, vector<1x256x256xbf16>
    %44 = vector.shape_cast %43 : vector<1x256x256xbf16> to vector<256x256xbf16>
    %cst_46 = arith.constant dense<0.000000e+00> : vector<8x256xf32>
    %45 = tpu.matmul %42, %44, %cst_46 {dimension_numbers = #tpu.dot_dimension_numbers<[1], [0], [0], [1], [0, 0, 1, 1], [], []>} : vector<8x256xbf16>, vector<256x256xbf16>, vector<8x256xf32> -> vector<8x256xf32>
    %46 = arith.addf %40, %45 : vector<8x256xf32>
    %c2_47 = arith.constant 2 : index
    %c0_48 = arith.constant 0 : index
    %47 = vector.load %arg6[%c2_47, %c0_48] : memref<10x256xf32, #tpu.memory_space<vmem>>, vector<8x256xf32>
    %48 = arith.truncf %47 : vector<8x256xf32> to vector<8x256xbf16>
    %c2_49 = arith.constant 2 : index
    %c0_50 = arith.constant 0 : index
    %c0_51 = arith.constant 0 : index
    %49 = vector.load %arg3[%c2_49, %c0_50, %c0_51] : memref<3x256x256xbf16, #tpu.memory_space<vmem>>, vector<1x256x256xbf16>
    %50 = vector.shape_cast %49 : vector<1x256x256xbf16> to vector<256x256xbf16>
    %cst_52 = arith.constant dense<0.000000e+00> : vector<8x256xf32>
    %51 = tpu.matmul %48, %50, %cst_52 {dimension_numbers = #tpu.dot_dimension_numbers<[1], [0], [0], [1], [0, 0, 1, 1], [], []>} : vector<8x256xbf16>, vector<256x256xbf16>, vector<8x256xf32> -> vector<8x256xf32>
    %52 = arith.addf %46, %51 : vector<8x256xf32>
    %cst_53 = arith.constant 0.000000e+00 : f32
    %53 = vector.broadcast %cst_53 : f32 to vector<8x256xf32>
    %54 = arith.maximumf %52, %53 : vector<8x256xf32>
    %55 = vector.shape_cast %54 : vector<8x256xf32> to vector<1x8x256xf32>
    %56 = arith.truncf %55 : vector<1x8x256xf32> to vector<1x8x256xbf16>
    %c0_54 = arith.constant 0 : index
    %c0_55 = arith.constant 0 : index
    %c0_56 = arith.constant 0 : index
    %57 = vector.load %arg4[%c0_54, %c0_55, %c0_56] : memref<1x8x256xbf16, #tpu.memory_space<vmem>>, vector<1x8x256xbf16>
    tpu.vector_store %arg4[%c0_54, %c0_55, %c0_56], %56 {strides = array<i32>} : memref<1x8x256xbf16, #tpu.memory_space<vmem>>, vector<1x8x256xbf16>,
    return
  }
  func.func @transform_0(%arg0: i32) -> (i32, i32, i32) {
    %c0_i32 = arith.constant 0 : i32
    %c0_i32_0 = arith.constant 0 : i32
    %c0_i32_1 = arith.constant 0 : i32
    return %arg0, %c0_i32, %c0_i32_0 : i32, i32, i32
  }
  func.func @transform_1(%arg0: i32) -> (i32, i32, i32) {
    %c0_i32 = arith.constant 0 : i32
    %c0_i32_0 = arith.constant 0 : i32
    %c0_i32_1 = arith.constant 0 : i32
    %c0_i32_2 = arith.constant 0 : i32
    return %c0_i32, %c0_i32_0, %c0_i32_1 : i32, i32, i32
  }
  func.func @transform_2(%arg0: i32) -> (i32, i32, i32) {
    %c0_i32 = arith.constant 0 : i32
    %c0_i32_0 = arith.constant 0 : i32
    %c0_i32_1 = arith.constant 0 : i32
    %c0_i32_2 = arith.constant 0 : i32
    return %c0_i32, %c0_i32_0, %c0_i32_1 : i32, i32, i32
  }
  func.func @transform_3(%arg0: i32) -> (i32, i32, i32) {
    %c0_i32 = arith.constant 0 : i32
    %c0_i32_0 = arith.constant 0 : i32
    %c0_i32_1 = arith.constant 0 : i32
    return %arg0, %c0_i32, %c0_i32_0 : i32, i32, i32
  }
}

module attributes {stable_mosaic.version = 11 : i64} {
  func.func @_double_conv_kernel(%arg0: i32, %arg1: memref<1x4x128xbf16, #tpu.memory_space<vmem>>, %arg2: memref<3x128x256xbf16, #tpu.memory_space<vmem>>, %arg3: memref<3x256x256xbf16, #tpu.memory_space<vmem>>, %arg4: memref<1x4x256xbf16, #tpu.memory_space<vmem>>, %arg5: memref<6x128xf32, #tpu.memory_space<vmem>>, %arg6: memref<6x256xf32, #tpu.memory_space<vmem>>) attributes {dimension_semantics = [#tpu.dimension_semantics<parallel>], iteration_bounds = array<i64: 2>, scalar_prefetch = 0 : i64, scratch_operands = 2 : i64, tpu.core_type = #tpu.core_type<tc>, window_params = [{transform_indices = @transform_0, window_bounds = array<i64: 1, 4, 128>}, {pipeline_mode = #tpu.pipeline_mode<synchronous>, transform_indices = @transform_1, window_bounds = array<i64: 3, 128, 256>}, {pipeline_mode = #tpu.pipeline_mode<synchronous>, transform_indices = @transform_2, window_bounds = array<i64: 3, 256, 256>}, {transform_indices = @transform_3, window_bounds = array<i64: 1, 4, 256>}]} {
    %c0 = arith.constant 0 : index
    %c0_0 = arith.constant 0 : index
    %c0_1 = arith.constant 0 : index
    %0 = vector.load %arg1[%c0, %c0_0, %c0_1] : memref<1x4x128xbf16, #tpu.memory_space<vmem>>, vector<1x4x128xbf16>
    %1 = vector.shape_cast %0 : vector<1x4x128xbf16> to vector<4x128xbf16>
    %2 = arith.extf %1 : vector<4x128xbf16> to vector<4x128xf32>
    %cst = arith.constant 0.000000e+00 : f32
    %3 = vector.broadcast %cst : f32 to vector<1x128xf32>
    %c0_2 = arith.constant 0 : index
    %c0_3 = arith.constant 0 : index
    %4 = vector.load %arg5[%c0_2, %c0_3] : memref<6x128xf32, #tpu.memory_space<vmem>>, vector<1x128xf32>
    tpu.vector_store %arg5[%c0_2, %c0_3], %3 {strides = array<i32>} : memref<6x128xf32, #tpu.memory_space<vmem>>, vector<1x128xf32>,
    %cst_4 = arith.constant 0.000000e+00 : f32
    %5 = vector.broadcast %cst_4 : f32 to vector<1x128xf32>
    %c5 = arith.constant 5 : index
    %c0_5 = arith.constant 0 : index
    %6 = vector.load %arg5[%c5, %c0_5] : memref<6x128xf32, #tpu.memory_space<vmem>>, vector<1x128xf32>
    tpu.vector_store %arg5[%c5, %c0_5], %5 {strides = array<i32>} : memref<6x128xf32, #tpu.memory_space<vmem>>, vector<1x128xf32>,
    %c1 = arith.constant 1 : index
    %c0_6 = arith.constant 0 : index
    %7 = vector.load %arg5[%c1, %c0_6] : memref<6x128xf32, #tpu.memory_space<vmem>>, vector<4x128xf32>
    tpu.vector_store %arg5[%c1, %c0_6], %2 {strides = array<i32>} : memref<6x128xf32, #tpu.memory_space<vmem>>, vector<4x128xf32>,
    %cst_7 = arith.constant 0.000000e+00 : f32
    %8 = vector.broadcast %cst_7 : f32 to vector<4x256xf32>
    %c0_8 = arith.constant 0 : index
    %c0_9 = arith.constant 0 : index
    %9 = vector.load %arg5[%c0_8, %c0_9] : memref<6x128xf32, #tpu.memory_space<vmem>>, vector<4x128xf32>
    %10 = arith.truncf %9 : vector<4x128xf32> to vector<4x128xbf16>
    %c0_10 = arith.constant 0 : index
    %c0_11 = arith.constant 0 : index
    %c0_12 = arith.constant 0 : index
    %11 = vector.load %arg2[%c0_10, %c0_11, %c0_12] : memref<3x128x256xbf16, #tpu.memory_space<vmem>>, vector<1x128x256xbf16>
    %12 = vector.shape_cast %11 : vector<1x128x256xbf16> to vector<128x256xbf16>
    %cst_13 = arith.constant dense<0.000000e+00> : vector<4x256xf32>
    %13 = tpu.matmul %10, %12, %cst_13 {dimension_numbers = #tpu.dot_dimension_numbers<[1], [0], [0], [1], [0, 0, 1, 1], [], []>} : vector<4x128xbf16>, vector<128x256xbf16>, vector<4x256xf32> -> vector<4x256xf32>
    %14 = arith.addf %8, %13 : vector<4x256xf32>
    %c1_14 = arith.constant 1 : index
    %c0_15 = arith.constant 0 : index
    %15 = vector.load %arg5[%c1_14, %c0_15] : memref<6x128xf32, #tpu.memory_space<vmem>>, vector<4x128xf32>
    %16 = arith.truncf %15 : vector<4x128xf32> to vector<4x128xbf16>
    %c1_16 = arith.constant 1 : index
    %c0_17 = arith.constant 0 : index
    %c0_18 = arith.constant 0 : index
    %17 = vector.load %arg2[%c1_16, %c0_17, %c0_18] : memref<3x128x256xbf16, #tpu.memory_space<vmem>>, vector<1x128x256xbf16>
    %18 = vector.shape_cast %17 : vector<1x128x256xbf16> to vector<128x256xbf16>
    %cst_19 = arith.constant dense<0.000000e+00> : vector<4x256xf32>
    %19 = tpu.matmul %16, %18, %cst_19 {dimension_numbers = #tpu.dot_dimension_numbers<[1], [0], [0], [1], [0, 0, 1, 1], [], []>} : vector<4x128xbf16>, vector<128x256xbf16>, vector<4x256xf32> -> vector<4x256xf32>
    %20 = arith.addf %14, %19 : vector<4x256xf32>
    %c2 = arith.constant 2 : index
    %c0_20 = arith.constant 0 : index
    %21 = vector.load %arg5[%c2, %c0_20] : memref<6x128xf32, #tpu.memory_space<vmem>>, vector<4x128xf32>
    %22 = arith.truncf %21 : vector<4x128xf32> to vector<4x128xbf16>
    %c2_21 = arith.constant 2 : index
    %c0_22 = arith.constant 0 : index
    %c0_23 = arith.constant 0 : index
    %23 = vector.load %arg2[%c2_21, %c0_22, %c0_23] : memref<3x128x256xbf16, #tpu.memory_space<vmem>>, vector<1x128x256xbf16>
    %24 = vector.shape_cast %23 : vector<1x128x256xbf16> to vector<128x256xbf16>
    %cst_24 = arith.constant dense<0.000000e+00> : vector<4x256xf32>
    %25 = tpu.matmul %22, %24, %cst_24 {dimension_numbers = #tpu.dot_dimension_numbers<[1], [0], [0], [1], [0, 0, 1, 1], [], []>} : vector<4x128xbf16>, vector<128x256xbf16>, vector<4x256xf32> -> vector<4x256xf32>
    %26 = arith.addf %20, %25 : vector<4x256xf32>
    %cst_25 = arith.constant 0.000000e+00 : f32
    %27 = vector.broadcast %cst_25 : f32 to vector<4x256xf32>
    %28 = arith.maximumf %26, %27 : vector<4x256xf32>
    %cst_26 = arith.constant 0.000000e+00 : f32
    %29 = vector.broadcast %cst_26 : f32 to vector<1x256xf32>
    %c0_27 = arith.constant 0 : index
    %c0_28 = arith.constant 0 : index
    %30 = vector.load %arg6[%c0_27, %c0_28] : memref<6x256xf32, #tpu.memory_space<vmem>>, vector<1x256xf32>
    tpu.vector_store %arg6[%c0_27, %c0_28], %29 {strides = array<i32>} : memref<6x256xf32, #tpu.memory_space<vmem>>, vector<1x256xf32>,
    %cst_29 = arith.constant 0.000000e+00 : f32
    %31 = vector.broadcast %cst_29 : f32 to vector<1x256xf32>
    %c5_30 = arith.constant 5 : index
    %c0_31 = arith.constant 0 : index
    %32 = vector.load %arg6[%c5_30, %c0_31] : memref<6x256xf32, #tpu.memory_space<vmem>>, vector<1x256xf32>
    tpu.vector_store %arg6[%c5_30, %c0_31], %31 {strides = array<i32>} : memref<6x256xf32, #tpu.memory_space<vmem>>, vector<1x256xf32>,
    %c1_32 = arith.constant 1 : index
    %c0_33 = arith.constant 0 : index
    %33 = vector.load %arg6[%c1_32, %c0_33] : memref<6x256xf32, #tpu.memory_space<vmem>>, vector<4x256xf32>
    tpu.vector_store %arg6[%c1_32, %c0_33], %28 {strides = array<i32>} : memref<6x256xf32, #tpu.memory_space<vmem>>, vector<4x256xf32>,
    %cst_34 = arith.constant 0.000000e+00 : f32
    %34 = vector.broadcast %cst_34 : f32 to vector<4x256xf32>
    %c0_35 = arith.constant 0 : index
    %c0_36 = arith.constant 0 : index
    %35 = vector.load %arg6[%c0_35, %c0_36] : memref<6x256xf32, #tpu.memory_space<vmem>>, vector<4x256xf32>
    %36 = arith.truncf %35 : vector<4x256xf32> to vector<4x256xbf16>
    %c0_37 = arith.constant 0 : index
    %c0_38 = arith.constant 0 : index
    %c0_39 = arith.constant 0 : index
    %37 = vector.load %arg3[%c0_37, %c0_38, %c0_39] : memref<3x256x256xbf16, #tpu.memory_space<vmem>>, vector<1x256x256xbf16>
    %38 = vector.shape_cast %37 : vector<1x256x256xbf16> to vector<256x256xbf16>
    %cst_40 = arith.constant dense<0.000000e+00> : vector<4x256xf32>
    %39 = tpu.matmul %36, %38, %cst_40 {dimension_numbers = #tpu.dot_dimension_numbers<[1], [0], [0], [1], [0, 0, 1, 1], [], []>} : vector<4x256xbf16>, vector<256x256xbf16>, vector<4x256xf32> -> vector<4x256xf32>
    %40 = arith.addf %34, %39 : vector<4x256xf32>
    %c1_41 = arith.constant 1 : index
    %c0_42 = arith.constant 0 : index
    %41 = vector.load %arg6[%c1_41, %c0_42] : memref<6x256xf32, #tpu.memory_space<vmem>>, vector<4x256xf32>
    %42 = arith.truncf %41 : vector<4x256xf32> to vector<4x256xbf16>
    %c1_43 = arith.constant 1 : index
    %c0_44 = arith.constant 0 : index
    %c0_45 = arith.constant 0 : index
    %43 = vector.load %arg3[%c1_43, %c0_44, %c0_45] : memref<3x256x256xbf16, #tpu.memory_space<vmem>>, vector<1x256x256xbf16>
    %44 = vector.shape_cast %43 : vector<1x256x256xbf16> to vector<256x256xbf16>
    %cst_46 = arith.constant dense<0.000000e+00> : vector<4x256xf32>
    %45 = tpu.matmul %42, %44, %cst_46 {dimension_numbers = #tpu.dot_dimension_numbers<[1], [0], [0], [1], [0, 0, 1, 1], [], []>} : vector<4x256xbf16>, vector<256x256xbf16>, vector<4x256xf32> -> vector<4x256xf32>
    %46 = arith.addf %40, %45 : vector<4x256xf32>
    %c2_47 = arith.constant 2 : index
    %c0_48 = arith.constant 0 : index
    %47 = vector.load %arg6[%c2_47, %c0_48] : memref<6x256xf32, #tpu.memory_space<vmem>>, vector<4x256xf32>
    %48 = arith.truncf %47 : vector<4x256xf32> to vector<4x256xbf16>
    %c2_49 = arith.constant 2 : index
    %c0_50 = arith.constant 0 : index
    %c0_51 = arith.constant 0 : index
    %49 = vector.load %arg3[%c2_49, %c0_50, %c0_51] : memref<3x256x256xbf16, #tpu.memory_space<vmem>>, vector<1x256x256xbf16>
    %50 = vector.shape_cast %49 : vector<1x256x256xbf16> to vector<256x256xbf16>
    %cst_52 = arith.constant dense<0.000000e+00> : vector<4x256xf32>
    %51 = tpu.matmul %48, %50, %cst_52 {dimension_numbers = #tpu.dot_dimension_numbers<[1], [0], [0], [1], [0, 0, 1, 1], [], []>} : vector<4x256xbf16>, vector<256x256xbf16>, vector<4x256xf32> -> vector<4x256xf32>
    %52 = arith.addf %46, %51 : vector<4x256xf32>
    %cst_53 = arith.constant 0.000000e+00 : f32
    %53 = vector.broadcast %cst_53 : f32 to vector<4x256xf32>
    %54 = arith.maximumf %52, %53 : vector<4x256xf32>
    %55 = vector.shape_cast %54 : vector<4x256xf32> to vector<1x4x256xf32>
    %56 = arith.truncf %55 : vector<1x4x256xf32> to vector<1x4x256xbf16>
    %c0_54 = arith.constant 0 : index
    %c0_55 = arith.constant 0 : index
    %c0_56 = arith.constant 0 : index
    %57 = vector.load %arg4[%c0_54, %c0_55, %c0_56] : memref<1x4x256xbf16, #tpu.memory_space<vmem>>, vector<1x4x256xbf16>
    tpu.vector_store %arg4[%c0_54, %c0_55, %c0_56], %56 {strides = array<i32>} : memref<1x4x256xbf16, #tpu.memory_space<vmem>>, vector<1x4x256xbf16>,
    return
  }
  func.func @transform_0(%arg0: i32) -> (i32, i32, i32) {
    %c0_i32 = arith.constant 0 : i32
    %c0_i32_0 = arith.constant 0 : i32
    %c0_i32_1 = arith.constant 0 : i32
    return %arg0, %c0_i32, %c0_i32_0 : i32, i32, i32
  }
  func.func @transform_1(%arg0: i32) -> (i32, i32, i32) {
    %c0_i32 = arith.constant 0 : i32
    %c0_i32_0 = arith.constant 0 : i32
    %c0_i32_1 = arith.constant 0 : i32
    %c0_i32_2 = arith.constant 0 : i32
    return %c0_i32, %c0_i32_0, %c0_i32_1 : i32, i32, i32
  }
  func.func @transform_2(%arg0: i32) -> (i32, i32, i32) {
    %c0_i32 = arith.constant 0 : i32
    %c0_i32_0 = arith.constant 0 : i32
    %c0_i32_1 = arith.constant 0 : i32
    %c0_i32_2 = arith.constant 0 : i32
    return %c0_i32, %c0_i32_0, %c0_i32_1 : i32, i32, i32
  }
  func.func @transform_3(%arg0: i32) -> (i32, i32, i32) {
    %c0_i32 = arith.constant 0 : i32
    %c0_i32_0 = arith.constant 0 : i32
    %c0_i32_1 = arith.constant 0 : i32
    return %arg0, %c0_i32, %c0_i32_0 : i32, i32, i32
  }
}

module attributes {stable_mosaic.version = 11 : i64} {
  func.func @_double_conv_kernel(%arg0: i32, %arg1: memref<1x2x128xbf16, #tpu.memory_space<vmem>>, %arg2: memref<3x128x256xbf16, #tpu.memory_space<vmem>>, %arg3: memref<3x256x256xbf16, #tpu.memory_space<vmem>>, %arg4: memref<1x2x256xbf16, #tpu.memory_space<vmem>>, %arg5: memref<4x128xf32, #tpu.memory_space<vmem>>, %arg6: memref<4x256xf32, #tpu.memory_space<vmem>>) attributes {dimension_semantics = [#tpu.dimension_semantics<parallel>], iteration_bounds = array<i64: 2>, scalar_prefetch = 0 : i64, scratch_operands = 2 : i64, tpu.core_type = #tpu.core_type<tc>, window_params = [{transform_indices = @transform_0, window_bounds = array<i64: 1, 2, 128>}, {pipeline_mode = #tpu.pipeline_mode<synchronous>, transform_indices = @transform_1, window_bounds = array<i64: 3, 128, 256>}, {pipeline_mode = #tpu.pipeline_mode<synchronous>, transform_indices = @transform_2, window_bounds = array<i64: 3, 256, 256>}, {transform_indices = @transform_3, window_bounds = array<i64: 1, 2, 256>}]} {
    %c0 = arith.constant 0 : index
    %c0_0 = arith.constant 0 : index
    %c0_1 = arith.constant 0 : index
    %0 = vector.load %arg1[%c0, %c0_0, %c0_1] : memref<1x2x128xbf16, #tpu.memory_space<vmem>>, vector<1x2x128xbf16>
    %1 = vector.shape_cast %0 : vector<1x2x128xbf16> to vector<2x128xbf16>
    %2 = arith.extf %1 : vector<2x128xbf16> to vector<2x128xf32>
    %cst = arith.constant 0.000000e+00 : f32
    %3 = vector.broadcast %cst : f32 to vector<1x128xf32>
    %c0_2 = arith.constant 0 : index
    %c0_3 = arith.constant 0 : index
    %4 = vector.load %arg5[%c0_2, %c0_3] : memref<4x128xf32, #tpu.memory_space<vmem>>, vector<1x128xf32>
    tpu.vector_store %arg5[%c0_2, %c0_3], %3 {strides = array<i32>} : memref<4x128xf32, #tpu.memory_space<vmem>>, vector<1x128xf32>,
    %cst_4 = arith.constant 0.000000e+00 : f32
    %5 = vector.broadcast %cst_4 : f32 to vector<1x128xf32>
    %c3 = arith.constant 3 : index
    %c0_5 = arith.constant 0 : index
    %6 = vector.load %arg5[%c3, %c0_5] : memref<4x128xf32, #tpu.memory_space<vmem>>, vector<1x128xf32>
    tpu.vector_store %arg5[%c3, %c0_5], %5 {strides = array<i32>} : memref<4x128xf32, #tpu.memory_space<vmem>>, vector<1x128xf32>,
    %c1 = arith.constant 1 : index
    %c0_6 = arith.constant 0 : index
    %7 = vector.load %arg5[%c1, %c0_6] : memref<4x128xf32, #tpu.memory_space<vmem>>, vector<2x128xf32>
    tpu.vector_store %arg5[%c1, %c0_6], %2 {strides = array<i32>} : memref<4x128xf32, #tpu.memory_space<vmem>>, vector<2x128xf32>,
    %cst_7 = arith.constant 0.000000e+00 : f32
    %8 = vector.broadcast %cst_7 : f32 to vector<2x256xf32>
    %c0_8 = arith.constant 0 : index
    %c0_9 = arith.constant 0 : index
    %9 = vector.load %arg5[%c0_8, %c0_9] : memref<4x128xf32, #tpu.memory_space<vmem>>, vector<2x128xf32>
    %10 = arith.truncf %9 : vector<2x128xf32> to vector<2x128xbf16>
    %c0_10 = arith.constant 0 : index
    %c0_11 = arith.constant 0 : index
    %c0_12 = arith.constant 0 : index
    %11 = vector.load %arg2[%c0_10, %c0_11, %c0_12] : memref<3x128x256xbf16, #tpu.memory_space<vmem>>, vector<1x128x256xbf16>
    %12 = vector.shape_cast %11 : vector<1x128x256xbf16> to vector<128x256xbf16>
    %cst_13 = arith.constant dense<0.000000e+00> : vector<2x256xf32>
    %13 = tpu.matmul %10, %12, %cst_13 {dimension_numbers = #tpu.dot_dimension_numbers<[1], [0], [0], [1], [0, 0, 1, 1], [], []>} : vector<2x128xbf16>, vector<128x256xbf16>, vector<2x256xf32> -> vector<2x256xf32>
    %14 = arith.addf %8, %13 : vector<2x256xf32>
    %c1_14 = arith.constant 1 : index
    %c0_15 = arith.constant 0 : index
    %15 = vector.load %arg5[%c1_14, %c0_15] : memref<4x128xf32, #tpu.memory_space<vmem>>, vector<2x128xf32>
    %16 = arith.truncf %15 : vector<2x128xf32> to vector<2x128xbf16>
    %c1_16 = arith.constant 1 : index
    %c0_17 = arith.constant 0 : index
    %c0_18 = arith.constant 0 : index
    %17 = vector.load %arg2[%c1_16, %c0_17, %c0_18] : memref<3x128x256xbf16, #tpu.memory_space<vmem>>, vector<1x128x256xbf16>
    %18 = vector.shape_cast %17 : vector<1x128x256xbf16> to vector<128x256xbf16>
    %cst_19 = arith.constant dense<0.000000e+00> : vector<2x256xf32>
    %19 = tpu.matmul %16, %18, %cst_19 {dimension_numbers = #tpu.dot_dimension_numbers<[1], [0], [0], [1], [0, 0, 1, 1], [], []>} : vector<2x128xbf16>, vector<128x256xbf16>, vector<2x256xf32> -> vector<2x256xf32>
    %20 = arith.addf %14, %19 : vector<2x256xf32>
    %c2 = arith.constant 2 : index
    %c0_20 = arith.constant 0 : index
    %21 = vector.load %arg5[%c2, %c0_20] : memref<4x128xf32, #tpu.memory_space<vmem>>, vector<2x128xf32>
    %22 = arith.truncf %21 : vector<2x128xf32> to vector<2x128xbf16>
    %c2_21 = arith.constant 2 : index
    %c0_22 = arith.constant 0 : index
    %c0_23 = arith.constant 0 : index
    %23 = vector.load %arg2[%c2_21, %c0_22, %c0_23] : memref<3x128x256xbf16, #tpu.memory_space<vmem>>, vector<1x128x256xbf16>
    %24 = vector.shape_cast %23 : vector<1x128x256xbf16> to vector<128x256xbf16>
    %cst_24 = arith.constant dense<0.000000e+00> : vector<2x256xf32>
    %25 = tpu.matmul %22, %24, %cst_24 {dimension_numbers = #tpu.dot_dimension_numbers<[1], [0], [0], [1], [0, 0, 1, 1], [], []>} : vector<2x128xbf16>, vector<128x256xbf16>, vector<2x256xf32> -> vector<2x256xf32>
    %26 = arith.addf %20, %25 : vector<2x256xf32>
    %cst_25 = arith.constant 0.000000e+00 : f32
    %27 = vector.broadcast %cst_25 : f32 to vector<2x256xf32>
    %28 = arith.maximumf %26, %27 : vector<2x256xf32>
    %cst_26 = arith.constant 0.000000e+00 : f32
    %29 = vector.broadcast %cst_26 : f32 to vector<1x256xf32>
    %c0_27 = arith.constant 0 : index
    %c0_28 = arith.constant 0 : index
    %30 = vector.load %arg6[%c0_27, %c0_28] : memref<4x256xf32, #tpu.memory_space<vmem>>, vector<1x256xf32>
    tpu.vector_store %arg6[%c0_27, %c0_28], %29 {strides = array<i32>} : memref<4x256xf32, #tpu.memory_space<vmem>>, vector<1x256xf32>,
    %cst_29 = arith.constant 0.000000e+00 : f32
    %31 = vector.broadcast %cst_29 : f32 to vector<1x256xf32>
    %c3_30 = arith.constant 3 : index
    %c0_31 = arith.constant 0 : index
    %32 = vector.load %arg6[%c3_30, %c0_31] : memref<4x256xf32, #tpu.memory_space<vmem>>, vector<1x256xf32>
    tpu.vector_store %arg6[%c3_30, %c0_31], %31 {strides = array<i32>} : memref<4x256xf32, #tpu.memory_space<vmem>>, vector<1x256xf32>,
    %c1_32 = arith.constant 1 : index
    %c0_33 = arith.constant 0 : index
    %33 = vector.load %arg6[%c1_32, %c0_33] : memref<4x256xf32, #tpu.memory_space<vmem>>, vector<2x256xf32>
    tpu.vector_store %arg6[%c1_32, %c0_33], %28 {strides = array<i32>} : memref<4x256xf32, #tpu.memory_space<vmem>>, vector<2x256xf32>,
    %cst_34 = arith.constant 0.000000e+00 : f32
    %34 = vector.broadcast %cst_34 : f32 to vector<2x256xf32>
    %c0_35 = arith.constant 0 : index
    %c0_36 = arith.constant 0 : index
    %35 = vector.load %arg6[%c0_35, %c0_36] : memref<4x256xf32, #tpu.memory_space<vmem>>, vector<2x256xf32>
    %36 = arith.truncf %35 : vector<2x256xf32> to vector<2x256xbf16>
    %c0_37 = arith.constant 0 : index
    %c0_38 = arith.constant 0 : index
    %c0_39 = arith.constant 0 : index
    %37 = vector.load %arg3[%c0_37, %c0_38, %c0_39] : memref<3x256x256xbf16, #tpu.memory_space<vmem>>, vector<1x256x256xbf16>
    %38 = vector.shape_cast %37 : vector<1x256x256xbf16> to vector<256x256xbf16>
    %cst_40 = arith.constant dense<0.000000e+00> : vector<2x256xf32>
    %39 = tpu.matmul %36, %38, %cst_40 {dimension_numbers = #tpu.dot_dimension_numbers<[1], [0], [0], [1], [0, 0, 1, 1], [], []>} : vector<2x256xbf16>, vector<256x256xbf16>, vector<2x256xf32> -> vector<2x256xf32>
    %40 = arith.addf %34, %39 : vector<2x256xf32>
    %c1_41 = arith.constant 1 : index
    %c0_42 = arith.constant 0 : index
    %41 = vector.load %arg6[%c1_41, %c0_42] : memref<4x256xf32, #tpu.memory_space<vmem>>, vector<2x256xf32>
    %42 = arith.truncf %41 : vector<2x256xf32> to vector<2x256xbf16>
    %c1_43 = arith.constant 1 : index
    %c0_44 = arith.constant 0 : index
    %c0_45 = arith.constant 0 : index
    %43 = vector.load %arg3[%c1_43, %c0_44, %c0_45] : memref<3x256x256xbf16, #tpu.memory_space<vmem>>, vector<1x256x256xbf16>
    %44 = vector.shape_cast %43 : vector<1x256x256xbf16> to vector<256x256xbf16>
    %cst_46 = arith.constant dense<0.000000e+00> : vector<2x256xf32>
    %45 = tpu.matmul %42, %44, %cst_46 {dimension_numbers = #tpu.dot_dimension_numbers<[1], [0], [0], [1], [0, 0, 1, 1], [], []>} : vector<2x256xbf16>, vector<256x256xbf16>, vector<2x256xf32> -> vector<2x256xf32>
    %46 = arith.addf %40, %45 : vector<2x256xf32>
    %c2_47 = arith.constant 2 : index
    %c0_48 = arith.constant 0 : index
    %47 = vector.load %arg6[%c2_47, %c0_48] : memref<4x256xf32, #tpu.memory_space<vmem>>, vector<2x256xf32>
    %48 = arith.truncf %47 : vector<2x256xf32> to vector<2x256xbf16>
    %c2_49 = arith.constant 2 : index
    %c0_50 = arith.constant 0 : index
    %c0_51 = arith.constant 0 : index
    %49 = vector.load %arg3[%c2_49, %c0_50, %c0_51] : memref<3x256x256xbf16, #tpu.memory_space<vmem>>, vector<1x256x256xbf16>
    %50 = vector.shape_cast %49 : vector<1x256x256xbf16> to vector<256x256xbf16>
    %cst_52 = arith.constant dense<0.000000e+00> : vector<2x256xf32>
    %51 = tpu.matmul %48, %50, %cst_52 {dimension_numbers = #tpu.dot_dimension_numbers<[1], [0], [0], [1], [0, 0, 1, 1], [], []>} : vector<2x256xbf16>, vector<256x256xbf16>, vector<2x256xf32> -> vector<2x256xf32>
    %52 = arith.addf %46, %51 : vector<2x256xf32>
    %cst_53 = arith.constant 0.000000e+00 : f32
    %53 = vector.broadcast %cst_53 : f32 to vector<2x256xf32>
    %54 = arith.maximumf %52, %53 : vector<2x256xf32>
    %55 = vector.shape_cast %54 : vector<2x256xf32> to vector<1x2x256xf32>
    %56 = arith.truncf %55 : vector<1x2x256xf32> to vector<1x2x256xbf16>
    %c0_54 = arith.constant 0 : index
    %c0_55 = arith.constant 0 : index
    %c0_56 = arith.constant 0 : index
    %57 = vector.load %arg4[%c0_54, %c0_55, %c0_56] : memref<1x2x256xbf16, #tpu.memory_space<vmem>>, vector<1x2x256xbf16>
    tpu.vector_store %arg4[%c0_54, %c0_55, %c0_56], %56 {strides = array<i32>} : memref<1x2x256xbf16, #tpu.memory_space<vmem>>, vector<1x2x256xbf16>,
    return
  }
  func.func @transform_0(%arg0: i32) -> (i32, i32, i32) {
    %c0_i32 = arith.constant 0 : i32
    %c0_i32_0 = arith.constant 0 : i32
    %c0_i32_1 = arith.constant 0 : i32
    return %arg0, %c0_i32, %c0_i32_0 : i32, i32, i32
  }
  func.func @transform_1(%arg0: i32) -> (i32, i32, i32) {
    %c0_i32 = arith.constant 0 : i32
    %c0_i32_0 = arith.constant 0 : i32
    %c0_i32_1 = arith.constant 0 : i32
    %c0_i32_2 = arith.constant 0 : i32
    return %c0_i32, %c0_i32_0, %c0_i32_1 : i32, i32, i32
  }
  func.func @transform_2(%arg0: i32) -> (i32, i32, i32) {
    %c0_i32 = arith.constant 0 : i32
    %c0_i32_0 = arith.constant 0 : i32
    %c0_i32_1 = arith.constant 0 : i32
    %c0_i32_2 = arith.constant 0 : i32
    return %c0_i32, %c0_i32_0, %c0_i32_1 : i32, i32, i32
  }
  func.func @transform_3(%arg0: i32) -> (i32, i32, i32) {
    %c0_i32 = arith.constant 0 : i32
    %c0_i32_0 = arith.constant 0 : i32
    %c0_i32_1 = arith.constant 0 : i32
    return %arg0, %c0_i32, %c0_i32_0 : i32, i32, i32
  }
}

module attributes {stable_mosaic.version = 11 : i64} {
  func.func @_double_conv_kernel(%arg0: i32, %arg1: memref<1x2x512xbf16, #tpu.memory_space<vmem>>, %arg2: memref<3x512x128xbf16, #tpu.memory_space<vmem>>, %arg3: memref<3x128x128xbf16, #tpu.memory_space<vmem>>, %arg4: memref<1x2x128xbf16, #tpu.memory_space<vmem>>, %arg5: memref<4x512xf32, #tpu.memory_space<vmem>>, %arg6: memref<4x128xf32, #tpu.memory_space<vmem>>) attributes {dimension_semantics = [#tpu.dimension_semantics<parallel>], iteration_bounds = array<i64: 2>, scalar_prefetch = 0 : i64, scratch_operands = 2 : i64, tpu.core_type = #tpu.core_type<tc>, window_params = [{transform_indices = @transform_0, window_bounds = array<i64: 1, 2, 512>}, {pipeline_mode = #tpu.pipeline_mode<synchronous>, transform_indices = @transform_1, window_bounds = array<i64: 3, 512, 128>}, {pipeline_mode = #tpu.pipeline_mode<synchronous>, transform_indices = @transform_2, window_bounds = array<i64: 3, 128, 128>}, {transform_indices = @transform_3, window_bounds = array<i64: 1, 2, 128>}]} {
    %c0 = arith.constant 0 : index
    %c0_0 = arith.constant 0 : index
    %c0_1 = arith.constant 0 : index
    %0 = vector.load %arg1[%c0, %c0_0, %c0_1] : memref<1x2x512xbf16, #tpu.memory_space<vmem>>, vector<1x2x512xbf16>
    %1 = vector.shape_cast %0 : vector<1x2x512xbf16> to vector<2x512xbf16>
    %2 = arith.extf %1 : vector<2x512xbf16> to vector<2x512xf32>
    %cst = arith.constant 0.000000e+00 : f32
    %3 = vector.broadcast %cst : f32 to vector<1x512xf32>
    %c0_2 = arith.constant 0 : index
    %c0_3 = arith.constant 0 : index
    %4 = vector.load %arg5[%c0_2, %c0_3] : memref<4x512xf32, #tpu.memory_space<vmem>>, vector<1x512xf32>
    tpu.vector_store %arg5[%c0_2, %c0_3], %3 {strides = array<i32>} : memref<4x512xf32, #tpu.memory_space<vmem>>, vector<1x512xf32>,
    %cst_4 = arith.constant 0.000000e+00 : f32
    %5 = vector.broadcast %cst_4 : f32 to vector<1x512xf32>
    %c3 = arith.constant 3 : index
    %c0_5 = arith.constant 0 : index
    %6 = vector.load %arg5[%c3, %c0_5] : memref<4x512xf32, #tpu.memory_space<vmem>>, vector<1x512xf32>
    tpu.vector_store %arg5[%c3, %c0_5], %5 {strides = array<i32>} : memref<4x512xf32, #tpu.memory_space<vmem>>, vector<1x512xf32>,
    %c1 = arith.constant 1 : index
    %c0_6 = arith.constant 0 : index
    %7 = vector.load %arg5[%c1, %c0_6] : memref<4x512xf32, #tpu.memory_space<vmem>>, vector<2x512xf32>
    tpu.vector_store %arg5[%c1, %c0_6], %2 {strides = array<i32>} : memref<4x512xf32, #tpu.memory_space<vmem>>, vector<2x512xf32>,
    %cst_7 = arith.constant 0.000000e+00 : f32
    %8 = vector.broadcast %cst_7 : f32 to vector<2x128xf32>
    %c0_8 = arith.constant 0 : index
    %c0_9 = arith.constant 0 : index
    %9 = vector.load %arg5[%c0_8, %c0_9] : memref<4x512xf32, #tpu.memory_space<vmem>>, vector<2x512xf32>
    %10 = arith.truncf %9 : vector<2x512xf32> to vector<2x512xbf16>
    %c0_10 = arith.constant 0 : index
    %c0_11 = arith.constant 0 : index
    %c0_12 = arith.constant 0 : index
    %11 = vector.load %arg2[%c0_10, %c0_11, %c0_12] : memref<3x512x128xbf16, #tpu.memory_space<vmem>>, vector<1x512x128xbf16>
    %12 = vector.shape_cast %11 : vector<1x512x128xbf16> to vector<512x128xbf16>
    %cst_13 = arith.constant dense<0.000000e+00> : vector<2x128xf32>
    %13 = tpu.matmul %10, %12, %cst_13 {dimension_numbers = #tpu.dot_dimension_numbers<[1], [0], [0], [1], [0, 0, 1, 1], [], []>} : vector<2x512xbf16>, vector<512x128xbf16>, vector<2x128xf32> -> vector<2x128xf32>
    %14 = arith.addf %8, %13 : vector<2x128xf32>
    %c1_14 = arith.constant 1 : index
    %c0_15 = arith.constant 0 : index
    %15 = vector.load %arg5[%c1_14, %c0_15] : memref<4x512xf32, #tpu.memory_space<vmem>>, vector<2x512xf32>
    %16 = arith.truncf %15 : vector<2x512xf32> to vector<2x512xbf16>
    %c1_16 = arith.constant 1 : index
    %c0_17 = arith.constant 0 : index
    %c0_18 = arith.constant 0 : index
    %17 = vector.load %arg2[%c1_16, %c0_17, %c0_18] : memref<3x512x128xbf16, #tpu.memory_space<vmem>>, vector<1x512x128xbf16>
    %18 = vector.shape_cast %17 : vector<1x512x128xbf16> to vector<512x128xbf16>
    %cst_19 = arith.constant dense<0.000000e+00> : vector<2x128xf32>
    %19 = tpu.matmul %16, %18, %cst_19 {dimension_numbers = #tpu.dot_dimension_numbers<[1], [0], [0], [1], [0, 0, 1, 1], [], []>} : vector<2x512xbf16>, vector<512x128xbf16>, vector<2x128xf32> -> vector<2x128xf32>
    %20 = arith.addf %14, %19 : vector<2x128xf32>
    %c2 = arith.constant 2 : index
    %c0_20 = arith.constant 0 : index
    %21 = vector.load %arg5[%c2, %c0_20] : memref<4x512xf32, #tpu.memory_space<vmem>>, vector<2x512xf32>
    %22 = arith.truncf %21 : vector<2x512xf32> to vector<2x512xbf16>
    %c2_21 = arith.constant 2 : index
    %c0_22 = arith.constant 0 : index
    %c0_23 = arith.constant 0 : index
    %23 = vector.load %arg2[%c2_21, %c0_22, %c0_23] : memref<3x512x128xbf16, #tpu.memory_space<vmem>>, vector<1x512x128xbf16>
    %24 = vector.shape_cast %23 : vector<1x512x128xbf16> to vector<512x128xbf16>
    %cst_24 = arith.constant dense<0.000000e+00> : vector<2x128xf32>
    %25 = tpu.matmul %22, %24, %cst_24 {dimension_numbers = #tpu.dot_dimension_numbers<[1], [0], [0], [1], [0, 0, 1, 1], [], []>} : vector<2x512xbf16>, vector<512x128xbf16>, vector<2x128xf32> -> vector<2x128xf32>
    %26 = arith.addf %20, %25 : vector<2x128xf32>
    %cst_25 = arith.constant 0.000000e+00 : f32
    %27 = vector.broadcast %cst_25 : f32 to vector<2x128xf32>
    %28 = arith.maximumf %26, %27 : vector<2x128xf32>
    %cst_26 = arith.constant 0.000000e+00 : f32
    %29 = vector.broadcast %cst_26 : f32 to vector<1x128xf32>
    %c0_27 = arith.constant 0 : index
    %c0_28 = arith.constant 0 : index
    %30 = vector.load %arg6[%c0_27, %c0_28] : memref<4x128xf32, #tpu.memory_space<vmem>>, vector<1x128xf32>
    tpu.vector_store %arg6[%c0_27, %c0_28], %29 {strides = array<i32>} : memref<4x128xf32, #tpu.memory_space<vmem>>, vector<1x128xf32>,
    %cst_29 = arith.constant 0.000000e+00 : f32
    %31 = vector.broadcast %cst_29 : f32 to vector<1x128xf32>
    %c3_30 = arith.constant 3 : index
    %c0_31 = arith.constant 0 : index
    %32 = vector.load %arg6[%c3_30, %c0_31] : memref<4x128xf32, #tpu.memory_space<vmem>>, vector<1x128xf32>
    tpu.vector_store %arg6[%c3_30, %c0_31], %31 {strides = array<i32>} : memref<4x128xf32, #tpu.memory_space<vmem>>, vector<1x128xf32>,
    %c1_32 = arith.constant 1 : index
    %c0_33 = arith.constant 0 : index
    %33 = vector.load %arg6[%c1_32, %c0_33] : memref<4x128xf32, #tpu.memory_space<vmem>>, vector<2x128xf32>
    tpu.vector_store %arg6[%c1_32, %c0_33], %28 {strides = array<i32>} : memref<4x128xf32, #tpu.memory_space<vmem>>, vector<2x128xf32>,
    %cst_34 = arith.constant 0.000000e+00 : f32
    %34 = vector.broadcast %cst_34 : f32 to vector<2x128xf32>
    %c0_35 = arith.constant 0 : index
    %c0_36 = arith.constant 0 : index
    %35 = vector.load %arg6[%c0_35, %c0_36] : memref<4x128xf32, #tpu.memory_space<vmem>>, vector<2x128xf32>
    %36 = arith.truncf %35 : vector<2x128xf32> to vector<2x128xbf16>
    %c0_37 = arith.constant 0 : index
    %c0_38 = arith.constant 0 : index
    %c0_39 = arith.constant 0 : index
    %37 = vector.load %arg3[%c0_37, %c0_38, %c0_39] : memref<3x128x128xbf16, #tpu.memory_space<vmem>>, vector<1x128x128xbf16>
    %38 = vector.shape_cast %37 : vector<1x128x128xbf16> to vector<128x128xbf16>
    %cst_40 = arith.constant dense<0.000000e+00> : vector<2x128xf32>
    %39 = tpu.matmul %36, %38, %cst_40 {dimension_numbers = #tpu.dot_dimension_numbers<[1], [0], [0], [1], [0, 0, 1, 1], [], []>} : vector<2x128xbf16>, vector<128x128xbf16>, vector<2x128xf32> -> vector<2x128xf32>
    %40 = arith.addf %34, %39 : vector<2x128xf32>
    %c1_41 = arith.constant 1 : index
    %c0_42 = arith.constant 0 : index
    %41 = vector.load %arg6[%c1_41, %c0_42] : memref<4x128xf32, #tpu.memory_space<vmem>>, vector<2x128xf32>
    %42 = arith.truncf %41 : vector<2x128xf32> to vector<2x128xbf16>
    %c1_43 = arith.constant 1 : index
    %c0_44 = arith.constant 0 : index
    %c0_45 = arith.constant 0 : index
    %43 = vector.load %arg3[%c1_43, %c0_44, %c0_45] : memref<3x128x128xbf16, #tpu.memory_space<vmem>>, vector<1x128x128xbf16>
    %44 = vector.shape_cast %43 : vector<1x128x128xbf16> to vector<128x128xbf16>
    %cst_46 = arith.constant dense<0.000000e+00> : vector<2x128xf32>
    %45 = tpu.matmul %42, %44, %cst_46 {dimension_numbers = #tpu.dot_dimension_numbers<[1], [0], [0], [1], [0, 0, 1, 1], [], []>} : vector<2x128xbf16>, vector<128x128xbf16>, vector<2x128xf32> -> vector<2x128xf32>
    %46 = arith.addf %40, %45 : vector<2x128xf32>
    %c2_47 = arith.constant 2 : index
    %c0_48 = arith.constant 0 : index
    %47 = vector.load %arg6[%c2_47, %c0_48] : memref<4x128xf32, #tpu.memory_space<vmem>>, vector<2x128xf32>
    %48 = arith.truncf %47 : vector<2x128xf32> to vector<2x128xbf16>
    %c2_49 = arith.constant 2 : index
    %c0_50 = arith.constant 0 : index
    %c0_51 = arith.constant 0 : index
    %49 = vector.load %arg3[%c2_49, %c0_50, %c0_51] : memref<3x128x128xbf16, #tpu.memory_space<vmem>>, vector<1x128x128xbf16>
    %50 = vector.shape_cast %49 : vector<1x128x128xbf16> to vector<128x128xbf16>
    %cst_52 = arith.constant dense<0.000000e+00> : vector<2x128xf32>
    %51 = tpu.matmul %48, %50, %cst_52 {dimension_numbers = #tpu.dot_dimension_numbers<[1], [0], [0], [1], [0, 0, 1, 1], [], []>} : vector<2x128xbf16>, vector<128x128xbf16>, vector<2x128xf32> -> vector<2x128xf32>
    %52 = arith.addf %46, %51 : vector<2x128xf32>
    %cst_53 = arith.constant 0.000000e+00 : f32
    %53 = vector.broadcast %cst_53 : f32 to vector<2x128xf32>
    %54 = arith.maximumf %52, %53 : vector<2x128xf32>
    %55 = vector.shape_cast %54 : vector<2x128xf32> to vector<1x2x128xf32>
    %56 = arith.truncf %55 : vector<1x2x128xf32> to vector<1x2x128xbf16>
    %c0_54 = arith.constant 0 : index
    %c0_55 = arith.constant 0 : index
    %c0_56 = arith.constant 0 : index
    %57 = vector.load %arg4[%c0_54, %c0_55, %c0_56] : memref<1x2x128xbf16, #tpu.memory_space<vmem>>, vector<1x2x128xbf16>
    tpu.vector_store %arg4[%c0_54, %c0_55, %c0_56], %56 {strides = array<i32>} : memref<1x2x128xbf16, #tpu.memory_space<vmem>>, vector<1x2x128xbf16>,
    return
  }
  func.func @transform_0(%arg0: i32) -> (i32, i32, i32) {
    %c0_i32 = arith.constant 0 : i32
    %c0_i32_0 = arith.constant 0 : i32
    %c0_i32_1 = arith.constant 0 : i32
    return %arg0, %c0_i32, %c0_i32_0 : i32, i32, i32
  }
  func.func @transform_1(%arg0: i32) -> (i32, i32, i32) {
    %c0_i32 = arith.constant 0 : i32
    %c0_i32_0 = arith.constant 0 : i32
    %c0_i32_1 = arith.constant 0 : i32
    %c0_i32_2 = arith.constant 0 : i32
    return %c0_i32, %c0_i32_0, %c0_i32_1 : i32, i32, i32
  }
  func.func @transform_2(%arg0: i32) -> (i32, i32, i32) {
    %c0_i32 = arith.constant 0 : i32
    %c0_i32_0 = arith.constant 0 : i32
    %c0_i32_1 = arith.constant 0 : i32
    %c0_i32_2 = arith.constant 0 : i32
    return %c0_i32, %c0_i32_0, %c0_i32_1 : i32, i32, i32
  }
  func.func @transform_3(%arg0: i32) -> (i32, i32, i32) {
    %c0_i32 = arith.constant 0 : i32
    %c0_i32_0 = arith.constant 0 : i32
    %c0_i32_1 = arith.constant 0 : i32
    return %arg0, %c0_i32, %c0_i32_0 : i32, i32, i32
  }
}

module attributes {stable_mosaic.version = 11 : i64} {
  func.func @_double_conv_kernel(%arg0: i32, %arg1: memref<1x4x512xbf16, #tpu.memory_space<vmem>>, %arg2: memref<3x512x128xbf16, #tpu.memory_space<vmem>>, %arg3: memref<3x128x128xbf16, #tpu.memory_space<vmem>>, %arg4: memref<1x4x128xbf16, #tpu.memory_space<vmem>>, %arg5: memref<6x512xf32, #tpu.memory_space<vmem>>, %arg6: memref<6x128xf32, #tpu.memory_space<vmem>>) attributes {dimension_semantics = [#tpu.dimension_semantics<parallel>], iteration_bounds = array<i64: 2>, scalar_prefetch = 0 : i64, scratch_operands = 2 : i64, tpu.core_type = #tpu.core_type<tc>, window_params = [{transform_indices = @transform_0, window_bounds = array<i64: 1, 4, 512>}, {pipeline_mode = #tpu.pipeline_mode<synchronous>, transform_indices = @transform_1, window_bounds = array<i64: 3, 512, 128>}, {pipeline_mode = #tpu.pipeline_mode<synchronous>, transform_indices = @transform_2, window_bounds = array<i64: 3, 128, 128>}, {transform_indices = @transform_3, window_bounds = array<i64: 1, 4, 128>}]} {
    %c0 = arith.constant 0 : index
    %c0_0 = arith.constant 0 : index
    %c0_1 = arith.constant 0 : index
    %0 = vector.load %arg1[%c0, %c0_0, %c0_1] : memref<1x4x512xbf16, #tpu.memory_space<vmem>>, vector<1x4x512xbf16>
    %1 = vector.shape_cast %0 : vector<1x4x512xbf16> to vector<4x512xbf16>
    %2 = arith.extf %1 : vector<4x512xbf16> to vector<4x512xf32>
    %cst = arith.constant 0.000000e+00 : f32
    %3 = vector.broadcast %cst : f32 to vector<1x512xf32>
    %c0_2 = arith.constant 0 : index
    %c0_3 = arith.constant 0 : index
    %4 = vector.load %arg5[%c0_2, %c0_3] : memref<6x512xf32, #tpu.memory_space<vmem>>, vector<1x512xf32>
    tpu.vector_store %arg5[%c0_2, %c0_3], %3 {strides = array<i32>} : memref<6x512xf32, #tpu.memory_space<vmem>>, vector<1x512xf32>,
    %cst_4 = arith.constant 0.000000e+00 : f32
    %5 = vector.broadcast %cst_4 : f32 to vector<1x512xf32>
    %c5 = arith.constant 5 : index
    %c0_5 = arith.constant 0 : index
    %6 = vector.load %arg5[%c5, %c0_5] : memref<6x512xf32, #tpu.memory_space<vmem>>, vector<1x512xf32>
    tpu.vector_store %arg5[%c5, %c0_5], %5 {strides = array<i32>} : memref<6x512xf32, #tpu.memory_space<vmem>>, vector<1x512xf32>,
    %c1 = arith.constant 1 : index
    %c0_6 = arith.constant 0 : index
    %7 = vector.load %arg5[%c1, %c0_6] : memref<6x512xf32, #tpu.memory_space<vmem>>, vector<4x512xf32>
    tpu.vector_store %arg5[%c1, %c0_6], %2 {strides = array<i32>} : memref<6x512xf32, #tpu.memory_space<vmem>>, vector<4x512xf32>,
    %cst_7 = arith.constant 0.000000e+00 : f32
    %8 = vector.broadcast %cst_7 : f32 to vector<4x128xf32>
    %c0_8 = arith.constant 0 : index
    %c0_9 = arith.constant 0 : index
    %9 = vector.load %arg5[%c0_8, %c0_9] : memref<6x512xf32, #tpu.memory_space<vmem>>, vector<4x512xf32>
    %10 = arith.truncf %9 : vector<4x512xf32> to vector<4x512xbf16>
    %c0_10 = arith.constant 0 : index
    %c0_11 = arith.constant 0 : index
    %c0_12 = arith.constant 0 : index
    %11 = vector.load %arg2[%c0_10, %c0_11, %c0_12] : memref<3x512x128xbf16, #tpu.memory_space<vmem>>, vector<1x512x128xbf16>
    %12 = vector.shape_cast %11 : vector<1x512x128xbf16> to vector<512x128xbf16>
    %cst_13 = arith.constant dense<0.000000e+00> : vector<4x128xf32>
    %13 = tpu.matmul %10, %12, %cst_13 {dimension_numbers = #tpu.dot_dimension_numbers<[1], [0], [0], [1], [0, 0, 1, 1], [], []>} : vector<4x512xbf16>, vector<512x128xbf16>, vector<4x128xf32> -> vector<4x128xf32>
    %14 = arith.addf %8, %13 : vector<4x128xf32>
    %c1_14 = arith.constant 1 : index
    %c0_15 = arith.constant 0 : index
    %15 = vector.load %arg5[%c1_14, %c0_15] : memref<6x512xf32, #tpu.memory_space<vmem>>, vector<4x512xf32>
    %16 = arith.truncf %15 : vector<4x512xf32> to vector<4x512xbf16>
    %c1_16 = arith.constant 1 : index
    %c0_17 = arith.constant 0 : index
    %c0_18 = arith.constant 0 : index
    %17 = vector.load %arg2[%c1_16, %c0_17, %c0_18] : memref<3x512x128xbf16, #tpu.memory_space<vmem>>, vector<1x512x128xbf16>
    %18 = vector.shape_cast %17 : vector<1x512x128xbf16> to vector<512x128xbf16>
    %cst_19 = arith.constant dense<0.000000e+00> : vector<4x128xf32>
    %19 = tpu.matmul %16, %18, %cst_19 {dimension_numbers = #tpu.dot_dimension_numbers<[1], [0], [0], [1], [0, 0, 1, 1], [], []>} : vector<4x512xbf16>, vector<512x128xbf16>, vector<4x128xf32> -> vector<4x128xf32>
    %20 = arith.addf %14, %19 : vector<4x128xf32>
    %c2 = arith.constant 2 : index
    %c0_20 = arith.constant 0 : index
    %21 = vector.load %arg5[%c2, %c0_20] : memref<6x512xf32, #tpu.memory_space<vmem>>, vector<4x512xf32>
    %22 = arith.truncf %21 : vector<4x512xf32> to vector<4x512xbf16>
    %c2_21 = arith.constant 2 : index
    %c0_22 = arith.constant 0 : index
    %c0_23 = arith.constant 0 : index
    %23 = vector.load %arg2[%c2_21, %c0_22, %c0_23] : memref<3x512x128xbf16, #tpu.memory_space<vmem>>, vector<1x512x128xbf16>
    %24 = vector.shape_cast %23 : vector<1x512x128xbf16> to vector<512x128xbf16>
    %cst_24 = arith.constant dense<0.000000e+00> : vector<4x128xf32>
    %25 = tpu.matmul %22, %24, %cst_24 {dimension_numbers = #tpu.dot_dimension_numbers<[1], [0], [0], [1], [0, 0, 1, 1], [], []>} : vector<4x512xbf16>, vector<512x128xbf16>, vector<4x128xf32> -> vector<4x128xf32>
    %26 = arith.addf %20, %25 : vector<4x128xf32>
    %cst_25 = arith.constant 0.000000e+00 : f32
    %27 = vector.broadcast %cst_25 : f32 to vector<4x128xf32>
    %28 = arith.maximumf %26, %27 : vector<4x128xf32>
    %cst_26 = arith.constant 0.000000e+00 : f32
    %29 = vector.broadcast %cst_26 : f32 to vector<1x128xf32>
    %c0_27 = arith.constant 0 : index
    %c0_28 = arith.constant 0 : index
    %30 = vector.load %arg6[%c0_27, %c0_28] : memref<6x128xf32, #tpu.memory_space<vmem>>, vector<1x128xf32>
    tpu.vector_store %arg6[%c0_27, %c0_28], %29 {strides = array<i32>} : memref<6x128xf32, #tpu.memory_space<vmem>>, vector<1x128xf32>,
    %cst_29 = arith.constant 0.000000e+00 : f32
    %31 = vector.broadcast %cst_29 : f32 to vector<1x128xf32>
    %c5_30 = arith.constant 5 : index
    %c0_31 = arith.constant 0 : index
    %32 = vector.load %arg6[%c5_30, %c0_31] : memref<6x128xf32, #tpu.memory_space<vmem>>, vector<1x128xf32>
    tpu.vector_store %arg6[%c5_30, %c0_31], %31 {strides = array<i32>} : memref<6x128xf32, #tpu.memory_space<vmem>>, vector<1x128xf32>,
    %c1_32 = arith.constant 1 : index
    %c0_33 = arith.constant 0 : index
    %33 = vector.load %arg6[%c1_32, %c0_33] : memref<6x128xf32, #tpu.memory_space<vmem>>, vector<4x128xf32>
    tpu.vector_store %arg6[%c1_32, %c0_33], %28 {strides = array<i32>} : memref<6x128xf32, #tpu.memory_space<vmem>>, vector<4x128xf32>,
    %cst_34 = arith.constant 0.000000e+00 : f32
    %34 = vector.broadcast %cst_34 : f32 to vector<4x128xf32>
    %c0_35 = arith.constant 0 : index
    %c0_36 = arith.constant 0 : index
    %35 = vector.load %arg6[%c0_35, %c0_36] : memref<6x128xf32, #tpu.memory_space<vmem>>, vector<4x128xf32>
    %36 = arith.truncf %35 : vector<4x128xf32> to vector<4x128xbf16>
    %c0_37 = arith.constant 0 : index
    %c0_38 = arith.constant 0 : index
    %c0_39 = arith.constant 0 : index
    %37 = vector.load %arg3[%c0_37, %c0_38, %c0_39] : memref<3x128x128xbf16, #tpu.memory_space<vmem>>, vector<1x128x128xbf16>
    %38 = vector.shape_cast %37 : vector<1x128x128xbf16> to vector<128x128xbf16>
    %cst_40 = arith.constant dense<0.000000e+00> : vector<4x128xf32>
    %39 = tpu.matmul %36, %38, %cst_40 {dimension_numbers = #tpu.dot_dimension_numbers<[1], [0], [0], [1], [0, 0, 1, 1], [], []>} : vector<4x128xbf16>, vector<128x128xbf16>, vector<4x128xf32> -> vector<4x128xf32>
    %40 = arith.addf %34, %39 : vector<4x128xf32>
    %c1_41 = arith.constant 1 : index
    %c0_42 = arith.constant 0 : index
    %41 = vector.load %arg6[%c1_41, %c0_42] : memref<6x128xf32, #tpu.memory_space<vmem>>, vector<4x128xf32>
    %42 = arith.truncf %41 : vector<4x128xf32> to vector<4x128xbf16>
    %c1_43 = arith.constant 1 : index
    %c0_44 = arith.constant 0 : index
    %c0_45 = arith.constant 0 : index
    %43 = vector.load %arg3[%c1_43, %c0_44, %c0_45] : memref<3x128x128xbf16, #tpu.memory_space<vmem>>, vector<1x128x128xbf16>
    %44 = vector.shape_cast %43 : vector<1x128x128xbf16> to vector<128x128xbf16>
    %cst_46 = arith.constant dense<0.000000e+00> : vector<4x128xf32>
    %45 = tpu.matmul %42, %44, %cst_46 {dimension_numbers = #tpu.dot_dimension_numbers<[1], [0], [0], [1], [0, 0, 1, 1], [], []>} : vector<4x128xbf16>, vector<128x128xbf16>, vector<4x128xf32> -> vector<4x128xf32>
    %46 = arith.addf %40, %45 : vector<4x128xf32>
    %c2_47 = arith.constant 2 : index
    %c0_48 = arith.constant 0 : index
    %47 = vector.load %arg6[%c2_47, %c0_48] : memref<6x128xf32, #tpu.memory_space<vmem>>, vector<4x128xf32>
    %48 = arith.truncf %47 : vector<4x128xf32> to vector<4x128xbf16>
    %c2_49 = arith.constant 2 : index
    %c0_50 = arith.constant 0 : index
    %c0_51 = arith.constant 0 : index
    %49 = vector.load %arg3[%c2_49, %c0_50, %c0_51] : memref<3x128x128xbf16, #tpu.memory_space<vmem>>, vector<1x128x128xbf16>
    %50 = vector.shape_cast %49 : vector<1x128x128xbf16> to vector<128x128xbf16>
    %cst_52 = arith.constant dense<0.000000e+00> : vector<4x128xf32>
    %51 = tpu.matmul %48, %50, %cst_52 {dimension_numbers = #tpu.dot_dimension_numbers<[1], [0], [0], [1], [0, 0, 1, 1], [], []>} : vector<4x128xbf16>, vector<128x128xbf16>, vector<4x128xf32> -> vector<4x128xf32>
    %52 = arith.addf %46, %51 : vector<4x128xf32>
    %cst_53 = arith.constant 0.000000e+00 : f32
    %53 = vector.broadcast %cst_53 : f32 to vector<4x128xf32>
    %54 = arith.maximumf %52, %53 : vector<4x128xf32>
    %55 = vector.shape_cast %54 : vector<4x128xf32> to vector<1x4x128xf32>
    %56 = arith.truncf %55 : vector<1x4x128xf32> to vector<1x4x128xbf16>
    %c0_54 = arith.constant 0 : index
    %c0_55 = arith.constant 0 : index
    %c0_56 = arith.constant 0 : index
    %57 = vector.load %arg4[%c0_54, %c0_55, %c0_56] : memref<1x4x128xbf16, #tpu.memory_space<vmem>>, vector<1x4x128xbf16>
    tpu.vector_store %arg4[%c0_54, %c0_55, %c0_56], %56 {strides = array<i32>} : memref<1x4x128xbf16, #tpu.memory_space<vmem>>, vector<1x4x128xbf16>,
    return
  }
  func.func @transform_0(%arg0: i32) -> (i32, i32, i32) {
    %c0_i32 = arith.constant 0 : i32
    %c0_i32_0 = arith.constant 0 : i32
    %c0_i32_1 = arith.constant 0 : i32
    return %arg0, %c0_i32, %c0_i32_0 : i32, i32, i32
  }
  func.func @transform_1(%arg0: i32) -> (i32, i32, i32) {
    %c0_i32 = arith.constant 0 : i32
    %c0_i32_0 = arith.constant 0 : i32
    %c0_i32_1 = arith.constant 0 : i32
    %c0_i32_2 = arith.constant 0 : i32
    return %c0_i32, %c0_i32_0, %c0_i32_1 : i32, i32, i32
  }
  func.func @transform_2(%arg0: i32) -> (i32, i32, i32) {
    %c0_i32 = arith.constant 0 : i32
    %c0_i32_0 = arith.constant 0 : i32
    %c0_i32_1 = arith.constant 0 : i32
    %c0_i32_2 = arith.constant 0 : i32
    return %c0_i32, %c0_i32_0, %c0_i32_1 : i32, i32, i32
  }
  func.func @transform_3(%arg0: i32) -> (i32, i32, i32) {
    %c0_i32 = arith.constant 0 : i32
    %c0_i32_0 = arith.constant 0 : i32
    %c0_i32_1 = arith.constant 0 : i32
    return %arg0, %c0_i32, %c0_i32_0 : i32, i32, i32
  }
}

module attributes {stable_mosaic.version = 11 : i64} {
  func.func @_double_conv_kernel(%arg0: i32, %arg1: memref<1x8x512xbf16, #tpu.memory_space<vmem>>, %arg2: memref<3x512x128xbf16, #tpu.memory_space<vmem>>, %arg3: memref<3x128x128xbf16, #tpu.memory_space<vmem>>, %arg4: memref<1x8x128xbf16, #tpu.memory_space<vmem>>, %arg5: memref<10x512xf32, #tpu.memory_space<vmem>>, %arg6: memref<10x128xf32, #tpu.memory_space<vmem>>) attributes {dimension_semantics = [#tpu.dimension_semantics<parallel>], iteration_bounds = array<i64: 2>, scalar_prefetch = 0 : i64, scratch_operands = 2 : i64, tpu.core_type = #tpu.core_type<tc>, window_params = [{transform_indices = @transform_0, window_bounds = array<i64: 1, 8, 512>}, {pipeline_mode = #tpu.pipeline_mode<synchronous>, transform_indices = @transform_1, window_bounds = array<i64: 3, 512, 128>}, {pipeline_mode = #tpu.pipeline_mode<synchronous>, transform_indices = @transform_2, window_bounds = array<i64: 3, 128, 128>}, {transform_indices = @transform_3, window_bounds = array<i64: 1, 8, 128>}]} {
    %c0 = arith.constant 0 : index
    %c0_0 = arith.constant 0 : index
    %c0_1 = arith.constant 0 : index
    %0 = vector.load %arg1[%c0, %c0_0, %c0_1] : memref<1x8x512xbf16, #tpu.memory_space<vmem>>, vector<1x8x512xbf16>
    %1 = vector.shape_cast %0 : vector<1x8x512xbf16> to vector<8x512xbf16>
    %2 = arith.extf %1 : vector<8x512xbf16> to vector<8x512xf32>
    %cst = arith.constant 0.000000e+00 : f32
    %3 = vector.broadcast %cst : f32 to vector<1x512xf32>
    %c0_2 = arith.constant 0 : index
    %c0_3 = arith.constant 0 : index
    %4 = vector.load %arg5[%c0_2, %c0_3] : memref<10x512xf32, #tpu.memory_space<vmem>>, vector<1x512xf32>
    tpu.vector_store %arg5[%c0_2, %c0_3], %3 {strides = array<i32>} : memref<10x512xf32, #tpu.memory_space<vmem>>, vector<1x512xf32>,
    %cst_4 = arith.constant 0.000000e+00 : f32
    %5 = vector.broadcast %cst_4 : f32 to vector<1x512xf32>
    %c9 = arith.constant 9 : index
    %c0_5 = arith.constant 0 : index
    %6 = vector.load %arg5[%c9, %c0_5] : memref<10x512xf32, #tpu.memory_space<vmem>>, vector<1x512xf32>
    tpu.vector_store %arg5[%c9, %c0_5], %5 {strides = array<i32>} : memref<10x512xf32, #tpu.memory_space<vmem>>, vector<1x512xf32>,
    %c1 = arith.constant 1 : index
    %c0_6 = arith.constant 0 : index
    %7 = vector.load %arg5[%c1, %c0_6] : memref<10x512xf32, #tpu.memory_space<vmem>>, vector<8x512xf32>
    tpu.vector_store %arg5[%c1, %c0_6], %2 {strides = array<i32>} : memref<10x512xf32, #tpu.memory_space<vmem>>, vector<8x512xf32>,
    %cst_7 = arith.constant 0.000000e+00 : f32
    %8 = vector.broadcast %cst_7 : f32 to vector<8x128xf32>
    %c0_8 = arith.constant 0 : index
    %c0_9 = arith.constant 0 : index
    %9 = vector.load %arg5[%c0_8, %c0_9] : memref<10x512xf32, #tpu.memory_space<vmem>>, vector<8x512xf32>
    %10 = arith.truncf %9 : vector<8x512xf32> to vector<8x512xbf16>
    %c0_10 = arith.constant 0 : index
    %c0_11 = arith.constant 0 : index
    %c0_12 = arith.constant 0 : index
    %11 = vector.load %arg2[%c0_10, %c0_11, %c0_12] : memref<3x512x128xbf16, #tpu.memory_space<vmem>>, vector<1x512x128xbf16>
    %12 = vector.shape_cast %11 : vector<1x512x128xbf16> to vector<512x128xbf16>
    %cst_13 = arith.constant dense<0.000000e+00> : vector<8x128xf32>
    %13 = tpu.matmul %10, %12, %cst_13 {dimension_numbers = #tpu.dot_dimension_numbers<[1], [0], [0], [1], [0, 0, 1, 1], [], []>} : vector<8x512xbf16>, vector<512x128xbf16>, vector<8x128xf32> -> vector<8x128xf32>
    %14 = arith.addf %8, %13 : vector<8x128xf32>
    %c1_14 = arith.constant 1 : index
    %c0_15 = arith.constant 0 : index
    %15 = vector.load %arg5[%c1_14, %c0_15] : memref<10x512xf32, #tpu.memory_space<vmem>>, vector<8x512xf32>
    %16 = arith.truncf %15 : vector<8x512xf32> to vector<8x512xbf16>
    %c1_16 = arith.constant 1 : index
    %c0_17 = arith.constant 0 : index
    %c0_18 = arith.constant 0 : index
    %17 = vector.load %arg2[%c1_16, %c0_17, %c0_18] : memref<3x512x128xbf16, #tpu.memory_space<vmem>>, vector<1x512x128xbf16>
    %18 = vector.shape_cast %17 : vector<1x512x128xbf16> to vector<512x128xbf16>
    %cst_19 = arith.constant dense<0.000000e+00> : vector<8x128xf32>
    %19 = tpu.matmul %16, %18, %cst_19 {dimension_numbers = #tpu.dot_dimension_numbers<[1], [0], [0], [1], [0, 0, 1, 1], [], []>} : vector<8x512xbf16>, vector<512x128xbf16>, vector<8x128xf32> -> vector<8x128xf32>
    %20 = arith.addf %14, %19 : vector<8x128xf32>
    %c2 = arith.constant 2 : index
    %c0_20 = arith.constant 0 : index
    %21 = vector.load %arg5[%c2, %c0_20] : memref<10x512xf32, #tpu.memory_space<vmem>>, vector<8x512xf32>
    %22 = arith.truncf %21 : vector<8x512xf32> to vector<8x512xbf16>
    %c2_21 = arith.constant 2 : index
    %c0_22 = arith.constant 0 : index
    %c0_23 = arith.constant 0 : index
    %23 = vector.load %arg2[%c2_21, %c0_22, %c0_23] : memref<3x512x128xbf16, #tpu.memory_space<vmem>>, vector<1x512x128xbf16>
    %24 = vector.shape_cast %23 : vector<1x512x128xbf16> to vector<512x128xbf16>
    %cst_24 = arith.constant dense<0.000000e+00> : vector<8x128xf32>
    %25 = tpu.matmul %22, %24, %cst_24 {dimension_numbers = #tpu.dot_dimension_numbers<[1], [0], [0], [1], [0, 0, 1, 1], [], []>} : vector<8x512xbf16>, vector<512x128xbf16>, vector<8x128xf32> -> vector<8x128xf32>
    %26 = arith.addf %20, %25 : vector<8x128xf32>
    %cst_25 = arith.constant 0.000000e+00 : f32
    %27 = vector.broadcast %cst_25 : f32 to vector<8x128xf32>
    %28 = arith.maximumf %26, %27 : vector<8x128xf32>
    %cst_26 = arith.constant 0.000000e+00 : f32
    %29 = vector.broadcast %cst_26 : f32 to vector<1x128xf32>
    %c0_27 = arith.constant 0 : index
    %c0_28 = arith.constant 0 : index
    %30 = vector.load %arg6[%c0_27, %c0_28] : memref<10x128xf32, #tpu.memory_space<vmem>>, vector<1x128xf32>
    tpu.vector_store %arg6[%c0_27, %c0_28], %29 {strides = array<i32>} : memref<10x128xf32, #tpu.memory_space<vmem>>, vector<1x128xf32>,
    %cst_29 = arith.constant 0.000000e+00 : f32
    %31 = vector.broadcast %cst_29 : f32 to vector<1x128xf32>
    %c9_30 = arith.constant 9 : index
    %c0_31 = arith.constant 0 : index
    %32 = vector.load %arg6[%c9_30, %c0_31] : memref<10x128xf32, #tpu.memory_space<vmem>>, vector<1x128xf32>
    tpu.vector_store %arg6[%c9_30, %c0_31], %31 {strides = array<i32>} : memref<10x128xf32, #tpu.memory_space<vmem>>, vector<1x128xf32>,
    %c1_32 = arith.constant 1 : index
    %c0_33 = arith.constant 0 : index
    %33 = vector.load %arg6[%c1_32, %c0_33] : memref<10x128xf32, #tpu.memory_space<vmem>>, vector<8x128xf32>
    tpu.vector_store %arg6[%c1_32, %c0_33], %28 {strides = array<i32>} : memref<10x128xf32, #tpu.memory_space<vmem>>, vector<8x128xf32>,
    %cst_34 = arith.constant 0.000000e+00 : f32
    %34 = vector.broadcast %cst_34 : f32 to vector<8x128xf32>
    %c0_35 = arith.constant 0 : index
    %c0_36 = arith.constant 0 : index
    %35 = vector.load %arg6[%c0_35, %c0_36] : memref<10x128xf32, #tpu.memory_space<vmem>>, vector<8x128xf32>
    %36 = arith.truncf %35 : vector<8x128xf32> to vector<8x128xbf16>
    %c0_37 = arith.constant 0 : index
    %c0_38 = arith.constant 0 : index
    %c0_39 = arith.constant 0 : index
    %37 = vector.load %arg3[%c0_37, %c0_38, %c0_39] : memref<3x128x128xbf16, #tpu.memory_space<vmem>>, vector<1x128x128xbf16>
    %38 = vector.shape_cast %37 : vector<1x128x128xbf16> to vector<128x128xbf16>
    %cst_40 = arith.constant dense<0.000000e+00> : vector<8x128xf32>
    %39 = tpu.matmul %36, %38, %cst_40 {dimension_numbers = #tpu.dot_dimension_numbers<[1], [0], [0], [1], [0, 0, 1, 1], [], []>} : vector<8x128xbf16>, vector<128x128xbf16>, vector<8x128xf32> -> vector<8x128xf32>
    %40 = arith.addf %34, %39 : vector<8x128xf32>
    %c1_41 = arith.constant 1 : index
    %c0_42 = arith.constant 0 : index
    %41 = vector.load %arg6[%c1_41, %c0_42] : memref<10x128xf32, #tpu.memory_space<vmem>>, vector<8x128xf32>
    %42 = arith.truncf %41 : vector<8x128xf32> to vector<8x128xbf16>
    %c1_43 = arith.constant 1 : index
    %c0_44 = arith.constant 0 : index
    %c0_45 = arith.constant 0 : index
    %43 = vector.load %arg3[%c1_43, %c0_44, %c0_45] : memref<3x128x128xbf16, #tpu.memory_space<vmem>>, vector<1x128x128xbf16>
    %44 = vector.shape_cast %43 : vector<1x128x128xbf16> to vector<128x128xbf16>
    %cst_46 = arith.constant dense<0.000000e+00> : vector<8x128xf32>
    %45 = tpu.matmul %42, %44, %cst_46 {dimension_numbers = #tpu.dot_dimension_numbers<[1], [0], [0], [1], [0, 0, 1, 1], [], []>} : vector<8x128xbf16>, vector<128x128xbf16>, vector<8x128xf32> -> vector<8x128xf32>
    %46 = arith.addf %40, %45 : vector<8x128xf32>
    %c2_47 = arith.constant 2 : index
    %c0_48 = arith.constant 0 : index
    %47 = vector.load %arg6[%c2_47, %c0_48] : memref<10x128xf32, #tpu.memory_space<vmem>>, vector<8x128xf32>
    %48 = arith.truncf %47 : vector<8x128xf32> to vector<8x128xbf16>
    %c2_49 = arith.constant 2 : index
    %c0_50 = arith.constant 0 : index
    %c0_51 = arith.constant 0 : index
    %49 = vector.load %arg3[%c2_49, %c0_50, %c0_51] : memref<3x128x128xbf16, #tpu.memory_space<vmem>>, vector<1x128x128xbf16>
    %50 = vector.shape_cast %49 : vector<1x128x128xbf16> to vector<128x128xbf16>
    %cst_52 = arith.constant dense<0.000000e+00> : vector<8x128xf32>
    %51 = tpu.matmul %48, %50, %cst_52 {dimension_numbers = #tpu.dot_dimension_numbers<[1], [0], [0], [1], [0, 0, 1, 1], [], []>} : vector<8x128xbf16>, vector<128x128xbf16>, vector<8x128xf32> -> vector<8x128xf32>
    %52 = arith.addf %46, %51 : vector<8x128xf32>
    %cst_53 = arith.constant 0.000000e+00 : f32
    %53 = vector.broadcast %cst_53 : f32 to vector<8x128xf32>
    %54 = arith.maximumf %52, %53 : vector<8x128xf32>
    %55 = vector.shape_cast %54 : vector<8x128xf32> to vector<1x8x128xf32>
    %56 = arith.truncf %55 : vector<1x8x128xf32> to vector<1x8x128xbf16>
    %c0_54 = arith.constant 0 : index
    %c0_55 = arith.constant 0 : index
    %c0_56 = arith.constant 0 : index
    %57 = vector.load %arg4[%c0_54, %c0_55, %c0_56] : memref<1x8x128xbf16, #tpu.memory_space<vmem>>, vector<1x8x128xbf16>
    tpu.vector_store %arg4[%c0_54, %c0_55, %c0_56], %56 {strides = array<i32>} : memref<1x8x128xbf16, #tpu.memory_space<vmem>>, vector<1x8x128xbf16>,
    return
  }
  func.func @transform_0(%arg0: i32) -> (i32, i32, i32) {
    %c0_i32 = arith.constant 0 : i32
    %c0_i32_0 = arith.constant 0 : i32
    %c0_i32_1 = arith.constant 0 : i32
    return %arg0, %c0_i32, %c0_i32_0 : i32, i32, i32
  }
  func.func @transform_1(%arg0: i32) -> (i32, i32, i32) {
    %c0_i32 = arith.constant 0 : i32
    %c0_i32_0 = arith.constant 0 : i32
    %c0_i32_1 = arith.constant 0 : i32
    %c0_i32_2 = arith.constant 0 : i32
    return %c0_i32, %c0_i32_0, %c0_i32_1 : i32, i32, i32
  }
  func.func @transform_2(%arg0: i32) -> (i32, i32, i32) {
    %c0_i32 = arith.constant 0 : i32
    %c0_i32_0 = arith.constant 0 : i32
    %c0_i32_1 = arith.constant 0 : i32
    %c0_i32_2 = arith.constant 0 : i32
    return %c0_i32, %c0_i32_0, %c0_i32_1 : i32, i32, i32
  }
  func.func @transform_3(%arg0: i32) -> (i32, i32, i32) {
    %c0_i32 = arith.constant 0 : i32
    %c0_i32_0 = arith.constant 0 : i32
    %c0_i32_1 = arith.constant 0 : i32
    return %arg0, %c0_i32, %c0_i32_0 : i32, i32, i32
  }
}

module attributes {stable_mosaic.version = 11 : i64} {
  func.func @_double_conv_kernel(%arg0: i32, %arg1: memref<1x16x512xbf16, #tpu.memory_space<vmem>>, %arg2: memref<3x512x128xbf16, #tpu.memory_space<vmem>>, %arg3: memref<3x128x128xbf16, #tpu.memory_space<vmem>>, %arg4: memref<1x16x128xbf16, #tpu.memory_space<vmem>>, %arg5: memref<18x512xf32, #tpu.memory_space<vmem>>, %arg6: memref<18x128xf32, #tpu.memory_space<vmem>>) attributes {dimension_semantics = [#tpu.dimension_semantics<parallel>], iteration_bounds = array<i64: 2>, scalar_prefetch = 0 : i64, scratch_operands = 2 : i64, tpu.core_type = #tpu.core_type<tc>, window_params = [{transform_indices = @transform_0, window_bounds = array<i64: 1, 16, 512>}, {pipeline_mode = #tpu.pipeline_mode<synchronous>, transform_indices = @transform_1, window_bounds = array<i64: 3, 512, 128>}, {pipeline_mode = #tpu.pipeline_mode<synchronous>, transform_indices = @transform_2, window_bounds = array<i64: 3, 128, 128>}, {transform_indices = @transform_3, window_bounds = array<i64: 1, 16, 128>}]} {
    %c0 = arith.constant 0 : index
    %c0_0 = arith.constant 0 : index
    %c0_1 = arith.constant 0 : index
    %0 = vector.load %arg1[%c0, %c0_0, %c0_1] : memref<1x16x512xbf16, #tpu.memory_space<vmem>>, vector<1x16x512xbf16>
    %1 = vector.shape_cast %0 : vector<1x16x512xbf16> to vector<16x512xbf16>
    %2 = arith.extf %1 : vector<16x512xbf16> to vector<16x512xf32>
    %cst = arith.constant 0.000000e+00 : f32
    %3 = vector.broadcast %cst : f32 to vector<1x512xf32>
    %c0_2 = arith.constant 0 : index
    %c0_3 = arith.constant 0 : index
    %4 = vector.load %arg5[%c0_2, %c0_3] : memref<18x512xf32, #tpu.memory_space<vmem>>, vector<1x512xf32>
    tpu.vector_store %arg5[%c0_2, %c0_3], %3 {strides = array<i32>} : memref<18x512xf32, #tpu.memory_space<vmem>>, vector<1x512xf32>,
    %cst_4 = arith.constant 0.000000e+00 : f32
    %5 = vector.broadcast %cst_4 : f32 to vector<1x512xf32>
    %c17 = arith.constant 17 : index
    %c0_5 = arith.constant 0 : index
    %6 = vector.load %arg5[%c17, %c0_5] : memref<18x512xf32, #tpu.memory_space<vmem>>, vector<1x512xf32>
    tpu.vector_store %arg5[%c17, %c0_5], %5 {strides = array<i32>} : memref<18x512xf32, #tpu.memory_space<vmem>>, vector<1x512xf32>,
    %c1 = arith.constant 1 : index
    %c0_6 = arith.constant 0 : index
    %7 = vector.load %arg5[%c1, %c0_6] : memref<18x512xf32, #tpu.memory_space<vmem>>, vector<16x512xf32>
    tpu.vector_store %arg5[%c1, %c0_6], %2 {strides = array<i32>} : memref<18x512xf32, #tpu.memory_space<vmem>>, vector<16x512xf32>,
    %cst_7 = arith.constant 0.000000e+00 : f32
    %8 = vector.broadcast %cst_7 : f32 to vector<16x128xf32>
    %c0_8 = arith.constant 0 : index
    %c0_9 = arith.constant 0 : index
    %9 = vector.load %arg5[%c0_8, %c0_9] : memref<18x512xf32, #tpu.memory_space<vmem>>, vector<16x512xf32>
    %10 = arith.truncf %9 : vector<16x512xf32> to vector<16x512xbf16>
    %c0_10 = arith.constant 0 : index
    %c0_11 = arith.constant 0 : index
    %c0_12 = arith.constant 0 : index
    %11 = vector.load %arg2[%c0_10, %c0_11, %c0_12] : memref<3x512x128xbf16, #tpu.memory_space<vmem>>, vector<1x512x128xbf16>
    %12 = vector.shape_cast %11 : vector<1x512x128xbf16> to vector<512x128xbf16>
    %cst_13 = arith.constant dense<0.000000e+00> : vector<16x128xf32>
    %13 = tpu.matmul %10, %12, %cst_13 {dimension_numbers = #tpu.dot_dimension_numbers<[1], [0], [0], [1], [0, 0, 1, 1], [], []>} : vector<16x512xbf16>, vector<512x128xbf16>, vector<16x128xf32> -> vector<16x128xf32>
    %14 = arith.addf %8, %13 : vector<16x128xf32>
    %c1_14 = arith.constant 1 : index
    %c0_15 = arith.constant 0 : index
    %15 = vector.load %arg5[%c1_14, %c0_15] : memref<18x512xf32, #tpu.memory_space<vmem>>, vector<16x512xf32>
    %16 = arith.truncf %15 : vector<16x512xf32> to vector<16x512xbf16>
    %c1_16 = arith.constant 1 : index
    %c0_17 = arith.constant 0 : index
    %c0_18 = arith.constant 0 : index
    %17 = vector.load %arg2[%c1_16, %c0_17, %c0_18] : memref<3x512x128xbf16, #tpu.memory_space<vmem>>, vector<1x512x128xbf16>
    %18 = vector.shape_cast %17 : vector<1x512x128xbf16> to vector<512x128xbf16>
    %cst_19 = arith.constant dense<0.000000e+00> : vector<16x128xf32>
    %19 = tpu.matmul %16, %18, %cst_19 {dimension_numbers = #tpu.dot_dimension_numbers<[1], [0], [0], [1], [0, 0, 1, 1], [], []>} : vector<16x512xbf16>, vector<512x128xbf16>, vector<16x128xf32> -> vector<16x128xf32>
    %20 = arith.addf %14, %19 : vector<16x128xf32>
    %c2 = arith.constant 2 : index
    %c0_20 = arith.constant 0 : index
    %21 = vector.load %arg5[%c2, %c0_20] : memref<18x512xf32, #tpu.memory_space<vmem>>, vector<16x512xf32>
    %22 = arith.truncf %21 : vector<16x512xf32> to vector<16x512xbf16>
    %c2_21 = arith.constant 2 : index
    %c0_22 = arith.constant 0 : index
    %c0_23 = arith.constant 0 : index
    %23 = vector.load %arg2[%c2_21, %c0_22, %c0_23] : memref<3x512x128xbf16, #tpu.memory_space<vmem>>, vector<1x512x128xbf16>
    %24 = vector.shape_cast %23 : vector<1x512x128xbf16> to vector<512x128xbf16>
    %cst_24 = arith.constant dense<0.000000e+00> : vector<16x128xf32>
    %25 = tpu.matmul %22, %24, %cst_24 {dimension_numbers = #tpu.dot_dimension_numbers<[1], [0], [0], [1], [0, 0, 1, 1], [], []>} : vector<16x512xbf16>, vector<512x128xbf16>, vector<16x128xf32> -> vector<16x128xf32>
    %26 = arith.addf %20, %25 : vector<16x128xf32>
    %cst_25 = arith.constant 0.000000e+00 : f32
    %27 = vector.broadcast %cst_25 : f32 to vector<16x128xf32>
    %28 = arith.maximumf %26, %27 : vector<16x128xf32>
    %cst_26 = arith.constant 0.000000e+00 : f32
    %29 = vector.broadcast %cst_26 : f32 to vector<1x128xf32>
    %c0_27 = arith.constant 0 : index
    %c0_28 = arith.constant 0 : index
    %30 = vector.load %arg6[%c0_27, %c0_28] : memref<18x128xf32, #tpu.memory_space<vmem>>, vector<1x128xf32>
    tpu.vector_store %arg6[%c0_27, %c0_28], %29 {strides = array<i32>} : memref<18x128xf32, #tpu.memory_space<vmem>>, vector<1x128xf32>,
    %cst_29 = arith.constant 0.000000e+00 : f32
    %31 = vector.broadcast %cst_29 : f32 to vector<1x128xf32>
    %c17_30 = arith.constant 17 : index
    %c0_31 = arith.constant 0 : index
    %32 = vector.load %arg6[%c17_30, %c0_31] : memref<18x128xf32, #tpu.memory_space<vmem>>, vector<1x128xf32>
    tpu.vector_store %arg6[%c17_30, %c0_31], %31 {strides = array<i32>} : memref<18x128xf32, #tpu.memory_space<vmem>>, vector<1x128xf32>,
    %c1_32 = arith.constant 1 : index
    %c0_33 = arith.constant 0 : index
    %33 = vector.load %arg6[%c1_32, %c0_33] : memref<18x128xf32, #tpu.memory_space<vmem>>, vector<16x128xf32>
    tpu.vector_store %arg6[%c1_32, %c0_33], %28 {strides = array<i32>} : memref<18x128xf32, #tpu.memory_space<vmem>>, vector<16x128xf32>,
    %cst_34 = arith.constant 0.000000e+00 : f32
    %34 = vector.broadcast %cst_34 : f32 to vector<16x128xf32>
    %c0_35 = arith.constant 0 : index
    %c0_36 = arith.constant 0 : index
    %35 = vector.load %arg6[%c0_35, %c0_36] : memref<18x128xf32, #tpu.memory_space<vmem>>, vector<16x128xf32>
    %36 = arith.truncf %35 : vector<16x128xf32> to vector<16x128xbf16>
    %c0_37 = arith.constant 0 : index
    %c0_38 = arith.constant 0 : index
    %c0_39 = arith.constant 0 : index
    %37 = vector.load %arg3[%c0_37, %c0_38, %c0_39] : memref<3x128x128xbf16, #tpu.memory_space<vmem>>, vector<1x128x128xbf16>
    %38 = vector.shape_cast %37 : vector<1x128x128xbf16> to vector<128x128xbf16>
    %cst_40 = arith.constant dense<0.000000e+00> : vector<16x128xf32>
    %39 = tpu.matmul %36, %38, %cst_40 {dimension_numbers = #tpu.dot_dimension_numbers<[1], [0], [0], [1], [0, 0, 1, 1], [], []>} : vector<16x128xbf16>, vector<128x128xbf16>, vector<16x128xf32> -> vector<16x128xf32>
    %40 = arith.addf %34, %39 : vector<16x128xf32>
    %c1_41 = arith.constant 1 : index
    %c0_42 = arith.constant 0 : index
    %41 = vector.load %arg6[%c1_41, %c0_42] : memref<18x128xf32, #tpu.memory_space<vmem>>, vector<16x128xf32>
    %42 = arith.truncf %41 : vector<16x128xf32> to vector<16x128xbf16>
    %c1_43 = arith.constant 1 : index
    %c0_44 = arith.constant 0 : index
    %c0_45 = arith.constant 0 : index
    %43 = vector.load %arg3[%c1_43, %c0_44, %c0_45] : memref<3x128x128xbf16, #tpu.memory_space<vmem>>, vector<1x128x128xbf16>
    %44 = vector.shape_cast %43 : vector<1x128x128xbf16> to vector<128x128xbf16>
    %cst_46 = arith.constant dense<0.000000e+00> : vector<16x128xf32>
    %45 = tpu.matmul %42, %44, %cst_46 {dimension_numbers = #tpu.dot_dimension_numbers<[1], [0], [0], [1], [0, 0, 1, 1], [], []>} : vector<16x128xbf16>, vector<128x128xbf16>, vector<16x128xf32> -> vector<16x128xf32>
    %46 = arith.addf %40, %45 : vector<16x128xf32>
    %c2_47 = arith.constant 2 : index
    %c0_48 = arith.constant 0 : index
    %47 = vector.load %arg6[%c2_47, %c0_48] : memref<18x128xf32, #tpu.memory_space<vmem>>, vector<16x128xf32>
    %48 = arith.truncf %47 : vector<16x128xf32> to vector<16x128xbf16>
    %c2_49 = arith.constant 2 : index
    %c0_50 = arith.constant 0 : index
    %c0_51 = arith.constant 0 : index
    %49 = vector.load %arg3[%c2_49, %c0_50, %c0_51] : memref<3x128x128xbf16, #tpu.memory_space<vmem>>, vector<1x128x128xbf16>
    %50 = vector.shape_cast %49 : vector<1x128x128xbf16> to vector<128x128xbf16>
    %cst_52 = arith.constant dense<0.000000e+00> : vector<16x128xf32>
    %51 = tpu.matmul %48, %50, %cst_52 {dimension_numbers = #tpu.dot_dimension_numbers<[1], [0], [0], [1], [0, 0, 1, 1], [], []>} : vector<16x128xbf16>, vector<128x128xbf16>, vector<16x128xf32> -> vector<16x128xf32>
    %52 = arith.addf %46, %51 : vector<16x128xf32>
    %cst_53 = arith.constant 0.000000e+00 : f32
    %53 = vector.broadcast %cst_53 : f32 to vector<16x128xf32>
    %54 = arith.maximumf %52, %53 : vector<16x128xf32>
    %55 = vector.shape_cast %54 : vector<16x128xf32> to vector<1x16x128xf32>
    %56 = arith.truncf %55 : vector<1x16x128xf32> to vector<1x16x128xbf16>
    %c0_54 = arith.constant 0 : index
    %c0_55 = arith.constant 0 : index
    %c0_56 = arith.constant 0 : index
    %57 = vector.load %arg4[%c0_54, %c0_55, %c0_56] : memref<1x16x128xbf16, #tpu.memory_space<vmem>>, vector<1x16x128xbf16>
    tpu.vector_store %arg4[%c0_54, %c0_55, %c0_56], %56 {strides = array<i32>} : memref<1x16x128xbf16, #tpu.memory_space<vmem>>, vector<1x16x128xbf16>,
    return
  }
  func.func @transform_0(%arg0: i32) -> (i32, i32, i32) {
    %c0_i32 = arith.constant 0 : i32
    %c0_i32_0 = arith.constant 0 : i32
    %c0_i32_1 = arith.constant 0 : i32
    return %arg0, %c0_i32, %c0_i32_0 : i32, i32, i32
  }
  func.func @transform_1(%arg0: i32) -> (i32, i32, i32) {
    %c0_i32 = arith.constant 0 : i32
    %c0_i32_0 = arith.constant 0 : i32
    %c0_i32_1 = arith.constant 0 : i32
    %c0_i32_2 = arith.constant 0 : i32
    return %c0_i32, %c0_i32_0, %c0_i32_1 : i32, i32, i32
  }
  func.func @transform_2(%arg0: i32) -> (i32, i32, i32) {
    %c0_i32 = arith.constant 0 : i32
    %c0_i32_0 = arith.constant 0 : i32
    %c0_i32_1 = arith.constant 0 : i32
    %c0_i32_2 = arith.constant 0 : i32
    return %c0_i32, %c0_i32_0, %c0_i32_1 : i32, i32, i32
  }
  func.func @transform_3(%arg0: i32) -> (i32, i32, i32) {
    %c0_i32 = arith.constant 0 : i32
    %c0_i32_0 = arith.constant 0 : i32
    %c0_i32_1 = arith.constant 0 : i32
    return %arg0, %c0_i32, %c0_i32_0 : i32, i32, i32
  }
}

module attributes {stable_mosaic.version = 11 : i64} {
  func.func @_double_conv_out_kernel(%arg0: i32, %arg1: memref<1x32x512xbf16, #tpu.memory_space<vmem>>, %arg2: memref<3x512x256xbf16, #tpu.memory_space<vmem>>, %arg3: memref<3x256x256xbf16, #tpu.memory_space<vmem>>, %arg4: memref<256x32xf32, #tpu.memory_space<vmem>>, %arg5: memref<1x1xf32, #tpu.memory_space<vmem>>, %arg6: memref<1x32x32xf32, #tpu.memory_space<vmem>>, %arg7: memref<34x512xf32, #tpu.memory_space<vmem>>, %arg8: memref<34x256xf32, #tpu.memory_space<vmem>>) attributes {dimension_semantics = [#tpu.dimension_semantics<parallel>], iteration_bounds = array<i64: 2>, scalar_prefetch = 0 : i64, scratch_operands = 2 : i64, tpu.core_type = #tpu.core_type<tc>, window_params = [{transform_indices = @transform_0, window_bounds = array<i64: 1, 32, 512>}, {pipeline_mode = #tpu.pipeline_mode<synchronous>, transform_indices = @transform_1, window_bounds = array<i64: 3, 512, 256>}, {pipeline_mode = #tpu.pipeline_mode<synchronous>, transform_indices = @transform_2, window_bounds = array<i64: 3, 256, 256>}, {pipeline_mode = #tpu.pipeline_mode<synchronous>, transform_indices = @transform_3, window_bounds = array<i64: 256, 32>}, {pipeline_mode = #tpu.pipeline_mode<synchronous>, transform_indices = @transform_4, window_bounds = array<i64: 1, 1>}, {transform_indices = @transform_5, window_bounds = array<i64: 1, 32, 32>}]} {
    %c0 = arith.constant 0 : index
    %c0_0 = arith.constant 0 : index
    %c0_1 = arith.constant 0 : index
    %0 = vector.load %arg1[%c0, %c0_0, %c0_1] : memref<1x32x512xbf16, #tpu.memory_space<vmem>>, vector<1x32x512xbf16>
    %1 = vector.shape_cast %0 : vector<1x32x512xbf16> to vector<32x512xbf16>
    %2 = arith.extf %1 : vector<32x512xbf16> to vector<32x512xf32>
    %cst = arith.constant 0.000000e+00 : f32
    %3 = vector.broadcast %cst : f32 to vector<1x512xf32>
    %c0_2 = arith.constant 0 : index
    %c0_3 = arith.constant 0 : index
    %4 = vector.load %arg7[%c0_2, %c0_3] : memref<34x512xf32, #tpu.memory_space<vmem>>, vector<1x512xf32>
    tpu.vector_store %arg7[%c0_2, %c0_3], %3 {strides = array<i32>} : memref<34x512xf32, #tpu.memory_space<vmem>>, vector<1x512xf32>,
    %cst_4 = arith.constant 0.000000e+00 : f32
    %5 = vector.broadcast %cst_4 : f32 to vector<1x512xf32>
    %c33 = arith.constant 33 : index
    %c0_5 = arith.constant 0 : index
    %6 = vector.load %arg7[%c33, %c0_5] : memref<34x512xf32, #tpu.memory_space<vmem>>, vector<1x512xf32>
    tpu.vector_store %arg7[%c33, %c0_5], %5 {strides = array<i32>} : memref<34x512xf32, #tpu.memory_space<vmem>>, vector<1x512xf32>,
    %c1 = arith.constant 1 : index
    %c0_6 = arith.constant 0 : index
    %7 = vector.load %arg7[%c1, %c0_6] : memref<34x512xf32, #tpu.memory_space<vmem>>, vector<32x512xf32>
    tpu.vector_store %arg7[%c1, %c0_6], %2 {strides = array<i32>} : memref<34x512xf32, #tpu.memory_space<vmem>>, vector<32x512xf32>,
    %cst_7 = arith.constant 0.000000e+00 : f32
    %8 = vector.broadcast %cst_7 : f32 to vector<32x256xf32>
    %c0_8 = arith.constant 0 : index
    %c0_9 = arith.constant 0 : index
    %9 = vector.load %arg7[%c0_8, %c0_9] : memref<34x512xf32, #tpu.memory_space<vmem>>, vector<32x512xf32>
    %10 = arith.truncf %9 : vector<32x512xf32> to vector<32x512xbf16>
    %c0_10 = arith.constant 0 : index
    %c0_11 = arith.constant 0 : index
    %c0_12 = arith.constant 0 : index
    %11 = vector.load %arg2[%c0_10, %c0_11, %c0_12] : memref<3x512x256xbf16, #tpu.memory_space<vmem>>, vector<1x512x256xbf16>
    %12 = vector.shape_cast %11 : vector<1x512x256xbf16> to vector<512x256xbf16>
    %cst_13 = arith.constant dense<0.000000e+00> : vector<32x256xf32>
    %13 = tpu.matmul %10, %12, %cst_13 {dimension_numbers = #tpu.dot_dimension_numbers<[1], [0], [0], [1], [0, 0, 1, 1], [], []>} : vector<32x512xbf16>, vector<512x256xbf16>, vector<32x256xf32> -> vector<32x256xf32>
    %14 = arith.addf %8, %13 : vector<32x256xf32>
    %c1_14 = arith.constant 1 : index
    %c0_15 = arith.constant 0 : index
    %15 = vector.load %arg7[%c1_14, %c0_15] : memref<34x512xf32, #tpu.memory_space<vmem>>, vector<32x512xf32>
    %16 = arith.truncf %15 : vector<32x512xf32> to vector<32x512xbf16>
    %c1_16 = arith.constant 1 : index
    %c0_17 = arith.constant 0 : index
    %c0_18 = arith.constant 0 : index
    %17 = vector.load %arg2[%c1_16, %c0_17, %c0_18] : memref<3x512x256xbf16, #tpu.memory_space<vmem>>, vector<1x512x256xbf16>
    %18 = vector.shape_cast %17 : vector<1x512x256xbf16> to vector<512x256xbf16>
    %cst_19 = arith.constant dense<0.000000e+00> : vector<32x256xf32>
    %19 = tpu.matmul %16, %18, %cst_19 {dimension_numbers = #tpu.dot_dimension_numbers<[1], [0], [0], [1], [0, 0, 1, 1], [], []>} : vector<32x512xbf16>, vector<512x256xbf16>, vector<32x256xf32> -> vector<32x256xf32>
    %20 = arith.addf %14, %19 : vector<32x256xf32>
    %c2 = arith.constant 2 : index
    %c0_20 = arith.constant 0 : index
    %21 = vector.load %arg7[%c2, %c0_20] : memref<34x512xf32, #tpu.memory_space<vmem>>, vector<32x512xf32>
    %22 = arith.truncf %21 : vector<32x512xf32> to vector<32x512xbf16>
    %c2_21 = arith.constant 2 : index
    %c0_22 = arith.constant 0 : index
    %c0_23 = arith.constant 0 : index
    %23 = vector.load %arg2[%c2_21, %c0_22, %c0_23] : memref<3x512x256xbf16, #tpu.memory_space<vmem>>, vector<1x512x256xbf16>
    %24 = vector.shape_cast %23 : vector<1x512x256xbf16> to vector<512x256xbf16>
    %cst_24 = arith.constant dense<0.000000e+00> : vector<32x256xf32>
    %25 = tpu.matmul %22, %24, %cst_24 {dimension_numbers = #tpu.dot_dimension_numbers<[1], [0], [0], [1], [0, 0, 1, 1], [], []>} : vector<32x512xbf16>, vector<512x256xbf16>, vector<32x256xf32> -> vector<32x256xf32>
    %26 = arith.addf %20, %25 : vector<32x256xf32>
    %cst_25 = arith.constant 0.000000e+00 : f32
    %27 = vector.broadcast %cst_25 : f32 to vector<32x256xf32>
    %28 = arith.maximumf %26, %27 : vector<32x256xf32>
    %cst_26 = arith.constant 0.000000e+00 : f32
    %29 = vector.broadcast %cst_26 : f32 to vector<1x256xf32>
    %c0_27 = arith.constant 0 : index
    %c0_28 = arith.constant 0 : index
    %30 = vector.load %arg8[%c0_27, %c0_28] : memref<34x256xf32, #tpu.memory_space<vmem>>, vector<1x256xf32>
    tpu.vector_store %arg8[%c0_27, %c0_28], %29 {strides = array<i32>} : memref<34x256xf32, #tpu.memory_space<vmem>>, vector<1x256xf32>,
    %cst_29 = arith.constant 0.000000e+00 : f32
    %31 = vector.broadcast %cst_29 : f32 to vector<1x256xf32>
    %c33_30 = arith.constant 33 : index
    %c0_31 = arith.constant 0 : index
    %32 = vector.load %arg8[%c33_30, %c0_31] : memref<34x256xf32, #tpu.memory_space<vmem>>, vector<1x256xf32>
    tpu.vector_store %arg8[%c33_30, %c0_31], %31 {strides = array<i32>} : memref<34x256xf32, #tpu.memory_space<vmem>>, vector<1x256xf32>,
    %c1_32 = arith.constant 1 : index
    %c0_33 = arith.constant 0 : index
    %33 = vector.load %arg8[%c1_32, %c0_33] : memref<34x256xf32, #tpu.memory_space<vmem>>, vector<32x256xf32>
    tpu.vector_store %arg8[%c1_32, %c0_33], %28 {strides = array<i32>} : memref<34x256xf32, #tpu.memory_space<vmem>>, vector<32x256xf32>,
    %cst_34 = arith.constant 0.000000e+00 : f32
    %34 = vector.broadcast %cst_34 : f32 to vector<32x256xf32>
    %c0_35 = arith.constant 0 : index
    %c0_36 = arith.constant 0 : index
    %35 = vector.load %arg8[%c0_35, %c0_36] : memref<34x256xf32, #tpu.memory_space<vmem>>, vector<32x256xf32>
    %36 = arith.truncf %35 : vector<32x256xf32> to vector<32x256xbf16>
    %c0_37 = arith.constant 0 : index
    %c0_38 = arith.constant 0 : index
    %c0_39 = arith.constant 0 : index
    %37 = vector.load %arg3[%c0_37, %c0_38, %c0_39] : memref<3x256x256xbf16, #tpu.memory_space<vmem>>, vector<1x256x256xbf16>
    %38 = vector.shape_cast %37 : vector<1x256x256xbf16> to vector<256x256xbf16>
    %cst_40 = arith.constant dense<0.000000e+00> : vector<32x256xf32>
    %39 = tpu.matmul %36, %38, %cst_40 {dimension_numbers = #tpu.dot_dimension_numbers<[1], [0], [0], [1], [0, 0, 1, 1], [], []>} : vector<32x256xbf16>, vector<256x256xbf16>, vector<32x256xf32> -> vector<32x256xf32>
    %40 = arith.addf %34, %39 : vector<32x256xf32>
    %c1_41 = arith.constant 1 : index
    %c0_42 = arith.constant 0 : index
    %41 = vector.load %arg8[%c1_41, %c0_42] : memref<34x256xf32, #tpu.memory_space<vmem>>, vector<32x256xf32>
    %42 = arith.truncf %41 : vector<32x256xf32> to vector<32x256xbf16>
    %c1_43 = arith.constant 1 : index
    %c0_44 = arith.constant 0 : index
    %c0_45 = arith.constant 0 : index
    %43 = vector.load %arg3[%c1_43, %c0_44, %c0_45] : memref<3x256x256xbf16, #tpu.memory_space<vmem>>, vector<1x256x256xbf16>
    %44 = vector.shape_cast %43 : vector<1x256x256xbf16> to vector<256x256xbf16>
    %cst_46 = arith.constant dense<0.000000e+00> : vector<32x256xf32>
    %45 = tpu.matmul %42, %44, %cst_46 {dimension_numbers = #tpu.dot_dimension_numbers<[1], [0], [0], [1], [0, 0, 1, 1], [], []>} : vector<32x256xbf16>, vector<256x256xbf16>, vector<32x256xf32> -> vector<32x256xf32>
    %46 = arith.addf %40, %45 : vector<32x256xf32>
    %c2_47 = arith.constant 2 : index
    %c0_48 = arith.constant 0 : index
    %47 = vector.load %arg8[%c2_47, %c0_48] : memref<34x256xf32, #tpu.memory_space<vmem>>, vector<32x256xf32>
    %48 = arith.truncf %47 : vector<32x256xf32> to vector<32x256xbf16>
    %c2_49 = arith.constant 2 : index
    %c0_50 = arith.constant 0 : index
    %c0_51 = arith.constant 0 : index
    %49 = vector.load %arg3[%c2_49, %c0_50, %c0_51] : memref<3x256x256xbf16, #tpu.memory_space<vmem>>, vector<1x256x256xbf16>
    %50 = vector.shape_cast %49 : vector<1x256x256xbf16> to vector<256x256xbf16>
    %cst_52 = arith.constant dense<0.000000e+00> : vector<32x256xf32>
    %51 = tpu.matmul %48, %50, %cst_52 {dimension_numbers = #tpu.dot_dimension_numbers<[1], [0], [0], [1], [0, 0, 1, 1], [], []>} : vector<32x256xbf16>, vector<256x256xbf16>, vector<32x256xf32> -> vector<32x256xf32>
    %52 = arith.addf %46, %51 : vector<32x256xf32>
    %cst_53 = arith.constant 0.000000e+00 : f32
    %53 = vector.broadcast %cst_53 : f32 to vector<32x256xf32>
    %54 = arith.maximumf %52, %53 : vector<32x256xf32>
    %c0_54 = arith.constant 0 : index
    %c0_55 = arith.constant 0 : index
    %55 = vector.load %arg4[%c0_54, %c0_55] : memref<256x32xf32, #tpu.memory_space<vmem>>, vector<256x32xf32>
    %cst_56 = arith.constant dense<0.000000e+00> : vector<32x32xf32>
    %56 = tpu.matmul %54, %55, %cst_56 {dimension_numbers = #tpu.dot_dimension_numbers<[1], [0], [0], [1], [0, 0, 1, 1], [], []>} : vector<32x256xf32>, vector<256x32xf32>, vector<32x32xf32> -> vector<32x32xf32>
    %c0_57 = arith.constant 0 : index
    %c0_58 = arith.constant 0 : index
    %57 = vector.load %arg5[%c0_57, %c0_58] : memref<1x1xf32, #tpu.memory_space<vmem>>, vector<1x1xf32>
    %58 = vector.broadcast %57 : vector<1x1xf32> to vector<32x32xf32>
    %59 = arith.addf %56, %58 : vector<32x32xf32>
    %60 = arith.negf %59 : vector<32x32xf32>
    %61 = math.exp %60 : vector<32x32xf32>
    %cst_59 = arith.constant 1.000000e+00 : f32
    %62 = vector.broadcast %cst_59 : f32 to vector<32x32xf32>
    %63 = arith.addf %62, %61 : vector<32x32xf32>
    %64 = arith.divf %62, %63 : vector<32x32xf32>
    %65 = vector.shape_cast %64 : vector<32x32xf32> to vector<1x32x32xf32>
    %c0_60 = arith.constant 0 : index
    %c0_61 = arith.constant 0 : index
    %c0_62 = arith.constant 0 : index
    %66 = vector.load %arg6[%c0_60, %c0_61, %c0_62] : memref<1x32x32xf32, #tpu.memory_space<vmem>>, vector<1x32x32xf32>
    tpu.vector_store %arg6[%c0_60, %c0_61, %c0_62], %65 {strides = array<i32>} : memref<1x32x32xf32, #tpu.memory_space<vmem>>, vector<1x32x32xf32>,
    return
  }
  func.func @transform_0(%arg0: i32) -> (i32, i32, i32) {
    %c0_i32 = arith.constant 0 : i32
    %c0_i32_0 = arith.constant 0 : i32
    %c0_i32_1 = arith.constant 0 : i32
    return %arg0, %c0_i32, %c0_i32_0 : i32, i32, i32
  }
  func.func @transform_1(%arg0: i32) -> (i32, i32, i32) {
    %c0_i32 = arith.constant 0 : i32
    %c0_i32_0 = arith.constant 0 : i32
    %c0_i32_1 = arith.constant 0 : i32
    %c0_i32_2 = arith.constant 0 : i32
    return %c0_i32, %c0_i32_0, %c0_i32_1 : i32, i32, i32
  }
  func.func @transform_2(%arg0: i32) -> (i32, i32, i32) {
    %c0_i32 = arith.constant 0 : i32
    %c0_i32_0 = arith.constant 0 : i32
    %c0_i32_1 = arith.constant 0 : i32
    %c0_i32_2 = arith.constant 0 : i32
    return %c0_i32, %c0_i32_0, %c0_i32_1 : i32, i32, i32
  }
  func.func @transform_3(%arg0: i32) -> (i32, i32) {
    %c0_i32 = arith.constant 0 : i32
    %c0_i32_0 = arith.constant 0 : i32
    %c0_i32_1 = arith.constant 0 : i32
    return %c0_i32, %c0_i32_0 : i32, i32
  }
  func.func @transform_4(%arg0: i32) -> (i32, i32) {
    %c0_i32 = arith.constant 0 : i32
    %c0_i32_0 = arith.constant 0 : i32
    %c0_i32_1 = arith.constant 0 : i32
    return %c0_i32, %c0_i32_0 : i32, i32
  }
  func.func @transform_5(%arg0: i32) -> (i32, i32, i32) {
    %c0_i32 = arith.constant 0 : i32
    %c0_i32_0 = arith.constant 0 : i32
    %c0_i32_1 = arith.constant 0 : i32
    return %arg0, %c0_i32, %c0_i32_0 : i32, i32, i32
  }
}

</mosaic_0001>

<bundles_post_ra>
// kernel: unet_forward.10
= control target key start
LH: loop header
LB: loop body
LE: loop exit
PB: predicated region body
PF: predicated region fallthrough
CT: control target
= control target key end

     0   :  { %8 = vsyncpa [#allocation5], 0  ;;  %s1918_s12 = smov 0   ;;  %s2071_s0 = inlined_call_operand.vmem [shape: bf16[2,32,32], index: 0, kind: input, shape index: {}]   ;;  %s2072_s1 = inlined_call_operand.vmem [shape: bf16[3,32,256], index: 1, kind: input, shape index: {}]   ;;  %s2073_s2 = inlined_call_operand.hbm [shape: bf16[3,256,256], index: 2, kind: input, shape index: {}]   ;;  %s2074_s3 = inlined_call_operand.vmem [shape: bf16[2,32,256], index: 3, kind: output, shape index: {}]  }
   0x1 LB: > { %s1924_s13 = sadd.s32 4294967295, %s1891_s12   ;;  %p1484_p0 = scmp.ge.s32.totalorder %s1891_s12, 1  ;;  %s1891_s12 = sphi %s1918_s12, %s14_s12  }
   0x2   : > { %p113_p1 = scmp.lt.s32.totalorder %s1891_s12, 3  ;;  %s1893_s14 = smov [#allocation4]  }
   0x3   : > { %s128_s15 = sshll.u32 %s1893_s14, 4  ;;  %p2075_p3 = scmp.eq.s32.totalorder %s1924_s13, 0  ;;  %s129_s15 = int_to_ptr.vmem [resolvable:$true] %s128_s15 }
   0x4   : > { %p1928_p2 = pnand %p1484_p0, %p113_p1  ;;  %s1853_s20 = scalar_lea.hbm %s2073_s2, 12288 }
   0x5   : > { %p1854_p6 = scmp.ne.s32.totalorder %s2073_s2, %s1853_s20  ;;  %p1860_p10 = scmp.lt.u32.totalorder %s1853_s20, %s2073_s2 }
   0x6   : > { %s2077_s16 = scalar_select %p1928_p2, 1, 0 }
   0x7   : > { %p1672_p4 = pneg %p1928_p2 }
   0x9   : > { %p1937_p5 = pnand %p2075_p3, %p1672_p4 }
   0xb   : > { %p1855_p7 = pneg %p1937_p5 }
   0xd   : > { %p1856_p8 = pnand %p1855_p7, %p1854_p6 }
   0xf   : > { %p1857_p9 = pneg %p1856_p8 }
  0x11   : > { %p1862_p11 = pnand %p1860_p10, %p1857_p9 }
  0x13   : > { %1865 = shalt.err (!%p1862_p11)
}
  0x14   : > { %s1866_s25 = scalar_lea.vmem %s129_s15, 12288  ;;  %p1874_p1 = scmp.lt.s32.totalorder %s129_s15, %s129_s15 }
  0x15   : > { %p1867_p12 = scmp.ne.s32.totalorder %s129_s15, %s1866_s25  ;;  %p1875_p4 = scmp.lt.s32.totalorder %s1866_s25, %s1866_s25 }
  0x17   : > { %p1869_p13 = pnand %p1867_p12, %p1855_p7  ;;  %p1876_p3 = por %p1875_p4, %p1874_p1 }
  0x19   : > { %p1870_p0 = pneg %p1869_p13 }
  0x1b   : > { %p1877_p2 = pnand %p1876_p3, %p1870_p0 }
  0x1d   : > { %1880 = shalt.err (!%p1877_p2)
}
  0x1e   : > { %s1894_s26 = smov 128   ;;  %s1895_s27 = smov 8  }
  0x1f   : > { %1675 = dma.hbm_to_vmem [thread:$0]  (!%p1937_p5), %s2073_s2, 12288, %s129_s15, [#allocation5], %s1894_s26, %s1894_s26, %s1895_s27  }
  0x20   : > { %p2079_p6 = scmp.ne.s32.totalorder %s2077_s16, 0 }
  0x21   : > { %p2080_p8 = scmp.eq.s32.totalorder (!%p2079_p6), %s1924_s13, 0 }
  0x22   : > { %152 = sbr.rel (%p2079_p6) target bundleno = 614 (0x266), region = 32 }
  0x29   : > { %1886 = dma.done.wait (%p2080_p8), [#allocation5], 12288   ;;  %p2081_p7 = pmov %p2080_p8 }
  0x2a   : > { %p176_p2 = scmp.lt.s32.totalorder %s1924_s13, 1  ;;  %vm195_vm0 = vcmask 253952   ;;  %v1896_v0 = vmov 0   ;;  %v1897_v1 = vmov 0.0   ;;  %v1691_v2 = vld [vmem:[%s2072_s1 + $0x24] ss:$8 sps:$4 sm:$0xff]  }
  0x2b   : > { %1888 = vsyncadd (%p2081_p7), [#allocation5], 4294955008  ;;  %282 = vmatprep.mubr.bf16.mxu0 %v1896_v0  ;;  %196 = vst.msk [vmem:[#allocation2] sm:$0x1] %vm195_vm0, %v1897_v1  ;;  %v1693_v3 = vld [vmem:[%s2072_s1 + $0x20] ss:$8 sps:$4 sm:$0xff]   ;;  %250 = vmatprep.subr.bf16.mxu0 %v1691_v2 }
  0x2c   : > { %s2083_s13 = smov (!%p176_p2, %s1924_s13), 1  ;;  %197 = vst.msk [vmem:[#allocation2 + $0x21] sm:$0x1] %vm195_vm0, %v1897_v1  ;;  %v1694_v4 = vld [vmem:[%s2072_s1 + $0x34] ss:$8 sps:$4 sm:$0xff]   ;;  %251 = vmatpush1.bf16.msra.mxu0 %v1693_v3  ;;  %vm198_vm1 = vcmask 261120  }
  0x2d   : > { %s1621_s30 = sshll.u32 %s2083_s13, 4  ;;  %v1696_v5 = vld [vmem:[%s2072_s1 + $0x30] ss:$8 sps:$4 sm:$0xff]   ;;  %v1699_v6 = vld [vmem:[%s2072_s1 + $0x4] ss:$8 sps:$4 sm:$0xff]   ;;  %252 = vmatprep.subr.bf16.mxu0 %v1694_v4  ;;  %vm505_vm3 = vcmask 1040384  }
  0x2e   : > { %s180_s10 = scalar_lea.vmem %s2071_s0, %s1621_s30  ;;  %v1709_v13 = vld [vmem:[#allocation4 + $0x4] ss:$8 sps:$4 sm:$0xff]   ;;  %v1711_v14 = vld [vmem:[#allocation4] ss:$8 sps:$4 sm:$0xff]   ;;  %v1712_v15 = vld [vmem:[#allocation4 + $0x14] ss:$8 sps:$4 sm:$0xff]  }
  0x2f   : > { %v1628_v7 = vld [vmem:[%s180_s10] sm:$0xff]   ;;  %v1635_v10 = vld [vmem:[%s180_s10 + $0x8] sm:$0xff]   ;;  %1043 = vmatprep.subr.bf16.mxu1 %v1709_v13  ;;  %v1702_v22 = vld [vmem:[%s2072_s1 + $0x14] ss:$8 sps:$4 sm:$0xff]   ;;  %vm1143_vm4 = vcmask 1046528   ;;  %s1622_s6 = sshll.u32 %s2083_s13, 5 }
  0x30   : > { %v1629_v8 = vunpack.c.l.bf16 %v1628_v7  ;;  %v1630_v9 = vunpack.c.h.bf16 %v1628_v7  ;;  %v1633_v11 = vunpack.c.l.bf16 %v1635_v10  ;;  %v1634_v12 = vunpack.c.h.bf16 %v1635_v10  ;;  %253 = vmatpush1.bf16.msra.mxu0 %v1696_v5  ;;  %1044 = vmatpush1.bf16.msra.mxu1 %v1711_v14  ;;  %v1714_v16 = vld [vmem:[#allocation4 + $0x10] ss:$8 sps:$4 sm:$0xff]   ;;  %v1715_v17 = vld [vmem:[#allocation4 + $0x24] ss:$8 sps:$4 sm:$0xff]   ;;  %v1717_v23 = vld [vmem:[#allocation4 + $0x20] ss:$8 sps:$4 sm:$0xff]   ;;  %s185_s9 = scalar_lea.vmem %s2074_s3, %s1622_s6 }
  0x31   : > { %329 = vmatprep.subr.bf16.mxu0 %v1699_v6  ;;  %1045 = vmatprep.subr.bf16.mxu1 %v1712_v15  ;;  %v1697_v18 = vld [vmem:[%s2072_s1] ss:$8 sps:$4 sm:$0xff]   ;;  %v1700_v24 = vld [vmem:[%s2072_s1 + $0x10] ss:$8 sps:$4 sm:$0xff]   ;;  %v1718_v26 = vld [vmem:[#allocation4 + $0x34] ss:$8 sps:$4 sm:$0xff]  }
  0x32   : > { %199 = vst.msk [vmem:[#allocation2 + $0x1] sm:$0xff] %vm198_vm1, %v1629_v8  ;;  %200 = vst.msk [vmem:[#allocation2 + $0x9] sm:$0xff] %vm198_vm1, %v1630_v9  ;;  %v1705_v28 = vld [vmem:[%s2072_s1 + $0x44] ss:$8 sps:$4 sm:$0xff]   ;;  %v1720_v29 = vld [vmem:[#allocation4 + $0x30] ss:$8 sps:$4 sm:$0xff]  }
  0x33   : > { %201 = vst.msk [vmem:[#allocation2 + $0x11] sm:$0xff] %vm198_vm1, %v1633_v11  ;;  %202 = vst.msk [vmem:[#allocation2 + $0x19] sm:$0xff] %vm198_vm1, %v1634_v12  ;;  %v1724_v31 = vld [vmem:[#allocation4 + $0x44] ss:$8 sps:$4 sm:$0xff]   ;;  %v1726_v32 = vld [vmem:[#allocation4 + $0x40] ss:$8 sps:$4 sm:$0xff]  }
  0x34   : > { %1046 = vmatpush1.bf16.msra.mxu1 %v1714_v16  ;;  %v1730_v34 = vld [vmem:[#allocation4 + $0x54] ss:$8 sps:$4 sm:$0xff]   ;;  %v1732_v36 = vld [vmem:[#allocation4 + $0x50] ss:$8 sps:$4 sm:$0xff]   ;;  %v1736_v38 = vld [vmem:[#allocation4 + $0x64] ss:$8 sps:$4 sm:$0xff]  }
  0x35   : > { %1047 = vmatprep.subr.bf16.mxu1 %v1715_v17  ;;  %v1703_v39 = vld [vmem:[%s2072_s1 + $0x40] ss:$8 sps:$4 sm:$0xff]   ;;  %v1708_v40 = vld [vmem:[%s2072_s1 + $0x54] ss:$8 sps:$4 sm:$0xff]   ;;  %v1706_v41 = vld [vmem:[%s2072_s1 + $0x50] ss:$8 sps:$4 sm:$0xff]  }
  0x36   : > { %v1738_v42 = vld [vmem:[#allocation4 + $0x60] ss:$8 sps:$4 sm:$0xff]   ;;  %v1742_v44 = vld [vmem:[#allocation4 + $0x74] ss:$8 sps:$4 sm:$0xff]   ;;  %v1723_v46 = vld [vmem:[#allocation4 + $0x104] ss:$8 sps:$4 sm:$0xff]  }
  0x37   : > { %v1744_v47 = vld [vmem:[#allocation4 + $0x70] ss:$8 sps:$4 sm:$0xff]   ;;  %v1748_v49 = vld [vmem:[#allocation4 + $0x84] ss:$8 sps:$4 sm:$0xff]   ;;  %v1750_v50 = vld [vmem:[#allocation4 + $0x80] ss:$8 sps:$4 sm:$0xff]  }
  0x38   : > { %1048 = vmatpush1.bf16.msra.mxu1 %v1717_v23  ;;  %v1754_v51 = vld [vmem:[#allocation4 + $0x94] ss:$8 sps:$4 sm:$0xff]   ;;  %v1756_v54 = vld [vmem:[#allocation4 + $0x90] ss:$8 sps:$4 sm:$0xff]   ;;  %v1760_v55 = vld [vmem:[#allocation4 + $0xa4] ss:$8 sps:$4 sm:$0xff]  }
  0x39   : > { %v213_v19 = vld [vmem:[#allocation2 + $0x1] sm:$0xff]  ;;  %v214_v20 = vld [vmem:[#allocation2 + $0x9] sm:$0xff]  ;;  %1049 = vmatprep.subr.bf16.mxu1 %v1718_v26  ;;  %vm625_vm5 = vsmask.f32 7424 }
  0x3a   : > { %v217_v21 = vpack.c.bf16 %v214_v20, %v213_v19  ;;  %v215_v25 = vld [vmem:[#allocation2 + $0x11] sm:$0xff]  ;;  %v216_v27 = vld [vmem:[#allocation2 + $0x19] sm:$0xff]  ;;  %v204_v35 = vld [vmem:[#allocation2 + $0x8] sm:$0xff] }
  0x3b   : > { %v218_v30 = vpack.c.bf16 %v216_v27, %v215_v25  ;;  %v203_v33 = vld [vmem:[#allocation2] sm:$0xff]  ;;  %v205_v43 = vld [vmem:[#allocation2 + $0x10] sm:$0xff]  ;;  %v206_v45 = vld [vmem:[#allocation2 + $0x18] sm:$0xff] }
  0x3c   : > { %1501 = vmatmul.mubr.msk.bf16.vlgmr.msra.gmra.mrb[0].mxu0 %vm198_vm1, %v217_v21  ;;  %1050 = vmatpush1.bf16.msra.mxu1 %v1720_v29  ;;  %v207_v37 = vpack.c.bf16 %v204_v35, %v203_v33  ;;  %v208_v48 = vpack.c.bf16 %v206_v45, %v205_v43  ;;  %v382_v52 = vld [vmem:[#allocation2 + $0x2] sm:$0xff]  ;;  %v383_v53 = vld [vmem:[#allocation2 + $0xa] sm:$0xff]  ;;  %v384_v61 = vld [vmem:[#allocation2 + $0x12] sm:$0xff] }
  0x3d   : > { %330 = vmatpush1.bf16.msra.mxu0 %v1697_v18  ;;  %292 = vmatprep.mubr.bf16.mxu0 %v1896_v0  ;;  %v1721_v56 = vld [vmem:[#allocation4 + $0x100] ss:$8 sps:$4 sm:$0xff]   ;;  %v386_v57 = vpack.c.bf16 %v383_v53, %v382_v52  ;;  %v1729_v58 = vld [vmem:[#allocation4 + $0x114] ss:$8 sps:$4 sm:$0xff]   ;;  %v1727_v63 = vld [vmem:[#allocation4 + $0x110] ss:$8 sps:$4 sm:$0xff]  }
  0x3e   : > { %331 = vmatprep.subr.bf16.mxu0 %v1702_v22  ;;  %1051 = vmatprep.subr.bf16.mxu1 %v1724_v31  ;;  %v1762_v59 = vld [vmem:[#allocation4 + $0xa0] ss:$8 sps:$4 sm:$0xff]   ;;  %v1766_v60 = vld [vmem:[#allocation4 + $0xb4] ss:$8 sps:$4 sm:$0xff]   ;;  %v1735_v2 = vld [vmem:[#allocation4 + $0x124] ss:$8 sps:$4 sm:$0xff]  }
  0x3f   : > { %v385_v62 = vld [vmem:[#allocation2 + $0x1a] sm:$0xff]  ;;  %v1741_v5 = vld [vmem:[#allocation4 + $0x134] ss:$8 sps:$4 sm:$0xff]   ;;  %v1739_v6 = vld [vmem:[#allocation4 + $0x130] ss:$8 sps:$4 sm:$0xff]  }
  0x40   : > { %1052 = vmatpush1.bf16.msra.mxu1 %v1726_v32  ;;  %v1733_v3 = vld [vmem:[#allocation4 + $0x120] ss:$8 sps:$4 sm:$0xff]   ;;  %v387_v4 = vpack.c.bf16 %v385_v62, %v384_v61  ;;  %v1747_v7 = vld [vmem:[#allocation4 + $0x144] ss:$8 sps:$4 sm:$0xff]   ;;  %v1753_v9 = vld [vmem:[#allocation4 + $0x154] ss:$8 sps:$4 sm:$0xff]  }
  0x41   : > { %332 = vmatpush1.bf16.msra.mxu0 %v1700_v24  ;;  %1053 = vmatprep.subr.bf16.mxu1 %v1730_v34  ;;  %v1745_v8 = vld [vmem:[#allocation4 + $0x140] ss:$8 sps:$4 sm:$0xff]   ;;  %v1759_v10 = vld [vmem:[#allocation4 + $0x164] ss:$8 sps:$4 sm:$0xff]   ;;  %v1765_v12 = vld [vmem:[#allocation4 + $0x174] ss:$8 sps:$4 sm:$0xff]   ;;  %v488_v24 = vlaneseq }
  0x42   : > { %419 = vmatprep.subr.bf16.mxu0 %v1705_v28  ;;  %v1757_v11 = vld [vmem:[#allocation4 + $0x160] ss:$8 sps:$4 sm:$0xff]   ;;  %v1763_v13 = vld [vmem:[#allocation4 + $0x170] ss:$8 sps:$4 sm:$0xff]   ;;  %v1771_v14 = vld [vmem:[#allocation4 + $0x184] ss:$8 sps:$4 sm:$0xff]  }
  0x43   : > { %v1769_v15 = vld [vmem:[#allocation4 + $0x180] ss:$8 sps:$4 sm:$0xff]   ;;  %v1768_v16 = vld [vmem:[#allocation4 + $0xb0] ss:$8 sps:$4 sm:$0xff]   ;;  %v1777_v17 = vld [vmem:[#allocation4 + $0x194] ss:$8 sps:$4 sm:$0xff]  }
  0x44   : > { %1502 = vmatmul.mubr.msk.bf16.gmra.mrb[4].mxu0 %vm198_vm1, %v218_v30  ;;  %1054 = vmatpush1.bf16.msra.mxu1 %v1732_v36  ;;  %v1775_v18 = vld [vmem:[#allocation4 + $0x190] ss:$8 sps:$4 sm:$0xff]   ;;  %v1772_v19 = vld [vmem:[#allocation4 + $0xc4] ss:$8 sps:$4 sm:$0xff]   ;;  %v1774_v20 = vld [vmem:[#allocation4 + $0xc0] ss:$8 sps:$4 sm:$0xff]  }
  0x45   : > { %361 = vmatprep.mubr.bf16.mxu0 %v1896_v0  ;;  %1055 = vmatprep.subr.bf16.mxu1 %v1736_v38  ;;  %v1783_v21 = vld [vmem:[#allocation4 + $0x1a4] ss:$8 sps:$4 sm:$0xff]   ;;  %v1781_v22 = vld [vmem:[#allocation4 + $0x1a0] ss:$8 sps:$4 sm:$0xff]   ;;  %v1778_v23 = vld [vmem:[#allocation4 + $0xd4] ss:$8 sps:$4 sm:$0xff]  }
  0x46   : > { %v1780_v25 = vld [vmem:[#allocation4 + $0xd0] ss:$8 sps:$4 sm:$0xff]   ;;  %v1789_v26 = vld [vmem:[#allocation4 + $0x1b4] ss:$8 sps:$4 sm:$0xff]   ;;  %vm490_vm2 = vcmp.lt.s32.totalorder %v488_v24, 256 }
  0x47   : > { %v1787_v27 = vld [vmem:[#allocation4 + $0x1b0] ss:$8 sps:$4 sm:$0xff]   ;;  %492 = vst.msk [vmem:[#allocation3] ss:$8 sm:$0x3] %vm490_vm2, %v1897_v1 }
  0x48   : > { %1056 = vmatpush1.bf16.msra.mxu1 %v1738_v42  ;;  %495 = vst.msk [vmem:[#allocation3 + $0x41] ss:$8 sm:$0x3] %vm490_vm2, %v1897_v1  ;;  %v1784_v28 = vld [vmem:[#allocation4 + $0xe4] ss:$8 sps:$4 sm:$0xff]  }
  0x49   : > { %1057 = vmatprep.subr.bf16.mxu1 %v1742_v44  ;;  %v1786_v29 = vld [vmem:[#allocation4 + $0xe0] ss:$8 sps:$4 sm:$0xff]   ;;  %v1795_v30 = vld [vmem:[#allocation4 + $0x1c4] ss:$8 sps:$4 sm:$0xff]   ;;  %v1790_v32 = vld [vmem:[#allocation4 + $0xf4] ss:$8 sps:$4 sm:$0xff]  }
  0x4a   : > { %v1793_v31 = vld [vmem:[#allocation4 + $0x1c0] ss:$8 sps:$4 sm:$0xff]   ;;  %v1792_v33 = vld [vmem:[#allocation4 + $0xf0] ss:$8 sps:$4 sm:$0xff]   ;;  %v1801_v34 = vld [vmem:[#allocation4 + $0x1d4] ss:$8 sps:$4 sm:$0xff]  }
  0x4b   : > { %v1798_v35 = vld [vmem:[#allocation4 + $0x204] ss:$8 sps:$4 sm:$0xff]   ;;  %v1799_v36 = vld [vmem:[#allocation4 + $0x1d0] ss:$8 sps:$4 sm:$0xff]   ;;  %v1813_v38 = vld [vmem:[#allocation4 + $0x1f4] ss:$8 sps:$4 sm:$0xff]  }
  0x4c   : > { %1507 = vmatmul.mubr.msk.bf16.vlgmr.msra.gmra.mrb[0].mxu0 %vm198_vm1, %v207_v37  ;;  %1058 = vmatpush1.bf16.msra.mxu1 %v1744_v47  ;;  %v1807_v1 = vld [vmem:[#allocation4 + $0x1e4] ss:$8 sps:$4 sm:$0xff]   ;;  %v1805_v37 = vld [vmem:[#allocation4 + $0x1e0] ss:$8 sps:$4 sm:$0xff]  }
  0x4d   : > { %420 = vmatpush1.bf16.msra.mxu0 %v1703_v39  ;;  %371 = vmatprep.mubr.bf16.mxu0 %v1896_v0  ;;  %v1811_v39 = vld [vmem:[#allocation4 + $0x1f0] ss:$8 sps:$4 sm:$0xff]  }
  0x4e   : > { %421 = vmatprep.subr.bf16.mxu0 %v1708_v40  ;;  %1059 = vmatprep.subr.bf16.mxu1 %v1748_v49 }
  0x50   : > { %1060 = vmatpush1.bf16.msra.mxu1 %v1750_v50 }
  0x51   : > { %422 = vmatpush1.bf16.msra.mxu0 %v1706_v41  ;;  %1061 = vmatprep.subr.bf16.mxu1 %v1754_v51 }
  0x52   : > { %830 = vmatprep.subr.bf16.mxu0 %v1723_v46 }
  0x54   : > { %1508 = vmatmul.mubr.msk.bf16.gmra.mrb[4].mxu0 %vm198_vm1, %v208_v48  ;;  %1062 = vmatpush1.bf16.msra.mxu1 %v1756_v54 }
  0x55   : > { %451 = vmatprep.mubr.bf16.mxu0 %v1896_v0  ;;  %1063 = vmatprep.subr.bf16.mxu1 %v1760_v55 }
  0x58   : > { %1064 = vmatpush1.bf16.msra.mxu1 %v1762_v59 }
  0x59   : > { %1065 = vmatprep.subr.bf16.mxu1 %v1766_v60 }
  0x5c   : > { %1517 = vmatmul.mubr.msk.bf16.vlgmr.msra.gmra.mrb[0].mxu0 %vm198_vm1, %v386_v57  ;;  %1066 = vmatpush1.bf16.msra.mxu1 %v1768_v16 }
  0x5d   : > { %461 = vmatprep.mubr.bf16.mxu0 %v1896_v0  ;;  %831 = vmatpush1.bf16.msra.mxu0 %v1721_v56  ;;  %v1751_v0 = vld [vmem:[#allocation4 + $0x150] ss:$8 sps:$4 sm:$0xff]  }
  0x5e   : > { %832 = vmatprep.subr.bf16.mxu0 %v1729_v58  ;;  %1067 = vmatprep.subr.bf16.mxu1 %v1772_v19  ;;  %v1804_v19 = vld [vmem:[#allocation4 + $0x214] ss:$8 sps:$4 sm:$0xff]  }
  0x60   : > { %1068 = vmatpush1.bf16.msra.mxu1 %v1774_v20 }
  0x61   : > { %833 = vmatpush1.bf16.msra.mxu0 %v1727_v63  ;;  %1069 = vmatprep.subr.bf16.mxu1 %v1778_v23 }
  0x62   : > { %834 = vmatprep.subr.bf16.mxu0 %v1735_v2 }
  0x64   : > { %1518 = vmatmul.mubr.msk.bf16.gmra.mrb[4].mxu0 %vm198_vm1, %v387_v4  ;;  %1070 = vmatpush1.bf16.msra.mxu1 %v1780_v25 }
  0x65   : > { %835 = vmatpush1.bf16.msra.mxu0 %v1733_v3  ;;  %1071 = vmatprep.subr.bf16.mxu1 %v1784_v28 }
  0x66   : > { %836 = vmatprep.subr.bf16.mxu0 %v1741_v5 }
  0x68   : > { %1072 = vmatpush1.bf16.msra.mxu1 %v1786_v29 }
  0x69   : > { %837 = vmatpush1.bf16.msra.mxu0 %v1739_v6  ;;  %1073 = vmatprep.subr.bf16.mxu1 %v1790_v32 }
  0x6a   : > { %838 = vmatprep.subr.bf16.mxu0 %v1747_v7 }
  0x6c   : > { %1074 = vmatpush1.bf16.msra.mxu1 %v1792_v33 }
  0x6d   : > { %839 = vmatpush1.bf16.msra.mxu0 %v1745_v8  ;;  %1318 = vmatprep.subr.bf16.mxu1 %v1798_v35 }
  0x6e   : > { %840 = vmatprep.subr.bf16.mxu0 %v1753_v9 }
  0x71   : > { %841 = vmatpush1.bf16.msra.mxu0 %v1751_v0 }
  0x72   : > { %842 = vmatprep.subr.bf16.mxu0 %v1759_v10 }
  0x75   : > { %843 = vmatpush1.bf16.msra.mxu0 %v1757_v11 }
  0x76   : > { %844 = vmatprep.subr.bf16.mxu0 %v1765_v12 }
  0x79   : > { %845 = vmatpush1.bf16.msra.mxu0 %v1763_v13  ;;  %v1796_v13 = vld [vmem:[#allocation4 + $0x200] ss:$8 sps:$4 sm:$0xff]  }
  0x7a   : > { %846 = vmatprep.subr.bf16.mxu0 %v1771_v14 }
  0x7d   : > { %847 = vmatpush1.bf16.msra.mxu0 %v1769_v15 }
  0x7e   : > { %848 = vmatprep.subr.bf16.mxu0 %v1777_v17 }
  0x81   : > { %849 = vmatpush1.bf16.msra.mxu0 %v1775_v18 }
  0x82   : > { %850 = vmatprep.subr.bf16.mxu0 %v1783_v21 }
  0x85   : > { %851 = vmatpush1.bf16.msra.mxu0 %v1781_v22 }
  0x86   : > { %852 = vmatprep.subr.bf16.mxu0 %v1789_v26 }
  0x89   : > { %853 = vmatpush1.bf16.msra.mxu0 %v1787_v27 }
  0x8a   : > { %854 = vmatprep.subr.bf16.mxu0 %v1795_v30  ;;  %v1802_v30 = vld [vmem:[#allocation4 + $0x210] ss:$8 sps:$4 sm:$0xff]  }
  0x8d   : > { %855 = vmatpush1.bf16.msra.mxu0 %v1793_v31  ;;  %v1810_v31 = vld [vmem:[#allocation4 + $0x224] ss:$8 sps:$4 sm:$0xff]  }
  0x8e   : > { %856 = vmatprep.subr.bf16.mxu0 %v1801_v34 }
  0x91   : > { %857 = vmatpush1.bf16.msra.mxu0 %v1799_v36 }
  0x92   : > { %858 = vmatprep.subr.bf16.mxu0 %v1807_v1 }
  0x95   : > { %859 = vmatpush1.bf16.msra.mxu0 %v1805_v37 }
  0x96   : > { %860 = vmatprep.subr.bf16.mxu0 %v1813_v38 }
  0x99   : > { %861 = vmatpush1.bf16.msra.mxu0 %v1811_v39 }
 0x12f   : > { %v453_v40 = vpop.f32.mrb[0].mxu0 }
 0x130   : > { %v480_v41 = vmax.f32 %v453_v40, 0.0  ;;  %v455_v42 = vpop.f32.mrb[1].mxu0 }
 0x131   : > { %v481_v43 = vmax.f32 %v455_v42, 0.0  ;;  %v457_v44 = vpop.f32.mrb[2].mxu0 }
 0x132   : > { %v506_v45 = vrot.slane %v480_v41, 7  ;;  %v482_v46 = vmax.f32 %v457_v44, 0.0  ;;  %v459_v47 = vpop.f32.mrb[3].mxu0  ;;  %v1808_v41 = vld [vmem:[#allocation4 + $0x220] ss:$8 sps:$4 sm:$0xff]  }
 0x133   : > { %v507_v48 = vrot.slane %v481_v43, 7  ;;  %v483_v49 = vmax.f32 %v459_v47, 0.0  ;;  %v1816_v44 = vld [vmem:[#allocation4 + $0x234] ss:$8 sps:$4 sm:$0xff]  }
 0x134   : > { %530 = vst [vmem:[#allocation3] sm:$0xfe] %v506_v45  ;;  %v508_v50 = vrot.slane %v482_v46, 7 }
 0x135   : > { %531 = vst [vmem:[#allocation3 + $0x8] sm:$0xfe] %v507_v48  ;;  %v510_v51 = vrot.slane %v483_v49, 7 }
 0x136   : > { %v509_v52 = vsel %vm505_vm3, %v506_v45, %v508_v50 }
 0x137   : > { %v511_v53 = vsel %vm505_vm3, %v507_v48, %v510_v51  ;;  %v463_v54 = vpop.f32.mrb[4].mxu0 }
 0x138   : > { %v484_v55 = vmax.f32 %v463_v54, 0.0  ;;  %v465_v56 = vpop.f32.mrb[5].mxu0  ;;  %v1819_v54 = vld [vmem:[#allocation4 + $0x244] ss:$8 sps:$4 sm:$0xff]  }
 0x139   : > { %v485_v57 = vmax.f32 %v465_v56, 0.0  ;;  %v467_v58 = vpop.f32.mrb[6].mxu0 }
 0x13a   : > { %v512_v59 = vrot.slane %v484_v55, 7  ;;  %v486_v60 = vmax.f32 %v467_v58, 0.0  ;;  %v469_v61 = vpop.f32.mrb[7].mxu0 }
 0x13b   : > { %v514_v62 = vrot.slane %v485_v57, 7  ;;  %v487_v63 = vmax.f32 %v469_v61, 0.0  ;;  %v540_v2 = vld [vmem:[#allocation3] sm:$0xff] }
 0x13c   : > { %v584_v3 = vld [vmem:[#allocation3] sm:$0xfe]  ;;  %v513_v4 = vsel %vm505_vm3, %v508_v50, %v512_v59  ;;  %v516_v5 = vrot.slane %v486_v60, 7  ;;  %v541_v6 = vld [vmem:[#allocation3 + $0x8] sm:$0xff]  ;;  %v548_v17 = vpack.c.bf16 %v509_v52, %v540_v2  ;;  %v1817_v60 = vld [vmem:[#allocation4 + $0x240] ss:$8 sps:$4 sm:$0xff]  }
 0x13d   : > { %v585_v7 = vld [vmem:[#allocation3 + $0x8] sm:$0xfe]  ;;  %v588_v9 = vpack.c.bf16 %v509_v52, %v584_v3  ;;  %v515_v0 = vsel %vm505_vm3, %v510_v51, %v514_v62  ;;  %v518_v10 = vrot.slane %v487_v63, 7  ;;  %v549_v11 = vpack.c.bf16 %v511_v53, %v541_v6  ;;  %v1096_v14 = vld [vmem:[#allocation3] sm:$0xfc] }
 0x13e   : > { %v1097_v8 = vld [vmem:[#allocation3 + $0x8] sm:$0xfc]  ;;  %v589_v12 = vpack.c.bf16 %v511_v53, %v585_v7  ;;  %v517_v15 = vsel %vm505_vm3, %v512_v59, %v516_v5  ;;  %538 = vst [vmem:[#allocation3 + $0x40] sm:$0x1] %v516_v5  ;;  %v1100_v22 = vpack.c.bf16 %v509_v52, %v1096_v14  ;;  %v1825_v3 = vld [vmem:[#allocation4 + $0x264] ss:$8 sps:$4 sm:$0xff]  }
 0x13f   : > { %v1101_v16 = vpack.c.bf16 %v511_v53, %v1097_v8  ;;  %v629_v18 = vshll.u32 %v588_v9, 16  ;;  %v519_v20 = vsel %vm505_vm3, %v514_v62, %v518_v10  ;;  %539 = vst [vmem:[#allocation3 + $0x48] sm:$0x1] %v518_v10  ;;  %1075 = vmatprep.mubr.bf16.mxu1 %v549_v11  ;;  %v627_v23 = vshrl.u32 %v588_v9, 16  ;;  %v1814_v51 = vld [vmem:[#allocation4 + $0x230] ss:$8 sps:$4 sm:$0xff]  }
 0x140   : > { %v641_v21 = vshll.u32 %v589_v12, 16  ;;  %1076 = vmatmul.mubr.bf16.vlgmr.msra.gmra.mrb[0].mxu1 %v548_v17  ;;  %v2033_v25 = vpack.c.bf16 %v519_v20, %v515_v0  ;;  %v2035_v26 = vpack.c.bf16 %v517_v15, %v513_v4  ;;  %v639_v27 = vshrl.u32 %v589_v12, 16  ;;  %v1822_v62 = vld [vmem:[#allocation4 + $0x254] ss:$8 sps:$4 sm:$0xff]   ;;  %v1820_v2 = vld [vmem:[#allocation4 + $0x250] ss:$8 sps:$4 sm:$0xff]  }
 0x141   : > { %v631_v24 = vrot.slane %v629_v18, 1  ;;  %v1147_v29 = vrot.slane %v1101_v16, 1  ;;  %1319 = vmatpush1.bf16.msra.mxu1 %v1796_v13  ;;  %v1144_v36 = vrot.slane %v1100_v22, 1  ;;  %v1823_v4 = vld [vmem:[#allocation4 + $0x260] ss:$8 sps:$4 sm:$0xff]  }
 0x142   : > { %v643_v28 = vrot.slane %v641_v21, 1  ;;  %1320 = vmatprep.subr.bf16.mxu1 %v1804_v19  ;;  %1085 = vmatprep.mubr.bf16.mxu1 %v2033_v25  ;;  %v1148_v32 = vrot.slane %v2033_v25, 1  ;;  %v646_v33 = vshll.u32 %v2033_v25, 16  ;;  %v634_v35 = vshll.u32 %v2035_v26, 16  ;;  %v1828_v5 = vld [vmem:[#allocation4 + $0x274] ss:$8 sps:$4 sm:$0xff]  }
 0x143   : > { %v632_v34 = vor.u32 %v631_v24, %v627_v23  ;;  %v1145_v37 = vrot.slane %v2035_v26, 1  ;;  %v658_v52 = vshrl.u32 %v2033_v25, 16  ;;  %v650_v57 = vshrl.u32 %v2035_v26, 16  ;;  %v1826_v6 = vld [vmem:[#allocation4 + $0x270] ss:$8 sps:$4 sm:$0xff]  }
 0x144   : > { %v644_v1 = vor.u32 %v643_v28, %v639_v27  ;;  %v1149_v38 = vsel %vm1143_vm4, %v1147_v29, %v1148_v32  ;;  %v648_v39 = vrot.slane %v646_v33, 1  ;;  %v636_v40 = vrot.slane %v634_v35, 1  ;;  %v1831_v7 = vld [vmem:[#allocation4 + $0x284] ss:$8 sps:$4 sm:$0xff]   ;;  %v1829_v8 = vld [vmem:[#allocation4 + $0x280] ss:$8 sps:$4 sm:$0xff]  }
 0x145   : > { %1321 = vmatpush1.bf16.msra.mxu1 %v1802_v30  ;;  %v586_v42 = vld [vmem:[#allocation3 + $0x40] sm:$0x1]  ;;  %v2048_v43 = vsel %vm1143_vm4, %v1144_v36, %v1145_v37  ;;  %v1834_v9 = vld [vmem:[#allocation4 + $0x294] ss:$8 sps:$4 sm:$0xff]   ;;  %v1837_v10 = vld [vmem:[#allocation4 + $0x2a4] ss:$8 sps:$4 sm:$0xff]  }
 0x146   : > { %1322 = vmatprep.subr.bf16.mxu1 %v1810_v31  ;;  %v649_v45 = vsel %vm625_vm5, %v644_v1, %v648_v39  ;;  %v637_v46 = vsel %vm625_vm5, %v632_v34, %v636_v40  ;;  %v587_v47 = vld [vmem:[#allocation3 + $0x48] sm:$0x1]  ;;  %v590_v48 = vpack.c.bf16 %v586_v42, %v586_v42  ;;  %v660_v55 = vor.u32 %v658_v52, %v648_v39  ;;  %v1835_v11 = vld [vmem:[#allocation4 + $0x2a0] ss:$8 sps:$4 sm:$0xff]   ;;  %v1840_v12 = vld [vmem:[#allocation4 + $0x2b4] ss:$8 sps:$4 sm:$0xff]  }
 0x147   : > { %862 = vmatprep.mubr.bf16.mxu0 %v649_v45  ;;  %v591_v49 = vpack.c.bf16 %v587_v47, %v587_v47  ;;  %v652_v61 = vor.u32 %v650_v57, %v636_v40  ;;  %v1832_v0 = vld [vmem:[#allocation4 + $0x290] ss:$8 sps:$4 sm:$0xff]   ;;  %v1843_v14 = vld [vmem:[#allocation4 + $0x2c4] ss:$8 sps:$4 sm:$0xff]   ;;  %v1841_v15 = vld [vmem:[#allocation4 + $0x2c0] ss:$8 sps:$4 sm:$0xff]  }
 0x148   : > { %1086 = vmatmul.mubr.bf16.gmra.mrb[4].mxu1 %v2035_v26  ;;  %863 = vmatmul.mubr.bf16.vlgmr.msra.gmra.mrb[8].mxu0 %v637_v46  ;;  %v654_v50 = vshll.u32 %v590_v48, 16  ;;  %v1838_v13 = vld [vmem:[#allocation4 + $0x2b0] ss:$8 sps:$4 sm:$0xff]   ;;  %v1846_v16 = vld [vmem:[#allocation4 + $0x2d4] ss:$8 sps:$4 sm:$0xff]  }
 0x149   : > { %1323 = vmatpush1.bf16.msra.mxu1 %v1808_v41  ;;  %1350 = vmatprep.mubr.bf16.mxu1 %v1149_v38  ;;  %v662_v53 = vshll.u32 %v591_v49, 16  ;;  %v1844_v17 = vld [vmem:[#allocation4 + $0x2d0] ss:$8 sps:$4 sm:$0xff]   ;;  %v1849_v18 = vld [vmem:[#allocation4 + $0x2e4] ss:$8 sps:$4 sm:$0xff]  }
 0x14a   : > { %1324 = vmatprep.subr.bf16.mxu1 %v1816_v44  ;;  %v656_v58 = vrot.slane %v654_v50, 1  ;;  %v1847_v19 = vld [vmem:[#allocation4 + $0x2e0] ss:$8 sps:$4 sm:$0xff]   ;;  %v1099_v20 = vld [vmem:[#allocation3 + $0x48] sm:$0x3] }
 0x14b   : > { %v664_v56 = vrot.slane %v662_v53, 1  ;;  %v1852_v21 = vld [vmem:[#allocation4 + $0x2f4] ss:$8 sps:$4 sm:$0xff]   ;;  %v1103_v22 = vpack.c.bf16 %v1099_v20, %v1099_v20  ;;  %v1850_v23 = vld [vmem:[#allocation4 + $0x2f0] ss:$8 sps:$4 sm:$0xff]  }
 0x14c   : > { %v657_v63 = vsel %vm625_vm5, %v652_v61, %v656_v58  ;;  %v1098_v27 = vld [vmem:[#allocation3 + $0x40] sm:$0x3] }
 0x14d   : > { %1325 = vmatpush1.bf16.msra.mxu1 %v1814_v51  ;;  %v665_v59 = vsel %vm625_vm5, %v660_v55, %v664_v56  ;;  %v1152_v24 = vrot.slane %v1103_v22, 1  ;;  %v1102_v28 = vpack.c.bf16 %v1098_v27, %v1098_v27 }
 0x14e   : > { %872 = vmatprep.mubr.bf16.mxu0 %v665_v59  ;;  %1326 = vmatprep.subr.bf16.mxu1 %v1819_v54 }
 0x14f   : > { %v1153_v29 = vsel %vm1143_vm4, %v1148_v32, %v1152_v24  ;;  %v1150_v30 = vrot.slane %v1102_v28, 1 }
 0x150   : > { %873 = vmatmul.mubr.bf16.gmra.mrb[12].mxu0 %v657_v63 }
 0x151   : > { %1327 = vmatpush1.bf16.msra.mxu1 %v1817_v60  ;;  %v1151_v31 = vsel %vm1143_vm4, %v1145_v37, %v1150_v30 }
 0x152   : > { %1328 = vmatprep.subr.bf16.mxu1 %v1822_v62 }
 0x155   : > { %1329 = vmatpush1.bf16.msra.mxu1 %v1820_v2 }
 0x156   : > { %1330 = vmatprep.subr.bf16.mxu1 %v1825_v3 }
 0x159   : > { %1331 = vmatpush1.bf16.msra.mxu1 %v1823_v4 }
 0x15a   : > { %1332 = vmatprep.subr.bf16.mxu1 %v1828_v5 }
 0x15d   : > { %1333 = vmatpush1.bf16.msra.mxu1 %v1826_v6 }
 0x15e   : > { %1334 = vmatprep.subr.bf16.mxu1 %v1831_v7 }
 0x161   : > { %1335 = vmatpush1.bf16.msra.mxu1 %v1829_v8 }
 0x162   : > { %1336 = vmatprep.subr.bf16.mxu1 %v1834_v9 }
 0x165   : > { %1337 = vmatpush1.bf16.msra.mxu1 %v1832_v0 }
 0x166   : > { %1338 = vmatprep.subr.bf16.mxu1 %v1837_v10 }
 0x169   : > { %1339 = vmatpush1.bf16.msra.mxu1 %v1835_v11 }
 0x16a   : > { %1340 = vmatprep.subr.bf16.mxu1 %v1840_v12 }
 0x16d   : > { %1341 = vmatpush1.bf16.msra.mxu1 %v1838_v13 }
 0x16e   : > { %1342 = vmatprep.subr.bf16.mxu1 %v1843_v14 }
 0x171   : > { %1343 = vmatpush1.bf16.msra.mxu1 %v1841_v15 }
 0x172   : > { %1344 = vmatprep.subr.bf16.mxu1 %v1846_v16 }
 0x175   : > { %1345 = vmatpush1.bf16.msra.mxu1 %v1844_v17 }
 0x176   : > { %1346 = vmatprep.subr.bf16.mxu1 %v1849_v18 }
 0x179   : > { %1347 = vmatpush1.bf16.msra.mxu1 %v1847_v19 }
 0x17a   : > { %1348 = vmatprep.subr.bf16.mxu1 %v1852_v21 }
 0x17d   : > { %1349 = vmatpush1.bf16.msra.mxu1 %v1850_v23 }
 0x180   : > { %1351 = vmatmul.mubr.bf16.vlgmr.msra.gmra.mrb[0].mxu1 %v2048_v43 }
 0x181   : > { %1360 = vmatprep.mubr.bf16.mxu1 %v1153_v29 }
 0x188   : > { %1361 = vmatmul.mubr.bf16.gmra.mrb[4].mxu1 %v1151_v31 }
 0x21b   : > { %v864_v33 = vpop.f32.mrb[8].mxu0 }
 0x21c   : > { %v866_v34 = vpop.f32.mrb[9].mxu0 }
 0x21d   : > { %v868_v35 = vpop.f32.mrb[10].mxu0 }
 0x21e   : > { %v870_v36 = vpop.f32.mrb[11].mxu0 }
 0x223   : > { %v874_v1 = vpop.f32.mrb[12].mxu0 }
 0x224   : > { %v876_v38 = vpop.f32.mrb[13].mxu0 }
 0x225   : > { %v878_v39 = vpop.f32.mrb[14].mxu0 }
 0x226   : > { %v880_v40 = vpop.f32.mrb[15].mxu0 }
 0x253   : > { %v1352_v41 = vpop.f32.mrb[0].mxu1 }
 0x254   : > { %v1636_v25 = vadd.f32 %v1352_v41, %v864_v33  ;;  %v1354_v42 = vpop.f32.mrb[1].mxu1 }
 0x255   : > { %v1637_v32 = vadd.f32 %v1354_v42, %v866_v34  ;;  %v1356_v43 = vpop.f32.mrb[2].mxu1 }
 0x256   : > { %v1379_v44 = vmax.f32 %v1636_v25, 0.0  ;;  %v1638_v45 = vadd.f32 %v1356_v43, %v868_v35  ;;  %v1358_v26 = vpop.f32.mrb[3].mxu1 }
 0x257   : > { %v1380_v46 = vmax.f32 %v1637_v32, 0.0  ;;  %v1639_v37 = vadd.f32 %v1358_v26, %v870_v36 }
 0x258   : > { %v1381_v47 = vmax.f32 %v1638_v45, 0.0 }
 0x259   : > { %v1623_v48 = vpack.c.bf16 %v1380_v46, %v1379_v44  ;;  %v1382_v49 = vmax.f32 %v1639_v37, 0.0 }
 0x25b   : > { %1411 = vst [vmem:[%s185_s9] sm:$0xff] %v1623_v48  ;;  %v1624_v50 = vpack.c.bf16 %v1382_v49, %v1381_v47  ;;  %v1362_v51 = vpop.f32.mrb[4].mxu1 }
 0x25c   : > { %v1640_v52 = vadd.f32 %v1362_v51, %v874_v1  ;;  %v1364_v53 = vpop.f32.mrb[5].mxu1 }
 0x25d   : > { %1412 = vst [vmem:[%s185_s9 + $0x8] sm:$0xff] %v1624_v50  ;;  %v1641_v54 = vadd.f32 %v1364_v53, %v876_v38  ;;  %v1366_v55 = vpop.f32.mrb[6].mxu1 }
 0x25e   : > { %v1383_v56 = vmax.f32 %v1640_v52, 0.0  ;;  %v1642_v57 = vadd.f32 %v1366_v55, %v878_v39  ;;  %v1368_v58 = vpop.f32.mrb[7].mxu1 }
 0x25f   : > { %v1384_v59 = vmax.f32 %v1641_v54, 0.0  ;;  %v1643_v60 = vadd.f32 %v1368_v58, %v880_v40 }
 0x260   : > { %v1385_v61 = vmax.f32 %v1642_v57, 0.0 }
 0x261   : > { %v1625_v62 = vpack.c.bf16 %v1384_v59, %v1383_v56  ;;  %v1386_v63 = vmax.f32 %v1643_v60, 0.0 }
 0x263   : > { %1413 = vst [vmem:[%s185_s9 + $0x10] sm:$0xff] %v1625_v62  ;;  %v1626_v2 = vpack.c.bf16 %v1386_v63, %v1385_v61 }
 0x265   : > { %1414 = vst [vmem:[%s185_s9 + $0x18] sm:$0xff] %v1626_v2 }
 0x266 PF: > { %s14_s12 = sadd.s32 1, %s1891_s12  }
 0x267   : > { %p11_p3 = scmp.ge.s32.totalorder %s14_s12, 4  }
 0x269   :  { %13 = sbr.rel (!%p11_p3) target bundleno = 1 (0x1), region = 72 }
 0x270   :  { %1436 = vsyncpa [#allocation5], 1 }
 0x271   :  { %1438 = vsyncpa [#allocation5 + $0x1], 1 }

// kernel: unet_forward.11
= control target key start
LH: loop header
LB: loop body
LE: loop exit
PB: predicated region body
PF: predicated region fallthrough
CT: control target
= control target key end

     0   :  { %s2028_s12 = smov 0   ;;  %s2495_s0 = inlined_call_operand.vmem [shape: bf16[2,16,128], index: 0, kind: input, shape index: {}]   ;;  %s2496_s1 = inlined_call_operand.vmem [shape: bf16[3,128,256], index: 1, kind: input, shape index: {}]   ;;  %s2497_s2 = inlined_call_operand.vmem [shape: bf16[3,256,256], index: 2, kind: input, shape index: {}]   ;;  %s2498_s3 = inlined_call_operand.vmem [shape: bf16[2,16,256], index: 3, kind: output, shape index: {}]  }
   0x1 LB: > { %s1494_s13 = sadd.s32 4294967295, %s2004_s12   ;;  %p1498_p0 = scmp.ge.s32.totalorder %s2004_s12, 1  ;;  %s2004_s12 = sphi %s2028_s12, %s13_s12  }
   0x2   : > { %p137_p1 = scmp.lt.s32.totalorder %s2004_s12, 3 }
   0x4   : > { %p138_p2 = pnand %p1498_p0, %p137_p1 }
   0x5   : > { %v1781_v0 = vld [vmem:[%s2496_s1 + $0x84] ss:$8 sps:$4 sm:$0xff] (!%p138_p2)   ;;  %p161_p3 = scmp.lt.s32.totalorder (!%p138_p2), %s1494_s13, 1  ;;  %v1783_v1 = vld [vmem:[%s2496_s1 + $0x80] ss:$8 sps:$4 sm:$0xff] (!%p138_p2)   ;;  %v2006_v2 = vmov (!%p138_p2), 0  }
   0x6   : > { %141 = sbr.rel (%p138_p2) target bundleno = 616 (0x268), region = 32  ;;  %331 = vmatprep.mubr.bf16.mxu0 (!%p138_p2), %v2006_v2  ;;  %299 = vmatprep.subr.bf16.mxu0 (!%p138_p2), %v1781_v0  ;;  %v1784_v3 = vld [vmem:[%s2496_s1 + $0x94] ss:$8 sps:$4 sm:$0xff] (!%p138_p2)   ;;  %v2007_v4 = vmov (!%p138_p2), 0.0   ;;  %v1786_v5 = vld [vmem:[%s2496_s1 + $0x90] ss:$8 sps:$4 sm:$0xff] (!%p138_p2)  }
   0x7   : > { %176 = vst [vmem:[#allocation2] sm:$0x1] (!%p138_p2), %v2007_v4  ;;  %177 = vst [vmem:[#allocation2 + $0x11] sm:$0x1] (!%p138_p2), %v2007_v4  ;;  %300 = vmatpush1.bf16.msra.mxu0 (!%p138_p2), %v1783_v1  ;;  %v1787_v6 = vld [vmem:[%s2496_s1 + $0xa4] ss:$8 sps:$4 sm:$0xff] (!%p138_p2)  }
   0x8   : > { %301 = vmatprep.subr.bf16.mxu0 (!%p138_p2), %v1784_v3  ;;  %v1789_v7 = vld [vmem:[%s2496_s1 + $0xa0] ss:$8 sps:$4 sm:$0xff] (!%p138_p2)   ;;  %v1790_v8 = vld [vmem:[%s2496_s1 + $0xb4] ss:$8 sps:$4 sm:$0xff] (!%p138_p2)   ;;  %v1792_v9 = vld [vmem:[%s2496_s1 + $0xb0] ss:$8 sps:$4 sm:$0xff] (!%p138_p2)  }
   0x9   : > { %v1793_v10 = vld [vmem:[%s2496_s1 + $0xc4] ss:$8 sps:$4 sm:$0xff] (!%p138_p2)   ;;  %v1795_v14 = vld [vmem:[%s2496_s1 + $0xc0] ss:$8 sps:$4 sm:$0xff] (!%p138_p2)   ;;  %v1796_v15 = vld [vmem:[%s2496_s1 + $0xd4] ss:$8 sps:$4 sm:$0xff] (!%p138_p2)  }
   0xa   : > { %v1798_v16 = vld [vmem:[%s2496_s1 + $0xd0] ss:$8 sps:$4 sm:$0xff] (!%p138_p2)   ;;  %v1799_v17 = vld [vmem:[%s2496_s1 + $0xe4] ss:$8 sps:$4 sm:$0xff] (!%p138_p2)   ;;  %v1801_v18 = vld [vmem:[%s2496_s1 + $0xe0] ss:$8 sps:$4 sm:$0xff] (!%p138_p2)  }
   0xb   : > { %302 = vmatpush1.bf16.msra.mxu0 (!%p138_p2), %v1786_v5  ;;  %v1802_v19 = vld [vmem:[%s2496_s1 + $0xf4] ss:$8 sps:$4 sm:$0xff] (!%p138_p2)   ;;  %v1804_v20 = vld [vmem:[%s2496_s1 + $0xf0] ss:$8 sps:$4 sm:$0xff] (!%p138_p2)   ;;  %v1807_v21 = vld [vmem:[%s2496_s1 + $0x4] ss:$8 sps:$4 sm:$0xff] (!%p138_p2)  }
   0xc   : > { %303 = vmatprep.subr.bf16.mxu0 (!%p138_p2), %v1787_v6  ;;  %v1805_v23 = vld [vmem:[%s2496_s1] ss:$8 sps:$4 sm:$0xff] (!%p138_p2)   ;;  %v1811_v24 = vld [vmem:[%s2496_s1 + $0x14] ss:$8 sps:$4 sm:$0xff] (!%p138_p2)   ;;  %v1809_v25 = vld [vmem:[%s2496_s1 + $0x10] ss:$8 sps:$4 sm:$0xff] (!%p138_p2)  }
   0xd   : > { %s2500_s13 = smov (!%p161_p3, %s1494_s13), 1  ;;  %v1854_v26 = vld [vmem:[%s2497_s2 + $0x4] ss:$8 sps:$4 sm:$0xff]   ;;  %v1856_v27 = vld [vmem:[%s2497_s2] ss:$8 sps:$4 sm:$0xff]   ;;  %vm629_vm1 = vcmask 1040384  }
   0xe   : > { %s1747_s28 = sshll.u32 %s2500_s13, 3  ;;  %v1814_v28 = vld [vmem:[%s2496_s1 + $0x24] ss:$8 sps:$4 sm:$0xff]   ;;  %1117 = vmatprep.subr.bf16.mxu1 %v1854_v26  ;;  %v1857_v29 = vld [vmem:[%s2497_s2 + $0x14] ss:$8 sps:$4 sm:$0xff]   ;;  %vm1205_vm2 = vcmask 1046528  }
   0xf   : > { %304 = vmatpush1.bf16.msra.mxu0 %v1789_v7  ;;  %s165_s6 = scalar_lea.vmem %s2495_s0, %s1747_s28  ;;  %1118 = vmatpush1.bf16.msra.mxu1 %v1856_v27  ;;  %v1859_v30 = vld [vmem:[%s2497_s2 + $0x10] ss:$8 sps:$4 sm:$0xff]   ;;  %v1863_v31 = vld [vmem:[%s2497_s2 + $0x24] ss:$8 sps:$4 sm:$0xff]   ;;  %v1812_v32 = vld [vmem:[%s2496_s1 + $0x20] ss:$8 sps:$4 sm:$0xff]  }
  0x10   : > { %305 = vmatprep.subr.bf16.mxu0 %v1790_v8  ;;  %v1752_v11 = vld [vmem:[%s165_s6] sm:$0xff]   ;;  %1119 = vmatprep.subr.bf16.mxu1 %v1857_v29  ;;  %v1817_v33 = vld [vmem:[%s2496_s1 + $0x34] ss:$8 sps:$4 sm:$0xff]   ;;  %v1815_v36 = vld [vmem:[%s2496_s1 + $0x30] ss:$8 sps:$4 sm:$0xff]   ;;  %s1748_s4 = sshll.u32 %s2500_s13, 4 }
  0x11   : > { %v1753_v12 = vunpack.c.l.bf16 %v1752_v11  ;;  %v1754_v13 = vunpack.c.h.bf16 %v1752_v11  ;;  %v1808_v22 = vld [vmem:[%s165_s6] sm:$0xff]  ;;  %v1869_v35 = vld [vmem:[%s2497_s2 + $0x34] ss:$8 sps:$4 sm:$0xff]   ;;  %v1871_v38 = vld [vmem:[%s2497_s2 + $0x30] ss:$8 sps:$4 sm:$0xff]   ;;  %s170_s8 = scalar_lea.vmem %s2498_s3, %s1748_s4 }
  0x12   : > { %v1865_v34 = vld [vmem:[%s2497_s2 + $0x20] ss:$8 sps:$4 sm:$0xff]   ;;  %v1820_v37 = vld [vmem:[%s2496_s1 + $0x44] ss:$8 sps:$4 sm:$0xff]   ;;  %v1823_v41 = vld [vmem:[%s2496_s1 + $0x54] ss:$8 sps:$4 sm:$0xff]  }
  0x13   : > { %306 = vmatpush1.bf16.msra.mxu0 %v1792_v9  ;;  %178 = vst [vmem:[#allocation2 + $0x1] sm:$0xff] %v1753_v12  ;;  %179 = vst [vmem:[#allocation2 + $0x9] sm:$0xff] %v1754_v13  ;;  %1120 = vmatpush1.bf16.msra.mxu1 %v1859_v30  ;;  %v1875_v39 = vld [vmem:[%s2497_s2 + $0x44] ss:$8 sps:$4 sm:$0xff]   ;;  %v1818_v40 = vld [vmem:[%s2496_s1 + $0x40] ss:$8 sps:$4 sm:$0xff]  }
  0x14   : > { %307 = vmatprep.subr.bf16.mxu0 %v1793_v10  ;;  %1121 = vmatprep.subr.bf16.mxu1 %v1863_v31  ;;  %v1877_v42 = vld [vmem:[%s2497_s2 + $0x40] ss:$8 sps:$4 sm:$0xff]   ;;  %v1881_v43 = vld [vmem:[%s2497_s2 + $0x54] ss:$8 sps:$4 sm:$0xff]   ;;  %v1821_v44 = vld [vmem:[%s2496_s1 + $0x50] ss:$8 sps:$4 sm:$0xff]  }
  0x15   : > { %v1826_v45 = vld [vmem:[%s2496_s1 + $0x64] ss:$8 sps:$4 sm:$0xff]   ;;  %v1883_v46 = vld [vmem:[%s2497_s2 + $0x50] ss:$8 sps:$4 sm:$0xff]   ;;  %v1824_v48 = vld [vmem:[%s2496_s1 + $0x60] ss:$8 sps:$4 sm:$0xff]  }
  0x16   : > { %v1887_v47 = vld [vmem:[%s2497_s2 + $0x64] ss:$8 sps:$4 sm:$0xff]   ;;  %v1829_v49 = vld [vmem:[%s2496_s1 + $0x74] ss:$8 sps:$4 sm:$0xff]   ;;  %v1827_v50 = vld [vmem:[%s2496_s1 + $0x70] ss:$8 sps:$4 sm:$0xff]  }
  0x17   : > { %308 = vmatpush1.bf16.msra.mxu0 %v1795_v14  ;;  %1122 = vmatpush1.bf16.msra.mxu1 %v1865_v34  ;;  %v1889_v52 = vld [vmem:[%s2497_s2 + $0x60] ss:$8 sps:$4 sm:$0xff]   ;;  %v1893_v53 = vld [vmem:[%s2497_s2 + $0x74] ss:$8 sps:$4 sm:$0xff]   ;;  %v1832_v55 = vld [vmem:[%s2496_s1 + $0x104] ss:$8 sps:$4 sm:$0xff]  }
  0x18   : > { %309 = vmatprep.subr.bf16.mxu0 %v1796_v15  ;;  %1123 = vmatprep.subr.bf16.mxu1 %v1869_v35  ;;  %v1830_v56 = vld [vmem:[%s2496_s1 + $0x100] ss:$8 sps:$4 sm:$0xff]   ;;  %v1895_v57 = vld [vmem:[%s2497_s2 + $0x70] ss:$8 sps:$4 sm:$0xff]   ;;  %v1835_v59 = vld [vmem:[%s2496_s1 + $0x114] ss:$8 sps:$4 sm:$0xff]  }
  0x19   : > { %v1899_v60 = vld [vmem:[%s2497_s2 + $0x84] ss:$8 sps:$4 sm:$0xff]   ;;  %v1901_v61 = vld [vmem:[%s2497_s2 + $0x80] ss:$8 sps:$4 sm:$0xff]   ;;  %v1905_v62 = vld [vmem:[%s2497_s2 + $0x94] ss:$8 sps:$4 sm:$0xff]  }
  0x1a   : > { %v180_v51 = vld [vmem:[#allocation2] sm:$0xff]  ;;  %v181_v54 = vld [vmem:[#allocation2 + $0x8] sm:$0xff]  ;;  %v1833_v63 = vld [vmem:[%s2496_s1 + $0x110] ss:$8 sps:$4 sm:$0xff]   ;;  %vm727_vm3 = vsmask.f32 7424 }
  0x1b   : > { %310 = vmatpush1.bf16.msra.mxu0 %v1798_v16  ;;  %1124 = vmatpush1.bf16.msra.mxu1 %v1871_v38  ;;  %v182_v58 = vpack.c.bf16 %v181_v54, %v180_v51  ;;  %v1838_v0 = vld [vmem:[%s2496_s1 + $0x124] ss:$8 sps:$4 sm:$0xff]   ;;  %v1907_v1 = vld [vmem:[%s2497_s2 + $0x90] ss:$8 sps:$4 sm:$0xff]   ;;  %v1836_v5 = vld [vmem:[%s2496_s1 + $0x120] ss:$8 sps:$4 sm:$0xff]  }
  0x1c   : > { %311 = vmatprep.subr.bf16.mxu0 %v1799_v17  ;;  %1125 = vmatprep.subr.bf16.mxu1 %v1875_v39  ;;  %v1911_v3 = vld [vmem:[%s2497_s2 + $0xa4] ss:$8 sps:$4 sm:$0xff]   ;;  %v1841_v6 = vld [vmem:[%s2496_s1 + $0x134] ss:$8 sps:$4 sm:$0xff]   ;;  %v1839_v8 = vld [vmem:[%s2496_s1 + $0x130] ss:$8 sps:$4 sm:$0xff]  }
  0x1d   : > { %v1917_v7 = vld [vmem:[%s2497_s2 + $0xb4] ss:$8 sps:$4 sm:$0xff]   ;;  %v1844_v9 = vld [vmem:[%s2496_s1 + $0x144] ss:$8 sps:$4 sm:$0xff]   ;;  %v1842_v10 = vld [vmem:[%s2496_s1 + $0x140] ss:$8 sps:$4 sm:$0xff]  }
  0x1e   : > { %v1847_v11 = vld [vmem:[%s2496_s1 + $0x154] ss:$8 sps:$4 sm:$0xff]   ;;  %v1845_v12 = vld [vmem:[%s2496_s1 + $0x150] ss:$8 sps:$4 sm:$0xff]   ;;  %v1850_v13 = vld [vmem:[%s2496_s1 + $0x164] ss:$8 sps:$4 sm:$0xff]  }
  0x1f   : > { %312 = vmatpush1.bf16.msra.mxu0 %v1801_v18  ;;  %1126 = vmatpush1.bf16.msra.mxu1 %v1877_v42  ;;  %v1848_v14 = vld [vmem:[%s2496_s1 + $0x160] ss:$8 sps:$4 sm:$0xff]   ;;  %v1853_v15 = vld [vmem:[%s2496_s1 + $0x174] ss:$8 sps:$4 sm:$0xff]   ;;  %v1851_v16 = vld [vmem:[%s2496_s1 + $0x170] ss:$8 sps:$4 sm:$0xff]  }
  0x20   : > { %313 = vmatprep.subr.bf16.mxu0 %v1802_v19  ;;  %1127 = vmatprep.subr.bf16.mxu1 %v1881_v43  ;;  %v465_v17 = vld [vmem:[#allocation2 + $0x2] sm:$0xff]  ;;  %v466_v18 = vld [vmem:[#allocation2 + $0xa] sm:$0xff]  ;;  %v1880_v26 = vld [vmem:[%s2497_s2 + $0x134] ss:$8 sps:$4 sm:$0xff]  }
  0x21   : > { %v1862_v19 = vld [vmem:[%s2497_s2 + $0x104] ss:$8 sps:$4 sm:$0xff]   ;;  %v1878_v27 = vld [vmem:[%s2497_s2 + $0x130] ss:$8 sps:$4 sm:$0xff]   ;;  %v1884_v29 = vld [vmem:[%s2497_s2 + $0x140] ss:$8 sps:$4 sm:$0xff]  }
  0x22   : > { %v1892_v30 = vld [vmem:[%s2497_s2 + $0x154] ss:$8 sps:$4 sm:$0xff]   ;;  %v1890_v31 = vld [vmem:[%s2497_s2 + $0x150] ss:$8 sps:$4 sm:$0xff]   ;;  %v1923_v42 = vld [vmem:[%s2497_s2 + $0xc4] ss:$8 sps:$4 sm:$0xff]  }
  0x23   : > { %314 = vmatpush1.bf16.msra.mxu0 %v1804_v20  ;;  %1128 = vmatpush1.bf16.msra.mxu1 %v1883_v46  ;;  %v467_v20 = vpack.c.bf16 %v466_v18, %v465_v17  ;;  %v1904_v34 = vld [vmem:[%s2497_s2 + $0x174] ss:$8 sps:$4 sm:$0xff]   ;;  %v1902_v35 = vld [vmem:[%s2497_s2 + $0x170] ss:$8 sps:$4 sm:$0xff]   ;;  %v1920_v43 = vld [vmem:[%s2497_s2 + $0x1a0] ss:$8 sps:$4 sm:$0xff]  }
  0x24   : > { %422 = vmatprep.subr.bf16.mxu0 %v1807_v21  ;;  %1129 = vmatprep.subr.bf16.mxu1 %v1887_v47  ;;  %v1860_v21 = vld [vmem:[%s2497_s2 + $0x100] ss:$8 sps:$4 sm:$0xff]   ;;  %v1916_v38 = vld [vmem:[%s2497_s2 + $0x194] ss:$8 sps:$4 sm:$0xff]   ;;  %v1914_v39 = vld [vmem:[%s2497_s2 + $0x190] ss:$8 sps:$4 sm:$0xff]   ;;  %v616_v47 = vlaneseq }
  0x25   : > { %v1929_v46 = vld [vmem:[%s2497_s2 + $0xd4] ss:$8 sps:$4 sm:$0xff]   ;;  %v1935_v51 = vld [vmem:[%s2497_s2 + $0xe4] ss:$8 sps:$4 sm:$0xff]  }
  0x26   : > { %332 = vmatmul.mubr.bf16.vlgmr.msra.gmra.mrb[0].mxu0 %v1808_v22  ;;  %v1868_v22 = vld [vmem:[%s2497_s2 + $0x114] ss:$8 sps:$4 sm:$0xff]   ;;  %vm618_vm0 = vcmp.lt.s32.totalorder %v616_v47, 256 }
  0x27   : > { %423 = vmatpush1.bf16.msra.mxu0 %v1805_v23  ;;  %454 = vmatprep.mubr.bf16.mxu0 %v2006_v2  ;;  %v1866_v23 = vld [vmem:[%s2497_s2 + $0x110] ss:$8 sps:$4 sm:$0xff]   ;;  %620 = vst.msk [vmem:[#allocation3] ss:$8 sm:$0x3] %vm618_vm0, %v2007_v4 }
  0x28   : > { %424 = vmatprep.subr.bf16.mxu0 %v1811_v24  ;;  %1130 = vmatpush1.bf16.msra.mxu1 %v1889_v52  ;;  %v1874_v24 = vld [vmem:[%s2497_s2 + $0x124] ss:$8 sps:$4 sm:$0xff]   ;;  %623 = vst.msk [vmem:[#allocation3 + $0x21] ss:$8 sm:$0x3] %vm618_vm0, %v2007_v4 }
  0x29   : > { %1131 = vmatprep.subr.bf16.mxu1 %v1893_v53  ;;  %v1932_v52 = vld [vmem:[%s2497_s2 + $0x1c0] ss:$8 sps:$4 sm:$0xff]   ;;  %v1938_v4 = vld [vmem:[%s2497_s2 + $0x1d0] ss:$8 sps:$4 sm:$0xff]   ;;  %v1940_v54 = vld [vmem:[%s2497_s2 + $0x1d4] ss:$8 sps:$4 sm:$0xff]  }
  0x2a   : > { %v1937_v53 = vld [vmem:[%s2497_s2 + $0xe0] ss:$8 sps:$4 sm:$0xff]  }
  0x2b   : > { %425 = vmatpush1.bf16.msra.mxu0 %v1809_v25  ;;  %v1872_v25 = vld [vmem:[%s2497_s2 + $0x120] ss:$8 sps:$4 sm:$0xff]  }
  0x2c   : > { %426 = vmatprep.subr.bf16.mxu0 %v1814_v28  ;;  %1132 = vmatpush1.bf16.msra.mxu1 %v1895_v57  ;;  %v1886_v28 = vld [vmem:[%s2497_s2 + $0x144] ss:$8 sps:$4 sm:$0xff]  }
  0x2d   : > { %1133 = vmatprep.subr.bf16.mxu1 %v1899_v60  ;;  %v1946_v57 = vld [vmem:[%s2497_s2 + $0x1e4] ss:$8 sps:$4 sm:$0xff]   ;;  %v1952_v60 = vld [vmem:[%s2497_s2 + $0x1f4] ss:$8 sps:$4 sm:$0xff]  }
  0x2f   : > { %427 = vmatpush1.bf16.msra.mxu0 %v1812_v32  ;;  %v1898_v32 = vld [vmem:[%s2497_s2 + $0x164] ss:$8 sps:$4 sm:$0xff]  }
  0x30   : > { %428 = vmatprep.subr.bf16.mxu0 %v1817_v33  ;;  %1134 = vmatpush1.bf16.msra.mxu1 %v1901_v61  ;;  %v1896_v33 = vld [vmem:[%s2497_s2 + $0x160] ss:$8 sps:$4 sm:$0xff]   ;;  %v1950_v61 = vld [vmem:[%s2497_s2 + $0x1f0] ss:$8 sps:$4 sm:$0xff]  }
  0x31   : > { %1135 = vmatprep.subr.bf16.mxu1 %v1905_v62 }
  0x33   : > { %429 = vmatpush1.bf16.msra.mxu0 %v1815_v36  ;;  %v1910_v36 = vld [vmem:[%s2497_s2 + $0x184] ss:$8 sps:$4 sm:$0xff]  }
  0x34   : > { %430 = vmatprep.subr.bf16.mxu0 %v1820_v37  ;;  %1136 = vmatpush1.bf16.msra.mxu1 %v1907_v1  ;;  %v1908_v37 = vld [vmem:[%s2497_s2 + $0x180] ss:$8 sps:$4 sm:$0xff]  }
  0x35   : > { %1137 = vmatprep.subr.bf16.mxu1 %v1911_v3 }
  0x37   : > { %431 = vmatpush1.bf16.msra.mxu0 %v1818_v40  ;;  %v1919_v40 = vld [vmem:[%s2497_s2 + $0xb0] ss:$8 sps:$4 sm:$0xff]  }
  0x38   : > { %432 = vmatprep.subr.bf16.mxu0 %v1823_v41  ;;  %v1922_v41 = vld [vmem:[%s2497_s2 + $0x1a4] ss:$8 sps:$4 sm:$0xff]  }
  0x3b   : > { %433 = vmatpush1.bf16.msra.mxu0 %v1821_v44  ;;  %v1925_v44 = vld [vmem:[%s2497_s2 + $0xc0] ss:$8 sps:$4 sm:$0xff]  }
  0x3c   : > { %434 = vmatprep.subr.bf16.mxu0 %v1826_v45  ;;  %v1928_v45 = vld [vmem:[%s2497_s2 + $0x1b4] ss:$8 sps:$4 sm:$0xff]  }
  0x3f   : > { %435 = vmatpush1.bf16.msra.mxu0 %v1824_v48  ;;  %v1926_v48 = vld [vmem:[%s2497_s2 + $0x1b0] ss:$8 sps:$4 sm:$0xff]  }
  0x40   : > { %436 = vmatprep.subr.bf16.mxu0 %v1829_v49  ;;  %v1931_v49 = vld [vmem:[%s2497_s2 + $0xd0] ss:$8 sps:$4 sm:$0xff]  }
  0x43   : > { %437 = vmatpush1.bf16.msra.mxu0 %v1827_v50  ;;  %v1934_v50 = vld [vmem:[%s2497_s2 + $0x1c4] ss:$8 sps:$4 sm:$0xff]  }
  0x44   : > { %565 = vmatprep.subr.bf16.mxu0 %v1832_v55  ;;  %v1941_v55 = vld [vmem:[%s2497_s2 + $0xf4] ss:$8 sps:$4 sm:$0xff]  }
  0x46   : > { %455 = vmatmul.mubr.bf16.vlgmr.msra.gmra.mrb[0].mxu0 %v182_v58  ;;  %v1944_v58 = vld [vmem:[%s2497_s2 + $0x1e0] ss:$8 sps:$4 sm:$0xff]  }
  0x47   : > { %566 = vmatpush1.bf16.msra.mxu0 %v1830_v56  ;;  %597 = vmatprep.mubr.bf16.mxu0 %v2006_v2  ;;  %v1913_v2 = vld [vmem:[%s2497_s2 + $0xa0] ss:$8 sps:$4 sm:$0xff]   ;;  %v1943_v56 = vld [vmem:[%s2497_s2 + $0xf0] ss:$8 sps:$4 sm:$0xff]  }
  0x48   : > { %567 = vmatprep.subr.bf16.mxu0 %v1835_v59  ;;  %1138 = vmatpush1.bf16.msra.mxu1 %v1913_v2  ;;  %v1949_v59 = vld [vmem:[%s2497_s2 + $0x204] ss:$8 sps:$4 sm:$0xff]  }
  0x49   : > { %1139 = vmatprep.subr.bf16.mxu1 %v1917_v7 }
  0x4b   : > { %568 = vmatpush1.bf16.msra.mxu0 %v1833_v63 }
  0x4c   : > { %569 = vmatprep.subr.bf16.mxu0 %v1838_v0  ;;  %1140 = vmatpush1.bf16.msra.mxu1 %v1919_v40  ;;  %v1953_v40 = vld [vmem:[%s2497_s2 + $0x210] ss:$8 sps:$4 sm:$0xff]  }
  0x4d   : > { %1141 = vmatprep.subr.bf16.mxu1 %v1923_v42  ;;  %v1958_v42 = vld [vmem:[%s2497_s2 + $0x224] ss:$8 sps:$4 sm:$0xff]  }
  0x4f   : > { %570 = vmatpush1.bf16.msra.mxu0 %v1836_v5 }
  0x50   : > { %571 = vmatprep.subr.bf16.mxu0 %v1841_v6  ;;  %1142 = vmatpush1.bf16.msra.mxu1 %v1925_v44 }
  0x51   : > { %1143 = vmatprep.subr.bf16.mxu1 %v1929_v46 }
  0x53   : > { %572 = vmatpush1.bf16.msra.mxu0 %v1839_v8 }
  0x54   : > { %573 = vmatprep.subr.bf16.mxu0 %v1844_v9  ;;  %1144 = vmatpush1.bf16.msra.mxu1 %v1931_v49 }
  0x55   : > { %1145 = vmatprep.subr.bf16.mxu1 %v1935_v51 }
  0x57   : > { %574 = vmatpush1.bf16.msra.mxu0 %v1842_v10 }
  0x58   : > { %575 = vmatprep.subr.bf16.mxu0 %v1847_v11  ;;  %1146 = vmatpush1.bf16.msra.mxu1 %v1937_v53  ;;  %v1964_v53 = vld [vmem:[%s2497_s2 + $0x244] ss:$8 sps:$4 sm:$0xff]  }
  0x59   : > { %1147 = vmatprep.subr.bf16.mxu1 %v1941_v55  ;;  %v1965_v55 = vld [vmem:[%s2497_s2 + $0x250] ss:$8 sps:$4 sm:$0xff]  }
  0x5b   : > { %576 = vmatpush1.bf16.msra.mxu0 %v1845_v12 }
  0x5c   : > { %577 = vmatprep.subr.bf16.mxu0 %v1850_v13  ;;  %1148 = vmatpush1.bf16.msra.mxu1 %v1943_v56  ;;  %v1970_v56 = vld [vmem:[%s2497_s2 + $0x264] ss:$8 sps:$4 sm:$0xff]  }
  0x5d   : > { %1374 = vmatprep.subr.bf16.mxu1 %v1949_v59  ;;  %v1971_v59 = vld [vmem:[%s2497_s2 + $0x270] ss:$8 sps:$4 sm:$0xff]  }
  0x5f   : > { %578 = vmatpush1.bf16.msra.mxu0 %v1848_v14 }
  0x60   : > { %579 = vmatprep.subr.bf16.mxu0 %v1853_v15 }
  0x63   : > { %580 = vmatpush1.bf16.msra.mxu0 %v1851_v16 }
  0x64   : > { %914 = vmatprep.subr.bf16.mxu0 %v1862_v19 }
  0x66   : > { %598 = vmatmul.mubr.bf16.vlgmr.msra.gmra.mrb[0].mxu0 %v467_v20 }
  0x67   : > { %915 = vmatpush1.bf16.msra.mxu0 %v1860_v21 }
  0x68   : > { %916 = vmatprep.subr.bf16.mxu0 %v1868_v22  ;;  %v1947_v22 = vld [vmem:[%s2497_s2 + $0x200] ss:$8 sps:$4 sm:$0xff]  }
  0x6b   : > { %917 = vmatpush1.bf16.msra.mxu0 %v1866_v23  ;;  %v1955_v23 = vld [vmem:[%s2497_s2 + $0x214] ss:$8 sps:$4 sm:$0xff]  }
  0x6c   : > { %918 = vmatprep.subr.bf16.mxu0 %v1874_v24 }
  0x6f   : > { %919 = vmatpush1.bf16.msra.mxu0 %v1872_v25 }
  0x70   : > { %920 = vmatprep.subr.bf16.mxu0 %v1880_v26 }
  0x73   : > { %921 = vmatpush1.bf16.msra.mxu0 %v1878_v27 }
  0x74   : > { %922 = vmatprep.subr.bf16.mxu0 %v1886_v28 }
  0x77   : > { %923 = vmatpush1.bf16.msra.mxu0 %v1884_v29 }
  0x78   : > { %924 = vmatprep.subr.bf16.mxu0 %v1892_v30 }
  0x7b   : > { %925 = vmatpush1.bf16.msra.mxu0 %v1890_v31 }
  0x7c   : > { %926 = vmatprep.subr.bf16.mxu0 %v1898_v32 }
  0x7f   : > { %927 = vmatpush1.bf16.msra.mxu0 %v1896_v33 }
  0x80   : > { %928 = vmatprep.subr.bf16.mxu0 %v1904_v34 }
  0x83   : > { %929 = vmatpush1.bf16.msra.mxu0 %v1902_v35 }
  0x84   : > { %930 = vmatprep.subr.bf16.mxu0 %v1910_v36 }
  0x87   : > { %931 = vmatpush1.bf16.msra.mxu0 %v1908_v37 }
  0x88   : > { %932 = vmatprep.subr.bf16.mxu0 %v1916_v38 }
  0x8b   : > { %933 = vmatpush1.bf16.msra.mxu0 %v1914_v39 }
  0x8c   : > { %934 = vmatprep.subr.bf16.mxu0 %v1922_v41 }
  0x8f   : > { %935 = vmatpush1.bf16.msra.mxu0 %v1920_v43 }
  0x90   : > { %936 = vmatprep.subr.bf16.mxu0 %v1928_v45 }
  0x93   : > { %937 = vmatpush1.bf16.msra.mxu0 %v1926_v48  ;;  %v1956_v48 = vld [vmem:[%s2497_s2 + $0x220] ss:$8 sps:$4 sm:$0xff]  }
  0x94   : > { %938 = vmatprep.subr.bf16.mxu0 %v1934_v50  ;;  %v1961_v50 = vld [vmem:[%s2497_s2 + $0x234] ss:$8 sps:$4 sm:$0xff]  }
  0x97   : > { %939 = vmatpush1.bf16.msra.mxu0 %v1932_v52  ;;  %v1959_v52 = vld [vmem:[%s2497_s2 + $0x230] ss:$8 sps:$4 sm:$0xff]  }
  0x98   : > { %940 = vmatprep.subr.bf16.mxu0 %v1940_v54  ;;  %v1967_v54 = vld [vmem:[%s2497_s2 + $0x254] ss:$8 sps:$4 sm:$0xff]  }
  0x9b   : > { %941 = vmatpush1.bf16.msra.mxu0 %v1938_v4  ;;  %v1962_v4 = vld [vmem:[%s2497_s2 + $0x240] ss:$8 sps:$4 sm:$0xff]  }
  0x9c   : > { %942 = vmatprep.subr.bf16.mxu0 %v1946_v57  ;;  %v1968_v57 = vld [vmem:[%s2497_s2 + $0x260] ss:$8 sps:$4 sm:$0xff]  }
  0x9f   : > { %943 = vmatpush1.bf16.msra.mxu0 %v1944_v58  ;;  %v1973_v58 = vld [vmem:[%s2497_s2 + $0x274] ss:$8 sps:$4 sm:$0xff]  }
  0xa0   : > { %944 = vmatprep.subr.bf16.mxu0 %v1952_v60  ;;  %v1976_v60 = vld [vmem:[%s2497_s2 + $0x284] ss:$8 sps:$4 sm:$0xff]  }
  0xa3   : > { %945 = vmatpush1.bf16.msra.mxu0 %v1950_v61  ;;  %v1974_v61 = vld [vmem:[%s2497_s2 + $0x280] ss:$8 sps:$4 sm:$0xff]  }
 0x139   : > { %v599_v62 = vpop.f32.mrb[0].mxu0 }
 0x13a   : > { %v612_v63 = vmax.f32 %v599_v62, 0.0  ;;  %v601_v0 = vpop.f32.mrb[1].mxu0  ;;  %v1979_v62 = vld [vmem:[%s2497_s2 + $0x294] ss:$8 sps:$4 sm:$0xff]  }
 0x13b   : > { %v613_v1 = vmax.f32 %v601_v0, 0.0  ;;  %v603_v3 = vpop.f32.mrb[2].mxu0  ;;  %v1982_v0 = vld [vmem:[%s2497_s2 + $0x2a4] ss:$8 sps:$4 sm:$0xff]  }
 0x13c   : > { %v630_v5 = vrot.slane %v612_v63, 7  ;;  %v614_v6 = vmax.f32 %v603_v3, 0.0  ;;  %v605_v2 = vpop.f32.mrb[3].mxu0  ;;  %v1977_v63 = vld [vmem:[%s2497_s2 + $0x290] ss:$8 sps:$4 sm:$0xff]  }
 0x13d   : > { %v631_v7 = vrot.slane %v613_v1, 7  ;;  %v615_v8 = vmax.f32 %v605_v2, 0.0  ;;  %v1980_v1 = vld [vmem:[%s2497_s2 + $0x2a0] ss:$8 sps:$4 sm:$0xff]   ;;  %v1985_v3 = vld [vmem:[%s2497_s2 + $0x2b4] ss:$8 sps:$4 sm:$0xff]  }
 0x13e   : > { %642 = vst [vmem:[#allocation3] sm:$0xfe] %v630_v5  ;;  %v632_v9 = vrot.slane %v614_v6, 7  ;;  %v1988_v6 = vld [vmem:[%s2497_s2 + $0x2c4] ss:$8 sps:$4 sm:$0xff]  }
 0x13f   : > { %643 = vst [vmem:[#allocation3 + $0x8] sm:$0xfe] %v631_v7  ;;  %v634_v10 = vrot.slane %v615_v8, 7  ;;  %v1986_v2 = vld [vmem:[%s2497_s2 + $0x2c0] ss:$8 sps:$4 sm:$0xff]  }
 0x140   : > { %v2388_v11 = vsel %vm629_vm1, %v630_v5, %v632_v9  ;;  %646 = vst [vmem:[#allocation3 + $0x20] sm:$0x1] %v632_v9  ;;  %v1983_v5 = vld [vmem:[%s2497_s2 + $0x2b0] ss:$8 sps:$4 sm:$0xff]   ;;  %v1994_v9 = vld [vmem:[%s2497_s2 + $0x2e4] ss:$8 sps:$4 sm:$0xff]  }
 0x141   : > { %v635_v12 = vsel %vm629_vm1, %v631_v7, %v634_v10  ;;  %647 = vst [vmem:[#allocation3 + $0x28] sm:$0x1] %v634_v10  ;;  %v1991_v7 = vld [vmem:[%s2497_s2 + $0x2d4] ss:$8 sps:$4 sm:$0xff]   ;;  %v1989_v8 = vld [vmem:[%s2497_s2 + $0x2d0] ss:$8 sps:$4 sm:$0xff]  }
 0x145   : > { %v648_v13 = vld [vmem:[#allocation3] sm:$0xff] }
 0x146   : > { %v686_v14 = vld [vmem:[#allocation3] sm:$0xfe]  ;;  %v649_v15 = vld [vmem:[#allocation3 + $0x8] sm:$0xff]  ;;  %v652_v25 = vpack.c.bf16 %v2388_v11, %v648_v13 }
 0x147   : > { %v687_v16 = vld [vmem:[#allocation3 + $0x8] sm:$0xfe]  ;;  %v690_v18 = vpack.c.bf16 %v2388_v11, %v686_v14  ;;  %v653_v19 = vpack.c.bf16 %v635_v12, %v649_v15  ;;  %v688_v24 = vld [vmem:[#allocation3 + $0x20] sm:$0x1]  ;;  %v1997_v13 = vld [vmem:[%s2497_s2 + $0x2f4] ss:$8 sps:$4 sm:$0xff]  }
 0x148   : > { %v1161_v17 = vld [vmem:[#allocation3 + $0x8] sm:$0xfc]  ;;  %v691_v20 = vpack.c.bf16 %v635_v12, %v687_v16  ;;  %v1163_v26 = vld [vmem:[#allocation3 + $0x28] sm:$0x3]  ;;  %v692_v28 = vpack.c.bf16 %v688_v24, %v688_v24  ;;  %v1162_v10 = vld [vmem:[#allocation3 + $0x20] sm:$0x3] }
 0x149   : > { %v1165_v21 = vpack.c.bf16 %v635_v12, %v1161_v17  ;;  %v689_v27 = vld [vmem:[#allocation3 + $0x28] sm:$0x1]  ;;  %v731_v29 = vshll.u32 %v690_v18, 16  ;;  %1149 = vmatprep.mubr.bf16.mxu1 %v653_v19  ;;  %v1167_v31 = vpack.c.bf16 %v1163_v26, %v1163_v26  ;;  %v729_v33 = vshrl.u32 %v690_v18, 16  ;;  %v1160_v14 = vld [vmem:[#allocation3] sm:$0xfc] }
 0x14a   : > { %v743_v30 = vshll.u32 %v691_v20, 16  ;;  %1150 = vmatmul.mubr.bf16.vlgmr.msra.gmra.mrb[0].mxu1 %v652_v25  ;;  %v693_v32 = vpack.c.bf16 %v689_v27, %v689_v27  ;;  %v736_v35 = vshll.u32 %v692_v28, 16  ;;  %v741_v36 = vshrl.u32 %v691_v20, 16  ;;  %v1992_v12 = vld [vmem:[%s2497_s2 + $0x2e0] ss:$8 sps:$4 sm:$0xff]  }
 0x14b   : > { %v733_v34 = vrot.slane %v731_v29, 1  ;;  %v1209_v38 = vrot.slane %v1165_v21, 1  ;;  %1375 = vmatpush1.bf16.msra.mxu1 %v1947_v22  ;;  %v1210_v39 = vrot.slane %v1167_v31, 1  ;;  %v1166_v15 = vpack.c.bf16 %v1162_v10, %v1162_v10  ;;  %v1995_v16 = vld [vmem:[%s2497_s2 + $0x2f0] ss:$8 sps:$4 sm:$0xff]  }
 0x14c   : > { %v745_v37 = vrot.slane %v743_v30, 1  ;;  %1376 = vmatprep.subr.bf16.mxu1 %v1955_v23  ;;  %v748_v41 = vshll.u32 %v693_v32, 16  ;;  %v738_v46 = vrot.slane %v736_v35, 1  ;;  %v1164_v17 = vpack.c.bf16 %v2388_v11, %v1160_v14 }
 0x14d   : > { %v1211_v43 = vsel %vm1205_vm2, %v1209_v38, %v1210_v39  ;;  %v734_v45 = vor.u32 %v733_v34, %v729_v33  ;;  %v1207_v18 = vrot.slane %v1166_v15, 1 }
 0x14e   : > { %v746_v44 = vor.u32 %v745_v37, %v741_v36  ;;  %1406 = vmatprep.mubr.bf16.mxu1 %v1211_v43  ;;  %v750_v47 = vrot.slane %v748_v41, 1  ;;  %v1206_v19 = vrot.slane %v1164_v17, 1 }
 0x14f   : > { %1377 = vmatpush1.bf16.msra.mxu1 %v1953_v40  ;;  %v739_v51 = vsel %vm727_vm3, %v734_v45, %v738_v46 }
 0x150   : > { %v751_v49 = vsel %vm727_vm3, %v746_v44, %v750_v47  ;;  %1378 = vmatprep.subr.bf16.mxu1 %v1958_v42  ;;  %v1208_v20 = vsel %vm1205_vm2, %v1206_v19, %v1207_v18 }
 0x151   : > { %946 = vmatprep.mubr.bf16.mxu0 %v751_v49 }
 0x152   : > { %947 = vmatmul.mubr.bf16.vlgmr.msra.gmra.mrb[4].mxu0 %v739_v51 }
 0x153   : > { %1379 = vmatpush1.bf16.msra.mxu1 %v1956_v48 }
 0x154   : > { %1380 = vmatprep.subr.bf16.mxu1 %v1961_v50 }
 0x157   : > { %1381 = vmatpush1.bf16.msra.mxu1 %v1959_v52 }
 0x158   : > { %1382 = vmatprep.subr.bf16.mxu1 %v1964_v53 }
 0x15b   : > { %1383 = vmatpush1.bf16.msra.mxu1 %v1962_v4 }
 0x15c   : > { %1384 = vmatprep.subr.bf16.mxu1 %v1967_v54 }
 0x15f   : > { %1385 = vmatpush1.bf16.msra.mxu1 %v1965_v55 }
 0x160   : > { %1386 = vmatprep.subr.bf16.mxu1 %v1970_v56 }
 0x163   : > { %1387 = vmatpush1.bf16.msra.mxu1 %v1968_v57 }
 0x164   : > { %1388 = vmatprep.subr.bf16.mxu1 %v1973_v58 }
 0x167   : > { %1389 = vmatpush1.bf16.msra.mxu1 %v1971_v59 }
 0x168   : > { %1390 = vmatprep.subr.bf16.mxu1 %v1976_v60 }
 0x16b   : > { %1391 = vmatpush1.bf16.msra.mxu1 %v1974_v61 }
 0x16c   : > { %1392 = vmatprep.subr.bf16.mxu1 %v1979_v62 }
 0x16f   : > { %1393 = vmatpush1.bf16.msra.mxu1 %v1977_v63 }
 0x170   : > { %1394 = vmatprep.subr.bf16.mxu1 %v1982_v0 }
 0x173   : > { %1395 = vmatpush1.bf16.msra.mxu1 %v1980_v1 }
 0x174   : > { %1396 = vmatprep.subr.bf16.mxu1 %v1985_v3 }
 0x177   : > { %1397 = vmatpush1.bf16.msra.mxu1 %v1983_v5 }
 0x178   : > { %1398 = vmatprep.subr.bf16.mxu1 %v1988_v6 }
 0x17b   : > { %1399 = vmatpush1.bf16.msra.mxu1 %v1986_v2 }
 0x17c   : > { %1400 = vmatprep.subr.bf16.mxu1 %v1991_v7 }
 0x17f   : > { %1401 = vmatpush1.bf16.msra.mxu1 %v1989_v8 }
 0x180   : > { %1402 = vmatprep.subr.bf16.mxu1 %v1994_v9 }
 0x183   : > { %1403 = vmatpush1.bf16.msra.mxu1 %v1992_v12 }
 0x184   : > { %1404 = vmatprep.subr.bf16.mxu1 %v1997_v13 }
 0x187   : > { %1405 = vmatpush1.bf16.msra.mxu1 %v1995_v16 }
 0x18a   : > { %1407 = vmatmul.mubr.bf16.vlgmr.msra.gmra.mrb[0].mxu1 %v1208_v20 }
 0x225   : > { %v948_v21 = vpop.f32.mrb[4].mxu0 }
 0x226   : > { %v950_v22 = vpop.f32.mrb[5].mxu0 }
 0x227   : > { %v952_v23 = vpop.f32.mrb[6].mxu0 }
 0x228   : > { %v954_v24 = vpop.f32.mrb[7].mxu0 }
 0x25d   : > { %v1408_v25 = vpop.f32.mrb[0].mxu1 }
 0x25e   : > { %v1755_v26 = vadd.f32 %v1408_v25, %v948_v21  ;;  %v1410_v27 = vpop.f32.mrb[1].mxu1 }
 0x25f   : > { %v1756_v28 = vadd.f32 %v1410_v27, %v950_v22  ;;  %v1412_v29 = vpop.f32.mrb[2].mxu1 }
 0x260   : > { %v1421_v30 = vmax.f32 %v1755_v26, 0.0  ;;  %v1757_v31 = vadd.f32 %v1412_v29, %v952_v23  ;;  %v1414_v11 = vpop.f32.mrb[3].mxu1 }
 0x261   : > { %v1422_v32 = vmax.f32 %v1756_v28, 0.0  ;;  %v1758_v33 = vadd.f32 %v1414_v11, %v954_v24 }
 0x262   : > { %v1423_v34 = vmax.f32 %v1757_v31, 0.0 }
 0x263   : > { %v1749_v35 = vpack.c.bf16 %v1422_v32, %v1421_v30  ;;  %v1424_v36 = vmax.f32 %v1758_v33, 0.0 }
 0x265   : > { %1437 = vst [vmem:[%s170_s8] sm:$0xff] %v1749_v35  ;;  %v1750_v37 = vpack.c.bf16 %v1424_v36, %v1423_v34 }
 0x267   : > { %1438 = vst [vmem:[%s170_s8 + $0x8] sm:$0xff] %v1750_v37 }
 0x268 PF: > { %s13_s12 = sadd.s32 1, %s2004_s12  }
 0x269   : > { %p10_p4 = scmp.ge.s32.totalorder %s13_s12, 4  }
 0x26b   :  { %12 = sbr.rel (!%p10_p4) target bundleno = 1 (0x1), region = 67 }

// kernel: unet_forward.12
= control target key start
LH: loop header
LB: loop body
LE: loop exit
PB: predicated region body
PF: predicated region fallthrough
CT: control target
= control target key end

     0   :  { %s1947_s12 = smov 0   ;;  %s2407_s0 = inlined_call_operand.vmem [shape: bf16[2,8,128], index: 0, kind: input, shape index: {}]   ;;  %s2408_s1 = inlined_call_operand.vmem [shape: bf16[3,128,256], index: 1, kind: input, shape index: {}]   ;;  %s2409_s2 = inlined_call_operand.vmem [shape: bf16[3,256,256], index: 2, kind: input, shape index: {}]   ;;  %s2410_s3 = inlined_call_operand.vmem [shape: bf16[2,8,256], index: 3, kind: output, shape index: {}]  }
   0x1 LB: > { %s1423_s13 = sadd.s32 4294967295, %s1923_s12   ;;  %p1427_p0 = scmp.ge.s32.totalorder %s1923_s12, 1  ;;  %s1923_s12 = sphi %s1947_s12, %s13_s12  }
   0x2   : > { %p136_p1 = scmp.lt.s32.totalorder %s1923_s12, 3 }
   0x4   : > { %p137_p2 = pnand %p1427_p0, %p136_p1 }
   0x5   : > { %v1700_v0 = vld [vmem:[%s2408_s1 + $0x84] ss:$8 sps:$4 sm:$0xff] (!%p137_p2)   ;;  %p159_p3 = scmp.lt.s32.totalorder (!%p137_p2), %s1423_s13, 1  ;;  %v1702_v1 = vld [vmem:[%s2408_s1 + $0x80] ss:$8 sps:$4 sm:$0xff] (!%p137_p2)   ;;  %v1925_v2 = vmov (!%p137_p2), 0  }
   0x6   : > { %140 = sbr.rel (%p137_p2) target bundleno = 614 (0x266), region = 32  ;;  %323 = vmatprep.mubr.bf16.mxu0 (!%p137_p2), %v1925_v2  ;;  %291 = vmatprep.subr.bf16.mxu0 (!%p137_p2), %v1700_v0  ;;  %v1703_v3 = vld [vmem:[%s2408_s1 + $0x94] ss:$8 sps:$4 sm:$0xff] (!%p137_p2)   ;;  %v1926_v4 = vmov (!%p137_p2), 0.0   ;;  %v1705_v5 = vld [vmem:[%s2408_s1 + $0x90] ss:$8 sps:$4 sm:$0xff] (!%p137_p2)  }
   0x7   : > { %171 = vst [vmem:[#allocation2] sm:$0x1] (!%p137_p2), %v1926_v4  ;;  %172 = vst [vmem:[#allocation2 + $0x9] sm:$0x1] (!%p137_p2), %v1926_v4  ;;  %292 = vmatpush1.bf16.msra.mxu0 (!%p137_p2), %v1702_v1  ;;  %v1706_v6 = vld [vmem:[%s2408_s1 + $0xa4] ss:$8 sps:$4 sm:$0xff] (!%p137_p2)  }
   0x8   : > { %293 = vmatprep.subr.bf16.mxu0 (!%p137_p2), %v1703_v3  ;;  %v1708_v7 = vld [vmem:[%s2408_s1 + $0xa0] ss:$8 sps:$4 sm:$0xff] (!%p137_p2)   ;;  %v1709_v8 = vld [vmem:[%s2408_s1 + $0xb4] ss:$8 sps:$4 sm:$0xff] (!%p137_p2)   ;;  %v1711_v9 = vld [vmem:[%s2408_s1 + $0xb0] ss:$8 sps:$4 sm:$0xff] (!%p137_p2)  }
   0x9   : > { %v1712_v10 = vld [vmem:[%s2408_s1 + $0xc4] ss:$8 sps:$4 sm:$0xff] (!%p137_p2)   ;;  %v1714_v13 = vld [vmem:[%s2408_s1 + $0xc0] ss:$8 sps:$4 sm:$0xff] (!%p137_p2)   ;;  %v1715_v14 = vld [vmem:[%s2408_s1 + $0xd4] ss:$8 sps:$4 sm:$0xff] (!%p137_p2)  }
   0xa   : > { %v1717_v15 = vld [vmem:[%s2408_s1 + $0xd0] ss:$8 sps:$4 sm:$0xff] (!%p137_p2)   ;;  %v1718_v16 = vld [vmem:[%s2408_s1 + $0xe4] ss:$8 sps:$4 sm:$0xff] (!%p137_p2)   ;;  %v1720_v17 = vld [vmem:[%s2408_s1 + $0xe0] ss:$8 sps:$4 sm:$0xff] (!%p137_p2)  }
   0xb   : > { %294 = vmatpush1.bf16.msra.mxu0 (!%p137_p2), %v1705_v5  ;;  %v1721_v18 = vld [vmem:[%s2408_s1 + $0xf4] ss:$8 sps:$4 sm:$0xff] (!%p137_p2)   ;;  %v1723_v19 = vld [vmem:[%s2408_s1 + $0xf0] ss:$8 sps:$4 sm:$0xff] (!%p137_p2)   ;;  %v1726_v20 = vld [vmem:[%s2408_s1 + $0x4] ss:$8 sps:$4 sm:$0xff] (!%p137_p2)  }
   0xc   : > { %295 = vmatprep.subr.bf16.mxu0 (!%p137_p2), %v1706_v6  ;;  %v1724_v22 = vld [vmem:[%s2408_s1] ss:$8 sps:$4 sm:$0xff] (!%p137_p2)   ;;  %v1730_v23 = vld [vmem:[%s2408_s1 + $0x14] ss:$8 sps:$4 sm:$0xff] (!%p137_p2)   ;;  %v1773_v24 = vld [vmem:[%s2409_s2 + $0x4] ss:$8 sps:$4 sm:$0xff] (!%p137_p2)  }
   0xd   : > { %s2412_s13 = smov (!%p159_p3, %s1423_s13), 1  ;;  %v1775_v25 = vld [vmem:[%s2409_s2] ss:$8 sps:$4 sm:$0xff]   ;;  %v1728_v26 = vld [vmem:[%s2408_s1 + $0x10] ss:$8 sps:$4 sm:$0xff]   ;;  %1068 = vmatprep.subr.bf16.mxu1 %v1773_v24 }
   0xe   : > { %s1428_s28 = sshll.u32 %s2412_s13, 2  ;;  %v1776_v27 = vld [vmem:[%s2409_s2 + $0x14] ss:$8 sps:$4 sm:$0xff]   ;;  %v1733_v28 = vld [vmem:[%s2408_s1 + $0x24] ss:$8 sps:$4 sm:$0xff]   ;;  %1069 = vmatpush1.bf16.msra.mxu1 %v1775_v25  ;;  %s1674_s4 = sshll.u32 %s2412_s13, 3 }
   0xf   : > { %296 = vmatpush1.bf16.msra.mxu0 %v1708_v7  ;;  %s162_s6 = scalar_lea.vmem %s2407_s0, %s1428_s28  ;;  %v1778_v29 = vld [vmem:[%s2409_s2 + $0x10] ss:$8 sps:$4 sm:$0xff]   ;;  %1070 = vmatprep.subr.bf16.mxu1 %v1776_v27  ;;  %v1782_v30 = vld [vmem:[%s2409_s2 + $0x24] ss:$8 sps:$4 sm:$0xff]   ;;  %v1731_v31 = vld [vmem:[%s2408_s1 + $0x20] ss:$8 sps:$4 sm:$0xff]   ;;  %s167_s8 = scalar_lea.vmem %s2410_s3, %s1674_s4 }
  0x10   : > { %297 = vmatprep.subr.bf16.mxu0 %v1709_v8  ;;  %v169_v11 = vld [vmem:[%s162_s6] sm:$0xf]  ;;  %v1736_v32 = vld [vmem:[%s2408_s1 + $0x34] ss:$8 sps:$4 sm:$0xff]   ;;  %v1734_v35 = vld [vmem:[%s2408_s1 + $0x30] ss:$8 sps:$4 sm:$0xff]  }
  0x11   : > { %v170_v12 = vunpack.c.l.bf16 %v169_v11  ;;  %v1727_v21 = vld [vmem:[%s162_s6] ss:$0 sps:$4 sm:$0xff]   ;;  %v1788_v34 = vld [vmem:[%s2409_s2 + $0x34] ss:$8 sps:$4 sm:$0xff]   ;;  %v1739_v36 = vld [vmem:[%s2408_s1 + $0x44] ss:$8 sps:$4 sm:$0xff]  }
  0x12   : > { %1071 = vmatpush1.bf16.msra.mxu1 %v1778_v29  ;;  %v1784_v33 = vld [vmem:[%s2409_s2 + $0x20] ss:$8 sps:$4 sm:$0xff]   ;;  %v1790_v37 = vld [vmem:[%s2409_s2 + $0x30] ss:$8 sps:$4 sm:$0xff]   ;;  %v1794_v38 = vld [vmem:[%s2409_s2 + $0x44] ss:$8 sps:$4 sm:$0xff]  }
  0x13   : > { %298 = vmatpush1.bf16.msra.mxu0 %v1711_v9  ;;  %173 = vst [vmem:[#allocation2 + $0x1] sm:$0xff] %v170_v12  ;;  %1072 = vmatprep.subr.bf16.mxu1 %v1782_v30  ;;  %v1737_v39 = vld [vmem:[%s2408_s1 + $0x40] ss:$8 sps:$4 sm:$0xff]   ;;  %v1742_v40 = vld [vmem:[%s2408_s1 + $0x54] ss:$8 sps:$4 sm:$0xff]  }
  0x14   : > { %299 = vmatprep.subr.bf16.mxu0 %v1712_v10  ;;  %v1796_v41 = vld [vmem:[%s2409_s2 + $0x40] ss:$8 sps:$4 sm:$0xff]   ;;  %v1800_v42 = vld [vmem:[%s2409_s2 + $0x54] ss:$8 sps:$4 sm:$0xff]   ;;  %v1740_v43 = vld [vmem:[%s2408_s1 + $0x50] ss:$8 sps:$4 sm:$0xff]  }
  0x15   : > { %v1745_v44 = vld [vmem:[%s2408_s1 + $0x64] ss:$8 sps:$4 sm:$0xff]   ;;  %v1802_v45 = vld [vmem:[%s2409_s2 + $0x50] ss:$8 sps:$4 sm:$0xff]   ;;  %v1743_v47 = vld [vmem:[%s2408_s1 + $0x60] ss:$8 sps:$4 sm:$0xff]  }
  0x16   : > { %1073 = vmatpush1.bf16.msra.mxu1 %v1784_v33  ;;  %v1806_v46 = vld [vmem:[%s2409_s2 + $0x64] ss:$8 sps:$4 sm:$0xff]   ;;  %v1748_v48 = vld [vmem:[%s2408_s1 + $0x74] ss:$8 sps:$4 sm:$0xff]   ;;  %v1808_v49 = vld [vmem:[%s2409_s2 + $0x60] ss:$8 sps:$4 sm:$0xff]  }
  0x17   : > { %300 = vmatpush1.bf16.msra.mxu0 %v1714_v13  ;;  %1074 = vmatprep.subr.bf16.mxu1 %v1788_v34  ;;  %v1812_v50 = vld [vmem:[%s2409_s2 + $0x74] ss:$8 sps:$4 sm:$0xff]   ;;  %v1746_v51 = vld [vmem:[%s2408_s1 + $0x70] ss:$8 sps:$4 sm:$0xff]   ;;  %v1751_v53 = vld [vmem:[%s2408_s1 + $0x104] ss:$8 sps:$4 sm:$0xff]  }
  0x18   : > { %301 = vmatprep.subr.bf16.mxu0 %v1715_v14  ;;  %v1814_v54 = vld [vmem:[%s2409_s2 + $0x70] ss:$8 sps:$4 sm:$0xff]   ;;  %v1749_v55 = vld [vmem:[%s2408_s1 + $0x100] ss:$8 sps:$4 sm:$0xff]   ;;  %v1818_v57 = vld [vmem:[%s2409_s2 + $0x84] ss:$8 sps:$4 sm:$0xff]  }
  0x19   : > { %v1754_v58 = vld [vmem:[%s2408_s1 + $0x114] ss:$8 sps:$4 sm:$0xff]   ;;  %v1820_v59 = vld [vmem:[%s2409_s2 + $0x80] ss:$8 sps:$4 sm:$0xff]   ;;  %v1752_v61 = vld [vmem:[%s2408_s1 + $0x110] ss:$8 sps:$4 sm:$0xff]  }
  0x1a   : > { %1075 = vmatpush1.bf16.msra.mxu1 %v1790_v37  ;;  %v174_v52 = vld [vmem:[#allocation2] sm:$0xff]  ;;  %v1824_v60 = vld [vmem:[%s2409_s2 + $0x94] ss:$8 sps:$4 sm:$0xff]   ;;  %v1826_v63 = vld [vmem:[%s2409_s2 + $0x90] ss:$8 sps:$4 sm:$0xff]  }
  0x1b   : > { %302 = vmatpush1.bf16.msra.mxu0 %v1717_v15  ;;  %1076 = vmatprep.subr.bf16.mxu1 %v1794_v38  ;;  %v175_v56 = vpack.c.bf16 %v174_v52, %v174_v52  ;;  %v1757_v62 = vld [vmem:[%s2408_s1 + $0x124] ss:$8 sps:$4 sm:$0xff]   ;;  %v1755_v1 = vld [vmem:[%s2408_s1 + $0x120] ss:$8 sps:$4 sm:$0xff]   ;;  %v1760_v3 = vld [vmem:[%s2408_s1 + $0x134] ss:$8 sps:$4 sm:$0xff]  }
  0x1c   : > { %303 = vmatprep.subr.bf16.mxu0 %v1718_v16  ;;  %v1830_v0 = vld [vmem:[%s2409_s2 + $0xa4] ss:$8 sps:$4 sm:$0xff]   ;;  %v1836_v5 = vld [vmem:[%s2409_s2 + $0xb4] ss:$8 sps:$4 sm:$0xff]   ;;  %v1758_v6 = vld [vmem:[%s2408_s1 + $0x130] ss:$8 sps:$4 sm:$0xff]  }
  0x1d   : > { %v1763_v7 = vld [vmem:[%s2408_s1 + $0x144] ss:$8 sps:$4 sm:$0xff]   ;;  %v1838_v8 = vld [vmem:[%s2409_s2 + $0xb0] ss:$8 sps:$4 sm:$0xff]   ;;  %v1761_v9 = vld [vmem:[%s2408_s1 + $0x140] ss:$8 sps:$4 sm:$0xff]  }
  0x1e   : > { %1077 = vmatpush1.bf16.msra.mxu1 %v1796_v41  ;;  %v1766_v10 = vld [vmem:[%s2408_s1 + $0x154] ss:$8 sps:$4 sm:$0xff]   ;;  %v1764_v11 = vld [vmem:[%s2408_s1 + $0x150] ss:$8 sps:$4 sm:$0xff]   ;;  %v1769_v12 = vld [vmem:[%s2408_s1 + $0x164] ss:$8 sps:$4 sm:$0xff]  }
  0x1f   : > { %304 = vmatpush1.bf16.msra.mxu0 %v1720_v17  ;;  %1078 = vmatprep.subr.bf16.mxu1 %v1800_v42  ;;  %v1767_v13 = vld [vmem:[%s2408_s1 + $0x160] ss:$8 sps:$4 sm:$0xff]   ;;  %v1772_v14 = vld [vmem:[%s2408_s1 + $0x174] ss:$8 sps:$4 sm:$0xff]   ;;  %v1770_v15 = vld [vmem:[%s2408_s1 + $0x170] ss:$8 sps:$4 sm:$0xff]  }
  0x20   : > { %305 = vmatprep.subr.bf16.mxu0 %v1721_v18  ;;  %v453_v16 = vld [vmem:[#allocation2 + $0x2] sm:$0xff]  ;;  %v1799_v24 = vld [vmem:[%s2409_s2 + $0x134] ss:$8 sps:$4 sm:$0xff]   ;;  %v1797_v25 = vld [vmem:[%s2409_s2 + $0x130] ss:$8 sps:$4 sm:$0xff]  }
  0x21   : > { %v1781_v17 = vld [vmem:[%s2409_s2 + $0x104] ss:$8 sps:$4 sm:$0xff]   ;;  %v454_v18 = vpack.c.bf16 %v453_v16, %v453_v16  ;;  %v1803_v27 = vld [vmem:[%s2409_s2 + $0x140] ss:$8 sps:$4 sm:$0xff]   ;;  %v1809_v29 = vld [vmem:[%s2409_s2 + $0x150] ss:$8 sps:$4 sm:$0xff]  }
  0x22   : > { %1079 = vmatpush1.bf16.msra.mxu1 %v1802_v45  ;;  %v1817_v30 = vld [vmem:[%s2409_s2 + $0x164] ss:$8 sps:$4 sm:$0xff]   ;;  %v1821_v33 = vld [vmem:[%s2409_s2 + $0x170] ss:$8 sps:$4 sm:$0xff]   ;;  %v1844_v41 = vld [vmem:[%s2409_s2 + $0xc0] ss:$8 sps:$4 sm:$0xff]   ;;  %v597_v45 = vlaneseq }
  0x23   : > { %306 = vmatpush1.bf16.msra.mxu0 %v1723_v19  ;;  %1080 = vmatprep.subr.bf16.mxu1 %v1806_v46  ;;  %v1779_v19 = vld [vmem:[%s2409_s2 + $0x100] ss:$8 sps:$4 sm:$0xff]   ;;  %v1829_v34 = vld [vmem:[%s2409_s2 + $0x184] ss:$8 sps:$4 sm:$0xff]   ;;  %v1833_v37 = vld [vmem:[%s2409_s2 + $0x190] ss:$8 sps:$4 sm:$0xff]  }
  0x24   : > { %412 = vmatprep.subr.bf16.mxu0 %v1726_v20  ;;  %v1787_v20 = vld [vmem:[%s2409_s2 + $0x114] ss:$8 sps:$4 sm:$0xff]   ;;  %v1841_v38 = vld [vmem:[%s2409_s2 + $0x1a4] ss:$8 sps:$4 sm:$0xff]   ;;  %v1850_v46 = vld [vmem:[%s2409_s2 + $0xd0] ss:$8 sps:$4 sm:$0xff]  }
  0x25   : > { %v1847_v42 = vld [vmem:[%s2409_s2 + $0x1b4] ss:$8 sps:$4 sm:$0xff]   ;;  %vm599_vm0 = vcmp.lt.s32.totalorder %v597_v45, 256  ;;  %v1857_v52 = vld [vmem:[%s2409_s2 + $0x1d0] ss:$8 sps:$4 sm:$0xff]  }
  0x26   : > { %324 = vmatmul.mubr.bf16.vlgmr.msra.gmra.mrb[0].mxu0 %v1727_v21  ;;  %1081 = vmatpush1.bf16.msra.mxu1 %v1808_v49  ;;  %v1785_v21 = vld [vmem:[%s2409_s2 + $0x110] ss:$8 sps:$4 sm:$0xff]   ;;  %601 = vst.msk [vmem:[#allocation3] ss:$8 sm:$0x3] %vm599_vm0, %v1926_v4 }
  0x27   : > { %413 = vmatpush1.bf16.msra.mxu0 %v1724_v22  ;;  %444 = vmatprep.mubr.bf16.mxu0 %v1925_v2  ;;  %v1793_v22 = vld [vmem:[%s2409_s2 + $0x124] ss:$8 sps:$4 sm:$0xff]   ;;  %604 = vst.msk [vmem:[#allocation3 + $0x11] ss:$8 sm:$0x3] %vm599_vm0, %v1926_v4 }
  0x28   : > { %414 = vmatprep.subr.bf16.mxu0 %v1730_v23  ;;  %1082 = vmatprep.subr.bf16.mxu1 %v1812_v50  ;;  %v1791_v23 = vld [vmem:[%s2409_s2 + $0x120] ss:$8 sps:$4 sm:$0xff]   ;;  %v1854_v49 = vld [vmem:[%s2409_s2 + $0xe4] ss:$8 sps:$4 sm:$0xff]   ;;  %v1860_v4 = vld [vmem:[%s2409_s2 + $0xf4] ss:$8 sps:$4 sm:$0xff]  }
  0x29   : > { %v1856_v50 = vld [vmem:[%s2409_s2 + $0xe0] ss:$8 sps:$4 sm:$0xff]   ;;  %v1901_v45 = vld [vmem:[%s2409_s2 + $0x2a4] ss:$8 sps:$4 sm:$0xff]  }
  0x2a   : > { %1083 = vmatpush1.bf16.msra.mxu1 %v1814_v54  ;;  %v1865_v54 = vld [vmem:[%s2409_s2 + $0x1e4] ss:$8 sps:$4 sm:$0xff]  }
  0x2b   : > { %415 = vmatpush1.bf16.msra.mxu0 %v1728_v26  ;;  %1084 = vmatprep.subr.bf16.mxu1 %v1818_v57  ;;  %v1805_v26 = vld [vmem:[%s2409_s2 + $0x144] ss:$8 sps:$4 sm:$0xff]   ;;  %v1869_v57 = vld [vmem:[%s2409_s2 + $0x1f0] ss:$8 sps:$4 sm:$0xff]  }
  0x2c   : > { %416 = vmatprep.subr.bf16.mxu0 %v1733_v28  ;;  %v1811_v28 = vld [vmem:[%s2409_s2 + $0x154] ss:$8 sps:$4 sm:$0xff]  }
  0x2e   : > { %1085 = vmatpush1.bf16.msra.mxu1 %v1820_v59 }
  0x2f   : > { %417 = vmatpush1.bf16.msra.mxu0 %v1731_v31  ;;  %1086 = vmatprep.subr.bf16.mxu1 %v1824_v60  ;;  %v1815_v31 = vld [vmem:[%s2409_s2 + $0x160] ss:$8 sps:$4 sm:$0xff]  }
  0x30   : > { %418 = vmatprep.subr.bf16.mxu0 %v1736_v32  ;;  %v1823_v32 = vld [vmem:[%s2409_s2 + $0x174] ss:$8 sps:$4 sm:$0xff]  }
  0x32   : > { %1087 = vmatpush1.bf16.msra.mxu1 %v1826_v63 }
  0x33   : > { %419 = vmatpush1.bf16.msra.mxu0 %v1734_v35  ;;  %1088 = vmatprep.subr.bf16.mxu1 %v1830_v0  ;;  %v1827_v35 = vld [vmem:[%s2409_s2 + $0x180] ss:$8 sps:$4 sm:$0xff]  }
  0x34   : > { %420 = vmatprep.subr.bf16.mxu0 %v1739_v36  ;;  %v1835_v36 = vld [vmem:[%s2409_s2 + $0x194] ss:$8 sps:$4 sm:$0xff]  }
  0x37   : > { %421 = vmatpush1.bf16.msra.mxu0 %v1737_v39  ;;  %v1839_v39 = vld [vmem:[%s2409_s2 + $0x1a0] ss:$8 sps:$4 sm:$0xff]  }
  0x38   : > { %422 = vmatprep.subr.bf16.mxu0 %v1742_v40  ;;  %v1842_v40 = vld [vmem:[%s2409_s2 + $0xc4] ss:$8 sps:$4 sm:$0xff]  }
  0x3b   : > { %423 = vmatpush1.bf16.msra.mxu0 %v1740_v43  ;;  %v1845_v43 = vld [vmem:[%s2409_s2 + $0x1b0] ss:$8 sps:$4 sm:$0xff]  }
  0x3c   : > { %424 = vmatprep.subr.bf16.mxu0 %v1745_v44  ;;  %v1848_v44 = vld [vmem:[%s2409_s2 + $0xd4] ss:$8 sps:$4 sm:$0xff]  }
  0x3f   : > { %425 = vmatpush1.bf16.msra.mxu0 %v1743_v47  ;;  %v1853_v47 = vld [vmem:[%s2409_s2 + $0x1c4] ss:$8 sps:$4 sm:$0xff]  }
  0x40   : > { %426 = vmatprep.subr.bf16.mxu0 %v1748_v48  ;;  %v1851_v48 = vld [vmem:[%s2409_s2 + $0x1c0] ss:$8 sps:$4 sm:$0xff]  }
  0x43   : > { %427 = vmatpush1.bf16.msra.mxu0 %v1746_v51  ;;  %v1859_v51 = vld [vmem:[%s2409_s2 + $0x1d4] ss:$8 sps:$4 sm:$0xff]  }
  0x44   : > { %552 = vmatprep.subr.bf16.mxu0 %v1751_v53  ;;  %v1862_v53 = vld [vmem:[%s2409_s2 + $0xf0] ss:$8 sps:$4 sm:$0xff]  }
  0x46   : > { %445 = vmatmul.mubr.bf16.vlgmr.msra.gmra.mrb[0].mxu0 %v175_v56  ;;  %v1868_v56 = vld [vmem:[%s2409_s2 + $0x204] ss:$8 sps:$4 sm:$0xff]  }
  0x47   : > { %553 = vmatpush1.bf16.msra.mxu0 %v1749_v55  ;;  %584 = vmatprep.mubr.bf16.mxu0 %v1925_v2  ;;  %v1832_v2 = vld [vmem:[%s2409_s2 + $0xa0] ss:$8 sps:$4 sm:$0xff]  }
  0x48   : > { %554 = vmatprep.subr.bf16.mxu0 %v1754_v58  ;;  %1089 = vmatpush1.bf16.msra.mxu1 %v1832_v2  ;;  %v1863_v55 = vld [vmem:[%s2409_s2 + $0x1e0] ss:$8 sps:$4 sm:$0xff]   ;;  %v1871_v58 = vld [vmem:[%s2409_s2 + $0x1f4] ss:$8 sps:$4 sm:$0xff]  }
  0x49   : > { %1090 = vmatprep.subr.bf16.mxu1 %v1836_v5 }
  0x4b   : > { %555 = vmatpush1.bf16.msra.mxu0 %v1752_v61 }
  0x4c   : > { %556 = vmatprep.subr.bf16.mxu0 %v1757_v62  ;;  %1091 = vmatpush1.bf16.msra.mxu1 %v1838_v8 }
  0x4d   : > { %1092 = vmatprep.subr.bf16.mxu1 %v1842_v40  ;;  %v1890_v40 = vld [vmem:[%s2409_s2 + $0x270] ss:$8 sps:$4 sm:$0xff]  }
  0x4f   : > { %557 = vmatpush1.bf16.msra.mxu0 %v1755_v1 }
  0x50   : > { %558 = vmatprep.subr.bf16.mxu0 %v1760_v3  ;;  %1093 = vmatpush1.bf16.msra.mxu1 %v1844_v41  ;;  %v1895_v41 = vld [vmem:[%s2409_s2 + $0x284] ss:$8 sps:$4 sm:$0xff]  }
  0x51   : > { %1094 = vmatprep.subr.bf16.mxu1 %v1848_v44  ;;  %v1896_v44 = vld [vmem:[%s2409_s2 + $0x290] ss:$8 sps:$4 sm:$0xff]  }
  0x53   : > { %559 = vmatpush1.bf16.msra.mxu0 %v1758_v6 }
  0x54   : > { %560 = vmatprep.subr.bf16.mxu0 %v1763_v7  ;;  %1095 = vmatpush1.bf16.msra.mxu1 %v1850_v46  ;;  %v1899_v46 = vld [vmem:[%s2409_s2 + $0x2a0] ss:$8 sps:$4 sm:$0xff]  }
  0x55   : > { %1096 = vmatprep.subr.bf16.mxu1 %v1854_v49  ;;  %v1907_v49 = vld [vmem:[%s2409_s2 + $0x2c4] ss:$8 sps:$4 sm:$0xff]  }
  0x57   : > { %561 = vmatpush1.bf16.msra.mxu0 %v1761_v9 }
  0x58   : > { %562 = vmatprep.subr.bf16.mxu0 %v1766_v10  ;;  %1097 = vmatpush1.bf16.msra.mxu1 %v1856_v50  ;;  %v1905_v50 = vld [vmem:[%s2409_s2 + $0x2c0] ss:$8 sps:$4 sm:$0xff]  }
  0x59   : > { %1098 = vmatprep.subr.bf16.mxu1 %v1860_v4  ;;  %v1908_v4 = vld [vmem:[%s2409_s2 + $0x2d0] ss:$8 sps:$4 sm:$0xff]  }
  0x5b   : > { %563 = vmatpush1.bf16.msra.mxu0 %v1764_v11 }
  0x5c   : > { %564 = vmatprep.subr.bf16.mxu0 %v1769_v12  ;;  %1099 = vmatpush1.bf16.msra.mxu1 %v1862_v53  ;;  %v1866_v12 = vld [vmem:[%s2409_s2 + $0x200] ss:$8 sps:$4 sm:$0xff]  }
  0x5d   : > { %1314 = vmatprep.subr.bf16.mxu1 %v1868_v56  ;;  %v1911_v53 = vld [vmem:[%s2409_s2 + $0x2e0] ss:$8 sps:$4 sm:$0xff]  }
  0x5f   : > { %565 = vmatpush1.bf16.msra.mxu0 %v1767_v13 }
  0x60   : > { %566 = vmatprep.subr.bf16.mxu0 %v1772_v14 }
  0x63   : > { %567 = vmatpush1.bf16.msra.mxu0 %v1770_v15 }
  0x64   : > { %867 = vmatprep.subr.bf16.mxu0 %v1781_v17  ;;  %v1874_v17 = vld [vmem:[%s2409_s2 + $0x214] ss:$8 sps:$4 sm:$0xff]  }
  0x66   : > { %585 = vmatmul.mubr.bf16.vlgmr.msra.gmra.mrb[0].mxu0 %v454_v18 }
  0x67   : > { %868 = vmatpush1.bf16.msra.mxu0 %v1779_v19 }
  0x68   : > { %869 = vmatprep.subr.bf16.mxu0 %v1787_v20 }
  0x6b   : > { %870 = vmatpush1.bf16.msra.mxu0 %v1785_v21 }
  0x6c   : > { %871 = vmatprep.subr.bf16.mxu0 %v1793_v22  ;;  %v1872_v22 = vld [vmem:[%s2409_s2 + $0x210] ss:$8 sps:$4 sm:$0xff]  }
  0x6f   : > { %872 = vmatpush1.bf16.msra.mxu0 %v1791_v23 }
  0x70   : > { %873 = vmatprep.subr.bf16.mxu0 %v1799_v24 }
  0x73   : > { %874 = vmatpush1.bf16.msra.mxu0 %v1797_v25 }
  0x74   : > { %875 = vmatprep.subr.bf16.mxu0 %v1805_v26  ;;  %v1877_v26 = vld [vmem:[%s2409_s2 + $0x224] ss:$8 sps:$4 sm:$0xff]  }
  0x77   : > { %876 = vmatpush1.bf16.msra.mxu0 %v1803_v27 }
  0x78   : > { %877 = vmatprep.subr.bf16.mxu0 %v1811_v28 }
  0x7b   : > { %878 = vmatpush1.bf16.msra.mxu0 %v1809_v29 }
  0x7c   : > { %879 = vmatprep.subr.bf16.mxu0 %v1817_v30  ;;  %v1875_v30 = vld [vmem:[%s2409_s2 + $0x220] ss:$8 sps:$4 sm:$0xff]  }
  0x7f   : > { %880 = vmatpush1.bf16.msra.mxu0 %v1815_v31  ;;  %v1880_v31 = vld [vmem:[%s2409_s2 + $0x234] ss:$8 sps:$4 sm:$0xff]  }
  0x80   : > { %881 = vmatprep.subr.bf16.mxu0 %v1823_v32  ;;  %v1878_v32 = vld [vmem:[%s2409_s2 + $0x230] ss:$8 sps:$4 sm:$0xff]  }
  0x83   : > { %882 = vmatpush1.bf16.msra.mxu0 %v1821_v33  ;;  %v1883_v33 = vld [vmem:[%s2409_s2 + $0x244] ss:$8 sps:$4 sm:$0xff]  }
  0x84   : > { %883 = vmatprep.subr.bf16.mxu0 %v1829_v34  ;;  %v1881_v34 = vld [vmem:[%s2409_s2 + $0x240] ss:$8 sps:$4 sm:$0xff]  }
  0x87   : > { %884 = vmatpush1.bf16.msra.mxu0 %v1827_v35  ;;  %v1886_v35 = vld [vmem:[%s2409_s2 + $0x254] ss:$8 sps:$4 sm:$0xff]  }
  0x88   : > { %885 = vmatprep.subr.bf16.mxu0 %v1835_v36  ;;  %v1884_v36 = vld [vmem:[%s2409_s2 + $0x250] ss:$8 sps:$4 sm:$0xff]  }
  0x8b   : > { %886 = vmatpush1.bf16.msra.mxu0 %v1833_v37  ;;  %v1889_v37 = vld [vmem:[%s2409_s2 + $0x264] ss:$8 sps:$4 sm:$0xff]  }
  0x8c   : > { %887 = vmatprep.subr.bf16.mxu0 %v1841_v38  ;;  %v1887_v38 = vld [vmem:[%s2409_s2 + $0x260] ss:$8 sps:$4 sm:$0xff]  }
  0x8f   : > { %888 = vmatpush1.bf16.msra.mxu0 %v1839_v39  ;;  %v1892_v39 = vld [vmem:[%s2409_s2 + $0x274] ss:$8 sps:$4 sm:$0xff]  }
  0x90   : > { %889 = vmatprep.subr.bf16.mxu0 %v1847_v42  ;;  %v1893_v42 = vld [vmem:[%s2409_s2 + $0x280] ss:$8 sps:$4 sm:$0xff]  }
  0x93   : > { %890 = vmatpush1.bf16.msra.mxu0 %v1845_v43  ;;  %v1898_v43 = vld [vmem:[%s2409_s2 + $0x294] ss:$8 sps:$4 sm:$0xff]  }
  0x94   : > { %891 = vmatprep.subr.bf16.mxu0 %v1853_v47  ;;  %v1904_v47 = vld [vmem:[%s2409_s2 + $0x2b4] ss:$8 sps:$4 sm:$0xff]  }
  0x97   : > { %892 = vmatpush1.bf16.msra.mxu0 %v1851_v48  ;;  %v1902_v48 = vld [vmem:[%s2409_s2 + $0x2b0] ss:$8 sps:$4 sm:$0xff]  }
  0x98   : > { %893 = vmatprep.subr.bf16.mxu0 %v1859_v51  ;;  %v1910_v51 = vld [vmem:[%s2409_s2 + $0x2d4] ss:$8 sps:$4 sm:$0xff]  }
  0x9b   : > { %894 = vmatpush1.bf16.msra.mxu0 %v1857_v52  ;;  %v1913_v52 = vld [vmem:[%s2409_s2 + $0x2e4] ss:$8 sps:$4 sm:$0xff]  }
  0x9c   : > { %895 = vmatprep.subr.bf16.mxu0 %v1865_v54  ;;  %v1916_v54 = vld [vmem:[%s2409_s2 + $0x2f4] ss:$8 sps:$4 sm:$0xff]  }
  0x9f   : > { %896 = vmatpush1.bf16.msra.mxu0 %v1863_v55 }
  0xa0   : > { %897 = vmatprep.subr.bf16.mxu0 %v1871_v58 }
  0xa3   : > { %898 = vmatpush1.bf16.msra.mxu0 %v1869_v57  ;;  %v1914_v57 = vld [vmem:[%s2409_s2 + $0x2f0] ss:$8 sps:$4 sm:$0xff]  }
 0x139   : > { %v586_v59 = vpop.f32.mrb[0].mxu0 }
 0x13a   : > { %v595_v60 = vmax.f32 %v586_v59, 0.0  ;;  %v588_v61 = vpop.f32.mrb[1].mxu0 }
 0x13b   : > { %v596_v62 = vmax.f32 %v588_v61, 0.0  ;;  %v590_v63 = vpop.f32.mrb[2].mxu0 }
 0x13c   : > { %v608_v0 = vrot.slane %v595_v60, 7  ;;  %v591_v1 = vpop.f32.mrb[3].mxu0 }
 0x13d   : > { %v609_v3 = vrot.slane %v596_v62, 7 }
 0x13e   : > { %612 = vst [vmem:[#allocation3] sm:$0xfe] %v608_v0  ;;  %614 = vst [vmem:[#allocation3 + $0x10] sm:$0x1] %v608_v0 }
 0x13f   : > { %613 = vst [vmem:[#allocation3 + $0x8] sm:$0xfe] %v609_v3  ;;  %615 = vst [vmem:[#allocation3 + $0x18] sm:$0x1] %v609_v3 }
 0x145   : > { %v616_v2 = vld [vmem:[#allocation3] sm:$0xff]  ;;  %v654_v6 = vld [vmem:[#allocation3 + $0x10] sm:$0x1] }
 0x146   : > { %v652_v5 = vld [vmem:[#allocation3] sm:$0xfe]  ;;  %v617_v7 = vld [vmem:[#allocation3 + $0x8] sm:$0xff]  ;;  %v1112_v9 = vld [vmem:[#allocation3 + $0x18] sm:$0x3]  ;;  %v618_v16 = vpack.c.bf16 %v616_v2, %v616_v2 }
 0x147   : > { %v1110_v8 = vld [vmem:[#allocation3 + $0x8] sm:$0xfc]  ;;  %v656_v10 = vpack.c.bf16 %v654_v6, %v652_v5  ;;  %v619_v11 = vpack.c.bf16 %v617_v7, %v617_v7  ;;  %v655_v15 = vld [vmem:[#allocation3 + $0x18] sm:$0x1]  ;;  %v1109_v55 = vld [vmem:[#allocation3] sm:$0xfc] }
 0x148   : > { %v1114_v13 = vpack.c.bf16 %v1112_v9, %v1110_v8  ;;  %v653_v14 = vld [vmem:[#allocation3 + $0x8] sm:$0xfe]  ;;  %v1111_v56 = vld [vmem:[#allocation3 + $0x10] sm:$0x3] }
 0x149   : > { %v657_v18 = vpack.c.bf16 %v655_v15, %v653_v14  ;;  %v694_v19 = vshll.u32 %v656_v10, 16  ;;  %1100 = vmatprep.mubr.bf16.mxu1 %v619_v11  ;;  %v692_v27 = vshrl.u32 %v656_v10, 16  ;;  %v1113_v58 = vpack.c.bf16 %v1111_v56, %v1109_v55 }
 0x14a   : > { %v1151_v20 = vrot.slane %v1114_v13, 1  ;;  %1101 = vmatmul.mubr.bf16.vlgmr.msra.gmra.mrb[0].mxu1 %v618_v16 }
 0x14b   : > { %v701_v21 = vshll.u32 %v657_v18, 16  ;;  %1315 = vmatpush1.bf16.msra.mxu1 %v1866_v12  ;;  %v696_v23 = vrot.slane %v694_v19, 1  ;;  %v699_v24 = vshrl.u32 %v657_v18, 16  ;;  %v1150_v59 = vrot.slane %v1113_v58, 1 }
 0x14c   : > { %1346 = vmatprep.mubr.bf16.mxu1 %v1151_v20  ;;  %1316 = vmatprep.subr.bf16.mxu1 %v1874_v17 }
 0x14d   : > { %v703_v25 = vrot.slane %v701_v21, 1  ;;  %v697_v29 = vor.u32 %v696_v23, %v692_v27 }
 0x14f   : > { %v704_v28 = vor.u32 %v703_v25, %v699_v24  ;;  %1317 = vmatpush1.bf16.msra.mxu1 %v1872_v22 }
 0x150   : > { %1318 = vmatprep.subr.bf16.mxu1 %v1877_v26 }
 0x151   : > { %899 = vmatprep.mubr.bf16.mxu0 %v704_v28 }
 0x152   : > { %900 = vmatmul.mubr.bf16.vlgmr.msra.gmra.mrb[4].mxu0 %v697_v29 }
 0x153   : > { %1319 = vmatpush1.bf16.msra.mxu1 %v1875_v30 }
 0x154   : > { %1320 = vmatprep.subr.bf16.mxu1 %v1880_v31 }
 0x157   : > { %1321 = vmatpush1.bf16.msra.mxu1 %v1878_v32 }
 0x158   : > { %1322 = vmatprep.subr.bf16.mxu1 %v1883_v33 }
 0x15b   : > { %1323 = vmatpush1.bf16.msra.mxu1 %v1881_v34 }
 0x15c   : > { %1324 = vmatprep.subr.bf16.mxu1 %v1886_v35 }
 0x15f   : > { %1325 = vmatpush1.bf16.msra.mxu1 %v1884_v36 }
 0x160   : > { %1326 = vmatprep.subr.bf16.mxu1 %v1889_v37 }
 0x163   : > { %1327 = vmatpush1.bf16.msra.mxu1 %v1887_v38 }
 0x164   : > { %1328 = vmatprep.subr.bf16.mxu1 %v1892_v39 }
 0x167   : > { %1329 = vmatpush1.bf16.msra.mxu1 %v1890_v40 }
 0x168   : > { %1330 = vmatprep.subr.bf16.mxu1 %v1895_v41 }
 0x16b   : > { %1331 = vmatpush1.bf16.msra.mxu1 %v1893_v42 }
 0x16c   : > { %1332 = vmatprep.subr.bf16.mxu1 %v1898_v43 }
 0x16f   : > { %1333 = vmatpush1.bf16.msra.mxu1 %v1896_v44 }
 0x170   : > { %1334 = vmatprep.subr.bf16.mxu1 %v1901_v45 }
 0x173   : > { %1335 = vmatpush1.bf16.msra.mxu1 %v1899_v46 }
 0x174   : > { %1336 = vmatprep.subr.bf16.mxu1 %v1904_v47 }
 0x177   : > { %1337 = vmatpush1.bf16.msra.mxu1 %v1902_v48 }
 0x178   : > { %1338 = vmatprep.subr.bf16.mxu1 %v1907_v49 }
 0x17b   : > { %1339 = vmatpush1.bf16.msra.mxu1 %v1905_v50 }
 0x17c   : > { %1340 = vmatprep.subr.bf16.mxu1 %v1910_v51 }
 0x17f   : > { %1341 = vmatpush1.bf16.msra.mxu1 %v1908_v4 }
 0x180   : > { %1342 = vmatprep.subr.bf16.mxu1 %v1913_v52 }
 0x183   : > { %1343 = vmatpush1.bf16.msra.mxu1 %v1911_v53 }
 0x184   : > { %1344 = vmatprep.subr.bf16.mxu1 %v1916_v54 }
 0x187   : > { %1345 = vmatpush1.bf16.msra.mxu1 %v1914_v57 }
 0x18a   : > { %1347 = vmatmul.mubr.bf16.vlgmr.msra.gmra.mrb[0].mxu1 %v1150_v59 }
 0x225   : > { %v901_v60 = vpop.f32.mrb[4].mxu0 }
 0x226   : > { %v903_v61 = vpop.f32.mrb[5].mxu0 }
 0x227   : > { %v905_v62 = vpop.f32.mrb[6].mxu0 }
 0x228   : > { %v906_v63 = vpop.f32.mrb[7].mxu0 }
 0x25d   : > { %v1348_v0 = vpop.f32.mrb[0].mxu1 }
 0x25e   : > { %v1676_v1 = vadd.f32 %v1348_v0, %v901_v60  ;;  %v1350_v3 = vpop.f32.mrb[1].mxu1 }
 0x25f   : > { %v1677_v2 = vadd.f32 %v1350_v3, %v903_v61  ;;  %v1352_v5 = vpop.f32.mrb[2].mxu1 }
 0x260   : > { %v1357_v6 = vmax.f32 %v1676_v1, 0.0  ;;  %v1353_v7 = vpop.f32.mrb[3].mxu1 }
 0x261   : > { %v1358_v8 = vmax.f32 %v1677_v2, 0.0 }
 0x263   : > { %v1675_v9 = vpack.c.bf16 %v1358_v8, %v1357_v6 }
 0x265   : > { %1367 = vst [vmem:[%s167_s8] sm:$0xff] %v1675_v9 }
 0x266 PF: > { %s13_s12 = sadd.s32 1, %s1923_s12  }
 0x267   : > { %p10_p4 = scmp.ge.s32.totalorder %s13_s12, 4  }
 0x269   :  { %12 = sbr.rel (!%p10_p4) target bundleno = 1 (0x1), region = 67 }

// kernel: unet_forward.13
= control target key start
LH: loop header
LB: loop body
LE: loop exit
PB: predicated region body
PF: predicated region fallthrough
CT: control target
= control target key end

     0   :  { %s1945_s12 = smov 0   ;;  %s2405_s0 = inlined_call_operand.vmem [shape: bf16[2,4,128], index: 0, kind: input, shape index: {}]   ;;  %s2406_s1 = inlined_call_operand.vmem [shape: bf16[3,128,256], index: 1, kind: input, shape index: {}]   ;;  %s2407_s2 = inlined_call_operand.vmem [shape: bf16[3,256,256], index: 2, kind: input, shape index: {}]   ;;  %s2408_s3 = inlined_call_operand.vmem [shape: bf16[2,4,256], index: 3, kind: output, shape index: {}]  }
   0x1 LB: > { %s1422_s13 = sadd.s32 4294967295, %s1921_s12   ;;  %p1426_p0 = scmp.ge.s32.totalorder %s1921_s12, 1  ;;  %s1921_s12 = sphi %s1945_s12, %s13_s12  }
   0x2   : > { %p136_p1 = scmp.lt.s32.totalorder %s1921_s12, 3 }
   0x4   : > { %p137_p2 = pnand %p1426_p0, %p136_p1 }
   0x5   : > { %v1699_v0 = vld [vmem:[%s2406_s1 + $0x84] ss:$8 sps:$4 sm:$0xff] (!%p137_p2)   ;;  %p159_p3 = scmp.lt.s32.totalorder (!%p137_p2), %s1422_s13, 1  ;;  %v1701_v1 = vld [vmem:[%s2406_s1 + $0x80] ss:$8 sps:$4 sm:$0xff] (!%p137_p2)   ;;  %v1923_v2 = vmov (!%p137_p2), 0  }
   0x6   : > { %140 = sbr.rel (%p137_p2) target bundleno = 614 (0x266), region = 32  ;;  %323 = vmatprep.mubr.bf16.mxu0 (!%p137_p2), %v1923_v2  ;;  %291 = vmatprep.subr.bf16.mxu0 (!%p137_p2), %v1699_v0  ;;  %v1702_v3 = vld [vmem:[%s2406_s1 + $0x94] ss:$8 sps:$4 sm:$0xff] (!%p137_p2)   ;;  %v1924_v4 = vmov (!%p137_p2), 0.0   ;;  %v1704_v5 = vld [vmem:[%s2406_s1 + $0x90] ss:$8 sps:$4 sm:$0xff] (!%p137_p2)  }
   0x7   : > { %171 = vst [vmem:[#allocation2] sm:$0x1] (!%p137_p2), %v1924_v4  ;;  %172 = vst [vmem:[#allocation2 + $0x5] sm:$0x1] (!%p137_p2), %v1924_v4  ;;  %292 = vmatpush1.bf16.msra.mxu0 (!%p137_p2), %v1701_v1  ;;  %v1705_v6 = vld [vmem:[%s2406_s1 + $0xa4] ss:$8 sps:$4 sm:$0xff] (!%p137_p2)  }
   0x8   : > { %293 = vmatprep.subr.bf16.mxu0 (!%p137_p2), %v1702_v3  ;;  %v1707_v7 = vld [vmem:[%s2406_s1 + $0xa0] ss:$8 sps:$4 sm:$0xff] (!%p137_p2)   ;;  %v1708_v8 = vld [vmem:[%s2406_s1 + $0xb4] ss:$8 sps:$4 sm:$0xff] (!%p137_p2)   ;;  %v1710_v9 = vld [vmem:[%s2406_s1 + $0xb0] ss:$8 sps:$4 sm:$0xff] (!%p137_p2)  }
   0x9   : > { %v1711_v10 = vld [vmem:[%s2406_s1 + $0xc4] ss:$8 sps:$4 sm:$0xff] (!%p137_p2)   ;;  %v1713_v13 = vld [vmem:[%s2406_s1 + $0xc0] ss:$8 sps:$4 sm:$0xff] (!%p137_p2)   ;;  %v1714_v14 = vld [vmem:[%s2406_s1 + $0xd4] ss:$8 sps:$4 sm:$0xff] (!%p137_p2)  }
   0xa   : > { %v1716_v15 = vld [vmem:[%s2406_s1 + $0xd0] ss:$8 sps:$4 sm:$0xff] (!%p137_p2)   ;;  %v1717_v16 = vld [vmem:[%s2406_s1 + $0xe4] ss:$8 sps:$4 sm:$0xff] (!%p137_p2)   ;;  %v1719_v17 = vld [vmem:[%s2406_s1 + $0xe0] ss:$8 sps:$4 sm:$0xff] (!%p137_p2)  }
   0xb   : > { %294 = vmatpush1.bf16.msra.mxu0 (!%p137_p2), %v1704_v5  ;;  %v1720_v18 = vld [vmem:[%s2406_s1 + $0xf4] ss:$8 sps:$4 sm:$0xff] (!%p137_p2)   ;;  %v1722_v19 = vld [vmem:[%s2406_s1 + $0xf0] ss:$8 sps:$4 sm:$0xff] (!%p137_p2)   ;;  %v1725_v21 = vld [vmem:[%s2406_s1 + $0x4] ss:$8 sps:$4 sm:$0xff] (!%p137_p2)  }
   0xc   : > { %295 = vmatprep.subr.bf16.mxu0 (!%p137_p2), %v1705_v6  ;;  %v1723_v23 = vld [vmem:[%s2406_s1] ss:$8 sps:$4 sm:$0xff] (!%p137_p2)   ;;  %v1728_v24 = vld [vmem:[%s2406_s1 + $0x14] ss:$8 sps:$4 sm:$0xff] (!%p137_p2)   ;;  %v1771_v25 = vld [vmem:[%s2407_s2 + $0x4] ss:$8 sps:$4 sm:$0xff] (!%p137_p2)  }
   0xd   : > { %s2410_s13 = smov (!%p159_p3, %s1422_s13), 1  ;;  %v1773_v26 = vld [vmem:[%s2407_s2] ss:$8 sps:$4 sm:$0xff]   ;;  %v1726_v27 = vld [vmem:[%s2406_s1 + $0x10] ss:$8 sps:$4 sm:$0xff]   ;;  %1064 = vmatprep.subr.bf16.mxu1 %v1771_v25 }
   0xe   : > { %s1427_s24 = sshll.u32 %s2410_s13, 1  ;;  %v1774_v28 = vld [vmem:[%s2407_s2 + $0x14] ss:$8 sps:$4 sm:$0xff]   ;;  %v1731_v29 = vld [vmem:[%s2406_s1 + $0x24] ss:$8 sps:$4 sm:$0xff]   ;;  %1065 = vmatpush1.bf16.msra.mxu1 %v1773_v26 }
   0xf   : > { %s162_s4 = scalar_lea.vmem %s2405_s0, %s1427_s24  ;;  %296 = vmatpush1.bf16.msra.mxu0 %v1707_v7  ;;  %v1776_v30 = vld [vmem:[%s2407_s2 + $0x10] ss:$8 sps:$4 sm:$0xff]   ;;  %1066 = vmatprep.subr.bf16.mxu1 %v1774_v28  ;;  %v1780_v31 = vld [vmem:[%s2407_s2 + $0x24] ss:$8 sps:$4 sm:$0xff]   ;;  %v1729_v32 = vld [vmem:[%s2406_s1 + $0x20] ss:$8 sps:$4 sm:$0xff]  }
  0x10   : > { %297 = vmatprep.subr.bf16.mxu0 %v1708_v8  ;;  %v169_v11 = vld [vmem:[%s162_s4] sm:$0x3]  ;;  %v1734_v33 = vld [vmem:[%s2406_s1 + $0x34] ss:$8 sps:$4 sm:$0xff]   ;;  %v1732_v36 = vld [vmem:[%s2406_s1 + $0x30] ss:$8 sps:$4 sm:$0xff]  }
  0x11   : > { %v170_v12 = vunpack.c.l.bf16 %v169_v11  ;;  %v1782_v34 = vld [vmem:[%s2407_s2 + $0x20] ss:$8 sps:$4 sm:$0xff]   ;;  %v1786_v35 = vld [vmem:[%s2407_s2 + $0x34] ss:$8 sps:$4 sm:$0xff]   ;;  %v1737_v37 = vld [vmem:[%s2406_s1 + $0x44] ss:$8 sps:$4 sm:$0xff]  }
  0x12   : > { %1067 = vmatpush1.bf16.msra.mxu1 %v1776_v30  ;;  %v1788_v38 = vld [vmem:[%s2407_s2 + $0x30] ss:$8 sps:$4 sm:$0xff]   ;;  %v1792_v39 = vld [vmem:[%s2407_s2 + $0x44] ss:$8 sps:$4 sm:$0xff]   ;;  %v1735_v40 = vld [vmem:[%s2406_s1 + $0x40] ss:$8 sps:$4 sm:$0xff]  }
  0x13   : > { %298 = vmatpush1.bf16.msra.mxu0 %v1710_v9  ;;  %173 = vst [vmem:[#allocation2 + $0x1] sm:$0xf] %v170_v12  ;;  %1068 = vmatprep.subr.bf16.mxu1 %v1780_v31  ;;  %v1740_v41 = vld [vmem:[%s2406_s1 + $0x54] ss:$8 sps:$4 sm:$0xff]   ;;  %v1794_v42 = vld [vmem:[%s2407_s2 + $0x40] ss:$8 sps:$4 sm:$0xff]  }
  0x14   : > { %299 = vmatprep.subr.bf16.mxu0 %v1711_v10  ;;  %v1798_v43 = vld [vmem:[%s2407_s2 + $0x54] ss:$8 sps:$4 sm:$0xff]   ;;  %v1738_v44 = vld [vmem:[%s2406_s1 + $0x50] ss:$8 sps:$4 sm:$0xff]   ;;  %v1743_v45 = vld [vmem:[%s2406_s1 + $0x64] ss:$8 sps:$4 sm:$0xff]  }
  0x15   : > { %v1800_v46 = vld [vmem:[%s2407_s2 + $0x50] ss:$8 sps:$4 sm:$0xff]   ;;  %v1804_v47 = vld [vmem:[%s2407_s2 + $0x64] ss:$8 sps:$4 sm:$0xff]   ;;  %v1741_v48 = vld [vmem:[%s2406_s1 + $0x60] ss:$8 sps:$4 sm:$0xff]  }
  0x16   : > { %1069 = vmatpush1.bf16.msra.mxu1 %v1782_v34  ;;  %v1746_v49 = vld [vmem:[%s2406_s1 + $0x74] ss:$8 sps:$4 sm:$0xff]   ;;  %v1806_v50 = vld [vmem:[%s2407_s2 + $0x60] ss:$8 sps:$4 sm:$0xff]   ;;  %v1744_v52 = vld [vmem:[%s2406_s1 + $0x70] ss:$8 sps:$4 sm:$0xff]  }
  0x17   : > { %300 = vmatpush1.bf16.msra.mxu0 %v1713_v13  ;;  %1070 = vmatprep.subr.bf16.mxu1 %v1786_v35  ;;  %v1810_v51 = vld [vmem:[%s2407_s2 + $0x74] ss:$8 sps:$4 sm:$0xff]   ;;  %v1749_v54 = vld [vmem:[%s2406_s1 + $0x104] ss:$8 sps:$4 sm:$0xff]   ;;  %v1812_v55 = vld [vmem:[%s2407_s2 + $0x70] ss:$8 sps:$4 sm:$0xff]  }
  0x18   : > { %301 = vmatprep.subr.bf16.mxu0 %v1714_v14  ;;  %v1747_v56 = vld [vmem:[%s2406_s1 + $0x100] ss:$8 sps:$4 sm:$0xff]   ;;  %v1816_v58 = vld [vmem:[%s2407_s2 + $0x84] ss:$8 sps:$4 sm:$0xff]   ;;  %v1752_v59 = vld [vmem:[%s2406_s1 + $0x114] ss:$8 sps:$4 sm:$0xff]  }
  0x19   : > { %v1818_v60 = vld [vmem:[%s2407_s2 + $0x80] ss:$8 sps:$4 sm:$0xff]   ;;  %v1822_v61 = vld [vmem:[%s2407_s2 + $0x94] ss:$8 sps:$4 sm:$0xff]   ;;  %v1750_v62 = vld [vmem:[%s2406_s1 + $0x110] ss:$8 sps:$4 sm:$0xff]  }
  0x1a   : > { %v192_v20 = vld [vmem:[#allocation2 + $0x1] sm:$0xf]  ;;  %1071 = vmatpush1.bf16.msra.mxu1 %v1788_v38  ;;  %v1824_v0 = vld [vmem:[%s2407_s2 + $0x90] ss:$8 sps:$4 sm:$0xff]   ;;  %v1758_v5 = vld [vmem:[%s2406_s1 + $0x134] ss:$8 sps:$4 sm:$0xff]  }
  0x1b   : > { %302 = vmatpush1.bf16.msra.mxu0 %v1716_v15  ;;  %v193_v22 = vpack.c.bf16 %v192_v20, %v192_v20  ;;  %1072 = vmatprep.subr.bf16.mxu1 %v1792_v39  ;;  %v174_v53 = vld [vmem:[#allocation2] sm:$0xf]  ;;  %v1755_v63 = vld [vmem:[%s2406_s1 + $0x124] ss:$8 sps:$4 sm:$0xff]   ;;  %v1834_v6 = vld [vmem:[%s2407_s2 + $0xb4] ss:$8 sps:$4 sm:$0xff]  }
  0x1c   : > { %303 = vmatprep.subr.bf16.mxu0 %v1717_v16  ;;  %v175_v57 = vpack.c.bf16 %v174_v53, %v174_v53  ;;  %v1828_v1 = vld [vmem:[%s2407_s2 + $0xa4] ss:$8 sps:$4 sm:$0xff]   ;;  %v1753_v3 = vld [vmem:[%s2406_s1 + $0x120] ss:$8 sps:$4 sm:$0xff]   ;;  %v1756_v7 = vld [vmem:[%s2406_s1 + $0x130] ss:$8 sps:$4 sm:$0xff]  }
  0x1d   : > { %v1761_v8 = vld [vmem:[%s2406_s1 + $0x144] ss:$8 sps:$4 sm:$0xff]   ;;  %v1836_v9 = vld [vmem:[%s2407_s2 + $0xb0] ss:$8 sps:$4 sm:$0xff]   ;;  %v1759_v10 = vld [vmem:[%s2406_s1 + $0x140] ss:$8 sps:$4 sm:$0xff]  }
  0x1e   : > { %1073 = vmatpush1.bf16.msra.mxu1 %v1794_v42  ;;  %v1764_v11 = vld [vmem:[%s2406_s1 + $0x154] ss:$8 sps:$4 sm:$0xff]   ;;  %v1762_v12 = vld [vmem:[%s2406_s1 + $0x150] ss:$8 sps:$4 sm:$0xff]   ;;  %v1767_v13 = vld [vmem:[%s2406_s1 + $0x164] ss:$8 sps:$4 sm:$0xff]  }
  0x1f   : > { %304 = vmatpush1.bf16.msra.mxu0 %v1719_v17  ;;  %1074 = vmatprep.subr.bf16.mxu1 %v1798_v43  ;;  %v1765_v14 = vld [vmem:[%s2406_s1 + $0x160] ss:$8 sps:$4 sm:$0xff]   ;;  %v1770_v15 = vld [vmem:[%s2406_s1 + $0x174] ss:$8 sps:$4 sm:$0xff]   ;;  %v1768_v16 = vld [vmem:[%s2406_s1 + $0x170] ss:$8 sps:$4 sm:$0xff]  }
  0x20   : > { %305 = vmatprep.subr.bf16.mxu0 %v1720_v18  ;;  %v453_v17 = vld [vmem:[#allocation2 + $0x2] sm:$0xf]  ;;  %v1797_v25 = vld [vmem:[%s2407_s2 + $0x134] ss:$8 sps:$4 sm:$0xff]   ;;  %v1795_v26 = vld [vmem:[%s2407_s2 + $0x130] ss:$8 sps:$4 sm:$0xff]  }
  0x21   : > { %v1779_v18 = vld [vmem:[%s2407_s2 + $0x104] ss:$8 sps:$4 sm:$0xff]   ;;  %v1777_v20 = vld [vmem:[%s2407_s2 + $0x100] ss:$8 sps:$4 sm:$0xff]   ;;  %v1807_v30 = vld [vmem:[%s2407_s2 + $0x150] ss:$8 sps:$4 sm:$0xff]  }
  0x22   : > { %1075 = vmatpush1.bf16.msra.mxu1 %v1800_v46  ;;  %v1801_v28 = vld [vmem:[%s2407_s2 + $0x140] ss:$8 sps:$4 sm:$0xff]   ;;  %v1815_v31 = vld [vmem:[%s2407_s2 + $0x164] ss:$8 sps:$4 sm:$0xff]   ;;  %v1819_v34 = vld [vmem:[%s2407_s2 + $0x170] ss:$8 sps:$4 sm:$0xff]   ;;  %v597_v46 = vlaneseq }
  0x23   : > { %306 = vmatpush1.bf16.msra.mxu0 %v1722_v19  ;;  %1076 = vmatprep.subr.bf16.mxu1 %v1804_v47  ;;  %v454_v19 = vpack.c.bf16 %v453_v17, %v453_v17  ;;  %v1827_v35 = vld [vmem:[%s2407_s2 + $0x184] ss:$8 sps:$4 sm:$0xff]   ;;  %v1831_v38 = vld [vmem:[%s2407_s2 + $0x190] ss:$8 sps:$4 sm:$0xff]   ;;  %v1842_v42 = vld [vmem:[%s2407_s2 + $0xc0] ss:$8 sps:$4 sm:$0xff]  }
  0x24   : > { %412 = vmatprep.subr.bf16.mxu0 %v1725_v21  ;;  %v1785_v21 = vld [vmem:[%s2407_s2 + $0x114] ss:$8 sps:$4 sm:$0xff]   ;;  %v1839_v39 = vld [vmem:[%s2407_s2 + $0x1a4] ss:$8 sps:$4 sm:$0xff]   ;;  %v1848_v47 = vld [vmem:[%s2407_s2 + $0xd0] ss:$8 sps:$4 sm:$0xff]  }
  0x25   : > { %v1845_v43 = vld [vmem:[%s2407_s2 + $0x1b4] ss:$8 sps:$4 sm:$0xff]   ;;  %vm599_vm0 = vcmp.lt.s32.totalorder %v597_v46, 256  ;;  %v1855_v53 = vld [vmem:[%s2407_s2 + $0x1d0] ss:$8 sps:$4 sm:$0xff]   ;;  %s1674_s4 = sshll.u32 %s2410_s13, 2 }
  0x26   : > { %324 = vmatmul.mubr.bf16.vlgmr.msra.gmra.mrb[0].mxu0 %v193_v22  ;;  %1077 = vmatpush1.bf16.msra.mxu1 %v1806_v50  ;;  %v1783_v22 = vld [vmem:[%s2407_s2 + $0x110] ss:$8 sps:$4 sm:$0xff]   ;;  %601 = vst.msk [vmem:[#allocation3] ss:$8 sm:$0x3] %vm599_vm0, %v1924_v4  ;;  %s167_s7 = scalar_lea.vmem %s2408_s3, %s1674_s4 }
  0x27   : > { %413 = vmatpush1.bf16.msra.mxu0 %v1723_v23  ;;  %444 = vmatprep.mubr.bf16.mxu0 %v1923_v2  ;;  %v1791_v23 = vld [vmem:[%s2407_s2 + $0x124] ss:$8 sps:$4 sm:$0xff]   ;;  %604 = vst.msk [vmem:[#allocation3 + $0x5] ss:$8 sm:$0x3] %vm599_vm0, %v1924_v4 }
  0x28   : > { %414 = vmatprep.subr.bf16.mxu0 %v1728_v24  ;;  %1078 = vmatprep.subr.bf16.mxu1 %v1810_v51  ;;  %v1789_v24 = vld [vmem:[%s2407_s2 + $0x120] ss:$8 sps:$4 sm:$0xff]   ;;  %v1852_v50 = vld [vmem:[%s2407_s2 + $0xe4] ss:$8 sps:$4 sm:$0xff]   ;;  %v1858_v4 = vld [vmem:[%s2407_s2 + $0xf4] ss:$8 sps:$4 sm:$0xff]  }
  0x29   : > { %v1854_v51 = vld [vmem:[%s2407_s2 + $0xe0] ss:$8 sps:$4 sm:$0xff]   ;;  %v1900_v46 = vld [vmem:[%s2407_s2 + $0x2b0] ss:$8 sps:$4 sm:$0xff]  }
  0x2a   : > { %1079 = vmatpush1.bf16.msra.mxu1 %v1812_v55  ;;  %v1863_v55 = vld [vmem:[%s2407_s2 + $0x1e4] ss:$8 sps:$4 sm:$0xff]  }
  0x2b   : > { %415 = vmatpush1.bf16.msra.mxu0 %v1726_v27  ;;  %1080 = vmatprep.subr.bf16.mxu1 %v1816_v58  ;;  %v1803_v27 = vld [vmem:[%s2407_s2 + $0x144] ss:$8 sps:$4 sm:$0xff]   ;;  %v1867_v58 = vld [vmem:[%s2407_s2 + $0x1f0] ss:$8 sps:$4 sm:$0xff]  }
  0x2c   : > { %416 = vmatprep.subr.bf16.mxu0 %v1731_v29  ;;  %v1809_v29 = vld [vmem:[%s2407_s2 + $0x154] ss:$8 sps:$4 sm:$0xff]  }
  0x2e   : > { %1081 = vmatpush1.bf16.msra.mxu1 %v1818_v60 }
  0x2f   : > { %417 = vmatpush1.bf16.msra.mxu0 %v1729_v32  ;;  %1082 = vmatprep.subr.bf16.mxu1 %v1822_v61  ;;  %v1813_v32 = vld [vmem:[%s2407_s2 + $0x160] ss:$8 sps:$4 sm:$0xff]  }
  0x30   : > { %418 = vmatprep.subr.bf16.mxu0 %v1734_v33  ;;  %v1821_v33 = vld [vmem:[%s2407_s2 + $0x174] ss:$8 sps:$4 sm:$0xff]  }
  0x32   : > { %1083 = vmatpush1.bf16.msra.mxu1 %v1824_v0 }
  0x33   : > { %419 = vmatpush1.bf16.msra.mxu0 %v1732_v36  ;;  %1084 = vmatprep.subr.bf16.mxu1 %v1828_v1  ;;  %v1825_v36 = vld [vmem:[%s2407_s2 + $0x180] ss:$8 sps:$4 sm:$0xff]  }
  0x34   : > { %420 = vmatprep.subr.bf16.mxu0 %v1737_v37  ;;  %v1833_v37 = vld [vmem:[%s2407_s2 + $0x194] ss:$8 sps:$4 sm:$0xff]  }
  0x37   : > { %421 = vmatpush1.bf16.msra.mxu0 %v1735_v40  ;;  %v1837_v40 = vld [vmem:[%s2407_s2 + $0x1a0] ss:$8 sps:$4 sm:$0xff]  }
  0x38   : > { %422 = vmatprep.subr.bf16.mxu0 %v1740_v41  ;;  %v1840_v41 = vld [vmem:[%s2407_s2 + $0xc4] ss:$8 sps:$4 sm:$0xff]  }
  0x3b   : > { %423 = vmatpush1.bf16.msra.mxu0 %v1738_v44  ;;  %v1843_v44 = vld [vmem:[%s2407_s2 + $0x1b0] ss:$8 sps:$4 sm:$0xff]  }
  0x3c   : > { %424 = vmatprep.subr.bf16.mxu0 %v1743_v45  ;;  %v1846_v45 = vld [vmem:[%s2407_s2 + $0xd4] ss:$8 sps:$4 sm:$0xff]  }
  0x3f   : > { %425 = vmatpush1.bf16.msra.mxu0 %v1741_v48  ;;  %v1851_v48 = vld [vmem:[%s2407_s2 + $0x1c4] ss:$8 sps:$4 sm:$0xff]  }
  0x40   : > { %426 = vmatprep.subr.bf16.mxu0 %v1746_v49  ;;  %v1849_v49 = vld [vmem:[%s2407_s2 + $0x1c0] ss:$8 sps:$4 sm:$0xff]  }
  0x43   : > { %427 = vmatpush1.bf16.msra.mxu0 %v1744_v52  ;;  %v1857_v52 = vld [vmem:[%s2407_s2 + $0x1d4] ss:$8 sps:$4 sm:$0xff]  }
  0x44   : > { %552 = vmatprep.subr.bf16.mxu0 %v1749_v54  ;;  %v1860_v54 = vld [vmem:[%s2407_s2 + $0xf0] ss:$8 sps:$4 sm:$0xff]  }
  0x46   : > { %445 = vmatmul.mubr.bf16.vlgmr.msra.gmra.mrb[0].mxu0 %v175_v57  ;;  %v1866_v57 = vld [vmem:[%s2407_s2 + $0x204] ss:$8 sps:$4 sm:$0xff]  }
  0x47   : > { %553 = vmatpush1.bf16.msra.mxu0 %v1747_v56  ;;  %584 = vmatprep.mubr.bf16.mxu0 %v1923_v2  ;;  %v1830_v2 = vld [vmem:[%s2407_s2 + $0xa0] ss:$8 sps:$4 sm:$0xff]  }
  0x48   : > { %554 = vmatprep.subr.bf16.mxu0 %v1752_v59  ;;  %1085 = vmatpush1.bf16.msra.mxu1 %v1830_v2  ;;  %v1861_v56 = vld [vmem:[%s2407_s2 + $0x1e0] ss:$8 sps:$4 sm:$0xff]   ;;  %v1869_v59 = vld [vmem:[%s2407_s2 + $0x1f4] ss:$8 sps:$4 sm:$0xff]  }
  0x49   : > { %1086 = vmatprep.subr.bf16.mxu1 %v1834_v6 }
  0x4b   : > { %555 = vmatpush1.bf16.msra.mxu0 %v1750_v62 }
  0x4c   : > { %556 = vmatprep.subr.bf16.mxu0 %v1755_v63  ;;  %1087 = vmatpush1.bf16.msra.mxu1 %v1836_v9 }
  0x4d   : > { %1088 = vmatprep.subr.bf16.mxu1 %v1840_v41  ;;  %v1896_v41 = vld [vmem:[%s2407_s2 + $0x294] ss:$8 sps:$4 sm:$0xff]  }
  0x4f   : > { %557 = vmatpush1.bf16.msra.mxu0 %v1753_v3 }
  0x50   : > { %558 = vmatprep.subr.bf16.mxu0 %v1758_v5  ;;  %1089 = vmatpush1.bf16.msra.mxu1 %v1842_v42  ;;  %v1894_v42 = vld [vmem:[%s2407_s2 + $0x290] ss:$8 sps:$4 sm:$0xff]  }
  0x51   : > { %1090 = vmatprep.subr.bf16.mxu1 %v1846_v45  ;;  %v1902_v45 = vld [vmem:[%s2407_s2 + $0x2b4] ss:$8 sps:$4 sm:$0xff]  }
  0x53   : > { %559 = vmatpush1.bf16.msra.mxu0 %v1756_v7 }
  0x54   : > { %560 = vmatprep.subr.bf16.mxu0 %v1761_v8  ;;  %1091 = vmatpush1.bf16.msra.mxu1 %v1848_v47  ;;  %v1905_v47 = vld [vmem:[%s2407_s2 + $0x2c4] ss:$8 sps:$4 sm:$0xff]  }
  0x55   : > { %1092 = vmatprep.subr.bf16.mxu1 %v1852_v50  ;;  %v1906_v50 = vld [vmem:[%s2407_s2 + $0x2d0] ss:$8 sps:$4 sm:$0xff]  }
  0x57   : > { %561 = vmatpush1.bf16.msra.mxu0 %v1759_v10 }
  0x58   : > { %562 = vmatprep.subr.bf16.mxu0 %v1764_v11  ;;  %1093 = vmatpush1.bf16.msra.mxu1 %v1854_v51  ;;  %v1911_v51 = vld [vmem:[%s2407_s2 + $0x2e4] ss:$8 sps:$4 sm:$0xff]  }
  0x59   : > { %1094 = vmatprep.subr.bf16.mxu1 %v1858_v4  ;;  %v1914_v4 = vld [vmem:[%s2407_s2 + $0x2f4] ss:$8 sps:$4 sm:$0xff]  }
  0x5b   : > { %563 = vmatpush1.bf16.msra.mxu0 %v1762_v12  ;;  %v1864_v12 = vld [vmem:[%s2407_s2 + $0x200] ss:$8 sps:$4 sm:$0xff]  }
  0x5c   : > { %564 = vmatprep.subr.bf16.mxu0 %v1767_v13  ;;  %1095 = vmatpush1.bf16.msra.mxu1 %v1860_v54  ;;  %v1912_v54 = vld [vmem:[%s2407_s2 + $0x2f0] ss:$8 sps:$4 sm:$0xff]  }
  0x5d   : > { %1308 = vmatprep.subr.bf16.mxu1 %v1866_v57 }
  0x5f   : > { %565 = vmatpush1.bf16.msra.mxu0 %v1765_v14 }
  0x60   : > { %566 = vmatprep.subr.bf16.mxu0 %v1770_v15 }
  0x63   : > { %567 = vmatpush1.bf16.msra.mxu0 %v1768_v16  ;;  %v1872_v16 = vld [vmem:[%s2407_s2 + $0x214] ss:$8 sps:$4 sm:$0xff]  }
  0x64   : > { %863 = vmatprep.subr.bf16.mxu0 %v1779_v18 }
  0x66   : > { %585 = vmatmul.mubr.bf16.vlgmr.msra.gmra.mrb[0].mxu0 %v454_v19 }
  0x67   : > { %864 = vmatpush1.bf16.msra.mxu0 %v1777_v20 }
  0x68   : > { %865 = vmatprep.subr.bf16.mxu0 %v1785_v21  ;;  %v1870_v21 = vld [vmem:[%s2407_s2 + $0x210] ss:$8 sps:$4 sm:$0xff]  }
  0x6b   : > { %866 = vmatpush1.bf16.msra.mxu0 %v1783_v22 }
  0x6c   : > { %867 = vmatprep.subr.bf16.mxu0 %v1791_v23 }
  0x6f   : > { %868 = vmatpush1.bf16.msra.mxu0 %v1789_v24 }
  0x70   : > { %869 = vmatprep.subr.bf16.mxu0 %v1797_v25  ;;  %v1875_v25 = vld [vmem:[%s2407_s2 + $0x224] ss:$8 sps:$4 sm:$0xff]  }
  0x73   : > { %870 = vmatpush1.bf16.msra.mxu0 %v1795_v26 }
  0x74   : > { %871 = vmatprep.subr.bf16.mxu0 %v1803_v27 }
  0x77   : > { %872 = vmatpush1.bf16.msra.mxu0 %v1801_v28  ;;  %v1873_v28 = vld [vmem:[%s2407_s2 + $0x220] ss:$8 sps:$4 sm:$0xff]  }
  0x78   : > { %873 = vmatprep.subr.bf16.mxu0 %v1809_v29  ;;  %v1878_v29 = vld [vmem:[%s2407_s2 + $0x234] ss:$8 sps:$4 sm:$0xff]  }
  0x7b   : > { %874 = vmatpush1.bf16.msra.mxu0 %v1807_v30  ;;  %v1876_v30 = vld [vmem:[%s2407_s2 + $0x230] ss:$8 sps:$4 sm:$0xff]  }
  0x7c   : > { %875 = vmatprep.subr.bf16.mxu0 %v1815_v31  ;;  %v1881_v31 = vld [vmem:[%s2407_s2 + $0x244] ss:$8 sps:$4 sm:$0xff]  }
  0x7f   : > { %876 = vmatpush1.bf16.msra.mxu0 %v1813_v32  ;;  %v1879_v32 = vld [vmem:[%s2407_s2 + $0x240] ss:$8 sps:$4 sm:$0xff]  }
  0x80   : > { %877 = vmatprep.subr.bf16.mxu0 %v1821_v33  ;;  %v1884_v33 = vld [vmem:[%s2407_s2 + $0x254] ss:$8 sps:$4 sm:$0xff]  }
  0x83   : > { %878 = vmatpush1.bf16.msra.mxu0 %v1819_v34  ;;  %v1882_v34 = vld [vmem:[%s2407_s2 + $0x250] ss:$8 sps:$4 sm:$0xff]  }
  0x84   : > { %879 = vmatprep.subr.bf16.mxu0 %v1827_v35  ;;  %v1887_v35 = vld [vmem:[%s2407_s2 + $0x264] ss:$8 sps:$4 sm:$0xff]  }
  0x87   : > { %880 = vmatpush1.bf16.msra.mxu0 %v1825_v36  ;;  %v1885_v36 = vld [vmem:[%s2407_s2 + $0x260] ss:$8 sps:$4 sm:$0xff]  }
  0x88   : > { %881 = vmatprep.subr.bf16.mxu0 %v1833_v37  ;;  %v1890_v37 = vld [vmem:[%s2407_s2 + $0x274] ss:$8 sps:$4 sm:$0xff]  }
  0x8b   : > { %882 = vmatpush1.bf16.msra.mxu0 %v1831_v38  ;;  %v1888_v38 = vld [vmem:[%s2407_s2 + $0x270] ss:$8 sps:$4 sm:$0xff]  }
  0x8c   : > { %883 = vmatprep.subr.bf16.mxu0 %v1839_v39  ;;  %v1893_v39 = vld [vmem:[%s2407_s2 + $0x284] ss:$8 sps:$4 sm:$0xff]  }
  0x8f   : > { %884 = vmatpush1.bf16.msra.mxu0 %v1837_v40  ;;  %v1891_v40 = vld [vmem:[%s2407_s2 + $0x280] ss:$8 sps:$4 sm:$0xff]  }
  0x90   : > { %885 = vmatprep.subr.bf16.mxu0 %v1845_v43  ;;  %v1899_v43 = vld [vmem:[%s2407_s2 + $0x2a4] ss:$8 sps:$4 sm:$0xff]  }
  0x93   : > { %886 = vmatpush1.bf16.msra.mxu0 %v1843_v44  ;;  %v1897_v44 = vld [vmem:[%s2407_s2 + $0x2a0] ss:$8 sps:$4 sm:$0xff]  }
  0x94   : > { %887 = vmatprep.subr.bf16.mxu0 %v1851_v48  ;;  %v1903_v48 = vld [vmem:[%s2407_s2 + $0x2c0] ss:$8 sps:$4 sm:$0xff]  }
  0x97   : > { %888 = vmatpush1.bf16.msra.mxu0 %v1849_v49  ;;  %v1908_v49 = vld [vmem:[%s2407_s2 + $0x2d4] ss:$8 sps:$4 sm:$0xff]  }
  0x98   : > { %889 = vmatprep.subr.bf16.mxu0 %v1857_v52  ;;  %v1909_v52 = vld [vmem:[%s2407_s2 + $0x2e0] ss:$8 sps:$4 sm:$0xff]  }
  0x9b   : > { %890 = vmatpush1.bf16.msra.mxu0 %v1855_v53 }
  0x9c   : > { %891 = vmatprep.subr.bf16.mxu0 %v1863_v55 }
  0x9f   : > { %892 = vmatpush1.bf16.msra.mxu0 %v1861_v56 }
  0xa0   : > { %893 = vmatprep.subr.bf16.mxu0 %v1869_v59 }
  0xa3   : > { %894 = vmatpush1.bf16.msra.mxu0 %v1867_v58 }
 0x139   : > { %v586_v60 = vpop.f32.mrb[0].mxu0 }
 0x13a   : > { %v595_v61 = vmax.f32 %v586_v60, 0.0  ;;  %v588_v62 = vpop.f32.mrb[1].mxu0 }
 0x13b   : > { %v596_v63 = vmax.f32 %v588_v62, 0.0  ;;  %v590_v0 = vpop.f32.mrb[2].mxu0 }
 0x13c   : > { %v608_v1 = vrot.slane %v595_v61, 7  ;;  %v591_v3 = vpop.f32.mrb[3].mxu0 }
 0x13d   : > { %v609_v5 = vrot.slane %v596_v63, 7 }
 0x13e   : > { %612 = vst [vmem:[#allocation3] sm:$0x1e] %v608_v1 }
 0x13f   : > { %613 = vst [vmem:[#allocation3 + $0x8] sm:$0x1e] %v609_v5 }
 0x145   : > { %v614_v2 = vld [vmem:[#allocation3] sm:$0xf] }
 0x146   : > { %v650_v6 = vld [vmem:[#allocation3] sm:$0x1e]  ;;  %v615_v7 = vld [vmem:[#allocation3 + $0x8] sm:$0xf]  ;;  %v616_v15 = vpack.c.bf16 %v614_v2, %v614_v2 }
 0x147   : > { %v1106_v8 = vld [vmem:[#allocation3 + $0x8] sm:$0x3c]  ;;  %v652_v10 = vpack.c.bf16 %v650_v6, %v650_v6  ;;  %v617_v11 = vpack.c.bf16 %v615_v7, %v615_v7  ;;  %v1105_v53 = vld [vmem:[#allocation3] sm:$0x3c] }
 0x148   : > { %v651_v9 = vld [vmem:[#allocation3 + $0x8] sm:$0x1e]  ;;  %v1108_v13 = vpack.c.bf16 %v1106_v8, %v1106_v8  ;;  %v1107_v55 = vpack.c.bf16 %v1105_v53, %v1105_v53 }
 0x149   : > { %v653_v14 = vpack.c.bf16 %v651_v9, %v651_v9  ;;  %v690_v17 = vshll.u32 %v652_v10, 16  ;;  %1096 = vmatprep.mubr.bf16.mxu1 %v617_v11  ;;  %v688_v24 = vshrl.u32 %v652_v10, 16 }
 0x14a   : > { %v1145_v18 = vrot.slane %v1108_v13, 1  ;;  %1097 = vmatmul.mubr.bf16.vlgmr.msra.gmra.mrb[0].mxu1 %v616_v15  ;;  %v1144_v56 = vrot.slane %v1107_v55, 1 }
 0x14b   : > { %v697_v19 = vshll.u32 %v653_v14, 16  ;;  %v692_v20 = vrot.slane %v690_v17, 1  ;;  %1309 = vmatpush1.bf16.msra.mxu1 %v1864_v12  ;;  %v695_v22 = vshrl.u32 %v653_v14, 16 }
 0x14c   : > { %1340 = vmatprep.mubr.bf16.mxu1 %v1145_v18  ;;  %1310 = vmatprep.subr.bf16.mxu1 %v1872_v16 }
 0x14d   : > { %v699_v23 = vrot.slane %v697_v19, 1  ;;  %v693_v27 = vor.u32 %v692_v20, %v688_v24 }
 0x14f   : > { %v700_v26 = vor.u32 %v699_v23, %v695_v22  ;;  %1311 = vmatpush1.bf16.msra.mxu1 %v1870_v21 }
 0x150   : > { %1312 = vmatprep.subr.bf16.mxu1 %v1875_v25 }
 0x151   : > { %895 = vmatprep.mubr.bf16.mxu0 %v700_v26 }
 0x152   : > { %896 = vmatmul.mubr.bf16.vlgmr.msra.gmra.mrb[4].mxu0 %v693_v27 }
 0x153   : > { %1313 = vmatpush1.bf16.msra.mxu1 %v1873_v28 }
 0x154   : > { %1314 = vmatprep.subr.bf16.mxu1 %v1878_v29 }
 0x157   : > { %1315 = vmatpush1.bf16.msra.mxu1 %v1876_v30 }
 0x158   : > { %1316 = vmatprep.subr.bf16.mxu1 %v1881_v31 }
 0x15b   : > { %1317 = vmatpush1.bf16.msra.mxu1 %v1879_v32 }
 0x15c   : > { %1318 = vmatprep.subr.bf16.mxu1 %v1884_v33 }
 0x15f   : > { %1319 = vmatpush1.bf16.msra.mxu1 %v1882_v34 }
 0x160   : > { %1320 = vmatprep.subr.bf16.mxu1 %v1887_v35 }
 0x163   : > { %1321 = vmatpush1.bf16.msra.mxu1 %v1885_v36 }
 0x164   : > { %1322 = vmatprep.subr.bf16.mxu1 %v1890_v37 }
 0x167   : > { %1323 = vmatpush1.bf16.msra.mxu1 %v1888_v38 }
 0x168   : > { %1324 = vmatprep.subr.bf16.mxu1 %v1893_v39 }
 0x16b   : > { %1325 = vmatpush1.bf16.msra.mxu1 %v1891_v40 }
 0x16c   : > { %1326 = vmatprep.subr.bf16.mxu1 %v1896_v41 }
 0x16f   : > { %1327 = vmatpush1.bf16.msra.mxu1 %v1894_v42 }
 0x170   : > { %1328 = vmatprep.subr.bf16.mxu1 %v1899_v43 }
 0x173   : > { %1329 = vmatpush1.bf16.msra.mxu1 %v1897_v44 }
 0x174   : > { %1330 = vmatprep.subr.bf16.mxu1 %v1902_v45 }
 0x177   : > { %1331 = vmatpush1.bf16.msra.mxu1 %v1900_v46 }
 0x178   : > { %1332 = vmatprep.subr.bf16.mxu1 %v1905_v47 }
 0x17b   : > { %1333 = vmatpush1.bf16.msra.mxu1 %v1903_v48 }
 0x17c   : > { %1334 = vmatprep.subr.bf16.mxu1 %v1908_v49 }
 0x17f   : > { %1335 = vmatpush1.bf16.msra.mxu1 %v1906_v50 }
 0x180   : > { %1336 = vmatprep.subr.bf16.mxu1 %v1911_v51 }
 0x183   : > { %1337 = vmatpush1.bf16.msra.mxu1 %v1909_v52 }
 0x184   : > { %1338 = vmatprep.subr.bf16.mxu1 %v1914_v4 }
 0x187   : > { %1339 = vmatpush1.bf16.msra.mxu1 %v1912_v54 }
 0x18a   : > { %1341 = vmatmul.mubr.bf16.vlgmr.msra.gmra.mrb[0].mxu1 %v1144_v56 }
 0x225   : > { %v897_v57 = vpop.f32.mrb[4].mxu0 }
 0x226   : > { %v899_v58 = vpop.f32.mrb[5].mxu0 }
 0x227   : > { %v901_v59 = vpop.f32.mrb[6].mxu0 }
 0x228   : > { %v902_v60 = vpop.f32.mrb[7].mxu0 }
 0x25d   : > { %v1342_v61 = vpop.f32.mrb[0].mxu1 }
 0x25e   : > { %v1675_v62 = vadd.f32 %v1342_v61, %v897_v57  ;;  %v1344_v63 = vpop.f32.mrb[1].mxu1 }
 0x25f   : > { %v1676_v0 = vadd.f32 %v1344_v63, %v899_v58  ;;  %v1346_v1 = vpop.f32.mrb[2].mxu1 }
 0x260   : > { %v1351_v3 = vmax.f32 %v1675_v62, 0.0  ;;  %v1347_v5 = vpop.f32.mrb[3].mxu1 }
 0x261   : > { %v1352_v2 = vmax.f32 %v1676_v0, 0.0 }
 0x263   : > { %v1670_v6 = vpack.c.bf16 %v1352_v2, %v1351_v3 }
 0x265   : > { %1671 = vst.sshfl [vmem:[%s167_s7] sm:$0x33 pattern:$0x76325410] %v1670_v6 }
 0x266 PF: > { %s13_s12 = sadd.s32 1, %s1921_s12  }
 0x267   : > { %p10_p4 = scmp.ge.s32.totalorder %s13_s12, 4  }
 0x269   :  { %12 = sbr.rel (!%p10_p4) target bundleno = 1 (0x1), region = 67 }

// kernel: unet_forward.14
= control target key start
LH: loop header
LB: loop body
LE: loop exit
PB: predicated region body
PF: predicated region fallthrough
CT: control target
= control target key end

     0   :  { %s1946_s12 = smov 0   ;;  %s2414_s0 = inlined_call_operand.vmem [shape: bf16[2,2,128], index: 0, kind: input, shape index: {}]   ;;  %s2415_s1 = inlined_call_operand.vmem [shape: bf16[3,128,256], index: 1, kind: input, shape index: {}]   ;;  %s2416_s2 = inlined_call_operand.vmem [shape: bf16[3,256,256], index: 2, kind: input, shape index: {}]   ;;  %s2417_s3 = inlined_call_operand.vmem [shape: bf16[2,2,256], index: 3, kind: output, shape index: {}]  }
   0x1 LB: > { %s1421_s13 = sadd.s32 4294967295, %s1921_s12   ;;  %p1425_p0 = scmp.ge.s32.totalorder %s1921_s12, 1  ;;  %s1921_s12 = sphi %s1946_s12, %s13_s12  }
   0x2   : > { %p135_p1 = scmp.lt.s32.totalorder %s1921_s12, 3 }
   0x4   : > { %p136_p2 = pnand %p1425_p0, %p135_p1 }
   0x5   : > { %v1696_v0 = vld [vmem:[%s2415_s1 + $0x84] ss:$8 sps:$4 sm:$0xff] (!%p136_p2)   ;;  %v1698_v1 = vld [vmem:[%s2415_s1 + $0x80] ss:$8 sps:$4 sm:$0xff] (!%p136_p2)   ;;  %v1923_v2 = vmov (!%p136_p2), 0   ;;  %p156_p3 = scmp.lt.s32.totalorder (!%p136_p2), %s1421_s13, 1 }
   0x6   : > { %139 = sbr.rel (%p136_p2) target bundleno = 620 (0x26c), region = 32  ;;  %318 = vmatprep.mubr.bf16.mxu0 (!%p136_p2), %v1923_v2  ;;  %286 = vmatprep.subr.bf16.mxu0 (!%p136_p2), %v1696_v0  ;;  %v1699_v3 = vld [vmem:[%s2415_s1 + $0x94] ss:$8 sps:$4 sm:$0xff] (!%p136_p2)   ;;  %v1924_v4 = vmov (!%p136_p2), 0.0   ;;  %v1701_v5 = vld [vmem:[%s2415_s1 + $0x90] ss:$8 sps:$4 sm:$0xff] (!%p136_p2)  }
   0x7   : > { %166 = vst [vmem:[#allocation2] sm:$0x1] (!%p136_p2), %v1924_v4  ;;  %167 = vst [vmem:[#allocation2 + $0x3] sm:$0x1] (!%p136_p2), %v1924_v4  ;;  %287 = vmatpush1.bf16.msra.mxu0 (!%p136_p2), %v1698_v1  ;;  %v1702_v6 = vld [vmem:[%s2415_s1 + $0xa4] ss:$8 sps:$4 sm:$0xff] (!%p136_p2)  }
   0x8   : > { %288 = vmatprep.subr.bf16.mxu0 (!%p136_p2), %v1699_v3  ;;  %v1704_v7 = vld [vmem:[%s2415_s1 + $0xa0] ss:$8 sps:$4 sm:$0xff] (!%p136_p2)   ;;  %v1705_v8 = vld [vmem:[%s2415_s1 + $0xb4] ss:$8 sps:$4 sm:$0xff] (!%p136_p2)   ;;  %v1707_v9 = vld [vmem:[%s2415_s1 + $0xb0] ss:$8 sps:$4 sm:$0xff] (!%p136_p2)  }
   0x9   : > { %v1708_v10 = vld [vmem:[%s2415_s1 + $0xc4] ss:$8 sps:$4 sm:$0xff] (!%p136_p2)   ;;  %v1710_v13 = vld [vmem:[%s2415_s1 + $0xc0] ss:$8 sps:$4 sm:$0xff] (!%p136_p2)   ;;  %v1711_v14 = vld [vmem:[%s2415_s1 + $0xd4] ss:$8 sps:$4 sm:$0xff] (!%p136_p2)  }
   0xa   : > { %v1713_v15 = vld [vmem:[%s2415_s1 + $0xd0] ss:$8 sps:$4 sm:$0xff] (!%p136_p2)   ;;  %v1714_v16 = vld [vmem:[%s2415_s1 + $0xe4] ss:$8 sps:$4 sm:$0xff] (!%p136_p2)   ;;  %v1716_v17 = vld [vmem:[%s2415_s1 + $0xe0] ss:$8 sps:$4 sm:$0xff] (!%p136_p2)  }
   0xb   : > { %289 = vmatpush1.bf16.msra.mxu0 (!%p136_p2), %v1701_v5  ;;  %v1717_v18 = vld [vmem:[%s2415_s1 + $0xf4] ss:$8 sps:$4 sm:$0xff] (!%p136_p2)   ;;  %v1719_v19 = vld [vmem:[%s2415_s1 + $0xf0] ss:$8 sps:$4 sm:$0xff] (!%p136_p2)   ;;  %v1722_v21 = vld [vmem:[%s2415_s1 + $0x4] ss:$8 sps:$4 sm:$0xff] (!%p136_p2)  }
   0xc   : > { %290 = vmatprep.subr.bf16.mxu0 (!%p136_p2), %v1702_v6  ;;  %v1720_v23 = vld [vmem:[%s2415_s1] ss:$8 sps:$4 sm:$0xff] (!%p136_p2)   ;;  %v1725_v24 = vld [vmem:[%s2415_s1 + $0x14] ss:$8 sps:$4 sm:$0xff] (!%p136_p2)   ;;  %v1768_v25 = vld [vmem:[%s2416_s2 + $0x4] ss:$8 sps:$4 sm:$0xff] (!%p136_p2)  }
   0xd   : > { %s2419_s13 = smov (!%p156_p3, %s1421_s13), 1  ;;  %v1770_v26 = vld [vmem:[%s2416_s2] ss:$8 sps:$4 sm:$0xff]   ;;  %v1723_v27 = vld [vmem:[%s2415_s1 + $0x10] ss:$8 sps:$4 sm:$0xff]   ;;  %1059 = vmatprep.subr.bf16.mxu1 %v1768_v25 }
   0xe   : > { %s158_s30 = scalar_lea.vmem %s2414_s0, %s2419_s13  ;;  %v1771_v28 = vld [vmem:[%s2416_s2 + $0x14] ss:$8 sps:$4 sm:$0xff]   ;;  %v1728_v29 = vld [vmem:[%s2415_s1 + $0x24] ss:$8 sps:$4 sm:$0xff]   ;;  %1060 = vmatpush1.bf16.msra.mxu1 %v1770_v26  ;;  %v1773_v30 = vld [vmem:[%s2416_s2 + $0x10] ss:$8 sps:$4 sm:$0xff]  }
   0xf   : > { %291 = vmatpush1.bf16.msra.mxu0 %v1704_v7  ;;  %v164_v11 = vld [vmem:[%s158_s30] sm:$0x1]  ;;  %1061 = vmatprep.subr.bf16.mxu1 %v1771_v28  ;;  %v1777_v31 = vld [vmem:[%s2416_s2 + $0x24] ss:$8 sps:$4 sm:$0xff]   ;;  %v1731_v33 = vld [vmem:[%s2415_s1 + $0x34] ss:$8 sps:$4 sm:$0xff]  }
  0x10   : > { %292 = vmatprep.subr.bf16.mxu0 %v1705_v8  ;;  %v165_v12 = vunpack.c.l.bf16 %v164_v11  ;;  %v1726_v32 = vld [vmem:[%s2415_s1 + $0x20] ss:$8 sps:$4 sm:$0xff]   ;;  %v1783_v35 = vld [vmem:[%s2416_s2 + $0x34] ss:$8 sps:$4 sm:$0xff]   ;;  %v1729_v36 = vld [vmem:[%s2415_s1 + $0x30] ss:$8 sps:$4 sm:$0xff]  }
  0x11   : > { %v1779_v34 = vld [vmem:[%s2416_s2 + $0x20] ss:$8 sps:$4 sm:$0xff]   ;;  %v1734_v37 = vld [vmem:[%s2415_s1 + $0x44] ss:$8 sps:$4 sm:$0xff]   ;;  %v1785_v38 = vld [vmem:[%s2416_s2 + $0x30] ss:$8 sps:$4 sm:$0xff]  }
  0x12   : > { %168 = vst [vmem:[#allocation2 + $0x1] sm:$0x3] %v165_v12  ;;  %1062 = vmatpush1.bf16.msra.mxu1 %v1773_v30  ;;  %v1789_v39 = vld [vmem:[%s2416_s2 + $0x44] ss:$8 sps:$4 sm:$0xff]   ;;  %v1732_v40 = vld [vmem:[%s2415_s1 + $0x40] ss:$8 sps:$4 sm:$0xff]  }
  0x13   : > { %293 = vmatpush1.bf16.msra.mxu0 %v1707_v9  ;;  %1063 = vmatprep.subr.bf16.mxu1 %v1777_v31  ;;  %v1737_v41 = vld [vmem:[%s2415_s1 + $0x54] ss:$8 sps:$4 sm:$0xff]   ;;  %v1791_v42 = vld [vmem:[%s2416_s2 + $0x40] ss:$8 sps:$4 sm:$0xff]   ;;  %v1735_v44 = vld [vmem:[%s2415_s1 + $0x50] ss:$8 sps:$4 sm:$0xff]  }
  0x14   : > { %294 = vmatprep.subr.bf16.mxu0 %v1708_v10  ;;  %v1795_v43 = vld [vmem:[%s2416_s2 + $0x54] ss:$8 sps:$4 sm:$0xff]   ;;  %v1740_v45 = vld [vmem:[%s2415_s1 + $0x64] ss:$8 sps:$4 sm:$0xff]   ;;  %v1797_v46 = vld [vmem:[%s2416_s2 + $0x50] ss:$8 sps:$4 sm:$0xff]  }
  0x15   : > { %v1801_v47 = vld [vmem:[%s2416_s2 + $0x64] ss:$8 sps:$4 sm:$0xff]   ;;  %v1738_v48 = vld [vmem:[%s2415_s1 + $0x60] ss:$8 sps:$4 sm:$0xff]   ;;  %v1743_v49 = vld [vmem:[%s2415_s1 + $0x74] ss:$8 sps:$4 sm:$0xff]  }
  0x16   : > { %1064 = vmatpush1.bf16.msra.mxu1 %v1779_v34  ;;  %v1803_v50 = vld [vmem:[%s2416_s2 + $0x60] ss:$8 sps:$4 sm:$0xff]   ;;  %v1741_v51 = vld [vmem:[%s2415_s1 + $0x70] ss:$8 sps:$4 sm:$0xff]   ;;  %v1807_v52 = vld [vmem:[%s2416_s2 + $0x74] ss:$8 sps:$4 sm:$0xff]  }
  0x17   : > { %295 = vmatpush1.bf16.msra.mxu0 %v1710_v13  ;;  %1065 = vmatprep.subr.bf16.mxu1 %v1783_v35  ;;  %v1746_v53 = vld [vmem:[%s2415_s1 + $0x104] ss:$8 sps:$4 sm:$0xff]   ;;  %v1809_v55 = vld [vmem:[%s2416_s2 + $0x70] ss:$8 sps:$4 sm:$0xff]   ;;  %v1744_v56 = vld [vmem:[%s2415_s1 + $0x100] ss:$8 sps:$4 sm:$0xff]  }
  0x18   : > { %296 = vmatprep.subr.bf16.mxu0 %v1711_v14  ;;  %v1813_v57 = vld [vmem:[%s2416_s2 + $0x84] ss:$8 sps:$4 sm:$0xff]   ;;  %v1749_v59 = vld [vmem:[%s2415_s1 + $0x114] ss:$8 sps:$4 sm:$0xff]   ;;  %v1815_v60 = vld [vmem:[%s2416_s2 + $0x80] ss:$8 sps:$4 sm:$0xff]  }
  0x19   : > { %v187_v20 = vld [vmem:[#allocation2 + $0x1] sm:$0x3]  ;;  %v1819_v61 = vld [vmem:[%s2416_s2 + $0x94] ss:$8 sps:$4 sm:$0xff]   ;;  %v1747_v62 = vld [vmem:[%s2415_s1 + $0x110] ss:$8 sps:$4 sm:$0xff]  }
  0x1a   : > { %v188_v22 = vpack.c.bf16 %v187_v20, %v187_v20  ;;  %1066 = vmatpush1.bf16.msra.mxu1 %v1785_v38  ;;  %v169_v54 = vld [vmem:[#allocation2] sm:$0x3]  ;;  %v1752_v63 = vld [vmem:[%s2415_s1 + $0x124] ss:$8 sps:$4 sm:$0xff]   ;;  %v1821_v0 = vld [vmem:[%s2416_s2 + $0x90] ss:$8 sps:$4 sm:$0xff]  }
  0x1b   : > { %297 = vmatpush1.bf16.msra.mxu0 %v1713_v15  ;;  %1067 = vmatprep.subr.bf16.mxu1 %v1789_v39  ;;  %v170_v58 = vpack.c.bf16 %v169_v54, %v169_v54  ;;  %v1825_v1 = vld [vmem:[%s2416_s2 + $0xa4] ss:$8 sps:$4 sm:$0xff]   ;;  %v1750_v3 = vld [vmem:[%s2415_s1 + $0x120] ss:$8 sps:$4 sm:$0xff]   ;;  %v1755_v5 = vld [vmem:[%s2415_s1 + $0x134] ss:$8 sps:$4 sm:$0xff]  }
  0x1c   : > { %298 = vmatprep.subr.bf16.mxu0 %v1714_v16  ;;  %v1753_v6 = vld [vmem:[%s2415_s1 + $0x130] ss:$8 sps:$4 sm:$0xff]   ;;  %v1758_v7 = vld [vmem:[%s2415_s1 + $0x144] ss:$8 sps:$4 sm:$0xff]   ;;  %v1756_v8 = vld [vmem:[%s2415_s1 + $0x140] ss:$8 sps:$4 sm:$0xff]  }
  0x1d   : > { %v1761_v9 = vld [vmem:[%s2415_s1 + $0x154] ss:$8 sps:$4 sm:$0xff]   ;;  %v1759_v10 = vld [vmem:[%s2415_s1 + $0x150] ss:$8 sps:$4 sm:$0xff]   ;;  %v1764_v11 = vld [vmem:[%s2415_s1 + $0x164] ss:$8 sps:$4 sm:$0xff]  }
  0x1e   : > { %1068 = vmatpush1.bf16.msra.mxu1 %v1791_v42  ;;  %v1762_v12 = vld [vmem:[%s2415_s1 + $0x160] ss:$8 sps:$4 sm:$0xff]   ;;  %v1767_v13 = vld [vmem:[%s2415_s1 + $0x174] ss:$8 sps:$4 sm:$0xff]   ;;  %v1765_v14 = vld [vmem:[%s2415_s1 + $0x170] ss:$8 sps:$4 sm:$0xff]  }
  0x1f   : > { %299 = vmatpush1.bf16.msra.mxu0 %v1716_v17  ;;  %1069 = vmatprep.subr.bf16.mxu1 %v1795_v43  ;;  %v448_v15 = vld [vmem:[#allocation2 + $0x2] sm:$0x3]  ;;  %v1776_v16 = vld [vmem:[%s2416_s2 + $0x104] ss:$8 sps:$4 sm:$0xff]   ;;  %v1780_v20 = vld [vmem:[%s2416_s2 + $0x110] ss:$8 sps:$4 sm:$0xff]  }
  0x20   : > { %300 = vmatprep.subr.bf16.mxu0 %v1717_v18  ;;  %v449_v17 = vpack.c.bf16 %v448_v15, %v448_v15  ;;  %v1774_v18 = vld [vmem:[%s2416_s2 + $0x100] ss:$8 sps:$4 sm:$0xff]   ;;  %v1800_v25 = vld [vmem:[%s2416_s2 + $0x144] ss:$8 sps:$4 sm:$0xff]   ;;  %v1804_v28 = vld [vmem:[%s2416_s2 + $0x150] ss:$8 sps:$4 sm:$0xff]  }
  0x21   : > { %v1798_v26 = vld [vmem:[%s2416_s2 + $0x140] ss:$8 sps:$4 sm:$0xff]   ;;  %v1818_v31 = vld [vmem:[%s2416_s2 + $0x174] ss:$8 sps:$4 sm:$0xff]   ;;  %v1833_v38 = vld [vmem:[%s2416_s2 + $0xb0] ss:$8 sps:$4 sm:$0xff]  }
  0x22   : > { %1070 = vmatpush1.bf16.msra.mxu1 %v1797_v46  ;;  %v1810_v30 = vld [vmem:[%s2416_s2 + $0x160] ss:$8 sps:$4 sm:$0xff]   ;;  %v1830_v35 = vld [vmem:[%s2416_s2 + $0x194] ss:$8 sps:$4 sm:$0xff]   ;;  %v1836_v39 = vld [vmem:[%s2416_s2 + $0x1a4] ss:$8 sps:$4 sm:$0xff]  }
  0x23   : > { %301 = vmatpush1.bf16.msra.mxu0 %v1719_v19  ;;  %1071 = vmatprep.subr.bf16.mxu1 %v1801_v47  ;;  %v1782_v19 = vld [vmem:[%s2416_s2 + $0x114] ss:$8 sps:$4 sm:$0xff]   ;;  %v1822_v34 = vld [vmem:[%s2416_s2 + $0x180] ss:$8 sps:$4 sm:$0xff]   ;;  %v1845_v47 = vld [vmem:[%s2416_s2 + $0xd0] ss:$8 sps:$4 sm:$0xff]  }
  0x24   : > { %407 = vmatprep.subr.bf16.mxu0 %v1722_v21  ;;  %v1788_v21 = vld [vmem:[%s2416_s2 + $0x124] ss:$8 sps:$4 sm:$0xff]   ;;  %v1839_v42 = vld [vmem:[%s2416_s2 + $0xc0] ss:$8 sps:$4 sm:$0xff]   ;;  %v1842_v43 = vld [vmem:[%s2416_s2 + $0x1b4] ss:$8 sps:$4 sm:$0xff]  }
  0x25   : > { %v1843_v46 = vld [vmem:[%s2416_s2 + $0xd4] ss:$8 sps:$4 sm:$0xff]   ;;  %v1857_v54 = vld [vmem:[%s2416_s2 + $0xf0] ss:$8 sps:$4 sm:$0xff]   ;;  %s1426_s30 = sshll.u32 %s2419_s13, 1 }
  0x26   : > { %319 = vmatmul.mubr.bf16.vlgmr.msra.gmra.mrb[0].mxu0 %v188_v22  ;;  %1072 = vmatpush1.bf16.msra.mxu1 %v1803_v50  ;;  %v1786_v22 = vld [vmem:[%s2416_s2 + $0x120] ss:$8 sps:$4 sm:$0xff]   ;;  %v1849_v50 = vld [vmem:[%s2416_s2 + $0xe4] ss:$8 sps:$4 sm:$0xff]   ;;  %s162_s6 = scalar_lea.vmem %s2417_s3, %s1426_s30 }
  0x27   : > { %408 = vmatpush1.bf16.msra.mxu0 %v1720_v23  ;;  %439 = vmatprep.mubr.bf16.mxu0 %v1923_v2  ;;  %v1794_v23 = vld [vmem:[%s2416_s2 + $0x134] ss:$8 sps:$4 sm:$0xff]  }
  0x28   : > { %409 = vmatprep.subr.bf16.mxu0 %v1725_v24  ;;  %1073 = vmatprep.subr.bf16.mxu1 %v1807_v52  ;;  %v1792_v24 = vld [vmem:[%s2416_s2 + $0x130] ss:$8 sps:$4 sm:$0xff]   ;;  %v1854_v52 = vld [vmem:[%s2416_s2 + $0x1d4] ss:$8 sps:$4 sm:$0xff]  }
  0x2a   : > { %1074 = vmatpush1.bf16.msra.mxu1 %v1809_v55  ;;  %v1860_v55 = vld [vmem:[%s2416_s2 + $0x1e4] ss:$8 sps:$4 sm:$0xff]  }
  0x2b   : > { %410 = vmatpush1.bf16.msra.mxu0 %v1723_v27  ;;  %1075 = vmatprep.subr.bf16.mxu1 %v1813_v57  ;;  %v1806_v27 = vld [vmem:[%s2416_s2 + $0x154] ss:$8 sps:$4 sm:$0xff]   ;;  %v1864_v57 = vld [vmem:[%s2416_s2 + $0x204] ss:$8 sps:$4 sm:$0xff]  }
  0x2c   : > { %411 = vmatprep.subr.bf16.mxu0 %v1728_v29  ;;  %v1812_v29 = vld [vmem:[%s2416_s2 + $0x164] ss:$8 sps:$4 sm:$0xff]  }
  0x2e   : > { %1076 = vmatpush1.bf16.msra.mxu1 %v1815_v60 }
  0x2f   : > { %412 = vmatpush1.bf16.msra.mxu0 %v1726_v32  ;;  %1077 = vmatprep.subr.bf16.mxu1 %v1819_v61  ;;  %v1816_v32 = vld [vmem:[%s2416_s2 + $0x170] ss:$8 sps:$4 sm:$0xff]  }
  0x30   : > { %413 = vmatprep.subr.bf16.mxu0 %v1731_v33  ;;  %v1824_v33 = vld [vmem:[%s2416_s2 + $0x184] ss:$8 sps:$4 sm:$0xff]  }
  0x32   : > { %1078 = vmatpush1.bf16.msra.mxu1 %v1821_v0 }
  0x33   : > { %414 = vmatpush1.bf16.msra.mxu0 %v1729_v36  ;;  %1079 = vmatprep.subr.bf16.mxu1 %v1825_v1  ;;  %v1828_v36 = vld [vmem:[%s2416_s2 + $0x190] ss:$8 sps:$4 sm:$0xff]  }
  0x34   : > { %415 = vmatprep.subr.bf16.mxu0 %v1734_v37  ;;  %v1831_v37 = vld [vmem:[%s2416_s2 + $0xb4] ss:$8 sps:$4 sm:$0xff]  }
  0x37   : > { %416 = vmatpush1.bf16.msra.mxu0 %v1732_v40  ;;  %v1834_v40 = vld [vmem:[%s2416_s2 + $0x1a0] ss:$8 sps:$4 sm:$0xff]  }
  0x38   : > { %417 = vmatprep.subr.bf16.mxu0 %v1737_v41  ;;  %v1837_v41 = vld [vmem:[%s2416_s2 + $0xc4] ss:$8 sps:$4 sm:$0xff]  }
  0x3b   : > { %418 = vmatpush1.bf16.msra.mxu0 %v1735_v44  ;;  %v592_v44 = vlaneseq }
  0x3c   : > { %419 = vmatprep.subr.bf16.mxu0 %v1740_v45  ;;  %v1840_v45 = vld [vmem:[%s2416_s2 + $0x1b0] ss:$8 sps:$4 sm:$0xff]  }
  0x3d   : > { %vm594_vm0 = vcmp.lt.s32.totalorder %v592_v44, 256 }
  0x3e   : > { %596 = vst.msk [vmem:[#allocation3] ss:$4 sm:$0x3] %vm594_vm0, %v1924_v4  ;;  %598 = vst.msk [vmem:[#allocation3 + $0x3] ss:$4 sm:$0x3] %vm594_vm0, %v1924_v4 }
  0x3f   : > { %420 = vmatpush1.bf16.msra.mxu0 %v1738_v48  ;;  %v1846_v48 = vld [vmem:[%s2416_s2 + $0x1c0] ss:$8 sps:$4 sm:$0xff]   ;;  %v1852_v4 = vld [vmem:[%s2416_s2 + $0x1d0] ss:$8 sps:$4 sm:$0xff]  }
  0x40   : > { %421 = vmatprep.subr.bf16.mxu0 %v1743_v49  ;;  %v1848_v49 = vld [vmem:[%s2416_s2 + $0x1c4] ss:$8 sps:$4 sm:$0xff]  }
  0x43   : > { %422 = vmatpush1.bf16.msra.mxu0 %v1741_v51  ;;  %v1851_v51 = vld [vmem:[%s2416_s2 + $0xe0] ss:$8 sps:$4 sm:$0xff]  }
  0x44   : > { %547 = vmatprep.subr.bf16.mxu0 %v1746_v53  ;;  %v1855_v53 = vld [vmem:[%s2416_s2 + $0xf4] ss:$8 sps:$4 sm:$0xff]  }
  0x46   : > { %440 = vmatmul.mubr.bf16.vlgmr.msra.gmra.mrb[0].mxu0 %v170_v58  ;;  %v1866_v58 = vld [vmem:[%s2416_s2 + $0x1f0] ss:$8 sps:$4 sm:$0xff]  }
  0x47   : > { %548 = vmatpush1.bf16.msra.mxu0 %v1744_v56  ;;  %579 = vmatprep.mubr.bf16.mxu0 %v1923_v2  ;;  %v1827_v2 = vld [vmem:[%s2416_s2 + $0xa0] ss:$8 sps:$4 sm:$0xff]  }
  0x48   : > { %549 = vmatprep.subr.bf16.mxu0 %v1749_v59  ;;  %1080 = vmatpush1.bf16.msra.mxu1 %v1827_v2  ;;  %v1858_v56 = vld [vmem:[%s2416_s2 + $0x1e0] ss:$8 sps:$4 sm:$0xff]   ;;  %v1868_v59 = vld [vmem:[%s2416_s2 + $0x1f4] ss:$8 sps:$4 sm:$0xff]  }
  0x49   : > { %1081 = vmatprep.subr.bf16.mxu1 %v1831_v37  ;;  %v1885_v37 = vld [vmem:[%s2416_s2 + $0x260] ss:$8 sps:$4 sm:$0xff]  }
  0x4b   : > { %550 = vmatpush1.bf16.msra.mxu0 %v1747_v62 }
  0x4c   : > { %551 = vmatprep.subr.bf16.mxu0 %v1752_v63  ;;  %1082 = vmatpush1.bf16.msra.mxu1 %v1833_v38  ;;  %v1890_v38 = vld [vmem:[%s2416_s2 + $0x274] ss:$8 sps:$4 sm:$0xff]  }
  0x4d   : > { %1083 = vmatprep.subr.bf16.mxu1 %v1837_v41  ;;  %v1891_v41 = vld [vmem:[%s2416_s2 + $0x280] ss:$8 sps:$4 sm:$0xff]  }
  0x4f   : > { %552 = vmatpush1.bf16.msra.mxu0 %v1750_v3 }
  0x50   : > { %553 = vmatprep.subr.bf16.mxu0 %v1755_v5  ;;  %1084 = vmatpush1.bf16.msra.mxu1 %v1839_v42  ;;  %v1896_v42 = vld [vmem:[%s2416_s2 + $0x294] ss:$8 sps:$4 sm:$0xff]  }
  0x51   : > { %1085 = vmatprep.subr.bf16.mxu1 %v1843_v46  ;;  %v1897_v46 = vld [vmem:[%s2416_s2 + $0x2a0] ss:$8 sps:$4 sm:$0xff]  }
  0x53   : > { %554 = vmatpush1.bf16.msra.mxu0 %v1753_v6 }
  0x54   : > { %555 = vmatprep.subr.bf16.mxu0 %v1758_v7  ;;  %1086 = vmatpush1.bf16.msra.mxu1 %v1845_v47  ;;  %v1902_v47 = vld [vmem:[%s2416_s2 + $0x2b4] ss:$8 sps:$4 sm:$0xff]  }
  0x55   : > { %1087 = vmatprep.subr.bf16.mxu1 %v1849_v50  ;;  %v1903_v50 = vld [vmem:[%s2416_s2 + $0x2c0] ss:$8 sps:$4 sm:$0xff]  }
  0x57   : > { %556 = vmatpush1.bf16.msra.mxu0 %v1756_v8 }
  0x58   : > { %557 = vmatprep.subr.bf16.mxu0 %v1761_v9  ;;  %1088 = vmatpush1.bf16.msra.mxu1 %v1851_v51  ;;  %v1908_v51 = vld [vmem:[%s2416_s2 + $0x2d4] ss:$8 sps:$4 sm:$0xff]  }
  0x59   : > { %1089 = vmatprep.subr.bf16.mxu1 %v1855_v53  ;;  %v1911_v53 = vld [vmem:[%s2416_s2 + $0x2e4] ss:$8 sps:$4 sm:$0xff]  }
  0x5b   : > { %558 = vmatpush1.bf16.msra.mxu0 %v1759_v10 }
  0x5c   : > { %559 = vmatprep.subr.bf16.mxu0 %v1764_v11  ;;  %1090 = vmatpush1.bf16.msra.mxu1 %v1857_v54  ;;  %v1914_v54 = vld [vmem:[%s2416_s2 + $0x2f4] ss:$8 sps:$4 sm:$0xff]  }
  0x5d   : > { %1305 = vmatprep.subr.bf16.mxu1 %v1864_v57 }
  0x5f   : > { %560 = vmatpush1.bf16.msra.mxu0 %v1762_v12 }
  0x60   : > { %561 = vmatprep.subr.bf16.mxu0 %v1767_v13  ;;  %v1862_v13 = vld [vmem:[%s2416_s2 + $0x200] ss:$8 sps:$4 sm:$0xff]  }
  0x63   : > { %562 = vmatpush1.bf16.msra.mxu0 %v1765_v14 }
  0x64   : > { %858 = vmatprep.subr.bf16.mxu0 %v1776_v16  ;;  %v1871_v16 = vld [vmem:[%s2416_s2 + $0x214] ss:$8 sps:$4 sm:$0xff]  }
  0x66   : > { %580 = vmatmul.mubr.bf16.vlgmr.msra.gmra.mrb[0].mxu0 %v449_v17 }
  0x67   : > { %859 = vmatpush1.bf16.msra.mxu0 %v1774_v18 }
  0x68   : > { %860 = vmatprep.subr.bf16.mxu0 %v1782_v19 }
  0x6b   : > { %861 = vmatpush1.bf16.msra.mxu0 %v1780_v20 }
  0x6c   : > { %862 = vmatprep.subr.bf16.mxu0 %v1788_v21  ;;  %v1869_v21 = vld [vmem:[%s2416_s2 + $0x210] ss:$8 sps:$4 sm:$0xff]  }
  0x6f   : > { %863 = vmatpush1.bf16.msra.mxu0 %v1786_v22 }
  0x70   : > { %864 = vmatprep.subr.bf16.mxu0 %v1794_v23 }
  0x73   : > { %865 = vmatpush1.bf16.msra.mxu0 %v1792_v24 }
  0x74   : > { %866 = vmatprep.subr.bf16.mxu0 %v1800_v25  ;;  %v1875_v25 = vld [vmem:[%s2416_s2 + $0x224] ss:$8 sps:$4 sm:$0xff]  }
  0x77   : > { %867 = vmatpush1.bf16.msra.mxu0 %v1798_v26 }
  0x78   : > { %868 = vmatprep.subr.bf16.mxu0 %v1806_v27 }
  0x7b   : > { %869 = vmatpush1.bf16.msra.mxu0 %v1804_v28 }
  0x7c   : > { %870 = vmatprep.subr.bf16.mxu0 %v1812_v29  ;;  %v1873_v29 = vld [vmem:[%s2416_s2 + $0x220] ss:$8 sps:$4 sm:$0xff]  }
  0x7f   : > { %871 = vmatpush1.bf16.msra.mxu0 %v1810_v30  ;;  %v1878_v30 = vld [vmem:[%s2416_s2 + $0x234] ss:$8 sps:$4 sm:$0xff]  }
  0x80   : > { %872 = vmatprep.subr.bf16.mxu0 %v1818_v31  ;;  %v1876_v31 = vld [vmem:[%s2416_s2 + $0x230] ss:$8 sps:$4 sm:$0xff]  }
  0x83   : > { %873 = vmatpush1.bf16.msra.mxu0 %v1816_v32  ;;  %v1881_v32 = vld [vmem:[%s2416_s2 + $0x244] ss:$8 sps:$4 sm:$0xff]  }
  0x84   : > { %874 = vmatprep.subr.bf16.mxu0 %v1824_v33  ;;  %v1879_v33 = vld [vmem:[%s2416_s2 + $0x240] ss:$8 sps:$4 sm:$0xff]  }
  0x87   : > { %875 = vmatpush1.bf16.msra.mxu0 %v1822_v34  ;;  %v1884_v34 = vld [vmem:[%s2416_s2 + $0x254] ss:$8 sps:$4 sm:$0xff]  }
  0x88   : > { %876 = vmatprep.subr.bf16.mxu0 %v1830_v35  ;;  %v1882_v35 = vld [vmem:[%s2416_s2 + $0x250] ss:$8 sps:$4 sm:$0xff]  }
  0x8b   : > { %877 = vmatpush1.bf16.msra.mxu0 %v1828_v36  ;;  %v1887_v36 = vld [vmem:[%s2416_s2 + $0x264] ss:$8 sps:$4 sm:$0xff]  }
  0x8c   : > { %878 = vmatprep.subr.bf16.mxu0 %v1836_v39  ;;  %v1888_v39 = vld [vmem:[%s2416_s2 + $0x270] ss:$8 sps:$4 sm:$0xff]  }
  0x8f   : > { %879 = vmatpush1.bf16.msra.mxu0 %v1834_v40  ;;  %v1893_v40 = vld [vmem:[%s2416_s2 + $0x284] ss:$8 sps:$4 sm:$0xff]  }
  0x90   : > { %880 = vmatprep.subr.bf16.mxu0 %v1842_v43  ;;  %v1894_v43 = vld [vmem:[%s2416_s2 + $0x290] ss:$8 sps:$4 sm:$0xff]  }
  0x93   : > { %881 = vmatpush1.bf16.msra.mxu0 %v1840_v45  ;;  %v1899_v45 = vld [vmem:[%s2416_s2 + $0x2a4] ss:$8 sps:$4 sm:$0xff]  }
  0x94   : > { %882 = vmatprep.subr.bf16.mxu0 %v1848_v49  ;;  %v1905_v49 = vld [vmem:[%s2416_s2 + $0x2c4] ss:$8 sps:$4 sm:$0xff]  }
  0x97   : > { %883 = vmatpush1.bf16.msra.mxu0 %v1846_v48  ;;  %v1900_v48 = vld [vmem:[%s2416_s2 + $0x2b0] ss:$8 sps:$4 sm:$0xff]  }
  0x98   : > { %884 = vmatprep.subr.bf16.mxu0 %v1854_v52  ;;  %v1906_v52 = vld [vmem:[%s2416_s2 + $0x2d0] ss:$8 sps:$4 sm:$0xff]  }
  0x9b   : > { %885 = vmatpush1.bf16.msra.mxu0 %v1852_v4  ;;  %v1909_v4 = vld [vmem:[%s2416_s2 + $0x2e0] ss:$8 sps:$4 sm:$0xff]  }
  0x9c   : > { %886 = vmatprep.subr.bf16.mxu0 %v1860_v55  ;;  %v1912_v55 = vld [vmem:[%s2416_s2 + $0x2f0] ss:$8 sps:$4 sm:$0xff]  }
  0x9f   : > { %887 = vmatpush1.bf16.msra.mxu0 %v1858_v56 }
  0xa0   : > { %888 = vmatprep.subr.bf16.mxu0 %v1868_v59 }
  0xa3   : > { %889 = vmatpush1.bf16.msra.mxu0 %v1866_v58 }
 0x139   : > { %v581_v60 = vpop.f32.mrb[0].mxu0 }
 0x13a   : > { %v590_v61 = vmax.f32 %v581_v60, 0.0  ;;  %v583_v62 = vpop.f32.mrb[1].mxu0 }
 0x13b   : > { %v591_v63 = vmax.f32 %v583_v62, 0.0  ;;  %v585_v0 = vpop.f32.mrb[2].mxu0  ;;  %v1925_v62 = vmov 1966171168  }
 0x13c   : > { %v586_v1 = vpop.f32.mrb[3].mxu0 }
 0x13d   : > { %v601_v3 = vcombine.low %v590_v61, %v591_v63  ;;  %v1356_v63 = vunpack.c.l.s4 %v1925_v62 }
 0x13f   : > { %v602_v5 = vrot.slane %v601_v3, 7  ;;  %v1357_v1 = vunpack.c.0.s8 %v1356_v63  ;;  %v1359_v3 = vshrl.u32 %v592_v44, 7 }
 0x141   : > { %604 = vst [vmem:[#allocation3] sm:$0x66] %v602_v5 }
 0x148   : > { %v605_v2 = vld [vmem:[#allocation3] sm:$0x33]  ;;  %v2307_v6 = vld [vmem:[#allocation3] sm:$0xcc] }
 0x149   : > { %v643_v7 = vld [vmem:[#allocation3] sm:$0x66]  ;;  %v607_v8 = vcombine.high %v605_v2, %v605_v2  ;;  %v1102_v9 = vcombine.high %v2307_v6, %v2307_v6  ;;  %v609_v15 = vpack.c.bf16 %v605_v2, %v605_v2  ;;  %v1104_v56 = vpack.c.bf16 %v2307_v6, %v2307_v6 }
 0x14a   : > { %v645_v10 = vcombine.high %v643_v7, %v643_v7  ;;  %v647_v11 = vpack.c.bf16 %v643_v7, %v643_v7 }
 0x14b   : > { %v610_v12 = vpack.c.bf16 %v607_v8, %v607_v8  ;;  %v1105_v14 = vpack.c.bf16 %v1102_v9, %v1102_v9  ;;  %v1141_v57 = vrot.slane %v1104_v56, 1 }
 0x14c   : > { %v648_v17 = vpack.c.bf16 %v645_v10, %v645_v10  ;;  %v685_v18 = vshll.u32 %v647_v11, 16  ;;  %v683_v26 = vshrl.u32 %v647_v11, 16  ;;  %v1360_v11 = vsub.s32 %v1357_v1, %v1359_v3 }
 0x14d   : > { %1091 = vmatprep.mubr.bf16.mxu1 %v610_v12  ;;  %v1142_v19 = vrot.slane %v1105_v14, 1 }
 0x14e   : > { %1092 = vmatmul.mubr.bf16.vlgmr.msra.gmra.mrb[0].mxu1 %v609_v15  ;;  %v692_v20 = vshll.u32 %v648_v17, 16  ;;  %v687_v22 = vrot.slane %v685_v18, 1  ;;  %v690_v23 = vshrl.u32 %v648_v17, 16 }
 0x14f   : > { %1306 = vmatpush1.bf16.msra.mxu1 %v1862_v13  ;;  %1337 = vmatprep.mubr.bf16.mxu1 %v1142_v19 }
 0x150   : > { %1307 = vmatprep.subr.bf16.mxu1 %v1871_v16  ;;  %v694_v24 = vrot.slane %v692_v20, 1  ;;  %v688_v28 = vor.u32 %v687_v22, %v683_v26 }
 0x152   : > { %v695_v27 = vor.u32 %v694_v24, %v690_v23 }
 0x153   : > { %1308 = vmatpush1.bf16.msra.mxu1 %v1869_v21 }
 0x154   : > { %890 = vmatprep.mubr.bf16.mxu0 %v695_v27  ;;  %1309 = vmatprep.subr.bf16.mxu1 %v1875_v25 }
 0x155   : > { %891 = vmatmul.mubr.bf16.vlgmr.msra.gmra.mrb[4].mxu0 %v688_v28 }
 0x157   : > { %1310 = vmatpush1.bf16.msra.mxu1 %v1873_v29 }
 0x158   : > { %1311 = vmatprep.subr.bf16.mxu1 %v1878_v30 }
 0x15b   : > { %1312 = vmatpush1.bf16.msra.mxu1 %v1876_v31 }
 0x15c   : > { %1313 = vmatprep.subr.bf16.mxu1 %v1881_v32 }
 0x15f   : > { %1314 = vmatpush1.bf16.msra.mxu1 %v1879_v33 }
 0x160   : > { %1315 = vmatprep.subr.bf16.mxu1 %v1884_v34 }
 0x163   : > { %1316 = vmatpush1.bf16.msra.mxu1 %v1882_v35 }
 0x164   : > { %1317 = vmatprep.subr.bf16.mxu1 %v1887_v36 }
 0x167   : > { %1318 = vmatpush1.bf16.msra.mxu1 %v1885_v37 }
 0x168   : > { %1319 = vmatprep.subr.bf16.mxu1 %v1890_v38 }
 0x16b   : > { %1320 = vmatpush1.bf16.msra.mxu1 %v1888_v39 }
 0x16c   : > { %1321 = vmatprep.subr.bf16.mxu1 %v1893_v40 }
 0x16f   : > { %1322 = vmatpush1.bf16.msra.mxu1 %v1891_v41 }
 0x170   : > { %1323 = vmatprep.subr.bf16.mxu1 %v1896_v42 }
 0x173   : > { %1324 = vmatpush1.bf16.msra.mxu1 %v1894_v43 }
 0x174   : > { %1325 = vmatprep.subr.bf16.mxu1 %v1899_v45 }
 0x177   : > { %1326 = vmatpush1.bf16.msra.mxu1 %v1897_v46 }
 0x178   : > { %1327 = vmatprep.subr.bf16.mxu1 %v1902_v47 }
 0x17b   : > { %1328 = vmatpush1.bf16.msra.mxu1 %v1900_v48 }
 0x17c   : > { %1329 = vmatprep.subr.bf16.mxu1 %v1905_v49 }
 0x17f   : > { %1330 = vmatpush1.bf16.msra.mxu1 %v1903_v50 }
 0x180   : > { %1331 = vmatprep.subr.bf16.mxu1 %v1908_v51 }
 0x183   : > { %1332 = vmatpush1.bf16.msra.mxu1 %v1906_v52 }
 0x184   : > { %1333 = vmatprep.subr.bf16.mxu1 %v1911_v53 }
 0x187   : > { %1334 = vmatpush1.bf16.msra.mxu1 %v1909_v4 }
 0x188   : > { %1335 = vmatprep.subr.bf16.mxu1 %v1914_v54 }
 0x18b   : > { %1336 = vmatpush1.bf16.msra.mxu1 %v1912_v55 }
 0x18e   : > { %1338 = vmatmul.mubr.bf16.vlgmr.msra.gmra.mrb[0].mxu1 %v1141_v57 }
 0x228   : > { %v892_v58 = vpop.f32.mrb[4].mxu0 }
 0x229   : > { %v894_v59 = vpop.f32.mrb[5].mxu0 }
 0x22a   : > { %v896_v60 = vpop.f32.mrb[6].mxu0 }
 0x22b   : > { %v897_v61 = vpop.f32.mrb[7].mxu0 }
 0x261   : > { %v1339_v0 = vpop.f32.mrb[0].mxu1 }
 0x262   : > { %v1671_v5 = vadd.f32 %v1339_v0, %v892_v58  ;;  %v1341_v2 = vpop.f32.mrb[1].mxu1 }
 0x263   : > { %v1672_v7 = vadd.f32 %v1341_v2, %v894_v59  ;;  %v1343_v8 = vpop.f32.mrb[2].mxu1 }
 0x264   : > { %v1348_v6 = vmax.f32 %v1671_v5, 0.0  ;;  %v1344_v9 = vpop.f32.mrb[3].mxu1 }
 0x265   : > { %v1349_v10 = vmax.f32 %v1672_v7, 0.0 }
 0x267   : > { %v1667_v12 = vpack.c.bf16 %v1349_v10, %v1348_v6 }
 0x269   : > { %v1361_v13 = vrot.slane %v1667_v12, %v1360_v11 }
 0x26b   : > { %1668 = vst.sshfl [vmem:[%s162_s6] sm:$0x5 pattern:$0x73625140] %v1361_v13 }
 0x26c PF: > { %s13_s12 = sadd.s32 1, %s1921_s12  }
 0x26d   : > { %p10_p4 = scmp.ge.s32.totalorder %s13_s12, 4  }
 0x26f   :  { %12 = sbr.rel (!%p10_p4) target bundleno = 1 (0x1), region = 67 }

// kernel: unet_forward.15
= control target key start
LH: loop header
LB: loop body
LE: loop exit
PB: predicated region body
PF: predicated region fallthrough
CT: control target
= control target key end

     0   :  { %s2345_s12 = smov 0   ;;  %s2766_s0 = inlined_call_operand.vmem [shape: bf16[2,2,512], index: 0, kind: input, shape index: {}]   ;;  %s2767_s1 = inlined_call_operand.vmem [shape: bf16[3,512,128], index: 1, kind: input, shape index: {}]   ;;  %s2768_s2 = inlined_call_operand.vmem [shape: bf16[3,128,128], index: 2, kind: input, shape index: {}]   ;;  %s2769_s3 = inlined_call_operand.vmem [shape: bf16[2,2,128], index: 3, kind: output, shape index: {}]  }
   0x1 LB: > { %s1662_s13 = sadd.s32 4294967295, %s2320_s12   ;;  %p1666_p0 = scmp.ge.s32.totalorder %s2320_s12, 1  ;;  %s2320_s12 = sphi %s2345_s12, %s13_s12  }
   0x2   : > { %p136_p1 = scmp.lt.s32.totalorder %s2320_s12, 3 }
   0x4   : > { %p137_p2 = pnand %p1666_p0, %p136_p1 }
   0x5   : > { %v2188_v0 = vld [vmem:[%s2767_s1 + $0x140] sm:$0xff] (!%p137_p2)   ;;  %v2190_v2 = vld [vmem:[%s2767_s1 + $0x148] sm:$0xff] (!%p137_p2)   ;;  %p157_p3 = scmp.lt.s32.totalorder (!%p137_p2), %s1662_s13, 1  ;;  %v2322_v3 = vmov (!%p137_p2), 0.0   ;;  %v167_v5 = vlaneseq (!%p137_p2)  ;;  %v2192_v6 = vld [vmem:[%s2767_s1 + $0x150] sm:$0xff] (!%p137_p2)   ;;  %vm2324_vm1 = vmmov (!%p137_p2), 0  }
   0x6   : > { %140 = sbr.rel (%p137_p2) target bundleno = 650 (0x28a), region = 32  ;;  %v2189_v1 = vld [vmem:[%s2767_s1 + $0x100] sm:$0xff] (!%p137_p2)   ;;  %1950 = vmatprep.subr.bf16.mxu1 (!%p137_p2), %v2188_v0  ;;  %1288 = vst [vmem:[#allocation3] sm:$0x1] (!%p137_p2), %v2322_v3  ;;  %1289 = vst [vmem:[#allocation3 + $0x3] sm:$0x1] (!%p137_p2), %v2322_v3 }
   0x7   : > { %1951 = vmatpush3.bf16.msra.mxu1 (!%p137_p2), %v2189_v1  ;;  %v2191_v4 = vld [vmem:[%s2767_s1 + $0x108] sm:$0xff] (!%p137_p2)   ;;  %vm169_vm0 = vcmp.lt.s32.totalorder (!%p137_p2), %v167_v5, 512  ;;  %v2193_v7 = vld [vmem:[%s2767_s1 + $0x110] sm:$0xff] (!%p137_p2)   ;;  %v2194_v8 = vld [vmem:[%s2767_s1 + $0x158] sm:$0xff] (!%p137_p2)   ;;  %v2323_v16 = vmov (!%p137_p2), 1983009808  }
   0x8   : > { %1952 = vmatprep.subr.bf16.mxu1 (!%p137_p2), %v2190_v2  ;;  %171 = vst.msk [vmem:[#allocation2] ss:$4 sm:$0xf] (!%p137_p2), %vm169_vm0, %v2322_v3  ;;  %173 = vst.msk [vmem:[#allocation2 + $0x3] ss:$4 sm:$0xf] (!%p137_p2), %vm169_vm0, %v2322_v3  ;;  %v177_v17 = vunpack.c.l.s4 (!%p137_p2), %v2323_v16 }
   0x9   : > { %v2195_v9 = vld [vmem:[%s2767_s1 + $0x118] sm:$0xff] (!%p137_p2)   ;;  %v2196_v10 = vld [vmem:[%s2767_s1 + $0x160] sm:$0xff] (!%p137_p2)   ;;  %v2198_v12 = vld [vmem:[%s2767_s1 + $0x168] sm:$0xff] (!%p137_p2)   ;;  %v180_v18 = vshrl.u32 (!%p137_p2), %v167_v5, 7 }
   0xa   : > { %v2197_v11 = vld [vmem:[%s2767_s1 + $0x120] sm:$0xff] (!%p137_p2)   ;;  %v2199_v14 = vld [vmem:[%s2767_s1 + $0x128] sm:$0xff] (!%p137_p2)   ;;  %v2200_v19 = vld [vmem:[%s2767_s1 + $0x170] sm:$0xff] (!%p137_p2)   ;;  %v178_v21 = vunpack.c.0.s8 (!%p137_p2), %v177_v17 }
   0xb   : > { %1953 = vmatpush3.bf16.msra.mxu1 (!%p137_p2), %v2191_v4  ;;  %v2207_v22 = vld [vmem:[%s2767_s1 + $0x40] sm:$0xff] (!%p137_p2)   ;;  %v2201_v24 = vld [vmem:[%s2767_s1 + $0x130] sm:$0xff] (!%p137_p2)   ;;  %v2202_v26 = vld [vmem:[%s2767_s1 + $0x178] sm:$0xff] (!%p137_p2)  }
   0xc   : > { %1954 = vmatprep.subr.bf16.mxu1 (!%p137_p2), %v2192_v6  ;;  %v2208_v23 = vld [vmem:[%s2767_s1] sm:$0xff] (!%p137_p2)   ;;  %v181_v25 = vsub.s32 (!%p137_p2), %v178_v21, %v180_v18  ;;  %1994 = vmatprep.subr.bf16.mxu0 (!%p137_p2), %v2207_v22  ;;  %v2211_v28 = vld [vmem:[%s2767_s1 + $0x48] sm:$0xff] (!%p137_p2)   ;;  %v2203_v31 = vld [vmem:[%s2767_s1 + $0x138] sm:$0xff] (!%p137_p2)  }
   0xd   : > { %s2771_s13 = smov (!%p157_p3, %s1662_s13), 1  ;;  %1995 = vmatpush3.bf16.msra.mxu0 %v2208_v23  ;;  %v2212_v30 = vld [vmem:[%s2767_s1 + $0x8] sm:$0xff]   ;;  %v2205_v33 = vld [vmem:[%s2767_s1 + $0x1c0] sm:$0xff]   ;;  %v2215_v35 = vld [vmem:[%s2767_s1 + $0x50] sm:$0xff]  }
   0xe   : > { %s1667_s28 = sshll.u32 %s2771_s13, 2  ;;  %1996 = vmatprep.subr.bf16.mxu0 %v2211_v28  ;;  %v2216_v36 = vld [vmem:[%s2767_s1 + $0x10] sm:$0xff]   ;;  %v2219_v37 = vld [vmem:[%s2767_s1 + $0x58] sm:$0xff]   ;;  %v2223_v42 = vld [vmem:[%s2767_s1 + $0x60] sm:$0xff]  }
   0xf   : > { %1955 = vmatpush3.bf16.msra.mxu1 %v2193_v7  ;;  %s160_s8 = scalar_lea.vmem %s2766_s0, %s1667_s28  ;;  %v2220_v38 = vld [vmem:[%s2767_s1 + $0x18] sm:$0xff]   ;;  %v2224_v43 = vld [vmem:[%s2767_s1 + $0x20] sm:$0xff]   ;;  %v2227_v50 = vld [vmem:[%s2767_s1 + $0x68] sm:$0xff]  }
  0x10   : > { %1956 = vmatprep.subr.bf16.mxu1 %v2194_v8  ;;  %v165_v13 = vld [vmem:[%s160_s8] sm:$0xf]  ;;  %v2228_v52 = vld [vmem:[%s2767_s1 + $0x28] sm:$0xff]   ;;  %v2231_v57 = vld [vmem:[%s2767_s1 + $0x70] sm:$0xff]   ;;  %s163_s8 = scalar_lea.vmem %s2769_s3, %s2771_s13 }
  0x11   : > { %v166_v15 = vunpack.c.l.bf16 %v165_v13  ;;  %1997 = vmatpush3.bf16.msra.mxu0 %v2212_v30  ;;  %v2206_v54 = vld [vmem:[%s2767_s1 + $0x180] sm:$0xff]   ;;  %v2209_v56 = vld [vmem:[%s2767_s1 + $0x1c8] sm:$0xff]   ;;  %v2232_v58 = vld [vmem:[%s2767_s1 + $0x30] sm:$0xff]  }
  0x12   : > { %1998 = vmatprep.subr.bf16.mxu0 %v2215_v35  ;;  %v2210_v59 = vld [vmem:[%s2767_s1 + $0x188] sm:$0xff]   ;;  %v2213_v60 = vld [vmem:[%s2767_s1 + $0x1d0] sm:$0xff]   ;;  %v2235_v61 = vld [vmem:[%s2767_s1 + $0x78] sm:$0xff]  }
  0x13   : > { %1957 = vmatpush3.bf16.msra.mxu1 %v2195_v9  ;;  %v175_v20 = vcombine.high %v166_v15, %v166_v15  ;;  %v182_v27 = vrot.slane %v166_v15, %v181_v25  ;;  %v2237_v0 = vld [vmem:[%s2767_s1 + $0x38] sm:$0xff]   ;;  %v2214_v1 = vld [vmem:[%s2767_s1 + $0x190] sm:$0xff]   ;;  %v2221_v13 = vld [vmem:[%s2767_s1 + $0x1e0] sm:$0xff]  }
  0x14   : > { %1958 = vmatprep.subr.bf16.mxu1 %v2196_v10  ;;  %v2217_v5 = vld [vmem:[%s2767_s1 + $0x1d8] sm:$0xff]   ;;  %v2222_v15 = vld [vmem:[%s2767_s1 + $0x1a0] sm:$0xff]   ;;  %v2225_v16 = vld [vmem:[%s2767_s1 + $0x1e8] sm:$0xff]  }
  0x15   : > { %v189_v29 = vrot.slane %v175_v20, %v181_v25  ;;  %v190_v32 = vrot.slane %v182_v27, 7  ;;  %1999 = vmatpush3.bf16.msra.mxu0 %v2216_v36  ;;  %v2226_v18 = vld [vmem:[%s2767_s1 + $0x1a8] sm:$0xff]   ;;  %v2230_v20 = vld [vmem:[%s2767_s1 + $0x1b0] sm:$0xff]   ;;  %v2233_v21 = vld [vmem:[%s2767_s1 + $0x1f8] sm:$0xff]  }
  0x16   : > { %2000 = vmatprep.subr.bf16.mxu0 %v2219_v37  ;;  %v2255_v23 = vld [vmem:[%s2767_s1 + $0x240] sm:$0xff]   ;;  %v2234_v25 = vld [vmem:[%s2767_s1 + $0x1b8] sm:$0xff]   ;;  %v2259_v30 = vld [vmem:[%s2767_s1 + $0x248] sm:$0xff]  }
  0x17   : > { %1959 = vmatpush3.bf16.msra.mxu1 %v2197_v11  ;;  %v191_v34 = vrot.slane %v189_v29, 7  ;;  %194 = vst [vmem:[#allocation2] sm:$0x66] %v190_v32  ;;  %v2218_v11 = vld [vmem:[%s2767_s1 + $0x198] sm:$0xff]   ;;  %v2261_v32 = vld [vmem:[%s2767_s1 + $0x208] sm:$0xff]   ;;  %v2263_v36 = vld [vmem:[%s2767_s1 + $0x250] sm:$0xff]  }
  0x18   : > { %1960 = vmatprep.subr.bf16.mxu1 %v2198_v12  ;;  %v2241_v37 = vld [vmem:[%s2767_s1 + $0xc8] sm:$0xff]  }
  0x19   : > { %195 = vst [vmem:[#allocation2 + $0x8] sm:$0x66] %v191_v34  ;;  %2001 = vmatpush3.bf16.msra.mxu0 %v2220_v38  ;;  %v2240_v34 = vld [vmem:[%s2767_s1 + $0x80] sm:$0xff]   ;;  %v2265_v38 = vld [vmem:[%s2767_s1 + $0x210] sm:$0xff]  }
  0x1a   : > { %2002 = vmatprep.subr.bf16.mxu0 %v2223_v42  ;;  %v2269_v42 = vld [vmem:[%s2767_s1 + $0x218] sm:$0xff]  }
  0x1b   : > { %1961 = vmatpush3.bf16.msra.mxu1 %v2199_v14 }
  0x1c   : > { %1962 = vmatprep.subr.bf16.mxu1 %v2200_v19  ;;  %v2229_v19 = vld [vmem:[%s2767_s1 + $0x1f0] sm:$0xff]  }
  0x1d   : > { %2003 = vmatpush3.bf16.msra.mxu0 %v2224_v43  ;;  %v2244_v43 = vld [vmem:[%s2767_s1 + $0x90] sm:$0xff]  }
  0x1e   : > { %v272_v39 = vld [vmem:[#allocation2] sm:$0x66]  ;;  %2004 = vmatprep.subr.bf16.mxu0 %v2227_v50  ;;  %v2277_v50 = vld [vmem:[%s2767_s1 + $0x228] sm:$0xff]  }
  0x1f   : > { %1963 = vmatpush3.bf16.msra.mxu1 %v2201_v24  ;;  %v276_v40 = vcombine.high %v272_v39, %v272_v39  ;;  %v280_v41 = vpack.c.bf16 %v272_v39, %v272_v39  ;;  %v196_v4 = vld [vmem:[#allocation2] sm:$0x33]  ;;  %v2242_v39 = vld [vmem:[%s2767_s1 + $0x88] sm:$0xff]  }
  0x20   : > { %1964 = vmatprep.subr.bf16.mxu1 %v2202_v26  ;;  %v273_v62 = vld [vmem:[#allocation2 + $0x8] sm:$0x66]  ;;  %v200_v6 = vcombine.high %v196_v4, %v196_v4  ;;  %v204_v9 = vpack.c.bf16 %v196_v4, %v196_v4  ;;  %v2256_v24 = vld [vmem:[%s2767_s1 + $0x200] sm:$0xff]  }
  0x21   : > { %v281_v44 = vpack.c.bf16 %v276_v40, %v276_v40  ;;  %v352_v45 = vshll.u32 %v280_v41, 16  ;;  %v350_v46 = vshrl.u32 %v280_v41, 16  ;;  %2005 = vmatpush3.bf16.msra.mxu0 %v2228_v52  ;;  %v277_v63 = vcombine.high %v273_v62, %v273_v62  ;;  %v2513_v26 = vld [vmem:[#allocation2 + $0x8] sm:$0x33]  ;;  %v2267_v40 = vld [vmem:[%s2767_s1 + $0x258] sm:$0xff]   ;;  %v2243_v41 = vld [vmem:[%s2767_s1 + $0xd0] sm:$0xff]  }
  0x22   : > { %2006 = vmatprep.subr.bf16.mxu0 %v2231_v57  ;;  %v205_v10 = vpack.c.bf16 %v200_v6, %v200_v6  ;;  %v282_v17 = vpack.c.bf16 %v273_v62, %v273_v62  ;;  %v201_v29 = vcombine.high %v2513_v26, %v2513_v26  ;;  %v2279_v52 = vld [vmem:[%s2767_s1 + $0x270] sm:$0xff]  }
  0x23   : > { %1965 = vmatpush3.bf16.msra.mxu1 %v2203_v31  ;;  %v357_v47 = vshrl.u32 %v281_v44, 16  ;;  %v359_v48 = vshll.u32 %v281_v44, 16  ;;  %v354_v49 = vrot.slane %v352_v45, 1  ;;  %v283_v2 = vpack.c.bf16 %v277_v63, %v277_v63  ;;  %v2238_v31 = vld [vmem:[%s2767_s1 + $0xc0] sm:$0xff]   ;;  %v2245_v45 = vld [vmem:[%s2767_s1 + $0xd8] sm:$0xff]   ;;  %v2251_v57 = vld [vmem:[%s2767_s1 + $0xf0] sm:$0xff]  }
  0x24   : > { %1972 = vmatprep.subr.bf16.mxu1 %v2205_v33  ;;  %877 = vmatprep.mubr.bf16.mxu0 %v205_v10  ;;  %v366_v22 = vshll.u32 %v282_v17, 16  ;;  %v364_v27 = vshrl.u32 %v282_v17, 16  ;;  %v207_v35 = vpack.c.bf16 %v201_v29, %v201_v29  ;;  %v2271_v44 = vld [vmem:[%s2767_s1 + $0x260] sm:$0xff]   ;;  %v2252_v62 = vld [vmem:[%s2767_s1 + $0xb0] sm:$0xff]   ;;  %v926_v63 = vld [vmem:[#allocation2 + $0x8] sm:$0xcc] }
  0x25   : > { %v361_v51 = vrot.slane %v359_v48, 1  ;;  %v355_v53 = vor.u32 %v354_v49, %v350_v46  ;;  %2007 = vmatpush3.bf16.msra.mxu0 %v2232_v58  ;;  %v371_v7 = vshrl.u32 %v283_v2, 16  ;;  %v373_v8 = vshll.u32 %v283_v2, 16  ;;  %v2273_v46 = vld [vmem:[%s2767_s1 + $0x220] sm:$0xff]   ;;  %v2275_v48 = vld [vmem:[%s2767_s1 + $0x268] sm:$0xff]   ;;  %v2285_v58 = vld [vmem:[%s2767_s1 + $0x238] sm:$0xff]  }
  0x26   : > { %2008 = vmatprep.subr.bf16.mxu0 %v2235_v61  ;;  %v368_v28 = vrot.slane %v366_v22, 1  ;;  %v2247_v49 = vld [vmem:[%s2767_s1 + $0xe0] sm:$0xff]   ;;  %v930_v4 = vcombine.high %v926_v63, %v926_v63  ;;  %v2272_v17 = vld [vmem:[%s2767_s1 + $0x298] sm:$0xff]   ;;  %v2282_v22 = vld [vmem:[%s2767_s1 + $0x2f0] sm:$0xff]  }
  0x27   : > { %v362_v55 = vor.u32 %v361_v51, %v357_v47  ;;  %v375_v12 = vrot.slane %v373_v8, 1  ;;  %v2246_v47 = vld [vmem:[%s2767_s1 + $0x98] sm:$0xff]   ;;  %v2248_v51 = vld [vmem:[%s2767_s1 + $0xa0] sm:$0xff]   ;;  %v2291_v29 = vld [vmem:[%s2768_s2 + $0x48] sm:$0xff]  }
  0x28   : > { %v369_v33 = vor.u32 %v368_v28, %v364_v27  ;;  %v2258_v8 = vld [vmem:[%s2767_s1 + $0x2c0] sm:$0xff]  }
  0x29   : > { %605 = vmatprep.mubr.bf16.mxu1 %v362_v55  ;;  %2009 = vmatpush3.bf16.msra.mxu0 %v2237_v0  ;;  %v376_v14 = vor.u32 %v375_v12, %v371_v7  ;;  %v2250_v55 = vld [vmem:[%s2767_s1 + $0xa8] sm:$0xff]   ;;  %v2253_v0 = vld [vmem:[%s2767_s1 + $0xf8] sm:$0xff]   ;;  %v936_v7 = vpack.c.bf16 %v930_v4, %v930_v4  ;;  %v2260_v10 = vld [vmem:[%s2767_s1 + $0x280] sm:$0xff]  }
  0x2a   : > { %606 = vmatmul.mubr.bf16.vlgmr.msra.gmra.mrb[0].mxu1 %v355_v53  ;;  %2038 = vmatprep.subr.bf16.mxu0 %v2255_v23  ;;  %v2249_v53 = vld [vmem:[%s2767_s1 + $0xe8] sm:$0xff]   ;;  %v2284_v23 = vld [vmem:[%s2767_s1 + $0x2b0] sm:$0xff]   ;;  %v2290_v28 = vld [vmem:[%s2768_s2 + $0x40] sm:$0xff]  }
  0x2b   : > { %1973 = vmatpush3.bf16.msra.mxu1 %v2206_v54  ;;  %645 = vmatprep.mubr.bf16.mxu1 %v376_v14  ;;  %v2281_v54 = vld [vmem:[%s2767_s1 + $0x230] sm:$0xff]   ;;  %v2262_v12 = vld [vmem:[%s2767_s1 + $0x2c8] sm:$0xff]  }
  0x2c   : > { %1974 = vmatprep.subr.bf16.mxu1 %v2209_v56  ;;  %878 = vmatmul.mubr.bf16.vlgmr.msra.gmra.mrb[0].mxu0 %v204_v9  ;;  %v2283_v56 = vld [vmem:[%s2767_s1 + $0x278] sm:$0xff]   ;;  %v1009_v9 = vrot.slane %v936_v7, 1  ;;  %v2266_v14 = vld [vmem:[%s2767_s1 + $0x2d0] sm:$0xff]  }
  0x2d   : > { %2039 = vmatpush3.bf16.msra.mxu0 %v2256_v24  ;;  %v2287_v24 = vld [vmem:[%s2767_s1 + $0x2f8] sm:$0xff]  }
  0x2e   : > { %2040 = vmatprep.subr.bf16.mxu0 %v2259_v30  ;;  %v2292_v30 = vld [vmem:[%s2768_s2 + $0x50] sm:$0xff]  }
  0x2f   : > { %1975 = vmatpush3.bf16.msra.mxu1 %v2210_v59  ;;  %v925_v59 = vld [vmem:[#allocation2] sm:$0xcc] }
  0x30   : > { %1976 = vmatprep.subr.bf16.mxu1 %v2213_v60  ;;  %v929_v60 = vcombine.high %v925_v59, %v925_v59  ;;  %v933_v61 = vpack.c.bf16 %v925_v59, %v925_v59 }
  0x31   : > { %2041 = vmatpush3.bf16.msra.mxu0 %v2261_v32  ;;  %v2294_v32 = vld [vmem:[%s2768_s2 + $0x60] sm:$0xff]  }
  0x32   : > { %2042 = vmatprep.subr.bf16.mxu0 %v2263_v36  ;;  %v1006_v2 = vrot.slane %v933_v61, 1 }
  0x33   : > { %1977 = vmatpush3.bf16.msra.mxu1 %v2214_v1  ;;  %v934_v1 = vpack.c.bf16 %v929_v60, %v929_v60 }
  0x34   : > { %1978 = vmatprep.subr.bf16.mxu1 %v2217_v5  ;;  %v2254_v5 = vld [vmem:[%s2767_s1 + $0xb8] sm:$0xff]  }
  0x35   : > { %2043 = vmatpush3.bf16.msra.mxu0 %v2265_v38  ;;  %v1007_v6 = vrot.slane %v934_v1, 1 }
  0x36   : > { %2044 = vmatprep.subr.bf16.mxu0 %v2267_v40 }
  0x37   : > { %1979 = vmatpush3.bf16.msra.mxu1 %v2218_v11  ;;  %1238 = vmatprep.mubr.bf16.mxu0 %v1007_v6  ;;  %v206_v11 = vpack.c.bf16 %v2513_v26, %v2513_v26  ;;  %v2288_v26 = vld [vmem:[%s2767_s1 + $0x2b8] sm:$0xff]  }
  0x38   : > { %1980 = vmatprep.subr.bf16.mxu1 %v2221_v13  ;;  %v2264_v13 = vld [vmem:[%s2767_s1 + $0x288] sm:$0xff]  }
  0x39   : > { %2045 = vmatpush3.bf16.msra.mxu0 %v2269_v42 }
  0x3a   : > { %2046 = vmatprep.subr.bf16.mxu0 %v2271_v44 }
  0x3b   : > { %1981 = vmatpush3.bf16.msra.mxu1 %v2222_v15  ;;  %v2268_v15 = vld [vmem:[%s2767_s1 + $0x290] sm:$0xff]  }
  0x3c   : > { %1982 = vmatprep.subr.bf16.mxu1 %v2225_v16  ;;  %v2270_v16 = vld [vmem:[%s2767_s1 + $0x2d8] sm:$0xff]  }
  0x3d   : > { %2047 = vmatpush3.bf16.msra.mxu0 %v2273_v46 }
  0x3e   : > { %2048 = vmatprep.subr.bf16.mxu0 %v2275_v48 }
  0x3f   : > { %1983 = vmatpush3.bf16.msra.mxu1 %v2226_v18  ;;  %v2274_v18 = vld [vmem:[%s2767_s1 + $0x2e0] sm:$0xff]  }
  0x40   : > { %1984 = vmatprep.subr.bf16.mxu1 %v2229_v19  ;;  %v2276_v19 = vld [vmem:[%s2767_s1 + $0x2a0] sm:$0xff]  }
  0x41   : > { %2049 = vmatpush3.bf16.msra.mxu0 %v2277_v50 }
  0x42   : > { %2050 = vmatprep.subr.bf16.mxu0 %v2279_v52 }
  0x43   : > { %1985 = vmatpush3.bf16.msra.mxu1 %v2230_v20  ;;  %v2278_v20 = vld [vmem:[%s2767_s1 + $0x2e8] sm:$0xff]  }
  0x44   : > { %1986 = vmatprep.subr.bf16.mxu1 %v2233_v21  ;;  %v2280_v21 = vld [vmem:[%s2767_s1 + $0x2a8] sm:$0xff]  }
  0x45   : > { %2051 = vmatpush3.bf16.msra.mxu0 %v2281_v54 }
  0x46   : > { %2052 = vmatprep.subr.bf16.mxu0 %v2283_v56 }
  0x47   : > { %1987 = vmatpush3.bf16.msra.mxu1 %v2234_v25  ;;  %v935_v25 = vpack.c.bf16 %v926_v63, %v926_v63 }
  0x48   : > { %2016 = vmatprep.subr.bf16.mxu1 %v2238_v31  ;;  %v2293_v31 = vld [vmem:[%s2768_s2 + $0x58] sm:$0xff]  }
  0x49   : > { %2053 = vmatpush3.bf16.msra.mxu0 %v2285_v58  ;;  %v1008_v27 = vrot.slane %v935_v25, 1  ;;  %v2310_v25 = vld [vmem:[%s2768_s2 + $0xa0] sm:$0xff]  }
  0x4a   : > { %646 = vmatmul.mubr.bf16.vlgmr.msra.gmra.mrb[4].mxu1 %v369_v33  ;;  %2109 = vmatprep.subr.bf16.mxu0 %v2322_v3  ;;  %v2295_v33 = vld [vmem:[%s2768_s2 + $0x68] sm:$0xff]  }
  0x4b   : > { %2017 = vmatpush3.bf16.msra.mxu1 %v2240_v34  ;;  %917 = vmatprep.mubr.bf16.mxu1 %v207_v35  ;;  %v2296_v34 = vld [vmem:[%s2768_s2 + $0x70] sm:$0xff]   ;;  %v2297_v35 = vld [vmem:[%s2768_s2 + $0x78] sm:$0xff]  }
  0x4c   : > { %2018 = vmatprep.subr.bf16.mxu1 %v2241_v37  ;;  %1239 = vmatmul.mubr.bf16.vlgmr.msra.gmra.mrb[4].mxu0 %v1006_v2 }
  0x4d   : > { %2110 = vmatpush3.bf16.msra.mxu0 %v2290_v28  ;;  %2125 = vmatprep.mubr.msk.bf16.mxu0 %vm2324_vm1, %v2322_v3  ;;  %v2313_v28 = vld [vmem:[%s2768_s2 + $0xb8] sm:$0xff]  }
  0x4e   : > { %2111 = vmatprep.subr.bf16.mxu0 %v2322_v3 }
  0x4f   : > { %2019 = vmatpush3.bf16.msra.mxu1 %v2242_v39 }
  0x50   : > { %2020 = vmatprep.subr.bf16.mxu1 %v2243_v41 }
  0x51   : > { %2112 = vmatpush3.bf16.msra.mxu0 %v2291_v29 }
  0x52   : > { %2113 = vmatprep.subr.bf16.mxu0 %v2322_v3 }
  0x53   : > { %2021 = vmatpush3.bf16.msra.mxu1 %v2244_v43 }
  0x54   : > { %2022 = vmatprep.subr.bf16.mxu1 %v2245_v45 }
  0x55   : > { %2114 = vmatpush3.bf16.msra.mxu0 %v2292_v30 }
  0x56   : > { %2115 = vmatprep.subr.bf16.mxu0 %v2322_v3 }
  0x57   : > { %2023 = vmatpush3.bf16.msra.mxu1 %v2246_v47 }
  0x58   : > { %2024 = vmatprep.subr.bf16.mxu1 %v2247_v49 }
  0x59   : > { %2116 = vmatpush3.bf16.msra.mxu0 %v2293_v31 }
  0x5a   : > { %2117 = vmatprep.subr.bf16.mxu0 %v2322_v3 }
  0x5b   : > { %2025 = vmatpush3.bf16.msra.mxu1 %v2248_v51 }
  0x5c   : > { %2026 = vmatprep.subr.bf16.mxu1 %v2249_v53 }
  0x5d   : > { %2118 = vmatpush3.bf16.msra.mxu0 %v2294_v32 }
  0x5e   : > { %2119 = vmatprep.subr.bf16.mxu0 %v2322_v3 }
  0x5f   : > { %2027 = vmatpush3.bf16.msra.mxu1 %v2250_v55 }
  0x60   : > { %2028 = vmatprep.subr.bf16.mxu1 %v2251_v57 }
  0x61   : > { %2120 = vmatpush3.bf16.msra.mxu0 %v2295_v33 }
  0x62   : > { %2121 = vmatprep.subr.bf16.mxu0 %v2322_v3 }
  0x63   : > { %2029 = vmatpush3.bf16.msra.mxu1 %v2252_v62 }
  0x64   : > { %2030 = vmatprep.subr.bf16.mxu1 %v2253_v0 }
  0x65   : > { %2122 = vmatpush3.bf16.msra.mxu0 %v2296_v34 }
  0x66   : > { %2123 = vmatprep.subr.bf16.mxu0 %v2322_v3 }
  0x67   : > { %2031 = vmatpush3.bf16.msra.mxu1 %v2254_v5 }
  0x68   : > { %2060 = vmatprep.subr.bf16.mxu1 %v2258_v8 }
  0x69   : > { %2124 = vmatpush3.bf16.msra.mxu0 %v2297_v35 }
  0x6a   : > { %918 = vmatmul.mubr.bf16.vlgmr.msra.gmra.mrb[8].mxu1 %v206_v11  ;;  %2129 = vmatprep.subr.bf16.mxu0 %v2322_v3 }
  0x6b   : > { %2061 = vmatpush3.bf16.msra.mxu1 %v2260_v10  ;;  %1278 = vmatprep.mubr.bf16.mxu1 %v1009_v9  ;;  %v2298_v10 = vld [vmem:[%s2768_s2] sm:$0xff]  }
  0x6c   : > { %2062 = vmatprep.subr.bf16.mxu1 %v2262_v12  ;;  %v2299_v12 = vld [vmem:[%s2768_s2 + $0x8] sm:$0xff]  }
  0x6f   : > { %2063 = vmatpush3.bf16.msra.mxu1 %v2264_v13  ;;  %v2300_v13 = vld [vmem:[%s2768_s2 + $0x10] sm:$0xff]  }
  0x70   : > { %2064 = vmatprep.subr.bf16.mxu1 %v2266_v14  ;;  %v2301_v14 = vld [vmem:[%s2768_s2 + $0x18] sm:$0xff]  }
  0x73   : > { %2065 = vmatpush3.bf16.msra.mxu1 %v2268_v15  ;;  %v2302_v15 = vld [vmem:[%s2768_s2 + $0x20] sm:$0xff]  }
  0x74   : > { %2066 = vmatprep.subr.bf16.mxu1 %v2270_v16  ;;  %v2303_v16 = vld [vmem:[%s2768_s2 + $0x28] sm:$0xff]  }
  0x77   : > { %2067 = vmatpush3.bf16.msra.mxu1 %v2272_v17  ;;  %v2304_v17 = vld [vmem:[%s2768_s2 + $0x30] sm:$0xff]  }
  0x78   : > { %2068 = vmatprep.subr.bf16.mxu1 %v2274_v18  ;;  %v2305_v18 = vld [vmem:[%s2768_s2 + $0x38] sm:$0xff]  }
  0x7b   : > { %2069 = vmatpush3.bf16.msra.mxu1 %v2276_v19 }
  0x7c   : > { %2070 = vmatprep.subr.bf16.mxu1 %v2278_v20  ;;  %v2306_v20 = vld [vmem:[%s2768_s2 + $0x80] sm:$0xff]  }
  0x7f   : > { %2071 = vmatpush3.bf16.msra.mxu1 %v2280_v21 }
  0x80   : > { %2072 = vmatprep.subr.bf16.mxu1 %v2282_v22  ;;  %v2307_v22 = vld [vmem:[%s2768_s2 + $0x88] sm:$0xff]  }
  0x83   : > { %2073 = vmatpush3.bf16.msra.mxu1 %v2284_v23  ;;  %v2308_v23 = vld [vmem:[%s2768_s2 + $0x90] sm:$0xff]  }
  0x84   : > { %2074 = vmatprep.subr.bf16.mxu1 %v2287_v24  ;;  %v2309_v24 = vld [vmem:[%s2768_s2 + $0x98] sm:$0xff]  }
  0x87   : > { %2075 = vmatpush3.bf16.msra.mxu1 %v2288_v26  ;;  %v2311_v26 = vld [vmem:[%s2768_s2 + $0xa8] sm:$0xff]  }
  0x8a   : > { %1279 = vmatmul.mubr.bf16.vlgmr.msra.gmra.mrb[12].mxu1 %v1008_v27  ;;  %v2312_v27 = vld [vmem:[%s2768_s2 + $0xb0] sm:$0xff]  }
  0xfd   : > { %v1966_v36 = vpop.f32.mrb[0].mxu1 }
  0xfe   : > { %v1967_v37 = vpop.f32.mrb[1].mxu1 }
  0xff   : > { %v1968_v38 = vadd.f32 %v1967_v37, %v1966_v36  ;;  %v1969_v39 = vpop.f32.mrb[2].mxu1  ;;  %v2010_v41 = vpop.f32.mrb[0].mxu0 }
 0x100   : > { %v1970_v40 = vpop.f32.mrb[3].mxu1  ;;  %v2011_v42 = vpop.f32.mrb[1].mxu0 }
 0x101   : > { %v2012_v43 = vadd.f32 %v2011_v42, %v2010_v41  ;;  %v2013_v44 = vpop.f32.mrb[2].mxu0 }
 0x102   : > { %v2014_v45 = vpop.f32.mrb[3].mxu0 }
 0x11d   : > { %v1988_v46 = vpop.f32.mrb[4].mxu1 }
 0x11e   : > { %v1989_v47 = vpop.f32.mrb[5].mxu1 }
 0x11f   : > { %v1990_v48 = vadd.f32 %v1989_v47, %v1988_v46  ;;  %v1991_v49 = vpop.f32.mrb[6].mxu1  ;;  %v2054_v53 = vpop.f32.mrb[4].mxu0 }
 0x120   : > { %v1992_v50 = vpop.f32.mrb[7].mxu1  ;;  %v2055_v54 = vpop.f32.mrb[5].mxu0 }
 0x121   : > { %v648_v51 = vadd.f32 %v1990_v48, %v1968_v38  ;;  %v2056_v55 = vadd.f32 %v2055_v54, %v2054_v53  ;;  %v2057_v56 = vpop.f32.mrb[6].mxu0 }
 0x122   : > { %v2058_v57 = vpop.f32.mrb[7].mxu0 }
 0x123   : > { %v880_v52 = vadd.f32 %v2012_v43, %v648_v51 }
 0x13d   : > { %v2032_v58 = vpop.f32.mrb[8].mxu1 }
 0x13e   : > { %v2033_v59 = vpop.f32.mrb[9].mxu1 }
 0x13f   : > { %v2034_v60 = vadd.f32 %v2033_v59, %v2032_v58  ;;  %v2035_v61 = vpop.f32.mrb[10].mxu1 }
 0x140   : > { %v2036_v62 = vpop.f32.mrb[11].mxu1 }
 0x141   : > { %v920_v63 = vadd.f32 %v2034_v60, %v880_v52 }
 0x15d   : > { %v2076_v0 = vpop.f32.mrb[12].mxu1 }
 0x15e   : > { %v2077_v1 = vpop.f32.mrb[13].mxu1 }
 0x15f   : > { %v2078_v2 = vadd.f32 %v2077_v1, %v2076_v0  ;;  %v2079_v4 = vpop.f32.mrb[14].mxu1 }
 0x160   : > { %v2080_v5 = vpop.f32.mrb[15].mxu1 }
 0x161   : > { %v1281_v6 = vadd.f32 %v2078_v2, %v2056_v55 }
 0x163   : > { %v1286_v7 = vadd.f32 %v1281_v6, %v920_v63 }
 0x165   : > { %v1287_v8 = vmax.f32 %v1286_v7, 0.0 }
 0x167   : > { %1290 = vst [vmem:[#allocation3 + $0x1] sm:$0x3] %v1287_v8 }
 0x16e   : > { %v1309_v9 = vld [vmem:[#allocation3 + $0x1] sm:$0x3] }
 0x16f   : > { %v1310_v11 = vpack.c.bf16 %v1309_v9, %v1309_v9  ;;  %v1291_v19 = vld [vmem:[#allocation3] sm:$0x3]  ;;  %v1504_v29 = vld [vmem:[#allocation3 + $0x2] sm:$0x3] }
 0x170   : > { %v1292_v21 = vpack.c.bf16 %v1291_v19, %v1291_v19  ;;  %v1505_v30 = vpack.c.bf16 %v1504_v29, %v1504_v29 }
 0x171   : > { %2126 = vmatmul.mubr.bf16.vlgmr.msra.gmra.mrb[8].mxu0 %v1310_v11 }
 0x172   : > { %2130 = vmatpush3.bf16.msra.mxu0 %v2298_v10  ;;  %2145 = vmatprep.mubr.msk.bf16.mxu0 %vm2324_vm1, %v2322_v3 }
 0x173   : > { %2131 = vmatprep.subr.bf16.mxu0 %v2322_v3 }
 0x176   : > { %2132 = vmatpush3.bf16.msra.mxu0 %v2299_v12 }
 0x177   : > { %2133 = vmatprep.subr.bf16.mxu0 %v2322_v3 }
 0x17a   : > { %2134 = vmatpush3.bf16.msra.mxu0 %v2300_v13 }
 0x17b   : > { %2135 = vmatprep.subr.bf16.mxu0 %v2322_v3 }
 0x17e   : > { %2136 = vmatpush3.bf16.msra.mxu0 %v2301_v14 }
 0x17f   : > { %2137 = vmatprep.subr.bf16.mxu0 %v2322_v3 }
 0x182   : > { %2138 = vmatpush3.bf16.msra.mxu0 %v2302_v15 }
 0x183   : > { %2139 = vmatprep.subr.bf16.mxu0 %v2322_v3 }
 0x186   : > { %2140 = vmatpush3.bf16.msra.mxu0 %v2303_v16 }
 0x187   : > { %2141 = vmatprep.subr.bf16.mxu0 %v2322_v3 }
 0x18a   : > { %2142 = vmatpush3.bf16.msra.mxu0 %v2304_v17 }
 0x18b   : > { %2143 = vmatprep.subr.bf16.mxu0 %v2322_v3 }
 0x18e   : > { %2144 = vmatpush3.bf16.msra.mxu0 %v2305_v18 }
 0x18f   : > { %2149 = vmatprep.subr.bf16.mxu0 %v2322_v3 }
 0x191   : > { %2146 = vmatmul.mubr.bf16.vlgmr.msra.gmra.mrb[8].mxu0 %v1292_v21 }
 0x192   : > { %2150 = vmatpush3.bf16.msra.mxu0 %v2306_v20  ;;  %2165 = vmatprep.mubr.msk.bf16.mxu0 %vm2324_vm1, %v2322_v3 }
 0x193   : > { %2151 = vmatprep.subr.bf16.mxu0 %v2322_v3 }
 0x196   : > { %2152 = vmatpush3.bf16.msra.mxu0 %v2307_v22 }
 0x197   : > { %2153 = vmatprep.subr.bf16.mxu0 %v2322_v3 }
 0x19a   : > { %2154 = vmatpush3.bf16.msra.mxu0 %v2308_v23 }
 0x19b   : > { %2155 = vmatprep.subr.bf16.mxu0 %v2322_v3 }
 0x19e   : > { %2156 = vmatpush3.bf16.msra.mxu0 %v2309_v24 }
 0x19f   : > { %2157 = vmatprep.subr.bf16.mxu0 %v2322_v3 }
 0x1a2   : > { %2158 = vmatpush3.bf16.msra.mxu0 %v2310_v25 }
 0x1a3   : > { %2159 = vmatprep.subr.bf16.mxu0 %v2322_v3 }
 0x1a6   : > { %2160 = vmatpush3.bf16.msra.mxu0 %v2311_v26 }
 0x1a7   : > { %2161 = vmatprep.subr.bf16.mxu0 %v2322_v3 }
 0x1aa   : > { %2162 = vmatpush3.bf16.msra.mxu0 %v2312_v27 }
 0x1ab   : > { %2163 = vmatprep.subr.bf16.mxu0 %v2322_v3 }
 0x1ae   : > { %2164 = vmatpush3.bf16.msra.mxu0 %v2313_v28 }
 0x1b1   : > { %2166 = vmatmul.mubr.bf16.vlgmr.msra.gmra.mrb[8].mxu0 %v1505_v30 }
 0x284   : > { %v1605_v31 = vpop.f32.mrb[8].mxu0 }
 0x285   : > { %v1612_v32 = vmax.f32 %v1605_v31, 0.0  ;;  %v2167_v33 = vpop.f32.mrb[9].mxu0 }
 0x286   : > { %v1608_v34 = vpop.f32.mrb[10].mxu0 }
 0x287   : > { %v1613_v35 = vpack.c.bf16 %v1612_v32, %v1612_v32  ;;  %v2168_v36 = vpop.f32.mrb[11].mxu0 }
 0x289   : > { %1614 = vst [vmem:[%s163_s8] sm:$0x1] %v1613_v35 }
 0x28a PF: > { %s13_s12 = sadd.s32 1, %s2320_s12  }
 0x28b   : > { %p10_p4 = scmp.ge.s32.totalorder %s13_s12, 4  }
 0x28d   :  { %12 = sbr.rel (!%p10_p4) target bundleno = 1 (0x1), region = 67 }

// kernel: unet_forward.16
= control target key start
LH: loop header
LB: loop body
LE: loop exit
PB: predicated region body
PF: predicated region fallthrough
CT: control target
= control target key end

     0   :  { %s2336_s12 = smov 0   ;;  %s2751_s0 = inlined_call_operand.vmem [shape: bf16[2,4,512], index: 0, kind: input, shape index: {}]   ;;  %s2752_s1 = inlined_call_operand.vmem [shape: bf16[3,512,128], index: 1, kind: input, shape index: {}]   ;;  %s2753_s2 = inlined_call_operand.vmem [shape: bf16[3,128,128], index: 2, kind: input, shape index: {}]   ;;  %s2754_s3 = inlined_call_operand.vmem [shape: bf16[2,4,128], index: 3, kind: output, shape index: {}]  }
   0x1 LB: > { %s1658_s13 = sadd.s32 4294967295, %s2312_s12   ;;  %p1662_p0 = scmp.ge.s32.totalorder %s2312_s12, 1  ;;  %s2312_s12 = sphi %s2336_s12, %s13_s12  }
   0x2   : > { %p137_p1 = scmp.lt.s32.totalorder %s2312_s12, 3 }
   0x4   : > { %p138_p2 = pnand %p1662_p0, %p137_p1 }
   0x5   : > { %v2186_v0 = vld [vmem:[%s2752_s1 + $0x140] sm:$0xff] (!%p138_p2)   ;;  %v173_v1 = vlaneseq (!%p138_p2)  ;;  %v2188_v3 = vld [vmem:[%s2752_s1 + $0x148] sm:$0xff] (!%p138_p2)   ;;  %p160_p3 = scmp.lt.s32.totalorder (!%p138_p2), %s1658_s13, 1  ;;  %v2314_v4 = vmov (!%p138_p2), 0.0   ;;  %v2190_v6 = vld [vmem:[%s2752_s1 + $0x150] sm:$0xff] (!%p138_p2)   ;;  %vm2315_vm1 = vmmov (!%p138_p2), 0  }
   0x6   : > { %141 = sbr.rel (%p138_p2) target bundleno = 648 (0x288), region = 32  ;;  %v2187_v2 = vld [vmem:[%s2752_s1 + $0x100] sm:$0xff] (!%p138_p2)   ;;  %1949 = vmatprep.subr.bf16.mxu1 (!%p138_p2), %v2186_v0  ;;  %1278 = vst [vmem:[#allocation3] sm:$0x1] (!%p138_p2), %v2314_v4  ;;  %1279 = vst [vmem:[#allocation3 + $0x5] sm:$0x1] (!%p138_p2), %v2314_v4 }
   0x7   : > { %1950 = vmatpush3.bf16.msra.mxu1 (!%p138_p2), %v2187_v2  ;;  %v2189_v5 = vld [vmem:[%s2752_s1 + $0x108] sm:$0xff] (!%p138_p2)   ;;  %vm175_vm0 = vcmp.lt.s32.totalorder (!%p138_p2), %v173_v1, 512  ;;  %v2191_v7 = vld [vmem:[%s2752_s1 + $0x110] sm:$0xff] (!%p138_p2)   ;;  %v2192_v8 = vld [vmem:[%s2752_s1 + $0x158] sm:$0xff] (!%p138_p2)  }
   0x8   : > { %1951 = vmatprep.subr.bf16.mxu1 (!%p138_p2), %v2188_v3  ;;  %177 = vst.msk [vmem:[#allocation2] ss:$8 sm:$0xf] (!%p138_p2), %vm175_vm0, %v2314_v4  ;;  %180 = vst.msk [vmem:[#allocation2 + $0x5] ss:$8 sm:$0xf] (!%p138_p2), %vm175_vm0, %v2314_v4 }
   0x9   : > { %v2193_v9 = vld [vmem:[%s2752_s1 + $0x118] sm:$0xff] (!%p138_p2)   ;;  %v2194_v10 = vld [vmem:[%s2752_s1 + $0x160] sm:$0xff] (!%p138_p2)   ;;  %v2196_v12 = vld [vmem:[%s2752_s1 + $0x168] sm:$0xff] (!%p138_p2)  }
   0xa   : > { %v2195_v11 = vld [vmem:[%s2752_s1 + $0x120] sm:$0xff] (!%p138_p2)   ;;  %v2197_v14 = vld [vmem:[%s2752_s1 + $0x128] sm:$0xff] (!%p138_p2)   ;;  %v2198_v17 = vld [vmem:[%s2752_s1 + $0x170] sm:$0xff] (!%p138_p2)  }
   0xb   : > { %1952 = vmatpush3.bf16.msra.mxu1 (!%p138_p2), %v2189_v5  ;;  %v2204_v21 = vld [vmem:[%s2752_s1 + $0x40] sm:$0xff] (!%p138_p2)   ;;  %v2199_v24 = vld [vmem:[%s2752_s1 + $0x130] sm:$0xff] (!%p138_p2)   ;;  %v2200_v26 = vld [vmem:[%s2752_s1 + $0x178] sm:$0xff] (!%p138_p2)  }
   0xc   : > { %1953 = vmatprep.subr.bf16.mxu1 (!%p138_p2), %v2190_v6  ;;  %v2205_v22 = vld [vmem:[%s2752_s1] sm:$0xff] (!%p138_p2)   ;;  %1993 = vmatprep.subr.bf16.mxu0 (!%p138_p2), %v2204_v21  ;;  %v2208_v28 = vld [vmem:[%s2752_s1 + $0x48] sm:$0xff] (!%p138_p2)   ;;  %v2201_v30 = vld [vmem:[%s2752_s1 + $0x138] sm:$0xff] (!%p138_p2)  }
   0xd   : > { %s2756_s13 = smov (!%p160_p3, %s1658_s13), 1  ;;  %1994 = vmatpush3.bf16.msra.mxu0 %v2205_v22  ;;  %v2209_v29 = vld [vmem:[%s2752_s1 + $0x8] sm:$0xff]   ;;  %v2202_v31 = vld [vmem:[%s2752_s1 + $0x1c0] sm:$0xff]   ;;  %v2212_v32 = vld [vmem:[%s2752_s1 + $0x50] sm:$0xff]  }
   0xe   : > { %s1948_s28 = sshll.u32 %s2756_s13, 3  ;;  %1995 = vmatprep.subr.bf16.mxu0 %v2208_v28  ;;  %v2213_v34 = vld [vmem:[%s2752_s1 + $0x10] sm:$0xff]   ;;  %v2216_v40 = vld [vmem:[%s2752_s1 + $0x58] sm:$0xff]   ;;  %v2203_v46 = vld [vmem:[%s2752_s1 + $0x180] sm:$0xff]   ;;  %s1665_s6 = sshll.u32 %s2756_s13, 1 }
   0xf   : > { %1954 = vmatpush3.bf16.msra.mxu1 %v2191_v7  ;;  %s164_s8 = scalar_lea.vmem %s2751_s0, %s1948_s28  ;;  %v2217_v44 = vld [vmem:[%s2752_s1 + $0x18] sm:$0xff]   ;;  %v2220_v48 = vld [vmem:[%s2752_s1 + $0x60] sm:$0xff]   ;;  %v2206_v51 = vld [vmem:[%s2752_s1 + $0x1c8] sm:$0xff]   ;;  %s168_s9 = scalar_lea.vmem %s2754_s3, %s1665_s6 }
  0x10   : > { %1955 = vmatprep.subr.bf16.mxu1 %v2192_v8  ;;  %v170_v13 = vld [vmem:[%s164_s8] sm:$0xff]  ;;  %v2207_v52 = vld [vmem:[%s2752_s1 + $0x188] sm:$0xff]   ;;  %v2210_v55 = vld [vmem:[%s2752_s1 + $0x1d0] sm:$0xff]  }
  0x11   : > { %v171_v15 = vunpack.c.l.bf16 %v170_v13  ;;  %v172_v16 = vunpack.c.h.bf16 %v170_v13  ;;  %1996 = vmatpush3.bf16.msra.mxu0 %v2209_v29  ;;  %v2221_v50 = vld [vmem:[%s2752_s1 + $0x20] sm:$0xff]   ;;  %v2224_v53 = vld [vmem:[%s2752_s1 + $0x68] sm:$0xff]   ;;  %v2211_v56 = vld [vmem:[%s2752_s1 + $0x190] sm:$0xff]  }
  0x12   : > { %1997 = vmatprep.subr.bf16.mxu0 %v2212_v32  ;;  %v2225_v54 = vld [vmem:[%s2752_s1 + $0x28] sm:$0xff]   ;;  %v2228_v57 = vld [vmem:[%s2752_s1 + $0x70] sm:$0xff]   ;;  %v2214_v59 = vld [vmem:[%s2752_s1 + $0x1d8] sm:$0xff]  }
  0x13   : > { %1956 = vmatpush3.bf16.msra.mxu1 %v2193_v9  ;;  %v184_v18 = vcombine.high %v171_v15, %v171_v15  ;;  %v188_v19 = vrot.slane %v172_v16, 7  ;;  %v186_v20 = vrot.slane %v171_v15, 7  ;;  %v185_v23 = vcombine.high %v172_v16, %v172_v16  ;;  %v2229_v58 = vld [vmem:[%s2752_s1 + $0x30] sm:$0xff]   ;;  %v2215_v60 = vld [vmem:[%s2752_s1 + $0x198] sm:$0xff]   ;;  %v2218_v1 = vld [vmem:[%s2752_s1 + $0x1e0] sm:$0xff]  }
  0x14   : > { %1957 = vmatprep.subr.bf16.mxu1 %v2194_v10  ;;  %v2232_v61 = vld [vmem:[%s2752_s1 + $0x78] sm:$0xff]   ;;  %v2219_v2 = vld [vmem:[%s2752_s1 + $0x1a0] sm:$0xff]   ;;  %v2222_v9 = vld [vmem:[%s2752_s1 + $0x1e8] sm:$0xff]  }
  0x15   : > { %v187_v25 = vrot.slane %v184_v18, 7  ;;  %196 = vst [vmem:[#allocation2 + $0x10] sm:$0x1e] %v188_v19  ;;  %194 = vst [vmem:[#allocation2] sm:$0x1e] %v186_v20  ;;  %v189_v27 = vrot.slane %v185_v23, 7  ;;  %1998 = vmatpush3.bf16.msra.mxu0 %v2213_v34 }
  0x16   : > { %1999 = vmatprep.subr.bf16.mxu0 %v2216_v40  ;;  %v2233_v0 = vld [vmem:[%s2752_s1 + $0x38] sm:$0xff]   ;;  %v2223_v15 = vld [vmem:[%s2752_s1 + $0x1a8] sm:$0xff]   ;;  %v2226_v16 = vld [vmem:[%s2752_s1 + $0x1f0] sm:$0xff]  }
  0x17   : > { %1958 = vmatpush3.bf16.msra.mxu1 %v2195_v11  ;;  %195 = vst [vmem:[#allocation2 + $0x8] sm:$0x1e] %v187_v25  ;;  %197 = vst [vmem:[#allocation2 + $0x18] sm:$0x1e] %v189_v27  ;;  %v2227_v18 = vld [vmem:[%s2752_s1 + $0x1b0] sm:$0xff]   ;;  %v2230_v19 = vld [vmem:[%s2752_s1 + $0x1f8] sm:$0xff]  }
  0x18   : > { %1959 = vmatprep.subr.bf16.mxu1 %v2196_v12  ;;  %v2231_v22 = vld [vmem:[%s2752_s1 + $0x1b8] sm:$0xff]   ;;  %v2234_v23 = vld [vmem:[%s2752_s1 + $0xc0] sm:$0xff]   ;;  %v2236_v29 = vld [vmem:[%s2752_s1 + $0xc8] sm:$0xff]  }
  0x19   : > { %2000 = vmatpush3.bf16.msra.mxu0 %v2217_v44  ;;  %v2250_v25 = vld [vmem:[%s2752_s1 + $0x240] sm:$0xff]   ;;  %v2237_v32 = vld [vmem:[%s2752_s1 + $0x88] sm:$0xff]   ;;  %v2238_v34 = vld [vmem:[%s2752_s1 + $0xd0] sm:$0xff]  }
  0x1a   : > { %2001 = vmatprep.subr.bf16.mxu0 %v2220_v48  ;;  %v2251_v27 = vld [vmem:[%s2752_s1 + $0x200] sm:$0xff]   ;;  %v2241_v40 = vld [vmem:[%s2752_s1 + $0x98] sm:$0xff]   ;;  %v2245_v48 = vld [vmem:[%s2752_s1 + $0xa8] sm:$0xff]  }
  0x1b   : > { %1960 = vmatpush3.bf16.msra.mxu1 %v2197_v14  ;;  %v2243_v44 = vld [vmem:[%s2752_s1 + $0xa0] sm:$0xff]  }
  0x1c   : > { %1961 = vmatprep.subr.bf16.mxu1 %v2198_v17  ;;  %v270_v33 = vld [vmem:[#allocation2] sm:$0x1e]  ;;  %v272_v11 = vld [vmem:[#allocation2 + $0x10] sm:$0x1e] }
  0x1d   : > { %v274_v35 = vpack.c.bf16 %v270_v33, %v270_v33  ;;  %2002 = vmatpush3.bf16.msra.mxu0 %v2221_v50  ;;  %v198_v8 = vld [vmem:[#allocation2] sm:$0xf]  ;;  %v276_v14 = vpack.c.bf16 %v272_v11, %v272_v11  ;;  %v2255_v33 = vld [vmem:[%s2752_s1 + $0x208] sm:$0xff]   ;;  %v2246_v50 = vld [vmem:[%s2752_s1 + $0xf0] sm:$0xff]  }
  0x1e   : > { %v271_v36 = vld [vmem:[#allocation2 + $0x8] sm:$0x1e]  ;;  %2003 = vmatprep.subr.bf16.mxu0 %v2224_v53  ;;  %v273_v62 = vld [vmem:[#allocation2 + $0x18] sm:$0x1e]  ;;  %v202_v12 = vpack.c.bf16 %v198_v8, %v198_v8  ;;  %v2275_v53 = vld [vmem:[%s2752_s1 + $0x230] sm:$0xff]  }
  0x1f   : > { %1962 = vmatpush3.bf16.msra.mxu1 %v2199_v24  ;;  %v275_v37 = vpack.c.bf16 %v271_v36, %v271_v36  ;;  %v346_v38 = vshll.u32 %v274_v35, 16  ;;  %v344_v39 = vshrl.u32 %v274_v35, 16  ;;  %v277_v63 = vpack.c.bf16 %v273_v62, %v273_v62  ;;  %v199_v6 = vld [vmem:[#allocation2 + $0x8] sm:$0xf]  ;;  %v201_v28 = vld [vmem:[#allocation2 + $0x18] sm:$0xf] }
  0x20   : > { %1963 = vmatprep.subr.bf16.mxu1 %v2200_v26  ;;  %v203_v7 = vpack.c.bf16 %v199_v6, %v199_v6  ;;  %v360_v17 = vshll.u32 %v276_v14, 16  ;;  %v358_v20 = vshrl.u32 %v276_v14, 16  ;;  %v2235_v26 = vld [vmem:[%s2752_s1 + $0x80] sm:$0xff]   ;;  %v2257_v35 = vld [vmem:[%s2752_s1 + $0x250] sm:$0xff]   ;;  %v2256_v6 = vld [vmem:[%s2752_s1 + $0x2c8] sm:$0xff]  }
  0x21   : > { %v351_v41 = vshrl.u32 %v275_v37, 16  ;;  %v353_v42 = vshll.u32 %v275_v37, 16  ;;  %v348_v43 = vrot.slane %v346_v38, 1  ;;  %2004 = vmatpush3.bf16.msra.mxu0 %v2225_v54  ;;  %v365_v3 = vshrl.u32 %v277_v63, 16  ;;  %v2239_v36 = vld [vmem:[%s2752_s1 + $0x90] sm:$0xff]   ;;  %v2240_v38 = vld [vmem:[%s2752_s1 + $0xd8] sm:$0xff]  }
  0x22   : > { %2005 = vmatprep.subr.bf16.mxu0 %v2228_v57  ;;  %v367_v5 = vshll.u32 %v277_v63, 16  ;;  %871 = vmatprep.mubr.bf16.mxu0 %v203_v7  ;;  %v362_v21 = vrot.slane %v360_v17, 1  ;;  %v2259_v37 = vld [vmem:[%s2752_s1 + $0x210] sm:$0xff]   ;;  %v2248_v54 = vld [vmem:[%s2752_s1 + $0xf8] sm:$0xff]   ;;  %v919_v62 = vld [vmem:[#allocation2] sm:$0x3c] }
  0x23   : > { %1964 = vmatpush3.bf16.msra.mxu1 %v2201_v30  ;;  %v355_v45 = vrot.slane %v353_v42, 1  ;;  %v349_v47 = vor.u32 %v348_v43, %v344_v39  ;;  %v205_v30 = vpack.c.bf16 %v201_v28, %v201_v28  ;;  %v2261_v39 = vld [vmem:[%s2752_s1 + $0x258] sm:$0xff]   ;;  %v2242_v42 = vld [vmem:[%s2752_s1 + $0xe0] sm:$0xff]   ;;  %v2258_v8 = vld [vmem:[%s2752_s1 + $0x288] sm:$0xff]  }
  0x24   : > { %1971 = vmatprep.subr.bf16.mxu1 %v2202_v31  ;;  %v369_v10 = vrot.slane %v367_v5, 1  ;;  %v363_v24 = vor.u32 %v362_v21, %v358_v20  ;;  %v2253_v31 = vld [vmem:[%s2752_s1 + $0x248] sm:$0xff]   ;;  %v2265_v43 = vld [vmem:[%s2752_s1 + $0x260] sm:$0xff]   ;;  %v2277_v57 = vld [vmem:[%s2752_s1 + $0x278] sm:$0xff]  }
  0x25   : > { %v356_v49 = vor.u32 %v355_v45, %v351_v41  ;;  %2006 = vmatpush3.bf16.msra.mxu0 %v2229_v58  ;;  %v2263_v41 = vld [vmem:[%s2752_s1 + $0x218] sm:$0xff]   ;;  %v2267_v45 = vld [vmem:[%s2752_s1 + $0x220] sm:$0xff]   ;;  %v2262_v11 = vld [vmem:[%s2752_s1 + $0x290] sm:$0xff]  }
  0x26   : > { %2007 = vmatprep.subr.bf16.mxu0 %v2232_v61  ;;  %v370_v13 = vor.u32 %v369_v10, %v365_v3  ;;  %v2252_v58 = vld [vmem:[%s2752_s1 + $0x2c0] sm:$0xff]   ;;  %v2260_v10 = vld [vmem:[%s2752_s1 + $0x2d0] sm:$0xff]   ;;  %v2274_v17 = vld [vmem:[%s2752_s1 + $0x2a8] sm:$0xff]  }
  0x27   : > { %599 = vmatprep.mubr.bf16.mxu1 %v356_v49  ;;  %v2271_v49 = vld [vmem:[%s2752_s1 + $0x228] sm:$0xff]   ;;  %v2268_v14 = vld [vmem:[%s2752_s1 + $0x2e0] sm:$0xff]   ;;  %v921_v20 = vld [vmem:[#allocation2 + $0x10] sm:$0x3c] }
  0x28   : > { %600 = vmatmul.mubr.bf16.vlgmr.msra.gmra.mrb[0].mxu1 %v349_v47  ;;  %v2269_v47 = vld [vmem:[%s2752_s1 + $0x268] sm:$0xff]   ;;  %v2280_v21 = vld [vmem:[%s2752_s1 + $0x2f8] sm:$0xff]  }
  0x29   : > { %1972 = vmatpush3.bf16.msra.mxu1 %v2203_v46  ;;  %2008 = vmatpush3.bf16.msra.mxu0 %v2233_v0  ;;  %v2244_v46 = vld [vmem:[%s2752_s1 + $0xe8] sm:$0xff]   ;;  %v923_v0 = vpack.c.bf16 %v919_v62, %v919_v62  ;;  %v2285_v28 = vld [vmem:[%s2753_s2 + $0x58] sm:$0xff]  }
  0x2a   : > { %1973 = vmatprep.subr.bf16.mxu1 %v2206_v51  ;;  %639 = vmatprep.mubr.bf16.mxu1 %v370_v13  ;;  %v2273_v51 = vld [vmem:[%s2752_s1 + $0x270] sm:$0xff]   ;;  %v2266_v13 = vld [vmem:[%s2752_s1 + $0x298] sm:$0xff]  }
  0x2b   : > { %2037 = vmatprep.subr.bf16.mxu0 %v2250_v25  ;;  %v996_v7 = vrot.slane %v923_v0, 1  ;;  %v2282_v25 = vld [vmem:[%s2753_s2 + $0x40] sm:$0xff]  }
  0x2c   : > { %872 = vmatmul.mubr.bf16.vlgmr.msra.gmra.mrb[0].mxu0 %v202_v12  ;;  %v2264_v12 = vld [vmem:[%s2752_s1 + $0x2d8] sm:$0xff]  }
  0x2d   : > { %1974 = vmatpush3.bf16.msra.mxu1 %v2207_v52  ;;  %2038 = vmatpush3.bf16.msra.mxu0 %v2251_v27  ;;  %v2247_v52 = vld [vmem:[%s2752_s1 + $0xb0] sm:$0xff]  }
  0x2e   : > { %1975 = vmatprep.subr.bf16.mxu1 %v2210_v55  ;;  %2039 = vmatprep.subr.bf16.mxu0 %v2253_v31  ;;  %v2249_v55 = vld [vmem:[%s2752_s1 + $0xb8] sm:$0xff]   ;;  %v2284_v27 = vld [vmem:[%s2753_s2 + $0x50] sm:$0xff]  }
  0x2f   : > { %v2288_v31 = vld [vmem:[%s2753_s2 + $0x70] sm:$0xff]  }
  0x31   : > { %1976 = vmatpush3.bf16.msra.mxu1 %v2211_v56  ;;  %2040 = vmatpush3.bf16.msra.mxu0 %v2255_v33  ;;  %v200_v56 = vld [vmem:[#allocation2 + $0x10] sm:$0xf] }
  0x32   : > { %1977 = vmatprep.subr.bf16.mxu1 %v2214_v59  ;;  %2041 = vmatprep.subr.bf16.mxu0 %v2257_v35  ;;  %v2279_v59 = vld [vmem:[%s2752_s1 + $0x238] sm:$0xff]   ;;  %v204_v63 = vpack.c.bf16 %v200_v56, %v200_v56 }
  0x35   : > { %1978 = vmatpush3.bf16.msra.mxu1 %v2215_v60  ;;  %2042 = vmatpush3.bf16.msra.mxu0 %v2259_v37  ;;  %v920_v60 = vld [vmem:[#allocation2 + $0x8] sm:$0x3c] }
  0x36   : > { %1979 = vmatprep.subr.bf16.mxu1 %v2218_v1  ;;  %2043 = vmatprep.subr.bf16.mxu0 %v2261_v39  ;;  %v924_v61 = vpack.c.bf16 %v920_v60, %v920_v60  ;;  %v922_v1 = vld [vmem:[#allocation2 + $0x18] sm:$0x3c] }
  0x37   : > { %v926_v5 = vpack.c.bf16 %v922_v1, %v922_v1 }
  0x38   : > { %v997_v3 = vrot.slane %v924_v61, 1 }
  0x39   : > { %1980 = vmatpush3.bf16.msra.mxu1 %v2219_v2  ;;  %2044 = vmatpush3.bf16.msra.mxu0 %v2263_v41  ;;  %v2254_v2 = vld [vmem:[%s2752_s1 + $0x280] sm:$0xff]  }
  0x3a   : > { %1981 = vmatprep.subr.bf16.mxu1 %v2222_v9  ;;  %2045 = vmatprep.subr.bf16.mxu0 %v2265_v43  ;;  %v999_v9 = vrot.slane %v926_v5, 1 }
  0x3b   : > { %1228 = vmatprep.mubr.bf16.mxu0 %v997_v3 }
  0x3d   : > { %1982 = vmatpush3.bf16.msra.mxu1 %v2223_v15  ;;  %2046 = vmatpush3.bf16.msra.mxu0 %v2267_v45  ;;  %v2270_v15 = vld [vmem:[%s2752_s1 + $0x2a0] sm:$0xff]  }
  0x3e   : > { %1983 = vmatprep.subr.bf16.mxu1 %v2226_v16  ;;  %2047 = vmatprep.subr.bf16.mxu0 %v2269_v47  ;;  %v2272_v16 = vld [vmem:[%s2752_s1 + $0x2e8] sm:$0xff]  }
  0x41   : > { %1984 = vmatpush3.bf16.msra.mxu1 %v2227_v18  ;;  %2048 = vmatpush3.bf16.msra.mxu0 %v2271_v49  ;;  %v2276_v18 = vld [vmem:[%s2752_s1 + $0x2f0] sm:$0xff]  }
  0x42   : > { %1985 = vmatprep.subr.bf16.mxu1 %v2230_v19  ;;  %2049 = vmatprep.subr.bf16.mxu0 %v2273_v51  ;;  %v2278_v19 = vld [vmem:[%s2752_s1 + $0x2b0] sm:$0xff]  }
  0x45   : > { %1986 = vmatpush3.bf16.msra.mxu1 %v2231_v22  ;;  %2050 = vmatpush3.bf16.msra.mxu0 %v2275_v53  ;;  %v925_v22 = vpack.c.bf16 %v921_v20, %v921_v20  ;;  %v2300_v20 = vld [vmem:[%s2753_s2 + $0x90] sm:$0xff]  }
  0x46   : > { %2015 = vmatprep.subr.bf16.mxu1 %v2234_v23  ;;  %2051 = vmatprep.subr.bf16.mxu0 %v2277_v57  ;;  %v2281_v23 = vld [vmem:[%s2752_s1 + $0x2b8] sm:$0xff]  }
  0x48   : > { %640 = vmatmul.mubr.bf16.vlgmr.msra.gmra.mrb[4].mxu1 %v363_v24  ;;  %v998_v24 = vrot.slane %v925_v22, 1  ;;  %v2302_v22 = vld [vmem:[%s2753_s2 + $0xa0] sm:$0xff]  }
  0x49   : > { %2016 = vmatpush3.bf16.msra.mxu1 %v2235_v26  ;;  %911 = vmatprep.mubr.bf16.mxu1 %v205_v30  ;;  %v2283_v26 = vld [vmem:[%s2753_s2 + $0x48] sm:$0xff]  }
  0x4a   : > { %2017 = vmatprep.subr.bf16.mxu1 %v2236_v29  ;;  %2052 = vmatpush3.bf16.msra.mxu0 %v2279_v59  ;;  %v2286_v29 = vld [vmem:[%s2753_s2 + $0x60] sm:$0xff]   ;;  %v2287_v30 = vld [vmem:[%s2753_s2 + $0x68] sm:$0xff]  }
  0x4b   : > { %2108 = vmatprep.subr.bf16.mxu0 %v2314_v4 }
  0x4d   : > { %2018 = vmatpush3.bf16.msra.mxu1 %v2237_v32  ;;  %1229 = vmatmul.mubr.bf16.vlgmr.msra.gmra.mrb[4].mxu0 %v996_v7  ;;  %v2289_v32 = vld [vmem:[%s2753_s2 + $0x78] sm:$0xff]   ;;  %v2290_v7 = vld [vmem:[%s2753_s2] sm:$0xff]  }
  0x4e   : > { %2019 = vmatprep.subr.bf16.mxu1 %v2238_v34  ;;  %2109 = vmatpush3.bf16.msra.mxu0 %v2282_v25  ;;  %v2305_v25 = vld [vmem:[%s2753_s2 + $0xb8] sm:$0xff]  }
  0x4f   : > { %2110 = vmatprep.subr.bf16.mxu0 %v2314_v4  ;;  %2124 = vmatprep.mubr.msk.bf16.mxu0 %vm2315_vm1, %v2314_v4 }
  0x51   : > { %2020 = vmatpush3.bf16.msra.mxu1 %v2239_v36 }
  0x52   : > { %2021 = vmatprep.subr.bf16.mxu1 %v2240_v38  ;;  %2111 = vmatpush3.bf16.msra.mxu0 %v2283_v26 }
  0x53   : > { %2112 = vmatprep.subr.bf16.mxu0 %v2314_v4 }
  0x55   : > { %2022 = vmatpush3.bf16.msra.mxu1 %v2241_v40 }
  0x56   : > { %2023 = vmatprep.subr.bf16.mxu1 %v2242_v42  ;;  %2113 = vmatpush3.bf16.msra.mxu0 %v2284_v27 }
  0x57   : > { %2114 = vmatprep.subr.bf16.mxu0 %v2314_v4 }
  0x59   : > { %2024 = vmatpush3.bf16.msra.mxu1 %v2243_v44 }
  0x5a   : > { %2025 = vmatprep.subr.bf16.mxu1 %v2244_v46  ;;  %2115 = vmatpush3.bf16.msra.mxu0 %v2285_v28 }
  0x5b   : > { %2116 = vmatprep.subr.bf16.mxu0 %v2314_v4 }
  0x5d   : > { %2026 = vmatpush3.bf16.msra.mxu1 %v2245_v48 }
  0x5e   : > { %2027 = vmatprep.subr.bf16.mxu1 %v2246_v50  ;;  %2117 = vmatpush3.bf16.msra.mxu0 %v2286_v29 }
  0x5f   : > { %2118 = vmatprep.subr.bf16.mxu0 %v2314_v4 }
  0x61   : > { %2028 = vmatpush3.bf16.msra.mxu1 %v2247_v52 }
  0x62   : > { %2029 = vmatprep.subr.bf16.mxu1 %v2248_v54  ;;  %2119 = vmatpush3.bf16.msra.mxu0 %v2287_v30 }
  0x63   : > { %2120 = vmatprep.subr.bf16.mxu0 %v2314_v4 }
  0x65   : > { %2030 = vmatpush3.bf16.msra.mxu1 %v2249_v55 }
  0x66   : > { %2059 = vmatprep.subr.bf16.mxu1 %v2252_v58  ;;  %2121 = vmatpush3.bf16.msra.mxu0 %v2288_v31 }
  0x67   : > { %2122 = vmatprep.subr.bf16.mxu0 %v2314_v4 }
  0x68   : > { %912 = vmatmul.mubr.bf16.vlgmr.msra.gmra.mrb[8].mxu1 %v204_v63 }
  0x69   : > { %2060 = vmatpush3.bf16.msra.mxu1 %v2254_v2  ;;  %1268 = vmatprep.mubr.bf16.mxu1 %v999_v9  ;;  %v2291_v9 = vld [vmem:[%s2753_s2 + $0x8] sm:$0xff]  }
  0x6a   : > { %2061 = vmatprep.subr.bf16.mxu1 %v2256_v6  ;;  %2123 = vmatpush3.bf16.msra.mxu0 %v2289_v32 }
  0x6b   : > { %2128 = vmatprep.subr.bf16.mxu0 %v2314_v4 }
  0x6d   : > { %2062 = vmatpush3.bf16.msra.mxu1 %v2258_v8 }
  0x6e   : > { %2063 = vmatprep.subr.bf16.mxu1 %v2260_v10  ;;  %v2292_v10 = vld [vmem:[%s2753_s2 + $0x10] sm:$0xff]  }
  0x71   : > { %2064 = vmatpush3.bf16.msra.mxu1 %v2262_v11  ;;  %v2293_v11 = vld [vmem:[%s2753_s2 + $0x18] sm:$0xff]  }
  0x72   : > { %2065 = vmatprep.subr.bf16.mxu1 %v2264_v12  ;;  %v2294_v12 = vld [vmem:[%s2753_s2 + $0x20] sm:$0xff]  }
  0x75   : > { %2066 = vmatpush3.bf16.msra.mxu1 %v2266_v13  ;;  %v2295_v13 = vld [vmem:[%s2753_s2 + $0x28] sm:$0xff]  }
  0x76   : > { %2067 = vmatprep.subr.bf16.mxu1 %v2268_v14  ;;  %v2296_v14 = vld [vmem:[%s2753_s2 + $0x30] sm:$0xff]  }
  0x79   : > { %2068 = vmatpush3.bf16.msra.mxu1 %v2270_v15  ;;  %v2297_v15 = vld [vmem:[%s2753_s2 + $0x38] sm:$0xff]  }
  0x7a   : > { %2069 = vmatprep.subr.bf16.mxu1 %v2272_v16 }
  0x7d   : > { %2070 = vmatpush3.bf16.msra.mxu1 %v2274_v17  ;;  %v2298_v17 = vld [vmem:[%s2753_s2 + $0x80] sm:$0xff]  }
  0x7e   : > { %2071 = vmatprep.subr.bf16.mxu1 %v2276_v18 }
  0x81   : > { %2072 = vmatpush3.bf16.msra.mxu1 %v2278_v19  ;;  %v2299_v19 = vld [vmem:[%s2753_s2 + $0x88] sm:$0xff]  }
  0x82   : > { %2073 = vmatprep.subr.bf16.mxu1 %v2280_v21  ;;  %v2301_v21 = vld [vmem:[%s2753_s2 + $0x98] sm:$0xff]  }
  0x85   : > { %2074 = vmatpush3.bf16.msra.mxu1 %v2281_v23  ;;  %v2303_v23 = vld [vmem:[%s2753_s2 + $0xa8] sm:$0xff]  }
  0x88   : > { %1269 = vmatmul.mubr.bf16.vlgmr.msra.gmra.mrb[12].mxu1 %v998_v24  ;;  %v2304_v24 = vld [vmem:[%s2753_s2 + $0xb0] sm:$0xff]  }
  0xfb   : > { %v1965_v33 = vpop.f32.mrb[0].mxu1 }
  0xfc   : > { %v1966_v34 = vpop.f32.mrb[1].mxu1 }
  0xfd   : > { %v1967_v35 = vadd.f32 %v1966_v34, %v1965_v33  ;;  %v1968_v36 = vpop.f32.mrb[2].mxu1 }
  0xfe   : > { %v1969_v37 = vpop.f32.mrb[3].mxu1 }
  0xff   : > { %v2009_v38 = vpop.f32.mrb[0].mxu0 }
 0x100   : > { %v2010_v39 = vpop.f32.mrb[1].mxu0 }
 0x101   : > { %v2011_v40 = vadd.f32 %v2010_v39, %v2009_v38  ;;  %v2012_v41 = vpop.f32.mrb[2].mxu0 }
 0x102   : > { %v2013_v42 = vpop.f32.mrb[3].mxu0 }
 0x11b   : > { %v1987_v43 = vpop.f32.mrb[4].mxu1 }
 0x11c   : > { %v1988_v44 = vpop.f32.mrb[5].mxu1 }
 0x11d   : > { %v1989_v45 = vadd.f32 %v1988_v44, %v1987_v43  ;;  %v1990_v46 = vpop.f32.mrb[6].mxu1 }
 0x11e   : > { %v1991_v47 = vpop.f32.mrb[7].mxu1 }
 0x11f   : > { %v642_v48 = vadd.f32 %v1989_v45, %v1967_v35 }
 0x120   : > { %v2053_v51 = vpop.f32.mrb[4].mxu0 }
 0x121   : > { %v874_v49 = vadd.f32 %v2011_v40, %v642_v48  ;;  %v2054_v53 = vpop.f32.mrb[5].mxu0 }
 0x122   : > { %v2055_v56 = vadd.f32 %v2054_v53, %v2053_v51  ;;  %v2056_v57 = vpop.f32.mrb[6].mxu0 }
 0x123   : > { %v2057_v59 = vpop.f32.mrb[7].mxu0 }
 0x13b   : > { %v2031_v50 = vpop.f32.mrb[8].mxu1 }
 0x13c   : > { %v2032_v52 = vpop.f32.mrb[9].mxu1 }
 0x13d   : > { %v2033_v54 = vadd.f32 %v2032_v52, %v2031_v50  ;;  %v2034_v55 = vpop.f32.mrb[10].mxu1 }
 0x13e   : > { %v2035_v58 = vpop.f32.mrb[11].mxu1 }
 0x13f   : > { %v914_v60 = vadd.f32 %v2033_v54, %v874_v49 }
 0x15b   : > { %v2075_v61 = vpop.f32.mrb[12].mxu1 }
 0x15c   : > { %v2076_v62 = vpop.f32.mrb[13].mxu1 }
 0x15d   : > { %v2077_v63 = vadd.f32 %v2076_v62, %v2075_v61  ;;  %v2078_v0 = vpop.f32.mrb[14].mxu1 }
 0x15e   : > { %v2079_v1 = vpop.f32.mrb[15].mxu1 }
 0x15f   : > { %v1271_v2 = vadd.f32 %v2077_v63, %v2055_v56 }
 0x161   : > { %v1276_v3 = vadd.f32 %v1271_v2, %v914_v60 }
 0x163   : > { %v1277_v5 = vmax.f32 %v1276_v3, 0.0 }
 0x165   : > { %1280 = vst [vmem:[#allocation3 + $0x1] sm:$0xf] %v1277_v5 }
 0x16c   : > { %v1299_v6 = vld [vmem:[#allocation3 + $0x1] sm:$0xf] }
 0x16d   : > { %v1300_v8 = vpack.c.bf16 %v1299_v6, %v1299_v6  ;;  %v1281_v16 = vld [vmem:[#allocation3] sm:$0xf] }
 0x16e   : > { %v1282_v18 = vpack.c.bf16 %v1281_v16, %v1281_v16  ;;  %v1494_v26 = vld [vmem:[#allocation3 + $0x2] sm:$0xf] }
 0x16f   : > { %2125 = vmatmul.mubr.bf16.vlgmr.msra.gmra.mrb[8].mxu0 %v1300_v8  ;;  %v1495_v27 = vpack.c.bf16 %v1494_v26, %v1494_v26 }
 0x170   : > { %2129 = vmatpush3.bf16.msra.mxu0 %v2290_v7  ;;  %2144 = vmatprep.mubr.msk.bf16.mxu0 %vm2315_vm1, %v2314_v4 }
 0x171   : > { %2130 = vmatprep.subr.bf16.mxu0 %v2314_v4 }
 0x174   : > { %2131 = vmatpush3.bf16.msra.mxu0 %v2291_v9 }
 0x175   : > { %2132 = vmatprep.subr.bf16.mxu0 %v2314_v4 }
 0x178   : > { %2133 = vmatpush3.bf16.msra.mxu0 %v2292_v10 }
 0x179   : > { %2134 = vmatprep.subr.bf16.mxu0 %v2314_v4 }
 0x17c   : > { %2135 = vmatpush3.bf16.msra.mxu0 %v2293_v11 }
 0x17d   : > { %2136 = vmatprep.subr.bf16.mxu0 %v2314_v4 }
 0x180   : > { %2137 = vmatpush3.bf16.msra.mxu0 %v2294_v12 }
 0x181   : > { %2138 = vmatprep.subr.bf16.mxu0 %v2314_v4 }
 0x184   : > { %2139 = vmatpush3.bf16.msra.mxu0 %v2295_v13 }
 0x185   : > { %2140 = vmatprep.subr.bf16.mxu0 %v2314_v4 }
 0x188   : > { %2141 = vmatpush3.bf16.msra.mxu0 %v2296_v14 }
 0x189   : > { %2142 = vmatprep.subr.bf16.mxu0 %v2314_v4 }
 0x18c   : > { %2143 = vmatpush3.bf16.msra.mxu0 %v2297_v15 }
 0x18d   : > { %2148 = vmatprep.subr.bf16.mxu0 %v2314_v4 }
 0x18f   : > { %2145 = vmatmul.mubr.bf16.vlgmr.msra.gmra.mrb[8].mxu0 %v1282_v18 }
 0x190   : > { %2149 = vmatpush3.bf16.msra.mxu0 %v2298_v17  ;;  %2164 = vmatprep.mubr.msk.bf16.mxu0 %vm2315_vm1, %v2314_v4 }
 0x191   : > { %2150 = vmatprep.subr.bf16.mxu0 %v2314_v4 }
 0x194   : > { %2151 = vmatpush3.bf16.msra.mxu0 %v2299_v19 }
 0x195   : > { %2152 = vmatprep.subr.bf16.mxu0 %v2314_v4 }
 0x198   : > { %2153 = vmatpush3.bf16.msra.mxu0 %v2300_v20 }
 0x199   : > { %2154 = vmatprep.subr.bf16.mxu0 %v2314_v4 }
 0x19c   : > { %2155 = vmatpush3.bf16.msra.mxu0 %v2301_v21 }
 0x19d   : > { %2156 = vmatprep.subr.bf16.mxu0 %v2314_v4 }
 0x1a0   : > { %2157 = vmatpush3.bf16.msra.mxu0 %v2302_v22 }
 0x1a1   : > { %2158 = vmatprep.subr.bf16.mxu0 %v2314_v4 }
 0x1a4   : > { %2159 = vmatpush3.bf16.msra.mxu0 %v2303_v23 }
 0x1a5   : > { %2160 = vmatprep.subr.bf16.mxu0 %v2314_v4 }
 0x1a8   : > { %2161 = vmatpush3.bf16.msra.mxu0 %v2304_v24 }
 0x1a9   : > { %2162 = vmatprep.subr.bf16.mxu0 %v2314_v4 }
 0x1ac   : > { %2163 = vmatpush3.bf16.msra.mxu0 %v2305_v25 }
 0x1af   : > { %2165 = vmatmul.mubr.bf16.vlgmr.msra.gmra.mrb[8].mxu0 %v1495_v27 }
 0x282   : > { %v1595_v28 = vpop.f32.mrb[8].mxu0 }
 0x283   : > { %v1602_v29 = vmax.f32 %v1595_v28, 0.0  ;;  %v2166_v30 = vpop.f32.mrb[9].mxu0 }
 0x284   : > { %v1598_v31 = vpop.f32.mrb[10].mxu0 }
 0x285   : > { %v1603_v32 = vpack.c.bf16 %v1602_v29, %v1602_v29  ;;  %v2167_v33 = vpop.f32.mrb[11].mxu0 }
 0x287   : > { %1604 = vst [vmem:[%s168_s9] sm:$0x3] %v1603_v32 }
 0x288 PF: > { %s13_s12 = sadd.s32 1, %s2312_s12  }
 0x289   : > { %p10_p4 = scmp.ge.s32.totalorder %s13_s12, 4  }
 0x28b   :  { %12 = sbr.rel (!%p10_p4) target bundleno = 1 (0x1), region = 67 }

// kernel: unet_forward.17
= control target key start
LH: loop header
LB: loop body
LE: loop exit
PB: predicated region body
PF: predicated region fallthrough
CT: control target
= control target key end

     0   :  { %s2351_s12 = smov 0   ;;  %s2766_s0 = inlined_call_operand.vmem [shape: bf16[2,8,512], index: 0, kind: input, shape index: {}]   ;;  %s2767_s1 = inlined_call_operand.vmem [shape: bf16[3,512,128], index: 1, kind: input, shape index: {}]   ;;  %s2768_s2 = inlined_call_operand.vmem [shape: bf16[3,128,128], index: 2, kind: input, shape index: {}]   ;;  %s2769_s3 = inlined_call_operand.vmem [shape: bf16[2,8,128], index: 3, kind: output, shape index: {}]  }
   0x1 LB: > { %s1673_s13 = sadd.s32 4294967295, %s2327_s12   ;;  %p1677_p0 = scmp.ge.s32.totalorder %s2327_s12, 1  ;;  %s2327_s12 = sphi %s2351_s12, %s13_s12  }
   0x2   : > { %p137_p1 = scmp.lt.s32.totalorder %s2327_s12, 3 }
   0x4   : > { %p138_p2 = pnand %p1677_p0, %p137_p1 }
   0x5   : > { %v2201_v0 = vld [vmem:[%s2767_s1 + $0x140] sm:$0xff] (!%p138_p2)   ;;  %v176_v1 = vlaneseq (!%p138_p2)  ;;  %v2203_v3 = vld [vmem:[%s2767_s1 + $0x148] sm:$0xff] (!%p138_p2)   ;;  %p160_p3 = scmp.lt.s32.totalorder (!%p138_p2), %s1673_s13, 1  ;;  %v2329_v4 = vmov (!%p138_p2), 0.0   ;;  %v2205_v6 = vld [vmem:[%s2767_s1 + $0x150] sm:$0xff] (!%p138_p2)   ;;  %vm2330_vm1 = vmmov (!%p138_p2), 0  }
   0x6   : > { %141 = sbr.rel (%p138_p2) target bundleno = 639 (0x27f), region = 32  ;;  %v2202_v2 = vld [vmem:[%s2767_s1 + $0x100] sm:$0xff] (!%p138_p2)   ;;  %1964 = vmatprep.subr.bf16.mxu1 (!%p138_p2), %v2201_v0  ;;  %1293 = vst [vmem:[#allocation3] sm:$0x1] (!%p138_p2), %v2329_v4  ;;  %1294 = vst [vmem:[#allocation3 + $0x9] sm:$0x1] (!%p138_p2), %v2329_v4 }
   0x7   : > { %1965 = vmatpush3.bf16.msra.mxu1 (!%p138_p2), %v2202_v2  ;;  %v2204_v5 = vld [vmem:[%s2767_s1 + $0x108] sm:$0xff] (!%p138_p2)   ;;  %vm178_vm0 = vcmp.lt.s32.totalorder (!%p138_p2), %v176_v1, 512  ;;  %v2206_v7 = vld [vmem:[%s2767_s1 + $0x110] sm:$0xff] (!%p138_p2)   ;;  %v2207_v8 = vld [vmem:[%s2767_s1 + $0x158] sm:$0xff] (!%p138_p2)  }
   0x8   : > { %1966 = vmatprep.subr.bf16.mxu1 (!%p138_p2), %v2203_v3  ;;  %180 = vst.msk [vmem:[#allocation2] ss:$8 sm:$0xf] (!%p138_p2), %vm178_vm0, %v2329_v4  ;;  %183 = vst.msk [vmem:[#allocation2 + $0x21] ss:$8 sm:$0xf] (!%p138_p2), %vm178_vm0, %v2329_v4 }
   0x9   : > { %v2208_v9 = vld [vmem:[%s2767_s1 + $0x118] sm:$0xff] (!%p138_p2)   ;;  %v2209_v10 = vld [vmem:[%s2767_s1 + $0x160] sm:$0xff] (!%p138_p2)   ;;  %v2211_v12 = vld [vmem:[%s2767_s1 + $0x168] sm:$0xff] (!%p138_p2)  }
   0xa   : > { %v2210_v11 = vld [vmem:[%s2767_s1 + $0x120] sm:$0xff] (!%p138_p2)   ;;  %v2212_v15 = vld [vmem:[%s2767_s1 + $0x128] sm:$0xff] (!%p138_p2)   ;;  %v2213_v20 = vld [vmem:[%s2767_s1 + $0x170] sm:$0xff] (!%p138_p2)  }
   0xb   : > { %1967 = vmatpush3.bf16.msra.mxu1 (!%p138_p2), %v2204_v5  ;;  %v2219_v24 = vld [vmem:[%s2767_s1 + $0x40] sm:$0xff] (!%p138_p2)   ;;  %v2214_v27 = vld [vmem:[%s2767_s1 + $0x130] sm:$0xff] (!%p138_p2)   ;;  %v2215_v28 = vld [vmem:[%s2767_s1 + $0x178] sm:$0xff] (!%p138_p2)  }
   0xc   : > { %1968 = vmatprep.subr.bf16.mxu1 (!%p138_p2), %v2205_v6  ;;  %v2220_v25 = vld [vmem:[%s2767_s1] sm:$0xff] (!%p138_p2)   ;;  %2008 = vmatprep.subr.bf16.mxu0 (!%p138_p2), %v2219_v24  ;;  %v2223_v29 = vld [vmem:[%s2767_s1 + $0x48] sm:$0xff] (!%p138_p2)   ;;  %v2216_v31 = vld [vmem:[%s2767_s1 + $0x138] sm:$0xff] (!%p138_p2)  }
   0xd   : > { %s2771_s13 = smov (!%p160_p3, %s1673_s13), 1  ;;  %2009 = vmatpush3.bf16.msra.mxu0 %v2220_v25  ;;  %v2224_v30 = vld [vmem:[%s2767_s1 + $0x8] sm:$0xff]   ;;  %v2217_v32 = vld [vmem:[%s2767_s1 + $0x1c0] sm:$0xff]   ;;  %v2227_v33 = vld [vmem:[%s2767_s1 + $0x50] sm:$0xff]  }
   0xe   : > { %s1963_s28 = sshll.u32 %s2771_s13, 4  ;;  %2010 = vmatprep.subr.bf16.mxu0 %v2223_v29  ;;  %v2228_v40 = vld [vmem:[%s2767_s1 + $0x10] sm:$0xff]   ;;  %v2231_v46 = vld [vmem:[%s2767_s1 + $0x58] sm:$0xff]   ;;  %v2218_v50 = vld [vmem:[%s2767_s1 + $0x180] sm:$0xff]   ;;  %s1680_s6 = sshll.u32 %s2771_s13, 2 }
   0xf   : > { %1969 = vmatpush3.bf16.msra.mxu1 %v2206_v7  ;;  %s164_s8 = scalar_lea.vmem %s2766_s0, %s1963_s28  ;;  %v2232_v48 = vld [vmem:[%s2767_s1 + $0x18] sm:$0xff]   ;;  %v2221_v52 = vld [vmem:[%s2767_s1 + $0x1c8] sm:$0xff]   ;;  %v2235_v53 = vld [vmem:[%s2767_s1 + $0x60] sm:$0xff]   ;;  %s168_s9 = scalar_lea.vmem %s2769_s3, %s1680_s6 }
  0x10   : > { %1970 = vmatprep.subr.bf16.mxu1 %v2207_v8  ;;  %v170_v13 = vld [vmem:[%s164_s8] sm:$0xff]  ;;  %v171_v14 = vld [vmem:[%s164_s8 + $0x8] sm:$0xff]  ;;  %v2225_v56 = vld [vmem:[%s2767_s1 + $0x1d0] sm:$0xff]  }
  0x11   : > { %v172_v16 = vunpack.c.l.bf16 %v170_v13  ;;  %v173_v17 = vunpack.c.h.bf16 %v170_v13  ;;  %v174_v18 = vunpack.c.l.bf16 %v171_v14  ;;  %v175_v19 = vunpack.c.h.bf16 %v171_v14  ;;  %2011 = vmatpush3.bf16.msra.mxu0 %v2224_v30  ;;  %v2236_v54 = vld [vmem:[%s2767_s1 + $0x20] sm:$0xff]   ;;  %v2222_v55 = vld [vmem:[%s2767_s1 + $0x188] sm:$0xff]   ;;  %v2226_v59 = vld [vmem:[%s2767_s1 + $0x190] sm:$0xff]  }
  0x12   : > { %2012 = vmatprep.subr.bf16.mxu0 %v2227_v33  ;;  %v2239_v57 = vld [vmem:[%s2767_s1 + $0x68] sm:$0xff]   ;;  %v2229_v60 = vld [vmem:[%s2767_s1 + $0x1d8] sm:$0xff]   ;;  %v2243_v61 = vld [vmem:[%s2767_s1 + $0x70] sm:$0xff]  }
  0x13   : > { %1971 = vmatpush3.bf16.msra.mxu1 %v2208_v9  ;;  %v189_v21 = vrot.slane %v172_v16, 7  ;;  %v190_v22 = vrot.slane %v173_v17, 7  ;;  %v191_v23 = vrot.slane %v174_v18, 7  ;;  %v192_v26 = vrot.slane %v175_v19, 7  ;;  %v2240_v58 = vld [vmem:[%s2767_s1 + $0x28] sm:$0xff]   ;;  %v2244_v62 = vld [vmem:[%s2767_s1 + $0x30] sm:$0xff]  }
  0x14   : > { %1972 = vmatprep.subr.bf16.mxu1 %v2209_v10  ;;  %v2230_v63 = vld [vmem:[%s2767_s1 + $0x198] sm:$0xff]   ;;  %v2233_v0 = vld [vmem:[%s2767_s1 + $0x1e0] sm:$0xff]   ;;  %v2237_v10 = vld [vmem:[%s2767_s1 + $0x1e8] sm:$0xff]  }
  0x15   : > { %198 = vst [vmem:[#allocation2 + $0x8] sm:$0xfe] %v190_v22  ;;  %202 = vst [vmem:[#allocation2 + $0x28] sm:$0x1] %v190_v22  ;;  %2013 = vmatpush3.bf16.msra.mxu0 %v2228_v40  ;;  %v2234_v1 = vld [vmem:[%s2767_s1 + $0x1a0] sm:$0xff]   ;;  %v2247_v2 = vld [vmem:[%s2767_s1 + $0x78] sm:$0xff]  }
  0x16   : > { %197 = vst [vmem:[#allocation2] sm:$0xfe] %v189_v21  ;;  %199 = vst [vmem:[#allocation2 + $0x10] sm:$0xfe] %v191_v23  ;;  %2014 = vmatprep.subr.bf16.mxu0 %v2231_v46  ;;  %v2248_v7 = vld [vmem:[%s2767_s1 + $0x38] sm:$0xff]   ;;  %v2238_v17 = vld [vmem:[%s2767_s1 + $0x1a8] sm:$0xff]  }
  0x17   : > { %1973 = vmatpush3.bf16.msra.mxu1 %v2210_v11  ;;  %201 = vst [vmem:[#allocation2 + $0x20] sm:$0x1] %v189_v21  ;;  %203 = vst [vmem:[#allocation2 + $0x30] sm:$0x1] %v191_v23  ;;  %v2242_v23 = vld [vmem:[%s2767_s1 + $0x1b0] sm:$0xff]   ;;  %v2245_v24 = vld [vmem:[%s2767_s1 + $0x1f8] sm:$0xff]  }
  0x18   : > { %1974 = vmatprep.subr.bf16.mxu1 %v2211_v12  ;;  %200 = vst [vmem:[#allocation2 + $0x18] sm:$0xfe] %v192_v26  ;;  %204 = vst [vmem:[#allocation2 + $0x38] sm:$0x1] %v192_v26  ;;  %v2250_v30 = vld [vmem:[%s2767_s1 + $0x80] sm:$0xff]   ;;  %v2270_v40 = vld [vmem:[%s2767_s1 + $0x208] sm:$0xff]  }
  0x19   : > { %2015 = vmatpush3.bf16.msra.mxu0 %v2232_v48  ;;  %v2266_v33 = vld [vmem:[%s2767_s1 + $0x200] sm:$0xff]   ;;  %v2276_v46 = vld [vmem:[%s2767_s1 + $0x258] sm:$0xff]  }
  0x1a   : > { %2016 = vmatprep.subr.bf16.mxu0 %v2235_v53  ;;  %v2278_v48 = vld [vmem:[%s2767_s1 + $0x218] sm:$0xff]   ;;  %v2261_v53 = vld [vmem:[%s2767_s1 + $0xf0] sm:$0xff]  }
  0x1b   : > { %1975 = vmatpush3.bf16.msra.mxu1 %v2212_v15 }
  0x1c   : > { %1976 = vmatprep.subr.bf16.mxu1 %v2213_v20  ;;  %v278_v34 = vld [vmem:[#allocation2 + $0x8] sm:$0xfe]  ;;  %v282_v35 = vld [vmem:[#allocation2 + $0x28] sm:$0x1]  ;;  %v2241_v20 = vld [vmem:[%s2767_s1 + $0x1f0] sm:$0xff]  }
  0x1d   : > { %v277_v36 = vld [vmem:[#allocation2] sm:$0xfe]  ;;  %v286_v37 = vpack.c.bf16 %v282_v35, %v278_v34  ;;  %2017 = vmatpush3.bf16.msra.mxu0 %v2236_v54  ;;  %v279_v8 = vld [vmem:[#allocation2 + $0x10] sm:$0xfe]  ;;  %v206_v13 = vld [vmem:[#allocation2 + $0x8] sm:$0xff] }
  0x1e   : > { %v281_v38 = vld [vmem:[#allocation2 + $0x20] sm:$0x1]  ;;  %2018 = vmatprep.subr.bf16.mxu0 %v2239_v57  ;;  %v283_v9 = vld [vmem:[#allocation2 + $0x30] sm:$0x1]  ;;  %v210_v15 = vpack.c.bf16 %v206_v13, %v206_v13  ;;  %v2252_v35 = vld [vmem:[%s2767_s1 + $0x88] sm:$0xff]  }
  0x1f   : > { %1977 = vmatpush3.bf16.msra.mxu1 %v2214_v27  ;;  %v285_v39 = vpack.c.bf16 %v281_v38, %v277_v36  ;;  %v362_v41 = vshrl.u32 %v286_v37, 16  ;;  %v364_v42 = vshll.u32 %v286_v37, 16  ;;  %v280_v3 = vld [vmem:[#allocation2 + $0x18] sm:$0xfe]  ;;  %v284_v5 = vld [vmem:[#allocation2 + $0x38] sm:$0x1]  ;;  %v287_v14 = vpack.c.bf16 %v283_v9, %v279_v8 }
  0x20   : > { %1978 = vmatprep.subr.bf16.mxu1 %v2215_v28  ;;  %v288_v6 = vpack.c.bf16 %v284_v5, %v280_v3  ;;  %v205_v16 = vld [vmem:[#allocation2] sm:$0xff]  ;;  %882 = vmatprep.mubr.bf16.mxu0 %v210_v15  ;;  %v2246_v27 = vld [vmem:[%s2767_s1 + $0x1b8] sm:$0xff]   ;;  %v2253_v37 = vld [vmem:[%s2767_s1 + $0xd0] sm:$0xff]  }
  0x21   : > { %v355_v43 = vshrl.u32 %v285_v39, 16  ;;  %v357_v44 = vshll.u32 %v285_v39, 16  ;;  %v366_v45 = vrot.slane %v364_v42, 1  ;;  %2019 = vmatpush3.bf16.msra.mxu0 %v2240_v58  ;;  %v209_v19 = vpack.c.bf16 %v205_v16, %v205_v16  ;;  %v2249_v28 = vld [vmem:[%s2767_s1 + $0xc0] sm:$0xff]   ;;  %v208_v34 = vld [vmem:[#allocation2 + $0x18] sm:$0xff]  ;;  %v2268_v38 = vld [vmem:[%s2767_s1 + $0x248] sm:$0xff]  }
  0x22   : > { %2020 = vmatprep.subr.bf16.mxu0 %v2243_v61  ;;  %v376_v11 = vshrl.u32 %v288_v6, 16  ;;  %v378_v12 = vshll.u32 %v288_v6, 16  ;;  %v371_v22 = vshll.u32 %v287_v14, 16  ;;  %v369_v25 = vshrl.u32 %v287_v14, 16  ;;  %v2254_v39 = vld [vmem:[%s2767_s1 + $0x90] sm:$0xff]   ;;  %v2284_v54 = vld [vmem:[%s2767_s1 + $0x268] sm:$0xff]  }
  0x23   : > { %1979 = vmatpush3.bf16.msra.mxu1 %v2216_v31  ;;  %v359_v47 = vrot.slane %v357_v44, 1  ;;  %v367_v49 = vor.u32 %v366_v45, %v362_v41  ;;  %v2251_v31 = vld [vmem:[%s2767_s1 + $0xc8] sm:$0xff]   ;;  %v212_v36 = vpack.c.bf16 %v208_v34, %v208_v34  ;;  %v2255_v41 = vld [vmem:[%s2767_s1 + $0xd8] sm:$0xff]   ;;  %v2272_v42 = vld [vmem:[%s2767_s1 + $0x250] sm:$0xff]  }
  0x24   : > { %1986 = vmatprep.subr.bf16.mxu1 %v2217_v32  ;;  %v380_v18 = vrot.slane %v378_v12, 1  ;;  %v373_v26 = vrot.slane %v371_v22, 1  ;;  %v2265_v32 = vld [vmem:[%s2767_s1 + $0x240] sm:$0xff]   ;;  %v2274_v44 = vld [vmem:[%s2767_s1 + $0x210] sm:$0xff]   ;;  %v2263_v57 = vld [vmem:[%s2767_s1 + $0xf8] sm:$0xff]  }
  0x25   : > { %v360_v51 = vor.u32 %v359_v47, %v355_v43  ;;  %610 = vmatprep.mubr.bf16.mxu1 %v367_v49  ;;  %2021 = vmatpush3.bf16.msra.mxu0 %v2244_v62  ;;  %v2256_v43 = vld [vmem:[%s2767_s1 + $0x98] sm:$0xff]   ;;  %v2257_v45 = vld [vmem:[%s2767_s1 + $0xe0] sm:$0xff]   ;;  %v2259_v49 = vld [vmem:[%s2767_s1 + $0xe8] sm:$0xff]  }
  0x26   : > { %2022 = vmatprep.subr.bf16.mxu0 %v2247_v2  ;;  %v381_v21 = vor.u32 %v380_v18, %v376_v11  ;;  %v374_v29 = vor.u32 %v373_v26, %v369_v25  ;;  %v2258_v47 = vld [vmem:[%s2767_s1 + $0xa0] sm:$0xff]   ;;  %v2264_v58 = vld [vmem:[%s2767_s1 + $0xb8] sm:$0xff]   ;;  %v2290_v61 = vld [vmem:[%s2767_s1 + $0x230] sm:$0xff]  }
  0x27   : > { %611 = vmatmul.mubr.bf16.vlgmr.msra.gmra.mrb[0].mxu1 %v360_v51  ;;  %v2260_v51 = vld [vmem:[%s2767_s1 + $0xa8] sm:$0xff]   ;;  %v2267_v62 = vld [vmem:[%s2767_s1 + $0x2c0] sm:$0xff]   ;;  %v2294_v2 = vld [vmem:[%s2767_s1 + $0x238] sm:$0xff]  }
  0x28   : > { %1987 = vmatpush3.bf16.msra.mxu1 %v2218_v50  ;;  %650 = vmatprep.mubr.bf16.mxu1 %v381_v21  ;;  %v2280_v50 = vld [vmem:[%s2767_s1 + $0x260] sm:$0xff]   ;;  %v931_v3 = vld [vmem:[#allocation2 + $0x8] sm:$0xfc]  ;;  %v935_v5 = vld [vmem:[#allocation2 + $0x28] sm:$0x3] }
  0x29   : > { %1988 = vmatprep.subr.bf16.mxu1 %v2221_v52  ;;  %2023 = vmatpush3.bf16.msra.mxu0 %v2248_v7  ;;  %v2282_v52 = vld [vmem:[%s2767_s1 + $0x220] sm:$0xff]   ;;  %v2271_v6 = vld [vmem:[%s2767_s1 + $0x2c8] sm:$0xff]   ;;  %v939_v7 = vpack.c.bf16 %v935_v5, %v931_v3  ;;  %v933_v12 = vld [vmem:[#allocation2 + $0x18] sm:$0xfc] }
  0x2a   : > { %2052 = vmatprep.subr.bf16.mxu0 %v2265_v32  ;;  %v930_v8 = vld [vmem:[#allocation2] sm:$0xfc]  ;;  %v934_v9 = vld [vmem:[#allocation2 + $0x20] sm:$0x3]  ;;  %v2273_v13 = vld [vmem:[%s2767_s1 + $0x288] sm:$0xff]  }
  0x2b   : > { %v938_v11 = vpack.c.bf16 %v934_v9, %v930_v8  ;;  %v937_v14 = vld [vmem:[#allocation2 + $0x38] sm:$0x3]  ;;  %v2275_v15 = vld [vmem:[%s2767_s1 + $0x2d0] sm:$0xff]   ;;  %v2283_v22 = vld [vmem:[%s2767_s1 + $0x2e0] sm:$0xff]  }
  0x2c   : > { %1989 = vmatpush3.bf16.msra.mxu1 %v2222_v55  ;;  %883 = vmatmul.mubr.bf16.vlgmr.msra.gmra.mrb[0].mxu0 %v209_v19  ;;  %v2262_v55 = vld [vmem:[%s2767_s1 + $0xb0] sm:$0xff]   ;;  %v2279_v19 = vld [vmem:[%s2767_s1 + $0x2d8] sm:$0xff]   ;;  %v2289_v25 = vld [vmem:[%s2767_s1 + $0x2a8] sm:$0xff]  }
  0x2d   : > { %1990 = vmatprep.subr.bf16.mxu1 %v2225_v56  ;;  %2053 = vmatpush3.bf16.msra.mxu0 %v2266_v33  ;;  %v2286_v56 = vld [vmem:[%s2767_s1 + $0x228] sm:$0xff]   ;;  %v1011_v16 = vrot.slane %v938_v11, 1  ;;  %v2277_v18 = vld [vmem:[%s2767_s1 + $0x290] sm:$0xff]   ;;  %v2281_v21 = vld [vmem:[%s2767_s1 + $0x298] sm:$0xff]  }
  0x2e   : > { %2054 = vmatprep.subr.bf16.mxu0 %v2268_v38  ;;  %v2291_v26 = vld [vmem:[%s2767_s1 + $0x2f0] sm:$0xff]   ;;  %v2296_v32 = vld [vmem:[%s2767_s1 + $0x2b8] sm:$0xff]   ;;  %v2297_v34 = vld [vmem:[%s2768_s2 + $0x40] sm:$0xff]  }
  0x2f   : > { %v2301_v38 = vld [vmem:[%s2768_s2 + $0x60] sm:$0xff]  }
  0x30   : > { %1991 = vmatpush3.bf16.msra.mxu1 %v2226_v59  ;;  %v2288_v59 = vld [vmem:[%s2767_s1 + $0x270] sm:$0xff]  }
  0x31   : > { %1992 = vmatprep.subr.bf16.mxu1 %v2229_v60  ;;  %2055 = vmatpush3.bf16.msra.mxu0 %v2270_v40  ;;  %v207_v60 = vld [vmem:[#allocation2 + $0x10] sm:$0xff] }
  0x32   : > { %2056 = vmatprep.subr.bf16.mxu0 %v2272_v42  ;;  %v2303_v40 = vld [vmem:[%s2768_s2 + $0x70] sm:$0xff]  }
  0x34   : > { %1993 = vmatpush3.bf16.msra.mxu1 %v2230_v63  ;;  %v2292_v63 = vld [vmem:[%s2767_s1 + $0x278] sm:$0xff]  }
  0x35   : > { %1994 = vmatprep.subr.bf16.mxu1 %v2233_v0  ;;  %2057 = vmatpush3.bf16.msra.mxu0 %v2274_v44  ;;  %v211_v0 = vpack.c.bf16 %v207_v60, %v207_v60 }
  0x36   : > { %2058 = vmatprep.subr.bf16.mxu0 %v2276_v46 }
  0x38   : > { %1995 = vmatpush3.bf16.msra.mxu1 %v2234_v1  ;;  %v2269_v1 = vld [vmem:[%s2767_s1 + $0x280] sm:$0xff]  }
  0x39   : > { %1996 = vmatprep.subr.bf16.mxu1 %v2237_v10  ;;  %2059 = vmatpush3.bf16.msra.mxu0 %v2278_v48  ;;  %v1012_v10 = vrot.slane %v939_v7, 1 }
  0x3a   : > { %2060 = vmatprep.subr.bf16.mxu0 %v2280_v50 }
  0x3b   : > { %1243 = vmatprep.mubr.bf16.mxu0 %v1012_v10 }
  0x3c   : > { %1997 = vmatpush3.bf16.msra.mxu1 %v2238_v17  ;;  %v941_v17 = vpack.c.bf16 %v937_v14, %v933_v12 }
  0x3d   : > { %1998 = vmatprep.subr.bf16.mxu1 %v2241_v20  ;;  %2061 = vmatpush3.bf16.msra.mxu0 %v2282_v52 }
  0x3e   : > { %2062 = vmatprep.subr.bf16.mxu0 %v2284_v54  ;;  %v1014_v20 = vrot.slane %v941_v17, 1  ;;  %v2306_v17 = vld [vmem:[%s2768_s2 + $0x8] sm:$0xff]  }
  0x40   : > { %1999 = vmatpush3.bf16.msra.mxu1 %v2242_v23  ;;  %v2285_v23 = vld [vmem:[%s2767_s1 + $0x2a0] sm:$0xff]  }
  0x41   : > { %2000 = vmatprep.subr.bf16.mxu1 %v2245_v24  ;;  %2063 = vmatpush3.bf16.msra.mxu0 %v2286_v56  ;;  %v2287_v24 = vld [vmem:[%s2767_s1 + $0x2e8] sm:$0xff]  }
  0x42   : > { %2064 = vmatprep.subr.bf16.mxu0 %v2288_v59 }
  0x44   : > { %2001 = vmatpush3.bf16.msra.mxu1 %v2246_v27  ;;  %v2293_v27 = vld [vmem:[%s2767_s1 + $0x2b0] sm:$0xff]  }
  0x45   : > { %2030 = vmatprep.subr.bf16.mxu1 %v2249_v28  ;;  %2065 = vmatpush3.bf16.msra.mxu0 %v2290_v61  ;;  %v932_v28 = vld [vmem:[#allocation2 + $0x10] sm:$0xfc] }
  0x46   : > { %2066 = vmatprep.subr.bf16.mxu0 %v2292_v63 }
  0x47   : > { %651 = vmatmul.mubr.bf16.vlgmr.msra.gmra.mrb[4].mxu1 %v374_v29  ;;  %v936_v29 = vld [vmem:[#allocation2 + $0x30] sm:$0x3] }
  0x48   : > { %2031 = vmatpush3.bf16.msra.mxu1 %v2250_v30  ;;  %922 = vmatprep.mubr.bf16.mxu1 %v212_v36  ;;  %v2295_v30 = vld [vmem:[%s2767_s1 + $0x2f8] sm:$0xff]   ;;  %v2299_v36 = vld [vmem:[%s2768_s2 + $0x50] sm:$0xff]  }
  0x49   : > { %2032 = vmatprep.subr.bf16.mxu1 %v2251_v31  ;;  %2067 = vmatpush3.bf16.msra.mxu0 %v2294_v2  ;;  %v940_v31 = vpack.c.bf16 %v936_v29, %v932_v28  ;;  %v2315_v28 = vld [vmem:[%s2768_s2 + $0x90] sm:$0xff]   ;;  %v2316_v29 = vld [vmem:[%s2768_s2 + $0x98] sm:$0xff]  }
  0x4a   : > { %2123 = vmatprep.subr.bf16.mxu0 %v2329_v4 }
  0x4b   : > { %v1013_v33 = vrot.slane %v940_v31, 1  ;;  %v2318_v31 = vld [vmem:[%s2768_s2 + $0xa8] sm:$0xff]  }
  0x4c   : > { %2033 = vmatpush3.bf16.msra.mxu1 %v2252_v35  ;;  %1244 = vmatmul.mubr.bf16.vlgmr.msra.gmra.mrb[4].mxu0 %v1011_v16  ;;  %v2298_v35 = vld [vmem:[%s2768_s2 + $0x48] sm:$0xff]  }
  0x4d   : > { %2034 = vmatprep.subr.bf16.mxu1 %v2253_v37  ;;  %2124 = vmatpush3.bf16.msra.mxu0 %v2297_v34  ;;  %v2300_v37 = vld [vmem:[%s2768_s2 + $0x58] sm:$0xff]  }
  0x4e   : > { %2125 = vmatprep.subr.bf16.mxu0 %v2329_v4  ;;  %2139 = vmatprep.mubr.msk.bf16.mxu0 %vm2330_vm1, %v2329_v4 }
  0x50   : > { %2035 = vmatpush3.bf16.msra.mxu1 %v2254_v39  ;;  %v2302_v39 = vld [vmem:[%s2768_s2 + $0x68] sm:$0xff]  }
  0x51   : > { %2036 = vmatprep.subr.bf16.mxu1 %v2255_v41  ;;  %2126 = vmatpush3.bf16.msra.mxu0 %v2298_v35  ;;  %v2304_v41 = vld [vmem:[%s2768_s2 + $0x78] sm:$0xff]  }
  0x52   : > { %2127 = vmatprep.subr.bf16.mxu0 %v2329_v4 }
  0x54   : > { %2037 = vmatpush3.bf16.msra.mxu1 %v2256_v43 }
  0x55   : > { %2038 = vmatprep.subr.bf16.mxu1 %v2257_v45  ;;  %2128 = vmatpush3.bf16.msra.mxu0 %v2299_v36 }
  0x56   : > { %2129 = vmatprep.subr.bf16.mxu0 %v2329_v4 }
  0x58   : > { %2039 = vmatpush3.bf16.msra.mxu1 %v2258_v47 }
  0x59   : > { %2040 = vmatprep.subr.bf16.mxu1 %v2259_v49  ;;  %2130 = vmatpush3.bf16.msra.mxu0 %v2300_v37 }
  0x5a   : > { %2131 = vmatprep.subr.bf16.mxu0 %v2329_v4 }
  0x5c   : > { %2041 = vmatpush3.bf16.msra.mxu1 %v2260_v51 }
  0x5d   : > { %2042 = vmatprep.subr.bf16.mxu1 %v2261_v53  ;;  %2132 = vmatpush3.bf16.msra.mxu0 %v2301_v38 }
  0x5e   : > { %2133 = vmatprep.subr.bf16.mxu0 %v2329_v4 }
  0x60   : > { %2043 = vmatpush3.bf16.msra.mxu1 %v2262_v55 }
  0x61   : > { %2044 = vmatprep.subr.bf16.mxu1 %v2263_v57  ;;  %2134 = vmatpush3.bf16.msra.mxu0 %v2302_v39 }
  0x62   : > { %2135 = vmatprep.subr.bf16.mxu0 %v2329_v4 }
  0x64   : > { %2045 = vmatpush3.bf16.msra.mxu1 %v2264_v58 }
  0x65   : > { %2074 = vmatprep.subr.bf16.mxu1 %v2267_v62  ;;  %2136 = vmatpush3.bf16.msra.mxu0 %v2303_v40 }
  0x66   : > { %2137 = vmatprep.subr.bf16.mxu0 %v2329_v4 }
  0x67   : > { %923 = vmatmul.mubr.bf16.vlgmr.msra.gmra.mrb[8].mxu1 %v211_v0 }
  0x68   : > { %2075 = vmatpush3.bf16.msra.mxu1 %v2269_v1  ;;  %1283 = vmatprep.mubr.bf16.mxu1 %v1014_v20  ;;  %v2309_v20 = vld [vmem:[%s2768_s2 + $0x20] sm:$0xff]  }
  0x69   : > { %2076 = vmatprep.subr.bf16.mxu1 %v2271_v6  ;;  %2138 = vmatpush3.bf16.msra.mxu0 %v2304_v41 }
  0x6a   : > { %2143 = vmatprep.subr.bf16.mxu0 %v2329_v4 }
  0x6c   : > { %2077 = vmatpush3.bf16.msra.mxu1 %v2273_v13 }
  0x6d   : > { %2078 = vmatprep.subr.bf16.mxu1 %v2275_v15  ;;  %v2305_v15 = vld [vmem:[%s2768_s2] sm:$0xff]  }
  0x70   : > { %2079 = vmatpush3.bf16.msra.mxu1 %v2277_v18  ;;  %v2307_v18 = vld [vmem:[%s2768_s2 + $0x10] sm:$0xff]  }
  0x71   : > { %2080 = vmatprep.subr.bf16.mxu1 %v2279_v19  ;;  %v2308_v19 = vld [vmem:[%s2768_s2 + $0x18] sm:$0xff]  }
  0x74   : > { %2081 = vmatpush3.bf16.msra.mxu1 %v2281_v21  ;;  %v2310_v21 = vld [vmem:[%s2768_s2 + $0x28] sm:$0xff]  }
  0x75   : > { %2082 = vmatprep.subr.bf16.mxu1 %v2283_v22  ;;  %v2311_v22 = vld [vmem:[%s2768_s2 + $0x30] sm:$0xff]  }
  0x78   : > { %2083 = vmatpush3.bf16.msra.mxu1 %v2285_v23  ;;  %v2312_v23 = vld [vmem:[%s2768_s2 + $0x38] sm:$0xff]  }
  0x79   : > { %2084 = vmatprep.subr.bf16.mxu1 %v2287_v24 }
  0x7c   : > { %2085 = vmatpush3.bf16.msra.mxu1 %v2289_v25  ;;  %v2313_v25 = vld [vmem:[%s2768_s2 + $0x80] sm:$0xff]  }
  0x7d   : > { %2086 = vmatprep.subr.bf16.mxu1 %v2291_v26 }
  0x80   : > { %2087 = vmatpush3.bf16.msra.mxu1 %v2293_v27  ;;  %v2314_v27 = vld [vmem:[%s2768_s2 + $0x88] sm:$0xff]  }
  0x81   : > { %2088 = vmatprep.subr.bf16.mxu1 %v2295_v30  ;;  %v2317_v30 = vld [vmem:[%s2768_s2 + $0xa0] sm:$0xff]  }
  0x84   : > { %2089 = vmatpush3.bf16.msra.mxu1 %v2296_v32  ;;  %v2319_v32 = vld [vmem:[%s2768_s2 + $0xb0] sm:$0xff]  }
  0x87   : > { %1284 = vmatmul.mubr.bf16.vlgmr.msra.gmra.mrb[12].mxu1 %v1013_v33  ;;  %v2320_v33 = vld [vmem:[%s2768_s2 + $0xb8] sm:$0xff]  }
  0xfa   : > { %v1980_v42 = vpop.f32.mrb[0].mxu1 }
  0xfb   : > { %v1981_v43 = vpop.f32.mrb[1].mxu1 }
  0xfc   : > { %v1982_v44 = vadd.f32 %v1981_v43, %v1980_v42  ;;  %v1983_v45 = vpop.f32.mrb[2].mxu1 }
  0xfd   : > { %v1984_v46 = vpop.f32.mrb[3].mxu1 }
  0xff   : > { %v2024_v47 = vpop.f32.mrb[0].mxu0 }
 0x100   : > { %v2025_v48 = vpop.f32.mrb[1].mxu0 }
 0x101   : > { %v2026_v49 = vadd.f32 %v2025_v48, %v2024_v47  ;;  %v2027_v50 = vpop.f32.mrb[2].mxu0 }
 0x102   : > { %v2028_v51 = vpop.f32.mrb[3].mxu0 }
 0x11a   : > { %v2002_v52 = vpop.f32.mrb[4].mxu1 }
 0x11b   : > { %v2003_v53 = vpop.f32.mrb[5].mxu1 }
 0x11c   : > { %v2004_v54 = vadd.f32 %v2003_v53, %v2002_v52  ;;  %v2005_v55 = vpop.f32.mrb[6].mxu1 }
 0x11d   : > { %v2006_v56 = vpop.f32.mrb[7].mxu1 }
 0x11e   : > { %v653_v57 = vadd.f32 %v2004_v54, %v1982_v44 }
 0x11f   : > { %v2068_v1 = vpop.f32.mrb[4].mxu0 }
 0x120   : > { %v885_v58 = vadd.f32 %v2026_v49, %v653_v57  ;;  %v2069_v2 = vpop.f32.mrb[5].mxu0 }
 0x121   : > { %v2070_v3 = vadd.f32 %v2069_v2, %v2068_v1  ;;  %v2071_v5 = vpop.f32.mrb[6].mxu0 }
 0x122   : > { %v2072_v6 = vpop.f32.mrb[7].mxu0 }
 0x13a   : > { %v2046_v59 = vpop.f32.mrb[8].mxu1 }
 0x13b   : > { %v2047_v60 = vpop.f32.mrb[9].mxu1 }
 0x13c   : > { %v2048_v61 = vadd.f32 %v2047_v60, %v2046_v59  ;;  %v2049_v62 = vpop.f32.mrb[10].mxu1 }
 0x13d   : > { %v2050_v63 = vpop.f32.mrb[11].mxu1 }
 0x13e   : > { %v925_v0 = vadd.f32 %v2048_v61, %v885_v58 }
 0x15a   : > { %v2090_v7 = vpop.f32.mrb[12].mxu1 }
 0x15b   : > { %v2091_v8 = vpop.f32.mrb[13].mxu1 }
 0x15c   : > { %v2092_v9 = vadd.f32 %v2091_v8, %v2090_v7  ;;  %v2093_v10 = vpop.f32.mrb[14].mxu1 }
 0x15d   : > { %v2094_v11 = vpop.f32.mrb[15].mxu1 }
 0x15e   : > { %v1286_v12 = vadd.f32 %v2092_v9, %v2070_v3 }
 0x160   : > { %v1291_v13 = vadd.f32 %v1286_v12, %v925_v0 }
 0x162   : > { %v1292_v14 = vmax.f32 %v1291_v13, 0.0 }
 0x164   : > { %1295 = vst [vmem:[#allocation3 + $0x1] sm:$0xff] %v1292_v14  ;;  %v1315_v16 = vpack.c.bf16 %v1292_v14, %v1292_v14 }
 0x166   : > { %2140 = vmatmul.mubr.bf16.vlgmr.msra.gmra.mrb[8].mxu0 %v1315_v16 }
 0x167   : > { %2144 = vmatpush3.bf16.msra.mxu0 %v2305_v15  ;;  %2159 = vmatprep.mubr.msk.bf16.mxu0 %vm2330_vm1, %v2329_v4 }
 0x168   : > { %2145 = vmatprep.subr.bf16.mxu0 %v2329_v4 }
 0x16b   : > { %2146 = vmatpush3.bf16.msra.mxu0 %v2306_v17  ;;  %v1296_v24 = vld [vmem:[#allocation3] sm:$0xff] }
 0x16c   : > { %2147 = vmatprep.subr.bf16.mxu0 %v2329_v4  ;;  %v1297_v26 = vpack.c.bf16 %v1296_v24, %v1296_v24  ;;  %v1509_v34 = vld [vmem:[#allocation3 + $0x2] sm:$0xff] }
 0x16d   : > { %v1510_v35 = vpack.c.bf16 %v1509_v34, %v1509_v34 }
 0x16f   : > { %2148 = vmatpush3.bf16.msra.mxu0 %v2307_v18 }
 0x170   : > { %2149 = vmatprep.subr.bf16.mxu0 %v2329_v4 }
 0x173   : > { %2150 = vmatpush3.bf16.msra.mxu0 %v2308_v19 }
 0x174   : > { %2151 = vmatprep.subr.bf16.mxu0 %v2329_v4 }
 0x177   : > { %2152 = vmatpush3.bf16.msra.mxu0 %v2309_v20 }
 0x178   : > { %2153 = vmatprep.subr.bf16.mxu0 %v2329_v4 }
 0x17b   : > { %2154 = vmatpush3.bf16.msra.mxu0 %v2310_v21 }
 0x17c   : > { %2155 = vmatprep.subr.bf16.mxu0 %v2329_v4 }
 0x17f   : > { %2156 = vmatpush3.bf16.msra.mxu0 %v2311_v22 }
 0x180   : > { %2157 = vmatprep.subr.bf16.mxu0 %v2329_v4 }
 0x183   : > { %2158 = vmatpush3.bf16.msra.mxu0 %v2312_v23 }
 0x184   : > { %2163 = vmatprep.subr.bf16.mxu0 %v2329_v4 }
 0x186   : > { %2160 = vmatmul.mubr.bf16.vlgmr.msra.gmra.mrb[8].mxu0 %v1297_v26 }
 0x187   : > { %2164 = vmatpush3.bf16.msra.mxu0 %v2313_v25  ;;  %2179 = vmatprep.mubr.msk.bf16.mxu0 %vm2330_vm1, %v2329_v4 }
 0x188   : > { %2165 = vmatprep.subr.bf16.mxu0 %v2329_v4 }
 0x18b   : > { %2166 = vmatpush3.bf16.msra.mxu0 %v2314_v27 }
 0x18c   : > { %2167 = vmatprep.subr.bf16.mxu0 %v2329_v4 }
 0x18f   : > { %2168 = vmatpush3.bf16.msra.mxu0 %v2315_v28 }
 0x190   : > { %2169 = vmatprep.subr.bf16.mxu0 %v2329_v4 }
 0x193   : > { %2170 = vmatpush3.bf16.msra.mxu0 %v2316_v29 }
 0x194   : > { %2171 = vmatprep.subr.bf16.mxu0 %v2329_v4 }
 0x197   : > { %2172 = vmatpush3.bf16.msra.mxu0 %v2317_v30 }
 0x198   : > { %2173 = vmatprep.subr.bf16.mxu0 %v2329_v4 }
 0x19b   : > { %2174 = vmatpush3.bf16.msra.mxu0 %v2318_v31 }
 0x19c   : > { %2175 = vmatprep.subr.bf16.mxu0 %v2329_v4 }
 0x19f   : > { %2176 = vmatpush3.bf16.msra.mxu0 %v2319_v32 }
 0x1a0   : > { %2177 = vmatprep.subr.bf16.mxu0 %v2329_v4 }
 0x1a3   : > { %2178 = vmatpush3.bf16.msra.mxu0 %v2320_v33 }
 0x1a6   : > { %2180 = vmatmul.mubr.bf16.vlgmr.msra.gmra.mrb[8].mxu0 %v1510_v35 }
 0x279   : > { %v1610_v36 = vpop.f32.mrb[8].mxu0 }
 0x27a   : > { %v1617_v37 = vmax.f32 %v1610_v36, 0.0  ;;  %v2181_v38 = vpop.f32.mrb[9].mxu0 }
 0x27b   : > { %v1613_v39 = vpop.f32.mrb[10].mxu0 }
 0x27c   : > { %v1618_v40 = vpack.c.bf16 %v1617_v37, %v1617_v37  ;;  %v2182_v41 = vpop.f32.mrb[11].mxu0 }
 0x27e   : > { %1619 = vst [vmem:[%s168_s9] sm:$0xf] %v1618_v40 }
 0x27f PF: > { %s13_s12 = sadd.s32 1, %s2327_s12  }
 0x280   : > { %p10_p4 = scmp.ge.s32.totalorder %s13_s12, 4  }
 0x282   :  { %12 = sbr.rel (!%p10_p4) target bundleno = 1 (0x1), region = 67 }

// kernel: unet_forward.18
= control target key start
LH: loop header
LB: loop body
LE: loop exit
PB: predicated region body
PF: predicated region fallthrough
CT: control target
= control target key end

     0   :  { %s2468_s12 = smov 0   ;;  %s2921_s0 = inlined_call_operand.vmem [shape: bf16[2,16,512], index: 0, kind: input, shape index: {}]   ;;  %s2922_s1 = inlined_call_operand.vmem [shape: bf16[3,512,128], index: 1, kind: input, shape index: {}]   ;;  %s2923_s2 = inlined_call_operand.vmem [shape: bf16[3,128,128], index: 2, kind: input, shape index: {}]   ;;  %s2924_s3 = inlined_call_operand.vmem [shape: bf16[2,16,128], index: 3, kind: output, shape index: {}]  }
   0x1 LB: > { %s1779_s13 = sadd.s32 4294967295, %s2444_s12   ;;  %p1783_p0 = scmp.ge.s32.totalorder %s2444_s12, 1  ;;  %s2444_s12 = sphi %s2468_s12, %s13_s12  }
   0x2   : > { %p137_p1 = scmp.lt.s32.totalorder %s2444_s12, 3 }
   0x4   : > { %p138_p2 = pnand %p1783_p0, %p137_p1 }
   0x5   : > { %v2318_v0 = vld [vmem:[%s2922_s1 + $0x140] sm:$0xff] (!%p138_p2)   ;;  %v184_v1 = vlaneseq (!%p138_p2)  ;;  %v2320_v3 = vld [vmem:[%s2922_s1 + $0x148] sm:$0xff] (!%p138_p2)   ;;  %p161_p3 = scmp.lt.s32.totalorder (!%p138_p2), %s1779_s13, 1  ;;  %v2322_v5 = vld [vmem:[%s2922_s1 + $0x150] sm:$0xff] (!%p138_p2)   ;;  %v2446_v6 = vmov (!%p138_p2), 0.0   ;;  %vm201_vm1 = vcmask (!%p138_p2), 1040384  }
   0x6   : > { %141 = sbr.rel (%p138_p2) target bundleno = 643 (0x283), region = 32  ;;  %v2319_v2 = vld [vmem:[%s2922_s1 + $0x100] sm:$0xff] (!%p138_p2)   ;;  %2081 = vmatprep.subr.bf16.mxu1 (!%p138_p2), %v2318_v0  ;;  %v2321_v4 = vld [vmem:[%s2922_s1 + $0x108] sm:$0xff] (!%p138_p2)   ;;  %1380 = vst [vmem:[#allocation3] sm:$0x1] (!%p138_p2), %v2446_v6  ;;  %v2323_v7 = vld [vmem:[%s2922_s1 + $0x110] sm:$0xff] (!%p138_p2)  }
   0x7   : > { %2082 = vmatpush3.bf16.msra.mxu1 (!%p138_p2), %v2319_v2  ;;  %vm186_vm0 = vcmp.lt.s32.totalorder (!%p138_p2), %v184_v1, 512  ;;  %1381 = vst [vmem:[#allocation3 + $0x11] sm:$0x1] (!%p138_p2), %v2446_v6  ;;  %v2324_v8 = vld [vmem:[%s2922_s1 + $0x158] sm:$0xff] (!%p138_p2)   ;;  %v2326_v10 = vld [vmem:[%s2922_s1 + $0x160] sm:$0xff] (!%p138_p2)   ;;  %v2328_v12 = vld [vmem:[%s2922_s1 + $0x168] sm:$0xff] (!%p138_p2)  }
   0x8   : > { %2083 = vmatprep.subr.bf16.mxu1 (!%p138_p2), %v2320_v3  ;;  %188 = vst.msk [vmem:[#allocation2] ss:$8 sm:$0xf] (!%p138_p2), %vm186_vm0, %v2446_v6  ;;  %191 = vst.msk [vmem:[#allocation2 + $0x41] ss:$8 sm:$0xf] (!%p138_p2), %vm186_vm0, %v2446_v6 }
   0x9   : > { %v2325_v9 = vld [vmem:[%s2922_s1 + $0x118] sm:$0xff] (!%p138_p2)   ;;  %v2327_v11 = vld [vmem:[%s2922_s1 + $0x120] sm:$0xff] (!%p138_p2)   ;;  %v2329_v15 = vld [vmem:[%s2922_s1 + $0x128] sm:$0xff] (!%p138_p2)   ;;  %vm395_vm2 = vsmask.f32 (!%p138_p2), 7424  ;;  %vm1085_vm3 = vcmask (!%p138_p2), 1046528  }
   0xa   : > { %v2330_v20 = vld [vmem:[%s2922_s1 + $0x170] sm:$0xff] (!%p138_p2)   ;;  %v2336_v25 = vld [vmem:[%s2922_s1 + $0x40] sm:$0xff] (!%p138_p2)   ;;  %v2332_v30 = vld [vmem:[%s2922_s1 + $0x178] sm:$0xff] (!%p138_p2)   ;;  %vm2447_vm4 = vmmov (!%p138_p2), 0  }
   0xb   : > { %2084 = vmatpush3.bf16.msra.mxu1 (!%p138_p2), %v2321_v4  ;;  %v2337_v28 = vld [vmem:[%s2922_s1] sm:$0xff] (!%p138_p2)   ;;  %v2331_v29 = vld [vmem:[%s2922_s1 + $0x130] sm:$0xff] (!%p138_p2)   ;;  %2125 = vmatprep.subr.bf16.mxu0 (!%p138_p2), %v2336_v25  ;;  %v2340_v31 = vld [vmem:[%s2922_s1 + $0x48] sm:$0xff] (!%p138_p2)  }
   0xc   : > { %2085 = vmatprep.subr.bf16.mxu1 (!%p138_p2), %v2322_v5  ;;  %2126 = vmatpush3.bf16.msra.mxu0 (!%p138_p2), %v2337_v28  ;;  %v2333_v32 = vld [vmem:[%s2922_s1 + $0x138] sm:$0xff] (!%p138_p2)   ;;  %v2341_v33 = vld [vmem:[%s2922_s1 + $0x8] sm:$0xff] (!%p138_p2)   ;;  %v2334_v34 = vld [vmem:[%s2922_s1 + $0x1c0] sm:$0xff] (!%p138_p2)  }
   0xd   : > { %s2926_s13 = smov (!%p161_p3, %s1779_s13), 1  ;;  %2127 = vmatprep.subr.bf16.mxu0 %v2340_v31  ;;  %v2344_v42 = vld [vmem:[%s2922_s1 + $0x50] sm:$0xff]   ;;  %v2348_v55 = vld [vmem:[%s2922_s1 + $0x58] sm:$0xff]   ;;  %v2335_v59 = vld [vmem:[%s2922_s1 + $0x180] sm:$0xff]  }
   0xe   : > { %s2072_s28 = sshll.u32 %s2926_s13, 5  ;;  %v2345_v44 = vld [vmem:[%s2922_s1 + $0x10] sm:$0xff]   ;;  %v2349_v56 = vld [vmem:[%s2922_s1 + $0x18] sm:$0xff]   ;;  %v2338_v61 = vld [vmem:[%s2922_s1 + $0x1c8] sm:$0xff]   ;;  %s2073_s7 = sshll.u32 %s2926_s13, 3 }
   0xf   : > { %2086 = vmatpush3.bf16.msra.mxu1 %v2323_v7  ;;  %s2513_s8 = scalar_lea.vmem %s2921_s0, %s2072_s28  ;;  %v2352_v63 = vld [vmem:[%s2922_s1 + $0x60] sm:$0xff]   ;;  %v2339_v1 = vld [vmem:[%s2922_s1 + $0x188] sm:$0xff]   ;;  %v2342_v2 = vld [vmem:[%s2922_s1 + $0x1d0] sm:$0xff]   ;;  %s170_s11 = scalar_lea.vmem %s2924_s3, %s2073_s7 }
  0x10   : > { %2087 = vmatprep.subr.bf16.mxu1 %v2324_v8  ;;  %v172_v13 = vld [vmem:[%s2513_s8] sm:$0xff]  ;;  %v174_v14 = vld [vmem:[%s2513_s8 + $0x10] sm:$0xff]  ;;  %2128 = vmatpush3.bf16.msra.mxu0 %v2341_v33  ;;  %v2356_v3 = vld [vmem:[%s2922_s1 + $0x68] sm:$0xff]  }
  0x11   : > { %v177_v16 = vunpack.c.h.bf16 %v172_v13  ;;  %v181_v17 = vunpack.c.h.bf16 %v174_v14  ;;  %v176_v18 = vunpack.c.l.bf16 %v172_v13  ;;  %v180_v19 = vunpack.c.l.bf16 %v174_v14  ;;  %2129 = vmatprep.subr.bf16.mxu0 %v2344_v42  ;;  %v2353_v0 = vld [vmem:[%s2922_s1 + $0x20] sm:$0xff]   ;;  %v2357_v4 = vld [vmem:[%s2922_s1 + $0x28] sm:$0xff]   ;;  %v2343_v5 = vld [vmem:[%s2922_s1 + $0x190] sm:$0xff]  }
  0x12   : > { %v2346_v7 = vld [vmem:[%s2922_s1 + $0x1d8] sm:$0xff]   ;;  %v2360_v8 = vld [vmem:[%s2922_s1 + $0x70] sm:$0xff]   ;;  %v173_v14 = vld [vmem:[%s2513_s8 + $0x8] sm:$0xff] }
  0x13   : > { %2088 = vmatpush3.bf16.msra.mxu1 %v2325_v9  ;;  %v203_v21 = vrot.slane %v177_v16, 7  ;;  %v208_v22 = vrot.slane %v181_v17, 7  ;;  %v202_v23 = vrot.slane %v176_v18, 7  ;;  %v206_v24 = vrot.slane %v180_v19, 7  ;;  %v2361_v9 = vld [vmem:[%s2922_s1 + $0x30] sm:$0xff]   ;;  %v2364_v13 = vld [vmem:[%s2922_s1 + $0x78] sm:$0xff]  }
  0x14   : > { %2089 = vmatprep.subr.bf16.mxu1 %v2326_v10  ;;  %2130 = vmatpush3.bf16.msra.mxu0 %v2345_v44  ;;  %v2347_v10 = vld [vmem:[%s2922_s1 + $0x198] sm:$0xff]   ;;  %v179_v16 = vunpack.c.h.bf16 %v173_v14  ;;  %v178_v17 = vunpack.c.l.bf16 %v173_v14  ;;  %v2374_v14 = vld [vmem:[%s2922_s1 + $0xe0] sm:$0xff]  }
  0x15   : > { %v2533_v26 = vsel %vm201_vm1, %v203_v21, %v208_v22  ;;  %227 = vst [vmem:[#allocation2 + $0x8] sm:$0xfe] %v203_v21  ;;  %235 = vst [vmem:[#allocation2 + $0x48] sm:$0x1] %v208_v22  ;;  %v2536_v27 = vsel %vm201_vm1, %v202_v23, %v206_v24  ;;  %2131 = vmatprep.subr.bf16.mxu0 %v2348_v55  ;;  %v2365_v19 = vld [vmem:[%s2922_s1 + $0x38] sm:$0xff]   ;;  %v2354_v21 = vld [vmem:[%s2922_s1 + $0x1e8] sm:$0xff]  }
  0x16   : > { %226 = vst [vmem:[#allocation2] sm:$0xfe] %v202_v23  ;;  %234 = vst [vmem:[#allocation2 + $0x40] sm:$0x1] %v206_v24  ;;  %v205_v22 = vrot.slane %v179_v16, 7  ;;  %v204_v23 = vrot.slane %v178_v17, 7 }
  0x17   : > { %2090 = vmatpush3.bf16.msra.mxu1 %v2327_v11  ;;  %v2350_v11 = vld [vmem:[%s2922_s1 + $0x1e0] sm:$0xff]   ;;  %v2363_v44 = vld [vmem:[%s2922_s1 + $0x1b8] sm:$0xff]  }
  0x18   : > { %2091 = vmatprep.subr.bf16.mxu1 %v2328_v12  ;;  %2132 = vmatpush3.bf16.msra.mxu0 %v2349_v56  ;;  %v2351_v12 = vld [vmem:[%s2922_s1 + $0x1a0] sm:$0xff]   ;;  %229 = vst [vmem:[#allocation2 + $0x18] sm:$0xfe] %v205_v22  ;;  %228 = vst [vmem:[#allocation2 + $0x10] sm:$0xfe] %v204_v23  ;;  %v2395_v17 = vld [vmem:[%s2922_s1 + $0x218] sm:$0xff]  }
  0x19   : > { %2133 = vmatprep.subr.bf16.mxu0 %v2352_v63  ;;  %v2368_v63 = vld [vmem:[%s2922_s1 + $0xc8] sm:$0xff]   ;;  %v2375_v16 = vld [vmem:[%s2922_s1 + $0xa0] sm:$0xff]  }
  0x1b   : > { %2092 = vmatpush3.bf16.msra.mxu1 %v2329_v15  ;;  %v175_v15 = vld [vmem:[%s2513_s8 + $0x18] sm:$0xff] }
  0x1c   : > { %2093 = vmatprep.subr.bf16.mxu1 %v2330_v20  ;;  %v315_v35 = vld [vmem:[#allocation2 + $0x8] sm:$0xfe]  ;;  %v319_v36 = vld [vmem:[#allocation2 + $0x48] sm:$0x1]  ;;  %2134 = vmatpush3.bf16.msra.mxu0 %v2353_v0  ;;  %v183_v18 = vunpack.c.h.bf16 %v175_v15  ;;  %v182_v20 = vunpack.c.l.bf16 %v175_v15  ;;  %v2382_v0 = vld [vmem:[%s2922_s1 + $0x240] sm:$0xff]  }
  0x1d   : > { %v314_v37 = vld [vmem:[#allocation2] sm:$0xfe]  ;;  %v323_v38 = vpack.c.bf16 %v2533_v26, %v315_v35  ;;  %v327_v39 = vpack.c.bf16 %v319_v36, %v319_v36  ;;  %v318_v40 = vld [vmem:[#allocation2 + $0x40] sm:$0x1]  ;;  %2135 = vmatprep.subr.bf16.mxu0 %v2356_v3  ;;  %v239_v24 = vld [vmem:[#allocation2 + $0x8] sm:$0xff] }
  0x1e   : > { %v322_v41 = vpack.c.bf16 %v2536_v27, %v314_v37  ;;  %v326_v43 = vpack.c.bf16 %v318_v40, %v318_v40  ;;  %v212_v25 = vrot.slane %v183_v18, 7  ;;  %v210_v28 = vrot.slane %v182_v20, 7  ;;  %v2358_v35 = vld [vmem:[%s2922_s1 + $0x1f0] sm:$0xff]   ;;  %v2362_v37 = vld [vmem:[%s2922_s1 + $0x1f8] sm:$0xff]   ;;  %v2376_v18 = vld [vmem:[%s2922_s1 + $0xe8] sm:$0xff]  }
  0x1f   : > { %2094 = vmatpush3.bf16.msra.mxu1 %v2331_v29  ;;  %v409_v45 = vshrl.u32 %v323_v38, 16  ;;  %v411_v46 = vshll.u32 %v323_v38, 16  ;;  %v416_v47 = vshll.u32 %v327_v39, 16  ;;  %v247_v29 = vpack.c.bf16 %v2533_v26, %v239_v24  ;;  %v2359_v36 = vld [vmem:[%s2922_s1 + $0x1b0] sm:$0xff]   ;;  %v317_v38 = vld [vmem:[#allocation2 + $0x18] sm:$0xfe] }
  0x20   : > { %2095 = vmatprep.subr.bf16.mxu1 %v2332_v30  ;;  %v397_v48 = vshrl.u32 %v322_v41, 16  ;;  %v399_v49 = vshll.u32 %v322_v41, 16  ;;  %v404_v50 = vshll.u32 %v326_v43, 16  ;;  %2136 = vmatpush3.bf16.msra.mxu0 %v2357_v4  ;;  %v238_v30 = vld [vmem:[#allocation2] sm:$0xff]  ;;  %v2637_v33 = vsel %vm201_vm1, %v205_v22, %v212_v25  ;;  %237 = vst [vmem:[#allocation2 + $0x58] sm:$0x1] %v212_v25 }
  0x21   : > { %v413_v51 = vrot.slane %v411_v46, 1  ;;  %v418_v52 = vrot.slane %v416_v47, 1  ;;  %2137 = vmatprep.subr.bf16.mxu0 %v2360_v8  ;;  %v246_v31 = vpack.c.bf16 %v2536_v27, %v238_v30  ;;  %236 = vst [vmem:[#allocation2 + $0x50] sm:$0x1] %v210_v28  ;;  %946 = vmatprep.mubr.bf16.mxu0 %v247_v29  ;;  %v316_v39 = vld [vmem:[#allocation2 + $0x10] sm:$0xfe]  ;;  %v325_v41 = vpack.c.bf16 %v2637_v33, %v317_v38 }
  0x22   : > { %v401_v53 = vrot.slane %v399_v49, 1  ;;  %v406_v54 = vrot.slane %v404_v50, 1  ;;  %v241_v3 = vld [vmem:[#allocation2 + $0x18] sm:$0xff]  ;;  %v2370_v4 = vld [vmem:[%s2922_s1 + $0xd0] sm:$0xff]   ;;  %v2377_v20 = vld [vmem:[%s2922_s1 + $0xa8] sm:$0xff]  }
  0x23   : > { %2096 = vmatpush3.bf16.msra.mxu1 %v2333_v32  ;;  %v414_v57 = vor.u32 %v413_v51, %v409_v45  ;;  %v2355_v32 = vld [vmem:[%s2922_s1 + $0x1a8] sm:$0xff]   ;;  %v433_v47 = vshrl.u32 %v325_v41, 16  ;;  %v2366_v51 = vld [vmem:[%s2922_s1 + $0xc0] sm:$0xff]   ;;  %v2371_v8 = vld [vmem:[%s2922_s1 + $0x90] sm:$0xff]  }
  0x24   : > { %2103 = vmatprep.subr.bf16.mxu1 %v2334_v34  ;;  %v402_v58 = vor.u32 %v401_v53, %v397_v48  ;;  %2138 = vmatpush3.bf16.msra.mxu0 %v2361_v9  ;;  %v2640_v34 = vsel %vm201_vm1, %v204_v23, %v210_v28  ;;  %v435_v48 = vshll.u32 %v325_v41, 16  ;;  %v2387_v9 = vld [vmem:[%s2922_s1 + $0x208] sm:$0xff]   ;;  %v2393_v15 = vld [vmem:[%s2922_s1 + $0x258] sm:$0xff]   ;;  %v2378_v22 = vld [vmem:[%s2922_s1 + $0xf0] sm:$0xff]  }
  0x25   : > { %v419_v60 = vsel %vm395_vm2, %v414_v57, %v418_v52  ;;  %2139 = vmatprep.subr.bf16.mxu0 %v2364_v13  ;;  %v324_v43 = vpack.c.bf16 %v2640_v34, %v316_v39  ;;  %v2391_v13 = vld [vmem:[%s2922_s1 + $0x210] sm:$0xff]   ;;  %v2401_v23 = vld [vmem:[%s2922_s1 + $0x268] sm:$0xff]   ;;  %v2380_v28 = vld [vmem:[%s2922_s1 + $0xf8] sm:$0xff]  }
  0x26   : > { %672 = vmatprep.mubr.bf16.mxu1 %v419_v60  ;;  %v407_v62 = vsel %vm395_vm2, %v402_v58, %v406_v54  ;;  %v437_v54 = vrot.slane %v435_v48, 1  ;;  %v2367_v60 = vld [vmem:[%s2922_s1 + $0x80] sm:$0xff]   ;;  %v2379_v24 = vld [vmem:[%s2922_s1 + $0xb0] sm:$0xff]   ;;  %v2403_v25 = vld [vmem:[%s2922_s1 + $0x228] sm:$0xff]  }
  0x27   : > { %673 = vmatmul.mubr.bf16.vlgmr.msra.gmra.mrb[0].mxu1 %v407_v62  ;;  %v321_v40 = vld [vmem:[#allocation2 + $0x58] sm:$0x1]  ;;  %v421_v49 = vshrl.u32 %v324_v43, 16  ;;  %v423_v50 = vshll.u32 %v324_v43, 16  ;;  %v2405_v29 = vld [vmem:[%s2922_s1 + $0x270] sm:$0xff]  }
  0x28   : > { %2104 = vmatpush3.bf16.msra.mxu1 %v2335_v59  ;;  %2140 = vmatpush3.bf16.msra.mxu0 %v2365_v19  ;;  %v320_v42 = vld [vmem:[#allocation2 + $0x50] sm:$0x1]  ;;  %v329_v45 = vpack.c.bf16 %v321_v40, %v321_v40  ;;  %v438_v58 = vor.u32 %v437_v54, %v433_v47  ;;  %v2397_v19 = vld [vmem:[%s2922_s1 + $0x260] sm:$0xff]   ;;  %v2381_v30 = vld [vmem:[%s2922_s1 + $0xb8] sm:$0xff]  }
  0x29   : > { %2105 = vmatprep.subr.bf16.mxu1 %v2338_v61  ;;  %v328_v46 = vpack.c.bf16 %v320_v42, %v320_v42  ;;  %v425_v55 = vrot.slane %v423_v50, 1  ;;  %2169 = vmatprep.subr.bf16.mxu0 %v2382_v0  ;;  %v2411_v39 = vld [vmem:[%s2922_s1 + $0x238] sm:$0xff]   ;;  %v997_v40 = vld [vmem:[#allocation2 + $0x8] sm:$0xfc]  ;;  %v1001_v41 = vld [vmem:[#allocation2 + $0x48] sm:$0x3] }
  0x2a   : > { %v440_v52 = vshll.u32 %v329_v45, 16  ;;  %v2388_v42 = vld [vmem:[%s2922_s1 + $0x2c8] sm:$0xff]   ;;  %v1005_v43 = vpack.c.bf16 %v2533_v26, %v997_v40  ;;  %v996_v45 = vld [vmem:[#allocation2] sm:$0xfc]  ;;  %v1003_v26 = vld [vmem:[#allocation2 + $0x58] sm:$0x3] }
  0x2b   : > { %947 = vmatmul.mubr.bf16.vlgmr.msra.gmra.mrb[0].mxu0 %v246_v31  ;;  %v428_v53 = vshll.u32 %v328_v46, 16  ;;  %v426_v59 = vor.u32 %v425_v55, %v421_v49  ;;  %v240_v31 = vld [vmem:[#allocation2 + $0x10] sm:$0xff]  ;;  %v1000_v46 = vld [vmem:[#allocation2 + $0x40] sm:$0x3]  ;;  %v1004_v47 = vpack.c.bf16 %v2536_v27, %v996_v45 }
  0x2c   : > { %2106 = vmatpush3.bf16.msra.mxu1 %v2339_v1  ;;  %v442_v56 = vrot.slane %v440_v52, 1  ;;  %v2369_v1 = vld [vmem:[%s2922_s1 + $0x88] sm:$0xff]   ;;  %v248_v38 = vpack.c.bf16 %v2640_v34, %v240_v31  ;;  %v1089_v48 = vrot.slane %v1005_v43, 1  ;;  %v1008_v50 = vpack.c.bf16 %v1000_v46, %v1000_v46  ;;  %v2392_v27 = vld [vmem:[%s2922_s1 + $0x2d0] sm:$0xff]   ;;  %v2400_v0 = vld [vmem:[%s2922_s1 + $0x2e0] sm:$0xff]  }
  0x2d   : > { %2107 = vmatprep.subr.bf16.mxu1 %v2342_v2  ;;  %v430_v57 = vrot.slane %v428_v53, 1  ;;  %v2383_v2 = vld [vmem:[%s2922_s1 + $0x200] sm:$0xff]   ;;  %v2390_v52 = vld [vmem:[%s2922_s1 + $0x288] sm:$0xff]   ;;  %v1086_v53 = vrot.slane %v1004_v47, 1 }
  0x2e   : > { %v443_v61 = vsel %vm395_vm2, %v438_v58, %v442_v56  ;;  %2170 = vmatpush3.bf16.msra.mxu0 %v2383_v2  ;;  %v1087_v56 = vrot.slane %v1008_v50, 1  ;;  %v2404_v2 = vld [vmem:[%s2922_s1 + $0x2e8] sm:$0xff]  }
  0x2f   : > { %v431_v62 = vsel %vm395_vm2, %v426_v59, %v430_v57  ;;  %713 = vmatprep.mubr.bf16.mxu1 %v443_v61  ;;  %v1011_v57 = vpack.c.bf16 %v1003_v26, %v1003_v26  ;;  %v2394_v59 = vld [vmem:[%s2922_s1 + $0x290] sm:$0xff]  }
  0x30   : > { %2108 = vmatpush3.bf16.msra.mxu1 %v2343_v5  ;;  %v249_v5 = vpack.c.bf16 %v2637_v33, %v241_v3  ;;  %v2406_v3 = vld [vmem:[%s2922_s1 + $0x2a8] sm:$0xff]  }
  0x31   : > { %2109 = vmatprep.subr.bf16.mxu1 %v2346_v7  ;;  %v2385_v7 = vld [vmem:[%s2922_s1 + $0x248] sm:$0xff]   ;;  %v1096_v61 = vrot.slane %v1011_v57, 1 }
  0x32   : > { %2171 = vmatprep.subr.bf16.mxu0 %v2385_v7  ;;  %v1002_v7 = vld [vmem:[#allocation2 + $0x50] sm:$0x3] }
  0x33   : > { %2172 = vmatpush3.bf16.msra.mxu0 %v2387_v9 }
  0x34   : > { %2110 = vmatpush3.bf16.msra.mxu1 %v2347_v10  ;;  %v2372_v10 = vld [vmem:[%s2922_s1 + $0xd8] sm:$0xff]  }
  0x35   : > { %2111 = vmatprep.subr.bf16.mxu1 %v2350_v11  ;;  %v2389_v11 = vld [vmem:[%s2922_s1 + $0x250] sm:$0xff]  }
  0x36   : > { %2173 = vmatprep.subr.bf16.mxu0 %v2389_v11  ;;  %v2412_v11 = vld [vmem:[%s2922_s1 + $0x2f8] sm:$0xff]  }
  0x37   : > { %2174 = vmatpush3.bf16.msra.mxu0 %v2391_v13 }
  0x38   : > { %2112 = vmatpush3.bf16.msra.mxu1 %v2351_v12  ;;  %v2373_v12 = vld [vmem:[%s2922_s1 + $0x98] sm:$0xff]   ;;  %2175 = vmatprep.subr.bf16.mxu0 %v2393_v15 }
  0x39   : > { %2113 = vmatprep.subr.bf16.mxu1 %v2354_v21  ;;  %v2399_v21 = vld [vmem:[%s2922_s1 + $0x220] sm:$0xff]  }
  0x3b   : > { %2176 = vmatpush3.bf16.msra.mxu0 %v2395_v17  ;;  %v2416_v17 = vld [vmem:[%s2923_s2 + $0x50] sm:$0xff]  }
  0x3c   : > { %2114 = vmatpush3.bf16.msra.mxu1 %v2355_v32  ;;  %2177 = vmatprep.subr.bf16.mxu0 %v2397_v19  ;;  %v2407_v32 = vld [vmem:[%s2922_s1 + $0x230] sm:$0xff]   ;;  %v2418_v19 = vld [vmem:[%s2923_s2 + $0x60] sm:$0xff]  }
  0x3d   : > { %2115 = vmatprep.subr.bf16.mxu1 %v2358_v35  ;;  %v2384_v35 = vld [vmem:[%s2922_s1 + $0x2c0] sm:$0xff]  }
  0x3f   : > { %2178 = vmatpush3.bf16.msra.mxu0 %v2399_v21  ;;  %v2420_v21 = vld [vmem:[%s2923_s2 + $0x70] sm:$0xff]  }
  0x40   : > { %2116 = vmatpush3.bf16.msra.mxu1 %v2359_v36  ;;  %2179 = vmatprep.subr.bf16.mxu0 %v2401_v23  ;;  %v2409_v36 = vld [vmem:[%s2922_s1 + $0x278] sm:$0xff]  }
  0x41   : > { %2117 = vmatprep.subr.bf16.mxu1 %v2362_v37  ;;  %v2386_v37 = vld [vmem:[%s2922_s1 + $0x280] sm:$0xff]  }
  0x43   : > { %2180 = vmatpush3.bf16.msra.mxu0 %v2403_v25 }
  0x44   : > { %2118 = vmatpush3.bf16.msra.mxu1 %v2363_v44  ;;  %2181 = vmatprep.subr.bf16.mxu0 %v2405_v29  ;;  %v1009_v44 = vpack.c.bf16 %v1001_v41, %v1001_v41 }
  0x45   : > { %2147 = vmatprep.subr.bf16.mxu1 %v2366_v51  ;;  %v999_v51 = vld [vmem:[#allocation2 + $0x18] sm:$0xfc] }
  0x46   : > { %v1090_v49 = vrot.slane %v1009_v44, 1  ;;  %v1007_v54 = vpack.c.bf16 %v2637_v33, %v999_v51  ;;  %v2396_v33 = vld [vmem:[%s2922_s1 + $0x2d8] sm:$0xff]  }
  0x47   : > { %714 = vmatmul.mubr.bf16.vlgmr.msra.gmra.mrb[4].mxu1 %v431_v62  ;;  %2182 = vmatpush3.bf16.msra.mxu0 %v2407_v32 }
  0x48   : > { %2148 = vmatpush3.bf16.msra.mxu1 %v2367_v60  ;;  %987 = vmatprep.mubr.bf16.mxu1 %v249_v5  ;;  %v1091_v55 = vsel %vm1085_vm3, %v1089_v48, %v1090_v49  ;;  %v1095_v58 = vrot.slane %v1007_v54, 1  ;;  %v1088_v60 = vsel %vm1085_vm3, %v1086_v53, %v1087_v56  ;;  %v998_v5 = vld [vmem:[#allocation2 + $0x10] sm:$0xfc] }
  0x49   : > { %2149 = vmatprep.subr.bf16.mxu1 %v2368_v63  ;;  %2183 = vmatprep.subr.bf16.mxu0 %v2409_v36  ;;  %v2398_v63 = vld [vmem:[%s2922_s1 + $0x298] sm:$0xff]   ;;  %v1006_v9 = vpack.c.bf16 %v2640_v34, %v998_v5  ;;  %v2414_v34 = vld [vmem:[%s2923_s2 + $0x40] sm:$0xff]  }
  0x4a   : > { %1326 = vmatprep.mubr.bf16.mxu0 %v1091_v55  ;;  %v1097_v62 = vsel %vm1085_vm3, %v1095_v58, %v1096_v61 }
  0x4b   : > { %2184 = vmatpush3.bf16.msra.mxu0 %v2411_v39  ;;  %v1092_v13 = vrot.slane %v1006_v9, 1  ;;  %v2422_v9 = vld [vmem:[%s2923_s2] sm:$0xff]  }
  0x4c   : > { %2150 = vmatpush3.bf16.msra.mxu1 %v2369_v1  ;;  %2240 = vmatprep.subr.bf16.mxu0 %v2446_v6  ;;  %v2402_v1 = vld [vmem:[%s2922_s1 + $0x2a0] sm:$0xff]  }
  0x4d   : > { %2151 = vmatprep.subr.bf16.mxu1 %v2370_v4  ;;  %v2408_v4 = vld [vmem:[%s2922_s1 + $0x2f0] sm:$0xff]  }
  0x4e   : > { %1327 = vmatmul.mubr.bf16.vlgmr.msra.gmra.mrb[4].mxu0 %v1088_v60 }
  0x4f   : > { %2241 = vmatpush3.bf16.msra.mxu0 %v2414_v34  ;;  %2256 = vmatprep.mubr.msk.bf16.mxu0 %vm2447_vm4, %v2446_v6  ;;  %v2428_v34 = vld [vmem:[%s2923_s2 + $0x30] sm:$0xff]  }
  0x50   : > { %2152 = vmatpush3.bf16.msra.mxu1 %v2371_v8  ;;  %v2410_v8 = vld [vmem:[%s2922_s1 + $0x2b0] sm:$0xff]   ;;  %2242 = vmatprep.subr.bf16.mxu0 %v2446_v6 }
  0x51   : > { %2153 = vmatprep.subr.bf16.mxu1 %v2372_v10  ;;  %v1010_v10 = vpack.c.bf16 %v1002_v7, %v1002_v7 }
  0x54   : > { %2154 = vmatpush3.bf16.msra.mxu1 %v2373_v12  ;;  %v2413_v12 = vld [vmem:[%s2922_s1 + $0x2b8] sm:$0xff]  }
  0x55   : > { %2155 = vmatprep.subr.bf16.mxu1 %v2374_v14  ;;  %v1093_v14 = vrot.slane %v1010_v10, 1 }
  0x57   : > { %v1094_v15 = vsel %vm1085_vm3, %v1092_v13, %v1093_v14  ;;  %v2425_v13 = vld [vmem:[%s2923_s2 + $0x18] sm:$0xff]   ;;  %v2426_v14 = vld [vmem:[%s2923_s2 + $0x20] sm:$0xff]  }
  0x58   : > { %2156 = vmatpush3.bf16.msra.mxu1 %v2375_v16  ;;  %v2415_v16 = vld [vmem:[%s2923_s2 + $0x48] sm:$0xff]  }
  0x59   : > { %2157 = vmatprep.subr.bf16.mxu1 %v2376_v18  ;;  %2243 = vmatpush3.bf16.msra.mxu0 %v2415_v16  ;;  %v2417_v18 = vld [vmem:[%s2923_s2 + $0x58] sm:$0xff]  }
  0x5a   : > { %2244 = vmatprep.subr.bf16.mxu0 %v2446_v6  ;;  %v2429_v16 = vld [vmem:[%s2923_s2 + $0x38] sm:$0xff]  }
  0x5c   : > { %2158 = vmatpush3.bf16.msra.mxu1 %v2377_v20  ;;  %v2419_v20 = vld [vmem:[%s2923_s2 + $0x68] sm:$0xff]  }
  0x5d   : > { %2159 = vmatprep.subr.bf16.mxu1 %v2378_v22  ;;  %2245 = vmatpush3.bf16.msra.mxu0 %v2416_v17  ;;  %v2421_v22 = vld [vmem:[%s2923_s2 + $0x78] sm:$0xff]  }
  0x5e   : > { %2246 = vmatprep.subr.bf16.mxu0 %v2446_v6 }
  0x60   : > { %2160 = vmatpush3.bf16.msra.mxu1 %v2379_v24 }
  0x61   : > { %2161 = vmatprep.subr.bf16.mxu1 %v2380_v28  ;;  %2247 = vmatpush3.bf16.msra.mxu0 %v2417_v18 }
  0x62   : > { %2248 = vmatprep.subr.bf16.mxu0 %v2446_v6 }
  0x64   : > { %2162 = vmatpush3.bf16.msra.mxu1 %v2381_v30 }
  0x65   : > { %2191 = vmatprep.subr.bf16.mxu1 %v2384_v35  ;;  %2249 = vmatpush3.bf16.msra.mxu0 %v2418_v19  ;;  %v2430_v19 = vld [vmem:[%s2923_s2 + $0x80] sm:$0xff]  }
  0x66   : > { %2250 = vmatprep.subr.bf16.mxu0 %v2446_v6 }
  0x67   : > { %988 = vmatmul.mubr.bf16.vlgmr.msra.gmra.mrb[8].mxu1 %v248_v38 }
  0x68   : > { %2192 = vmatpush3.bf16.msra.mxu1 %v2386_v37  ;;  %1367 = vmatprep.mubr.bf16.mxu1 %v1097_v62 }
  0x69   : > { %2193 = vmatprep.subr.bf16.mxu1 %v2388_v42  ;;  %2251 = vmatpush3.bf16.msra.mxu0 %v2419_v20 }
  0x6a   : > { %2252 = vmatprep.subr.bf16.mxu0 %v2446_v6 }
  0x6c   : > { %2194 = vmatpush3.bf16.msra.mxu1 %v2390_v52 }
  0x6d   : > { %2195 = vmatprep.subr.bf16.mxu1 %v2392_v27  ;;  %2253 = vmatpush3.bf16.msra.mxu0 %v2420_v21  ;;  %v2431_v21 = vld [vmem:[%s2923_s2 + $0x88] sm:$0xff]  }
  0x6e   : > { %2254 = vmatprep.subr.bf16.mxu0 %v2446_v6 }
  0x70   : > { %2196 = vmatpush3.bf16.msra.mxu1 %v2394_v59 }
  0x71   : > { %2197 = vmatprep.subr.bf16.mxu1 %v2396_v33  ;;  %2255 = vmatpush3.bf16.msra.mxu0 %v2421_v22  ;;  %v2432_v22 = vld [vmem:[%s2923_s2 + $0x90] sm:$0xff]  }
  0x72   : > { %2260 = vmatprep.subr.bf16.mxu0 %v2446_v6 }
  0x74   : > { %2198 = vmatpush3.bf16.msra.mxu1 %v2398_v63 }
  0x75   : > { %2199 = vmatprep.subr.bf16.mxu1 %v2400_v0 }
  0x78   : > { %2200 = vmatpush3.bf16.msra.mxu1 %v2402_v1 }
  0x79   : > { %2201 = vmatprep.subr.bf16.mxu1 %v2404_v2 }
  0x7c   : > { %2202 = vmatpush3.bf16.msra.mxu1 %v2406_v3 }
  0x7d   : > { %2203 = vmatprep.subr.bf16.mxu1 %v2408_v4 }
  0x80   : > { %2204 = vmatpush3.bf16.msra.mxu1 %v2410_v8 }
  0x81   : > { %2205 = vmatprep.subr.bf16.mxu1 %v2412_v11  ;;  %v2423_v11 = vld [vmem:[%s2923_s2 + $0x8] sm:$0xff]  }
  0x84   : > { %2206 = vmatpush3.bf16.msra.mxu1 %v2413_v12  ;;  %v2424_v12 = vld [vmem:[%s2923_s2 + $0x10] sm:$0xff]  }
  0x87   : > { %1368 = vmatmul.mubr.bf16.vlgmr.msra.gmra.mrb[12].mxu1 %v1094_v15  ;;  %v2427_v15 = vld [vmem:[%s2923_s2 + $0x28] sm:$0xff]  }
  0xfa   : > { %v2097_v23 = vpop.f32.mrb[0].mxu1 }
  0xfb   : > { %v2098_v24 = vpop.f32.mrb[1].mxu1 }
  0xfc   : > { %v2099_v25 = vadd.f32 %v2098_v24, %v2097_v23  ;;  %v2100_v28 = vpop.f32.mrb[2].mxu1  ;;  %v2433_v23 = vld [vmem:[%s2923_s2 + $0x98] sm:$0xff]   ;;  %v2434_v24 = vld [vmem:[%s2923_s2 + $0xa0] sm:$0xff]  }
  0xfd   : > { %v2101_v29 = vpop.f32.mrb[3].mxu1 }
  0xfe   : > { %v2102_v30 = vadd.f32 %v2101_v29, %v2100_v28  ;;  %v2141_v31 = vpop.f32.mrb[0].mxu0  ;;  %v2436_v28 = vld [vmem:[%s2923_s2 + $0xb0] sm:$0xff]   ;;  %v2437_v29 = vld [vmem:[%s2923_s2 + $0xb8] sm:$0xff]  }
  0xff   : > { %v2142_v32 = vpop.f32.mrb[1].mxu0 }
 0x100   : > { %v2143_v35 = vadd.f32 %v2142_v32, %v2141_v31  ;;  %v2144_v36 = vpop.f32.mrb[2].mxu0 }
 0x101   : > { %v2145_v37 = vpop.f32.mrb[3].mxu0 }
 0x102   : > { %v2146_v38 = vadd.f32 %v2145_v37, %v2144_v36 }
 0x11a   : > { %v2119_v39 = vpop.f32.mrb[4].mxu1 }
 0x11b   : > { %v2120_v40 = vpop.f32.mrb[5].mxu1 }
 0x11c   : > { %v2121_v41 = vadd.f32 %v2120_v40, %v2119_v39  ;;  %v2122_v42 = vpop.f32.mrb[6].mxu1 }
 0x11d   : > { %v2123_v43 = vpop.f32.mrb[7].mxu1 }
 0x11e   : > { %v716_v44 = vadd.f32 %v2121_v41, %v2099_v25  ;;  %v2124_v45 = vadd.f32 %v2123_v43, %v2122_v42  ;;  %v2435_v25 = vld [vmem:[%s2923_s2 + $0xa8] sm:$0xff]  }
 0x120   : > { %v719_v46 = vadd.f32 %v2124_v45, %v2102_v30  ;;  %v949_v47 = vadd.f32 %v2143_v35, %v716_v44 }
 0x121   : > { %v2185_v27 = vpop.f32.mrb[4].mxu0 }
 0x122   : > { %v952_v48 = vadd.f32 %v2146_v38, %v719_v46  ;;  %v2186_v56 = vpop.f32.mrb[5].mxu0 }
 0x123   : > { %v2187_v57 = vadd.f32 %v2186_v56, %v2185_v27  ;;  %v2188_v58 = vpop.f32.mrb[6].mxu0 }
 0x124   : > { %v2189_v59 = vpop.f32.mrb[7].mxu0 }
 0x125   : > { %v2190_v60 = vadd.f32 %v2189_v59, %v2188_v58 }
 0x13a   : > { %v2163_v49 = vpop.f32.mrb[8].mxu1 }
 0x13b   : > { %v2164_v50 = vpop.f32.mrb[9].mxu1 }
 0x13c   : > { %v2165_v51 = vadd.f32 %v2164_v50, %v2163_v49  ;;  %v2166_v52 = vpop.f32.mrb[10].mxu1 }
 0x13d   : > { %v2167_v53 = vpop.f32.mrb[11].mxu1 }
 0x13e   : > { %v990_v26 = vadd.f32 %v2165_v51, %v949_v47  ;;  %v2168_v54 = vadd.f32 %v2167_v53, %v2166_v52 }
 0x140   : > { %v993_v55 = vadd.f32 %v2168_v54, %v952_v48 }
 0x15a   : > { %v2207_v61 = vpop.f32.mrb[12].mxu1 }
 0x15b   : > { %v2208_v33 = vpop.f32.mrb[13].mxu1 }
 0x15c   : > { %v2209_v62 = vadd.f32 %v2208_v33, %v2207_v61  ;;  %v2210_v63 = vpop.f32.mrb[14].mxu1 }
 0x15d   : > { %v2211_v0 = vpop.f32.mrb[15].mxu1 }
 0x15e   : > { %v1370_v1 = vadd.f32 %v2209_v62, %v2187_v57  ;;  %v2212_v2 = vadd.f32 %v2211_v0, %v2210_v63 }
 0x160   : > { %v1376_v3 = vadd.f32 %v1370_v1, %v990_v26  ;;  %v1373_v4 = vadd.f32 %v2212_v2, %v2190_v60 }
 0x162   : > { %v1378_v5 = vmax.f32 %v1376_v3, 0.0  ;;  %v1377_v7 = vadd.f32 %v1373_v4, %v993_v55 }
 0x164   : > { %1382 = vst [vmem:[#allocation3 + $0x1] sm:$0xff] %v1378_v5  ;;  %v1379_v8 = vmax.f32 %v1377_v7, 0.0 }
 0x166   : > { %1383 = vst [vmem:[#allocation3 + $0x9] sm:$0xff] %v1379_v8  ;;  %v1405_v10 = vpack.c.bf16 %v1379_v8, %v1378_v5 }
 0x168   : > { %2257 = vmatmul.mubr.bf16.vlgmr.msra.gmra.mrb[8].mxu0 %v1405_v10 }
 0x169   : > { %2261 = vmatpush3.bf16.msra.mxu0 %v2422_v9  ;;  %2276 = vmatprep.mubr.msk.bf16.mxu0 %vm2447_vm4, %v2446_v6 }
 0x16a   : > { %2262 = vmatprep.subr.bf16.mxu0 %v2446_v6 }
 0x16b   : > { %v1384_v18 = vld [vmem:[#allocation3] sm:$0xff] }
 0x16d   : > { %2263 = vmatpush3.bf16.msra.mxu0 %v2423_v11  ;;  %v1385_v17 = vld [vmem:[#allocation3 + $0x8] sm:$0xff] }
 0x16e   : > { %2264 = vmatprep.subr.bf16.mxu0 %v2446_v6  ;;  %v1386_v20 = vpack.c.bf16 %v1385_v17, %v1384_v18  ;;  %v1601_v30 = vld [vmem:[#allocation3 + $0x2] sm:$0xff]  ;;  %v1602_v31 = vld [vmem:[#allocation3 + $0xa] sm:$0xff] }
 0x16f   : > { %v1603_v32 = vpack.c.bf16 %v1602_v31, %v1601_v30 }
 0x171   : > { %2265 = vmatpush3.bf16.msra.mxu0 %v2424_v12 }
 0x172   : > { %2266 = vmatprep.subr.bf16.mxu0 %v2446_v6 }
 0x175   : > { %2267 = vmatpush3.bf16.msra.mxu0 %v2425_v13 }
 0x176   : > { %2268 = vmatprep.subr.bf16.mxu0 %v2446_v6 }
 0x179   : > { %2269 = vmatpush3.bf16.msra.mxu0 %v2426_v14 }
 0x17a   : > { %2270 = vmatprep.subr.bf16.mxu0 %v2446_v6 }
 0x17d   : > { %2271 = vmatpush3.bf16.msra.mxu0 %v2427_v15 }
 0x17e   : > { %2272 = vmatprep.subr.bf16.mxu0 %v2446_v6 }
 0x181   : > { %2273 = vmatpush3.bf16.msra.mxu0 %v2428_v34 }
 0x182   : > { %2274 = vmatprep.subr.bf16.mxu0 %v2446_v6 }
 0x185   : > { %2275 = vmatpush3.bf16.msra.mxu0 %v2429_v16 }
 0x186   : > { %2280 = vmatprep.subr.bf16.mxu0 %v2446_v6 }
 0x188   : > { %2277 = vmatmul.mubr.bf16.vlgmr.msra.gmra.mrb[8].mxu0 %v1386_v20 }
 0x189   : > { %2281 = vmatpush3.bf16.msra.mxu0 %v2430_v19  ;;  %2296 = vmatprep.mubr.msk.bf16.mxu0 %vm2447_vm4, %v2446_v6 }
 0x18a   : > { %2282 = vmatprep.subr.bf16.mxu0 %v2446_v6 }
 0x18d   : > { %2283 = vmatpush3.bf16.msra.mxu0 %v2431_v21 }
 0x18e   : > { %2284 = vmatprep.subr.bf16.mxu0 %v2446_v6 }
 0x191   : > { %2285 = vmatpush3.bf16.msra.mxu0 %v2432_v22 }
 0x192   : > { %2286 = vmatprep.subr.bf16.mxu0 %v2446_v6 }
 0x195   : > { %2287 = vmatpush3.bf16.msra.mxu0 %v2433_v23 }
 0x196   : > { %2288 = vmatprep.subr.bf16.mxu0 %v2446_v6 }
 0x199   : > { %2289 = vmatpush3.bf16.msra.mxu0 %v2434_v24 }
 0x19a   : > { %2290 = vmatprep.subr.bf16.mxu0 %v2446_v6 }
 0x19d   : > { %2291 = vmatpush3.bf16.msra.mxu0 %v2435_v25 }
 0x19e   : > { %2292 = vmatprep.subr.bf16.mxu0 %v2446_v6 }
 0x1a1   : > { %2293 = vmatpush3.bf16.msra.mxu0 %v2436_v28 }
 0x1a2   : > { %2294 = vmatprep.subr.bf16.mxu0 %v2446_v6 }
 0x1a5   : > { %2295 = vmatpush3.bf16.msra.mxu0 %v2437_v29 }
 0x1a8   : > { %2297 = vmatmul.mubr.bf16.vlgmr.msra.gmra.mrb[8].mxu0 %v1603_v32 }
 0x27b   : > { %v1703_v35 = vpop.f32.mrb[8].mxu0 }
 0x27c   : > { %v2298_v36 = vpop.f32.mrb[9].mxu0  ;;  %v1712_v38 = vmax.f32 %v1703_v35, 0.0 }
 0x27d   : > { %v1706_v37 = vpop.f32.mrb[10].mxu0 }
 0x27e   : > { %v1713_v39 = vmax.f32 %v1706_v37, 0.0  ;;  %v2299_v40 = vpop.f32.mrb[11].mxu0 }
 0x280   : > { %v2079_v41 = vpack.c.bf16 %v1713_v39, %v1712_v38 }
 0x282   : > { %2080 = vst [vmem:[%s170_s11] sm:$0xff] %v2079_v41  }
 0x283 PF: > { %s13_s12 = sadd.s32 1, %s2444_s12  }
 0x284   : > { %p10_p4 = scmp.ge.s32.totalorder %s13_s12, 4  }
 0x286   :  { %12 = sbr.rel (!%p10_p4) target bundleno = 1 (0x1), region = 67 }

// kernel: unet_forward.19
= control target key start
LH: loop header
LB: loop body
LE: loop exit
PB: predicated region body
PF: predicated region fallthrough
CT: control target
= control target key end

     0   :  { %s5589_s0 = inlined_call_operand.vmem [shape: bf16[2,32,512], index: 0, kind: input, shape index: {}]   ;;  %s5590_s1 = inlined_call_operand.vmem [shape: bf16[3,512,256], index: 1, kind: input, shape index: {}]   ;;  %s5591_s2 = inlined_call_operand.vmem [shape: bf16[3,256,256], index: 2, kind: input, shape index: {}]   ;;  %s5592_s3 = inlined_call_operand.vmem [shape: f32[256,32], index: 3, kind: input, shape index: {}]   ;;  %s5593_s4 = inlined_call_operand.<no memory space> [shape: f32[1,1], index: 4, kind: input, shape index: {}]   ;;  %s5594_s5 = inlined_call_operand.hbm [shape: f32[2,32,32], index: 5, kind: output, shape index: {}]  }
   0x1   :  { %v10_v0 = vstv %s5593_s4 }
   0x2   :  { %11 = vst [vmem:[#allocation4] sm:$0x1] %v10_v0 }
   0x3   :  { %12 = vsyncpa [#allocation6], 0 }
   0x4   :  { %14 = vsyncpa [#allocation6 + $0x1], 0  ;;  %s4371_s20 = smov 0   ;;  %s4373_s21 = smov 0  }
   0x5   :  { %s4375_s22 = smov 0   ;;  %s4377_s23 = smov 0  }
   0x6 LB: > { %s4392_s4 = sadd.s32 4294967295, %s4331_s23   ;;  %s3143_s24 = sadd.s32 4294967294, %s4331_s23   ;;  %s4331_s23 = sphi %s4377_s23, %s5600_s23   ;;  %s4327_s22 = sphi %s4375_s22, %s5599_s22   ;;  %s4323_s21 = sphi %s4373_s21, %s5598_s21   ;;  %s4319_s20 = sphi %s4371_s20, %s5597_s20  }
   0x7   : > { %s4396_s25 = sadd.s32 1, %s4331_s23   ;;  %s137_s26 = sadd.s32 1, %s4327_s22 }
   0x8   : > { %s134_s27 = ssub.s32 %s4331_s23, %s4396_s25  ;;  %p147_p0 = scmp.ne.s32.totalorder %s4327_s22, %s4323_s21 }
   0x9   : > { %p135_p1 = scmp.eq.s32.totalorder %s134_s27, 0  ;;  %p148_p2 = scmp.eq.s32.totalorder %s4392_s4, 1 }
   0xa   : > { %p153_p3 = scmp.ne.s32.totalorder %s4323_s21, %s4319_s20  ;;  %p154_p4 = scmp.eq.s32.totalorder %s3143_s24, 1 }
   0xb   : > { %s4407_s28 = scalar_select %p135_p1, %s4327_s22, %s137_s26  }
   0xc   : > { %p4409_p5 = por %p148_p2, %p147_p0  ;;  %p4413_p6 = por %p154_p4, %p153_p3 }
   0xd   : > { %p3146_p7 = scmp.ge.s32.totalorder %s4331_s23, 1  ;;  %p192_p8 = scmp.lt.s32.totalorder %s4331_s23, 3 }
   0xf   : > { %p193_p9 = pnand %p3146_p7, %p192_p8 }
  0x10   : > { %v3818_v1 = vld [vmem:[%s5590_s1 + $0x304] ss:$8 sps:$4 sm:$0xff] (!%p193_p9)   ;;  %v249_v2 = vlaneseq (!%p193_p9)  ;;  %v3820_v3 = vld [vmem:[%s5590_s1 + $0x300] ss:$8 sps:$4 sm:$0xff] (!%p193_p9)   ;;  %v3821_v4 = vld [vmem:[%s5590_s1 + $0x314] ss:$8 sps:$4 sm:$0xff] (!%p193_p9)  }
  0x11   : > { %196 = sbr.rel (%p193_p9) target bundleno = 1189 (0x4a5), region = 40  ;;  %974 = vmatprep.subr.bf16.mxu0 (!%p193_p9), %v3818_v1  ;;  %v3823_v5 = vld [vmem:[%s5590_s1 + $0x310] ss:$8 sps:$4 sm:$0xff] (!%p193_p9)   ;;  %v3824_v6 = vld [vmem:[%s5590_s1 + $0x324] ss:$8 sps:$4 sm:$0xff] (!%p193_p9)   ;;  %v4333_v7 = vmov (!%p193_p9), 0.0  }
  0x12   : > { %975 = vmatpush1.bf16.msra.mxu0 (!%p193_p9), %v3820_v3  ;;  %vm251_vm0 = vcmp.lt.s32.totalorder (!%p193_p9), %v249_v2, 512  ;;  %v3826_v8 = vld [vmem:[%s5590_s1 + $0x320] ss:$8 sps:$4 sm:$0xff] (!%p193_p9)   ;;  %p220_p10 = scmp.lt.s32.totalorder (!%p193_p9), %s4392_s4, 1  ;;  %v3827_v9 = vld [vmem:[%s5590_s1 + $0x334] ss:$8 sps:$4 sm:$0xff] (!%p193_p9)  }
  0x13   : > { %976 = vmatprep.subr.bf16.mxu0 (!%p193_p9), %v3821_v4  ;;  %253 = vst.msk [vmem:[#allocation2] ss:$8 sm:$0xf] (!%p193_p9), %vm251_vm0, %v4333_v7  ;;  %256 = vst.msk [vmem:[#allocation2 + $0x81] ss:$8 sm:$0xf] (!%p193_p9), %vm251_vm0, %v4333_v7 }
  0x14   : > { %v3829_v10 = vld [vmem:[%s5590_s1 + $0x330] ss:$8 sps:$4 sm:$0xff] (!%p193_p9)   ;;  %v3830_v11 = vld [vmem:[%s5590_s1 + $0x344] ss:$8 sps:$4 sm:$0xff] (!%p193_p9)   ;;  %v3832_v12 = vld [vmem:[%s5590_s1 + $0x340] ss:$8 sps:$4 sm:$0xff] (!%p193_p9)  }
  0x15   : > { %v3833_v13 = vld [vmem:[%s5590_s1 + $0x354] ss:$8 sps:$4 sm:$0xff] (!%p193_p9)   ;;  %v3835_v14 = vld [vmem:[%s5590_s1 + $0x350] ss:$8 sps:$4 sm:$0xff] (!%p193_p9)   ;;  %v3836_v15 = vld [vmem:[%s5590_s1 + $0x364] ss:$8 sps:$4 sm:$0xff] (!%p193_p9)  }
  0x16   : > { %977 = vmatpush1.bf16.msra.mxu0 (!%p193_p9), %v3823_v5  ;;  %vm274_vm1 = vcmask (!%p193_p9), 1040384   ;;  %v3838_v24 = vld [vmem:[%s5590_s1 + $0x360] ss:$8 sps:$4 sm:$0xff] (!%p193_p9)   ;;  %v3839_v25 = vld [vmem:[%s5590_s1 + $0x374] ss:$8 sps:$4 sm:$0xff] (!%p193_p9)   ;;  %vm1546_vm3 = vcmask (!%p193_p9), 1046528  }
  0x17   : > { %978 = vmatprep.subr.bf16.mxu0 (!%p193_p9), %v3824_v6  ;;  %v3841_v40 = vld [vmem:[%s5590_s1 + $0x370] ss:$8 sps:$4 sm:$0xff] (!%p193_p9)   ;;  %v3842_v45 = vld [vmem:[%s5590_s1 + $0x384] ss:$8 sps:$4 sm:$0xff] (!%p193_p9)   ;;  %v3844_v47 = vld [vmem:[%s5590_s1 + $0x380] ss:$8 sps:$4 sm:$0xff] (!%p193_p9)  }
  0x18   : > { %s221_s27 = scalar_select %p220_p10, %s4392_s4, 1  ;;  %v3845_v48 = vld [vmem:[%s5590_s1 + $0x394] ss:$8 sps:$4 sm:$0xff]   ;;  %v3847_v52 = vld [vmem:[%s5590_s1 + $0x390] ss:$8 sps:$4 sm:$0xff]   ;;  %vm2017_vm4 = vcmp.lt.s32.totalorder %v249_v2, 256 }
  0x19   : > { %v3848_v53 = vld [vmem:[%s5590_s1 + $0x3a4] ss:$8 sps:$4 sm:$0xff]   ;;  %v3850_v58 = vld [vmem:[%s5590_s1 + $0x3a0] ss:$8 sps:$4 sm:$0xff]   ;;  %vm512_vm2 = vsmask.f32 7424 }
  0x1a   : > { %979 = vmatpush1.bf16.msra.mxu0 %v3826_v8  ;;  %s3640_s10 = sshll.u32 %s221_s27, 6  ;;  %v3851_v59 = vld [vmem:[%s5590_s1 + $0x3b4] ss:$8 sps:$4 sm:$0xff]   ;;  %v3853_v62 = vld [vmem:[%s5590_s1 + $0x3b0] ss:$8 sps:$4 sm:$0xff]   ;;  %s217_s7 = sand.u32 1, %s4323_s21  }
  0x1b   : > { %980 = vmatprep.subr.bf16.mxu0 %v3827_v9  ;;  %s4460_s15 = scalar_lea.vmem %s5589_s0, %s3640_s10  ;;  %v3854_v63 = vld [vmem:[%s5590_s1 + $0x3c4] ss:$8 sps:$4 sm:$0xff]   ;;  %v3856_v1 = vld [vmem:[%s5590_s1 + $0x3c0] ss:$8 sps:$4 sm:$0xff]   ;;  %v3857_v6 = vld [vmem:[%s5590_s1 + $0x3d4] ss:$8 sps:$4 sm:$0xff]  }
  0x1c   : > { %v226_v16 = vld [vmem:[%s4460_s15 + $0x8] sm:$0xff]  ;;  %v228_v17 = vld [vmem:[%s4460_s15 + $0x18] sm:$0xff]  ;;  %v225_v4 = vld [vmem:[%s4460_s15] sm:$0xff]  ;;  %2019 = vst.msk [vmem:[#allocation3] ss:$8 sm:$0x3] %vm2017_vm4, %v4333_v7 }
  0x1d   : > { %v230_v18 = vld [vmem:[%s4460_s15 + $0x28] sm:$0xff]  ;;  %v232_v19 = vld [vmem:[%s4460_s15 + $0x38] sm:$0xff]  ;;  %v236_v20 = vunpack.c.h.bf16 %v226_v16  ;;  %v240_v21 = vunpack.c.h.bf16 %v228_v17  ;;  %v235_v22 = vunpack.c.l.bf16 %v226_v16  ;;  %v239_v23 = vunpack.c.l.bf16 %v228_v17  ;;  %v227_v5 = vld [vmem:[%s4460_s15 + $0x10] sm:$0xff]  ;;  %2022 = vst.msk [vmem:[#allocation3 + $0x41] ss:$8 sm:$0x3] %vm2017_vm4, %v4333_v7 }
  0x1e   : > { %981 = vmatpush1.bf16.msra.mxu0 %v3829_v10  ;;  %v244_v26 = vunpack.c.h.bf16 %v230_v18  ;;  %v248_v27 = vunpack.c.h.bf16 %v232_v19  ;;  %v243_v28 = vunpack.c.l.bf16 %v230_v18  ;;  %v247_v29 = vunpack.c.l.bf16 %v232_v19  ;;  %v4145_v2 = vld [vmem:[%s5591_s2 + $0x1d0] ss:$8 sps:$4 sm:$0xff]   ;;  %v4150_v7 = vld [vmem:[%s5591_s2 + $0x1e4] ss:$8 sps:$4 sm:$0xff]   ;;  %s3147_s8 = sshll.u32 %s217_s7, 5  ;;  %s3641_s10 = sshll.u32 %s4392_s4, 9 }
  0x1f   : > { %982 = vmatprep.subr.bf16.mxu0 %v3830_v11  ;;  %v278_v30 = vrot.slane %v236_v20, 7  ;;  %v285_v31 = vrot.slane %v240_v21, 7  ;;  %v277_v32 = vrot.slane %v235_v22, 7  ;;  %v283_v33 = vrot.slane %v239_v23, 7  ;;  %v3860_v20 = vld [vmem:[%s5590_s1 + $0x3e4] ss:$8 sps:$4 sm:$0xff]   ;;  %s5543_s14 = scalar_lea.hbm %s5594_s5, %s3641_s10 }
  0x20   : > { %v293_v34 = vrot.slane %v244_v26, 7  ;;  %v301_v35 = vrot.slane %v248_v27, 7  ;;  %v291_v36 = vrot.slane %v243_v28, 7  ;;  %v299_v37 = vrot.slane %v247_v29, 7  ;;  %s219_s9 = scalar_lea.vmem [#allocation5], %s3147_s8  ;;  %s5548_s16 = scalar_lea.sflag [#allocation6], %s217_s7 }
  0x21   : > { %v4479_v38 = vsel %vm274_vm1, %v278_v30, %v285_v31  ;;  %326 = vst [vmem:[#allocation2 + $0x18] sm:$0xfe] %v278_v30  ;;  %v284_v39 = vsel %vm274_vm1, %v277_v32, %v283_v33  ;;  %325 = vst [vmem:[#allocation2 + $0x10] sm:$0xfe] %v277_v32  ;;  %v233_v8 = vunpack.c.l.bf16 %v225_v4  ;;  %v234_v9 = vunpack.c.h.bf16 %v225_v4  ;;  %v3865_v32 = vld [vmem:[%s5590_s1 + $0x3f0] ss:$8 sps:$4 sm:$0xff]  }
  0x22   : > { %983 = vmatpush1.bf16.msra.mxu0 %v3832_v12  ;;  %v294_v41 = vsel %vm274_vm1, %v285_v31, %v293_v34  ;;  %v302_v42 = vsel %vm274_vm1, %v293_v34, %v301_v35  ;;  %330 = vst [vmem:[#allocation2 + $0x38] sm:$0xff] %v4479_v38  ;;  %342 = vst [vmem:[#allocation2 + $0x98] sm:$0x1] %v301_v35  ;;  %v292_v43 = vsel %vm274_vm1, %v283_v33, %v291_v36  ;;  %vm3062_vm5 = vcmask 261120   ;;  %s3081_s11 = sshll.u32 %s219_s9, 4  ;;  %s4335_s17 = smov [#allocation5]   ;;  %s5545_s11 = int_to_ptr.vmem [resolvable:$true] %s3081_s11 }
  0x23   : > { %984 = vmatprep.subr.bf16.mxu0 %v3833_v13  ;;  %v300_v44 = vsel %vm274_vm1, %v291_v36, %v299_v37  ;;  %329 = vst [vmem:[#allocation2 + $0x30] sm:$0xff] %v284_v39  ;;  %341 = vst [vmem:[#allocation2 + $0x90] sm:$0x1] %v299_v37  ;;  %v4493_v46 = vpack.c.bf16 %v302_v42, %v294_v41  ;;  %v237_v11 = vunpack.c.l.bf16 %v227_v5  ;;  %v238_v12 = vunpack.c.h.bf16 %v227_v5  ;;  %v3859_v13 = vld [vmem:[%s5590_s1 + $0x3d0] ss:$8 sps:$4 sm:$0xff]   ;;  %s4269_s4 = scalar_lea.vmem %s5545_s11, 512 }
  0x24   : > { %v4533_v16 = vpack.c.bf16 %v300_v44, %v292_v43  ;;  %v3868_v36 = vld [vmem:[%s5590_s1 + $0x4] ss:$8 sps:$4 sm:$0xff]   ;;  %v3871_v44 = vld [vmem:[%s5590_s1 + $0x14] ss:$8 sps:$4 sm:$0xff]   ;;  %p4270_p11 = scmp.ne.s32.totalorder %s5545_s11, %s4269_s4  ;;  %s4273_s18 = sshll.u32 %s4335_s17, 4  ;;  %s4274_s18 = int_to_ptr.vmem [resolvable:$false] %s4273_s18 }
  0x25   : > { %v557_v51 = vshll.u32 %v4493_v46, 16  ;;  %v4535_v18 = vrot.slane %v237_v11, 7  ;;  %v281_v19 = vrot.slane %v238_v12, 7  ;;  %v585_v29 = vshrl.u32 %v4493_v46, 16  ;;  %v3883_v11 = vld [vmem:[%s5590_s1 + $0x54] ss:$8 sps:$4 sm:$0xff]   ;;  %p4276_p0 = scmp.lt.s32.totalorder %s5545_s11, %s4274_s18 }
  0x26   : > { %985 = vmatpush1.bf16.msra.mxu0 %v3835_v14  ;;  %v275_v14 = vrot.slane %v233_v8, 7  ;;  %v545_v28 = vshll.u32 %v4533_v16, 16  ;;  %v577_v42 = vshrl.u32 %v4533_v16, 16  ;;  %v3875_v8 = vld [vmem:[%s5590_s1 + $0x30] ss:$8 sps:$4 sm:$0xff]   ;;  %p4271_p12 = pnand %p4270_p11, %p4409_p5  ;;  %s4275_s19 = scalar_lea.vmem %s4274_s18, 1024 }
  0x27   : > { %986 = vmatprep.subr.bf16.mxu0 %v3836_v15  ;;  %v559_v57 = vrot.slane %v557_v51, 1  ;;  %v276_v15 = vrot.slane %v234_v9, 7  ;;  %v229_v51 = vld [vmem:[%s4460_s15 + $0x20] sm:$0xff]  ;;  %v3881_v12 = vld [vmem:[%s5590_s1 + $0x50] ss:$8 sps:$4 sm:$0xff]   ;;  %p4277_p1 = scmp.lt.s32.totalorder %s4275_s19, %s4269_s4 }
  0x28   : > { %v434_v49 = vld [vmem:[#allocation2 + $0x18] sm:$0xfe]  ;;  %v433_v0 = vld [vmem:[#allocation2 + $0x10] sm:$0xfe]  ;;  %323 = vst [vmem:[#allocation2] sm:$0xfe] %v275_v14  ;;  %v4545_v23 = vsel %vm274_vm1, %v275_v14, %v4535_v18  ;;  %p4272_p13 = pneg %p4271_p12 }
  0x29   : > { %v442_v50 = vpack.c.bf16 %v4479_v38, %v434_v49  ;;  %v441_v3 = vpack.c.bf16 %v284_v39, %v433_v0  ;;  %v438_v10 = vld [vmem:[#allocation2 + $0x98] sm:$0x1]  ;;  %324 = vst [vmem:[#allocation2 + $0x8] sm:$0xfe] %v276_v15  ;;  %v4541_v22 = vsel %vm274_vm1, %v276_v15, %v281_v19  ;;  %327 = vst [vmem:[#allocation2 + $0x20] sm:$0xff] %v4545_v23  ;;  %v547_v34 = vrot.slane %v545_v28, 1  ;;  %p4278_p2 = por %p4277_p1, %p4276_p0 }
  0x2a   : > { %987 = vmatpush1.bf16.msra.mxu0 %v3838_v24  ;;  %v446_v21 = vpack.c.bf16 %v438_v10, %v438_v10  ;;  %v3862_v24 = vld [vmem:[%s5590_s1 + $0x3e0] ss:$8 sps:$4 sm:$0xff]   ;;  %v437_v31 = vld [vmem:[#allocation2 + $0x90] sm:$0x1]  ;;  %v587_v37 = vor.u32 %v585_v29, %v559_v57  ;;  %v3880_v9 = vld [vmem:[%s5590_s1 + $0x44] ss:$8 sps:$4 sm:$0xff]  }
  0x2b   : > { %988 = vmatprep.subr.bf16.mxu0 %v3839_v25  ;;  %v550_v54 = vshrl.u32 %v442_v50, 16  ;;  %v552_v55 = vshll.u32 %v442_v50, 16  ;;  %v540_v17 = vshll.u32 %v441_v3, 16  ;;  %v3863_v25 = vld [vmem:[%s5590_s1 + $0x3f4] ss:$8 sps:$4 sm:$0xff]   ;;  %v538_v26 = vshrl.u32 %v441_v3, 16  ;;  %p4279_p3 = pnand %p4278_p2, %p4272_p13 }
  0x2c   : > { %v589_v30 = vshll.u32 %v446_v21, 16  ;;  %v445_v35 = vpack.c.bf16 %v437_v31, %v437_v31  ;;  %v579_v49 = vor.u32 %v577_v42, %v547_v34  ;;  %v3878_v10 = vld [vmem:[%s5590_s1 + $0x40] ss:$8 sps:$4 sm:$0xff]   ;;  %v3889_v15 = vld [vmem:[%s5590_s1 + $0x74] ss:$8 sps:$4 sm:$0xff]  }
  0x2d   : > { %v554_v56 = vrot.slane %v552_v55, 1  ;;  %v542_v27 = vrot.slane %v540_v17, 1  ;;  %v3884_v14 = vld [vmem:[%s5590_s1 + $0x60] ss:$8 sps:$4 sm:$0xff]   ;;  %v3887_v17 = vld [vmem:[%s5590_s1 + $0x70] ss:$8 sps:$4 sm:$0xff]  }
  0x2e   : > { %989 = vmatpush1.bf16.msra.mxu0 %v3841_v40  ;;  %v591_v39 = vrot.slane %v589_v30, 1  ;;  %v3866_v40 = vld [vmem:[%s5590_s1] ss:$8 sps:$4 sm:$0xff]   ;;  %v581_v43 = vshll.u32 %v445_v35, 16  ;;  %v3893_v21 = vld [vmem:[%s5590_s1 + $0x90] ss:$8 sps:$4 sm:$0xff]  }
  0x2f   : > { %990 = vmatprep.subr.bf16.mxu0 %v3842_v45  ;;  %v555_v60 = vor.u32 %v554_v56, %v550_v54  ;;  %v543_v33 = vor.u32 %v542_v27, %v538_v26  ;;  %v242_v54 = vunpack.c.h.bf16 %v229_v51  ;;  %v241_v56 = vunpack.c.l.bf16 %v229_v51  ;;  %v3901_v26 = vld [vmem:[%s5590_s1 + $0xb4] ss:$8 sps:$4 sm:$0xff]   ;;  %v3899_v27 = vld [vmem:[%s5590_s1 + $0xb0] ss:$8 sps:$4 sm:$0xff]   ;;  %v3904_v28 = vld [vmem:[%s5590_s1 + $0xc4] ss:$8 sps:$4 sm:$0xff]  }
  0x30   : > { %v592_v45 = vsel %vm512_vm2, %v587_v37, %v591_v39  ;;  %v583_v50 = vrot.slane %v581_v43, 1  ;;  %v3902_v29 = vld [vmem:[%s5590_s1 + $0xc0] ss:$8 sps:$4 sm:$0xff]   ;;  %v3907_v30 = vld [vmem:[%s5590_s1 + $0xd4] ss:$8 sps:$4 sm:$0xff]  }
  0x31   : > { %v560_v61 = vsel %vm512_vm2, %v555_v60, %v559_v57  ;;  %v548_v41 = vsel %vm512_vm2, %v543_v33, %v547_v34  ;;  %v287_v60 = vrot.slane %v241_v56, 7  ;;  %v3905_v31 = vld [vmem:[%s5590_s1 + $0xd0] ss:$8 sps:$4 sm:$0xff]   ;;  %v3908_v33 = vld [vmem:[%s5590_s1 + $0xe0] ss:$8 sps:$4 sm:$0xff]  }
  0x32   : > { %991 = vmatpush1.bf16.msra.mxu0 %v3844_v47  ;;  %1006 = vmatprep.mubr.bf16.mxu0 %v560_v61  ;;  %v3869_v47 = vld [vmem:[%s5590_s1 + $0x10] ss:$8 sps:$4 sm:$0xff]   ;;  %v3913_v34 = vld [vmem:[%s5590_s1 + $0xf4] ss:$8 sps:$4 sm:$0xff]   ;;  %v3916_v37 = vld [vmem:[%s5590_s1 + $0x104] ss:$8 sps:$4 sm:$0xff]  }
  0x33   : > { %992 = vmatprep.subr.bf16.mxu0 %v3845_v48  ;;  %v3874_v48 = vld [vmem:[%s5590_s1 + $0x24] ss:$8 sps:$4 sm:$0xff]   ;;  %v4595_v5 = vsel %vm274_vm1, %v4535_v18, %v287_v60  ;;  %v3911_v35 = vld [vmem:[%s5590_s1 + $0xf0] ss:$8 sps:$4 sm:$0xff]   ;;  %v3914_v42 = vld [vmem:[%s5590_s1 + $0x100] ss:$8 sps:$4 sm:$0xff]  }
  0x34   : > { %v3892_v18 = vld [vmem:[%s5590_s1 + $0x84] ss:$8 sps:$4 sm:$0xff]  }
  0x35   : > { %v4010_v39 = vld [vmem:[%s5590_s1 + $0x204] ss:$8 sps:$4 sm:$0xff]  }
  0x36   : > { %993 = vmatpush1.bf16.msra.mxu0 %v3847_v52  ;;  %v231_v52 = vld [vmem:[%s4460_s15 + $0x30] sm:$0xff]  ;;  %921 = vmatprep.subr.bf16.mxu1 %v4010_v39  ;;  %v4022_v51 = vld [vmem:[%s5590_s1 + $0x224] ss:$8 sps:$4 sm:$0xff]  }
  0x37   : > { %994 = vmatprep.subr.bf16.mxu0 %v3848_v53  ;;  %v344_v53 = vld [vmem:[#allocation2 + $0x8] sm:$0xff]  ;;  %v246_v55 = vunpack.c.h.bf16 %v231_v52  ;;  %v245_v57 = vunpack.c.l.bf16 %v231_v52  ;;  %v4090_v39 = vld [vmem:[%s5590_s1 + $0x2d0] ss:$8 sps:$4 sm:$0xff]  }
  0x38   : > { %v360_v0 = vpack.c.bf16 %v4541_v22, %v344_v53  ;;  %v4024_v53 = vld [vmem:[%s5590_s1 + $0x220] ss:$8 sps:$4 sm:$0xff]  }
  0x39   : > { %v295_v61 = vrot.slane %v245_v57, 7  ;;  %v4028_v57 = vld [vmem:[%s5590_s1 + $0x234] ss:$8 sps:$4 sm:$0xff]  }
  0x3a   : > { %995 = vmatpush1.bf16.msra.mxu0 %v3850_v58  ;;  %v289_v58 = vrot.slane %v242_v54, 7  ;;  %v3920_v54 = vld [vmem:[%s5590_s1 + $0x120] ss:$8 sps:$4 sm:$0xff]  }
  0x3b   : > { %996 = vmatprep.subr.bf16.mxu0 %v3851_v59  ;;  %v297_v59 = vrot.slane %v246_v55, 7  ;;  %339 = vst [vmem:[#allocation2 + $0x80] sm:$0x1] %v295_v61  ;;  %v3925_v55 = vld [vmem:[%s5590_s1 + $0x134] ss:$8 sps:$4 sm:$0xff]  }
  0x3c   : > { %v4588_v3 = vsel %vm274_vm1, %v281_v19, %v289_v58  ;;  %v3890_v19 = vld [vmem:[%s5590_s1 + $0x80] ss:$8 sps:$4 sm:$0xff]  }
  0x3d   : > { %v4591_v4 = vsel %vm274_vm1, %v289_v58, %v297_v59  ;;  %340 = vst [vmem:[#allocation2 + $0x88] sm:$0x1] %v297_v59  ;;  %v4030_v58 = vld [vmem:[%s5590_s1 + $0x230] ss:$8 sps:$4 sm:$0xff]  }
  0x3e   : > { %997 = vmatpush1.bf16.msra.mxu0 %v3853_v62  ;;  %v3872_v62 = vld [vmem:[%s5590_s1 + $0x20] ss:$8 sps:$4 sm:$0xff]   ;;  %v4690_v43 = vpack.c.bf16 %v4591_v4, %v4588_v3  ;;  %v3923_v59 = vld [vmem:[%s5590_s1 + $0x130] ss:$8 sps:$4 sm:$0xff]   ;;  %v3934_v4 = vld [vmem:[%s5590_s1 + $0x164] ss:$8 sps:$4 sm:$0xff]  }
  0x3f   : > { %998 = vmatprep.subr.bf16.mxu0 %v3854_v63  ;;  %v584_v63 = vsel %vm512_vm2, %v579_v49, %v583_v50  ;;  %v3922_v49 = vld [vmem:[%s5590_s1 + $0x124] ss:$8 sps:$4 sm:$0xff]   ;;  %v346_v50 = vld [vmem:[#allocation2 + $0x18] sm:$0xff] }
  0x40   : > { %v362_v56 = vpack.c.bf16 %v4479_v38, %v346_v50  ;;  %v3928_v38 = vld [vmem:[%s5590_s1 + $0x144] ss:$8 sps:$4 sm:$0xff]   ;;  %v3929_v3 = vld [vmem:[%s5590_s1 + $0x150] ss:$8 sps:$4 sm:$0xff]   ;;  %v3956_v50 = vld [vmem:[%s5590_s1 + $0x1e0] ss:$8 sps:$4 sm:$0xff]  }
  0x42   : > { %999 = vmatpush1.bf16.msra.mxu0 %v3856_v1  ;;  %v3877_v1 = vld [vmem:[%s5590_s1 + $0x34] ss:$8 sps:$4 sm:$0xff]  }
  0x43   : > { %1000 = vmatprep.subr.bf16.mxu0 %v3857_v6  ;;  %v4598_v6 = vsel %vm274_vm1, %v287_v60, %v295_v61  ;;  %v4034_v60 = vld [vmem:[%s5590_s1 + $0x244] ss:$8 sps:$4 sm:$0xff]   ;;  %v4036_v61 = vld [vmem:[%s5590_s1 + $0x240] ss:$8 sps:$4 sm:$0xff]  }
  0x44   : > { %v4713_v52 = vpack.c.bf16 %v4598_v6, %v4595_v5  ;;  %v4046_v5 = vld [vmem:[%s5590_s1 + $0x264] ss:$8 sps:$4 sm:$0xff]   ;;  %v4048_v6 = vld [vmem:[%s5590_s1 + $0x260] ss:$8 sps:$4 sm:$0xff]  }
  0x46   : > { %1001 = vmatpush1.bf16.msra.mxu0 %v3859_v13  ;;  %v3886_v13 = vld [vmem:[%s5590_s1 + $0x64] ss:$8 sps:$4 sm:$0xff]  }
  0x47   : > { %1002 = vmatprep.subr.bf16.mxu0 %v3860_v20  ;;  %v3895_v20 = vld [vmem:[%s5590_s1 + $0x94] ss:$8 sps:$4 sm:$0xff]  }
  0x4a   : > { %1003 = vmatpush1.bf16.msra.mxu0 %v3862_v24  ;;  %v3898_v24 = vld [vmem:[%s5590_s1 + $0xa4] ss:$8 sps:$4 sm:$0xff]  }
  0x4b   : > { %1004 = vmatprep.subr.bf16.mxu0 %v3863_v25  ;;  %v3896_v25 = vld [vmem:[%s5590_s1 + $0xa0] ss:$8 sps:$4 sm:$0xff]  }
  0x4e   : > { %1005 = vmatpush1.bf16.msra.mxu0 %v3865_v32  ;;  %v3910_v32 = vld [vmem:[%s5590_s1 + $0xe4] ss:$8 sps:$4 sm:$0xff]  }
  0x4f   : > { %1347 = vmatprep.subr.bf16.mxu0 %v3868_v36  ;;  %v343_v36 = vld [vmem:[#allocation2] sm:$0xff] }
  0x51   : > { %1007 = vmatmul.mubr.bf16.vlgmr.msra.gmra.mrb[0].mxu0 %v548_v41  ;;  %v4012_v41 = vld [vmem:[%s5590_s1 + $0x200] ss:$8 sps:$4 sm:$0xff]  }
  0x52   : > { %1348 = vmatpush1.bf16.msra.mxu0 %v3866_v40  ;;  %1016 = vmatprep.mubr.bf16.mxu0 %v592_v45  ;;  %v359_v40 = vpack.c.bf16 %v4545_v23, %v343_v36  ;;  %v4016_v45 = vld [vmem:[%s5590_s1 + $0x214] ss:$8 sps:$4 sm:$0xff]  }
  0x53   : > { %1349 = vmatprep.subr.bf16.mxu0 %v3871_v44  ;;  %v3919_v44 = vld [vmem:[%s5590_s1 + $0x114] ss:$8 sps:$4 sm:$0xff]   ;;  %922 = vmatpush1.bf16.msra.mxu1 %v4012_v41  ;;  %v3958_v41 = vld [vmem:[%s5590_s1 + $0x1e4] ss:$8 sps:$4 sm:$0xff]  }
  0x54   : > { %923 = vmatprep.subr.bf16.mxu1 %v4016_v45  ;;  %v3955_v36 = vld [vmem:[%s5590_s1 + $0x1d4] ss:$8 sps:$4 sm:$0xff]  }
  0x56   : > { %1350 = vmatpush1.bf16.msra.mxu0 %v3869_v47  ;;  %v3917_v47 = vld [vmem:[%s5590_s1 + $0x110] ss:$8 sps:$4 sm:$0xff]  }
  0x57   : > { %1351 = vmatprep.subr.bf16.mxu0 %v3874_v48  ;;  %v4018_v48 = vld [vmem:[%s5590_s1 + $0x210] ss:$8 sps:$4 sm:$0xff]  }
  0x58   : > { %924 = vmatpush1.bf16.msra.mxu1 %v4018_v48  ;;  %v4096_v48 = vld [vmem:[%s5590_s1 + $0x2e0] ss:$8 sps:$4 sm:$0xff]  }
  0x59   : > { %1017 = vmatmul.mubr.bf16.gmra.mrb[4].mxu0 %v584_v63  ;;  %925 = vmatprep.subr.bf16.mxu1 %v4022_v51  ;;  %v3931_v63 = vld [vmem:[%s5590_s1 + $0x154] ss:$8 sps:$4 sm:$0xff]  }
  0x5a   : > { %1352 = vmatpush1.bf16.msra.mxu0 %v3872_v62  ;;  %1379 = vmatprep.mubr.bf16.mxu0 %v360_v0  ;;  %v3926_v62 = vld [vmem:[%s5590_s1 + $0x140] ss:$8 sps:$4 sm:$0xff]   ;;  %v4040_v0 = vld [vmem:[%s5590_s1 + $0x254] ss:$8 sps:$4 sm:$0xff]  }
  0x5b   : > { %1353 = vmatprep.subr.bf16.mxu0 %v3877_v1  ;;  %v4042_v1 = vld [vmem:[%s5590_s1 + $0x250] ss:$8 sps:$4 sm:$0xff]  }
  0x5c   : > { %926 = vmatpush1.bf16.msra.mxu1 %v4024_v53  ;;  %v3961_v53 = vld [vmem:[%s5590_s1 + $0x1f4] ss:$8 sps:$4 sm:$0xff]  }
  0x5d   : > { %927 = vmatprep.subr.bf16.mxu1 %v4028_v57 }
  0x5e   : > { %1354 = vmatpush1.bf16.msra.mxu0 %v3875_v8  ;;  %v3932_v8 = vld [vmem:[%s5590_s1 + $0x160] ss:$8 sps:$4 sm:$0xff]  }
  0x5f   : > { %1355 = vmatprep.subr.bf16.mxu0 %v3880_v9  ;;  %v3937_v9 = vld [vmem:[%s5590_s1 + $0x174] ss:$8 sps:$4 sm:$0xff]  }
  0x60   : > { %928 = vmatpush1.bf16.msra.mxu1 %v4030_v58  ;;  %v4102_v58 = vld [vmem:[%s5590_s1 + $0x2f0] ss:$8 sps:$4 sm:$0xff]  }
  0x61   : > { %929 = vmatprep.subr.bf16.mxu1 %v4034_v60  ;;  %v521_v60 = vshll.u32 %v4713_v52, 16 }
  0x62   : > { %1356 = vmatpush1.bf16.msra.mxu0 %v3878_v10  ;;  %v4052_v10 = vld [vmem:[%s5590_s1 + $0x274] ss:$8 sps:$4 sm:$0xff]  }
  0x63   : > { %1357 = vmatprep.subr.bf16.mxu0 %v3883_v11  ;;  %v4054_v11 = vld [vmem:[%s5590_s1 + $0x270] ss:$8 sps:$4 sm:$0xff]  }
  0x64   : > { %930 = vmatpush1.bf16.msra.mxu1 %v4036_v61  ;;  %v3959_v61 = vld [vmem:[%s5590_s1 + $0x1f0] ss:$8 sps:$4 sm:$0xff]  }
  0x65   : > { %931 = vmatprep.subr.bf16.mxu1 %v4040_v0 }
  0x66   : > { %1358 = vmatpush1.bf16.msra.mxu0 %v3881_v12  ;;  %v3935_v12 = vld [vmem:[%s5590_s1 + $0x170] ss:$8 sps:$4 sm:$0xff]  }
  0x67   : > { %1359 = vmatprep.subr.bf16.mxu0 %v3886_v13  ;;  %v3940_v13 = vld [vmem:[%s5590_s1 + $0x184] ss:$8 sps:$4 sm:$0xff]  }
  0x68   : > { %932 = vmatpush1.bf16.msra.mxu1 %v4042_v1  ;;  %v3964_v1 = vld [vmem:[%s5590_s1 + $0x404] ss:$8 sps:$4 sm:$0xff]  }
  0x69   : > { %933 = vmatprep.subr.bf16.mxu1 %v4046_v5  ;;  %v1454_v5 = vld [vmem:[#allocation2 + $0x8] sm:$0xfc] }
  0x6a   : > { %1360 = vmatpush1.bf16.msra.mxu0 %v3884_v14  ;;  %v4058_v14 = vld [vmem:[%s5590_s1 + $0x284] ss:$8 sps:$4 sm:$0xff]  }
  0x6b   : > { %1361 = vmatprep.subr.bf16.mxu0 %v3889_v15  ;;  %v4060_v15 = vld [vmem:[%s5590_s1 + $0x280] ss:$8 sps:$4 sm:$0xff]  }
  0x6c   : > { %934 = vmatpush1.bf16.msra.mxu1 %v4048_v6 }
  0x6d   : > { %935 = vmatprep.subr.bf16.mxu1 %v4052_v10 }
  0x6e   : > { %1362 = vmatpush1.bf16.msra.mxu0 %v3887_v17  ;;  %v3938_v17 = vld [vmem:[%s5590_s1 + $0x180] ss:$8 sps:$4 sm:$0xff]  }
  0x6f   : > { %1363 = vmatprep.subr.bf16.mxu0 %v3892_v18  ;;  %v3943_v18 = vld [vmem:[%s5590_s1 + $0x194] ss:$8 sps:$4 sm:$0xff]  }
  0x70   : > { %936 = vmatpush1.bf16.msra.mxu1 %v4054_v11  ;;  %v436_v11 = vld [vmem:[#allocation2 + $0x88] sm:$0x1] }
  0x71   : > { %937 = vmatprep.subr.bf16.mxu1 %v4058_v14  ;;  %v435_v14 = vld [vmem:[#allocation2 + $0x80] sm:$0x1] }
  0x72   : > { %1364 = vmatpush1.bf16.msra.mxu0 %v3890_v19  ;;  %v4064_v19 = vld [vmem:[%s5590_s1 + $0x294] ss:$8 sps:$4 sm:$0xff]  }
  0x73   : > { %1365 = vmatprep.subr.bf16.mxu0 %v3895_v20  ;;  %v4066_v20 = vld [vmem:[%s5590_s1 + $0x290] ss:$8 sps:$4 sm:$0xff]  }
  0x74   : > { %938 = vmatpush1.bf16.msra.mxu1 %v4060_v15  ;;  %v3967_v15 = vld [vmem:[%s5590_s1 + $0x414] ss:$8 sps:$4 sm:$0xff]  }
  0x75   : > { %939 = vmatprep.subr.bf16.mxu1 %v4064_v19  ;;  %v569_v19 = vshrl.u32 %v4690_v43, 16 }
  0x76   : > { %1366 = vmatpush1.bf16.msra.mxu0 %v3893_v21  ;;  %v3941_v21 = vld [vmem:[%s5590_s1 + $0x190] ss:$8 sps:$4 sm:$0xff]  }
  0x77   : > { %1367 = vmatprep.subr.bf16.mxu0 %v3898_v24  ;;  %v3946_v24 = vld [vmem:[%s5590_s1 + $0x1a4] ss:$8 sps:$4 sm:$0xff]  }
  0x78   : > { %940 = vmatpush1.bf16.msra.mxu1 %v4066_v20 }
  0x7a   : > { %1368 = vmatpush1.bf16.msra.mxu0 %v3896_v25  ;;  %v4070_v25 = vld [vmem:[%s5590_s1 + $0x2a4] ss:$8 sps:$4 sm:$0xff]  }
  0x7b   : > { %1369 = vmatprep.subr.bf16.mxu0 %v3901_v26  ;;  %941 = vmatprep.subr.bf16.mxu1 %v4070_v25  ;;  %v4072_v26 = vld [vmem:[%s5590_s1 + $0x2a0] ss:$8 sps:$4 sm:$0xff]   ;;  %v3965_v25 = vld [vmem:[%s5590_s1 + $0x410] ss:$8 sps:$4 sm:$0xff]  }
  0x7c   : > { %942 = vmatpush1.bf16.msra.mxu1 %v4072_v26 }
  0x7e   : > { %1370 = vmatpush1.bf16.msra.mxu0 %v3899_v27  ;;  %v3944_v27 = vld [vmem:[%s5590_s1 + $0x1a0] ss:$8 sps:$4 sm:$0xff]  }
  0x7f   : > { %1371 = vmatprep.subr.bf16.mxu0 %v3904_v28  ;;  %v3949_v28 = vld [vmem:[%s5590_s1 + $0x1b4] ss:$8 sps:$4 sm:$0xff]  }
  0x82   : > { %1372 = vmatpush1.bf16.msra.mxu0 %v3902_v29  ;;  %v4076_v29 = vld [vmem:[%s5590_s1 + $0x2b4] ss:$8 sps:$4 sm:$0xff]  }
  0x83   : > { %1373 = vmatprep.subr.bf16.mxu0 %v3907_v30  ;;  %943 = vmatprep.subr.bf16.mxu1 %v4076_v29  ;;  %v4078_v30 = vld [vmem:[%s5590_s1 + $0x2b0] ss:$8 sps:$4 sm:$0xff]   ;;  %v1551_v29 = vrot.slane %v4690_v43, 1 }
  0x84   : > { %944 = vmatpush1.bf16.msra.mxu1 %v4078_v30 }
  0x86   : > { %1374 = vmatpush1.bf16.msra.mxu0 %v3905_v31  ;;  %v3947_v31 = vld [vmem:[%s5590_s1 + $0x1b0] ss:$8 sps:$4 sm:$0xff]  }
  0x87   : > { %1375 = vmatprep.subr.bf16.mxu0 %v3910_v32  ;;  %v3952_v32 = vld [vmem:[%s5590_s1 + $0x1c4] ss:$8 sps:$4 sm:$0xff]  }
  0x8a   : > { %1376 = vmatpush1.bf16.msra.mxu0 %v3908_v33  ;;  %v4082_v33 = vld [vmem:[%s5590_s1 + $0x2c4] ss:$8 sps:$4 sm:$0xff]  }
  0x8b   : > { %1377 = vmatprep.subr.bf16.mxu0 %v3913_v34  ;;  %945 = vmatprep.subr.bf16.mxu1 %v4082_v33  ;;  %v4084_v34 = vld [vmem:[%s5590_s1 + $0x2c0] ss:$8 sps:$4 sm:$0xff]  }
  0x8c   : > { %946 = vmatpush1.bf16.msra.mxu1 %v4084_v34  ;;  %v3968_v34 = vld [vmem:[%s5590_s1 + $0x420] ss:$8 sps:$4 sm:$0xff]  }
  0x8e   : > { %1378 = vmatpush1.bf16.msra.mxu0 %v3911_v35  ;;  %v3950_v35 = vld [vmem:[%s5590_s1 + $0x1c0] ss:$8 sps:$4 sm:$0xff]  }
  0x8f   : > { %1400 = vmatprep.subr.bf16.mxu0 %v3916_v37  ;;  %v4088_v37 = vld [vmem:[%s5590_s1 + $0x2d4] ss:$8 sps:$4 sm:$0xff]  }
  0x90   : > { %947 = vmatprep.subr.bf16.mxu1 %v4088_v37  ;;  %v4106_v37 = vld [vmem:[%s5591_s2 + $0x100] ss:$8 sps:$4 sm:$0xff]  }
  0x91   : > { %1380 = vmatmul.mubr.bf16.vlgmr.msra.gmra.mrb[0].mxu0 %v359_v40  ;;  %v3953_v40 = vld [vmem:[%s5590_s1 + $0x1d0] ss:$8 sps:$4 sm:$0xff]   ;;  %948 = vmatpush1.bf16.msra.mxu1 %v4090_v39  ;;  %v4108_v39 = vld [vmem:[%s5591_s2 + $0x104] ss:$8 sps:$4 sm:$0xff]  }
  0x92   : > { %1401 = vmatpush1.bf16.msra.mxu0 %v3914_v42  ;;  %1389 = vmatprep.mubr.bf16.mxu0 %v4690_v43  ;;  %v4094_v42 = vld [vmem:[%s5590_s1 + $0x2e4] ss:$8 sps:$4 sm:$0xff]  }
  0x93   : > { %1402 = vmatprep.subr.bf16.mxu0 %v3919_v44  ;;  %v432_v44 = vld [vmem:[#allocation2 + $0x8] sm:$0xfe]  ;;  %949 = vmatprep.subr.bf16.mxu1 %v4094_v42 }
  0x94   : > { %v440_v45 = vpack.c.bf16 %v4541_v22, %v432_v44  ;;  %v3976_v42 = vld [vmem:[%s5590_s1 + $0x444] ss:$8 sps:$4 sm:$0xff]   ;;  %v4109_v44 = vld [vmem:[%s5591_s2 + $0x110] ss:$8 sps:$4 sm:$0xff]  }
  0x95   : > { %950 = vmatpush1.bf16.msra.mxu1 %v4096_v48  ;;  %v3979_v48 = vld [vmem:[%s5590_s1 + $0x454] ss:$8 sps:$4 sm:$0xff]  }
  0x96   : > { %1403 = vmatpush1.bf16.msra.mxu0 %v3917_v47  ;;  %v431_v47 = vld [vmem:[#allocation2] sm:$0xfe]  ;;  %v528_v51 = vshll.u32 %v440_v45, 16 }
  0x97   : > { %1404 = vmatprep.subr.bf16.mxu0 %v3922_v49  ;;  %v439_v49 = vpack.c.bf16 %v4545_v23, %v431_v47  ;;  %v533_v23 = vshll.u32 %v4690_v43, 16  ;;  %v3974_v47 = vld [vmem:[%s5590_s1 + $0x440] ss:$8 sps:$4 sm:$0xff]   ;;  %v1557_v43 = vrot.slane %v4493_v46, 1 }
  0x98   : > { %v530_v57 = vrot.slane %v528_v51, 1  ;;  %v3977_v51 = vld [vmem:[%s5590_s1 + $0x450] ss:$8 sps:$4 sm:$0xff]  }
  0x99   : > { %1390 = vmatmul.mubr.bf16.gmra.mrb[4].mxu0 %v4713_v52  ;;  %v535_v0 = vrot.slane %v533_v23, 1  ;;  %v4118_v23 = vld [vmem:[%s5591_s2 + $0x140] ss:$8 sps:$4 sm:$0xff]  }
  0x9a   : > { %1405 = vmatpush1.bf16.msra.mxu0 %v3920_v54  ;;  %1432 = vmatprep.mubr.bf16.mxu0 %v362_v56  ;;  %v4100_v54 = vld [vmem:[%s5590_s1 + $0x2f4] ss:$8 sps:$4 sm:$0xff]   ;;  %v526_v56 = vshrl.u32 %v440_v45, 16  ;;  %v4114_v45 = vld [vmem:[%s5591_s2 + $0x124] ss:$8 sps:$4 sm:$0xff]  }
  0x9b   : > { %1406 = vmatprep.subr.bf16.mxu0 %v3925_v55  ;;  %v516_v55 = vshll.u32 %v439_v49, 16  ;;  %951 = vmatprep.subr.bf16.mxu1 %v4100_v54  ;;  %v571_v26 = vor.u32 %v569_v19, %v535_v0  ;;  %v4115_v54 = vld [vmem:[%s5591_s2 + $0x130] ss:$8 sps:$4 sm:$0xff]  }
  0x9c   : > { %952 = vmatpush1.bf16.msra.mxu1 %v4102_v58  ;;  %v4123_v58 = vld [vmem:[%s5591_s2 + $0x154] ss:$8 sps:$4 sm:$0xff]  }
  0x9d   : > { %2355 = vmatprep.subr.bf16.mxu1 %v4108_v39 }
  0x9e   : > { %1407 = vmatpush1.bf16.msra.mxu0 %v3923_v59  ;;  %v514_v59 = vshrl.u32 %v439_v49, 16  ;;  %v4112_v49 = vld [vmem:[%s5591_s2 + $0x120] ss:$8 sps:$4 sm:$0xff]  }
  0x9f   : > { %1408 = vmatprep.subr.bf16.mxu0 %v3928_v38  ;;  %v518_v38 = vrot.slane %v516_v55, 1  ;;  %v4120_v55 = vld [vmem:[%s5591_s2 + $0x144] ss:$8 sps:$4 sm:$0xff]  }
  0xa2   : > { %1409 = vmatpush1.bf16.msra.mxu0 %v3926_v62  ;;  %v345_v62 = vld [vmem:[#allocation2 + $0x10] sm:$0xff] }
  0xa3   : > { %1410 = vmatprep.subr.bf16.mxu0 %v3931_v63  ;;  %v531_v63 = vor.u32 %v530_v57, %v526_v56  ;;  %v3980_v56 = vld [vmem:[%s5590_s1 + $0x460] ss:$8 sps:$4 sm:$0xff]   ;;  %v3985_v57 = vld [vmem:[%s5590_s1 + $0x474] ss:$8 sps:$4 sm:$0xff]  }
  0xa5   : > { %v536_v6 = vsel %vm512_vm2, %v531_v63, %v535_v0  ;;  %v3991_v63 = vld [vmem:[%s5590_s1 + $0x494] ss:$8 sps:$4 sm:$0xff]   ;;  %v4124_v0 = vld [vmem:[%s5591_s2 + $0x160] ss:$8 sps:$4 sm:$0xff]  }
  0xa6   : > { %1411 = vmatpush1.bf16.msra.mxu0 %v3929_v3  ;;  %v519_v3 = vor.u32 %v518_v38, %v514_v59  ;;  %953 = vmatprep.mubr.bf16.mxu1 %v536_v6  ;;  %v3983_v59 = vld [vmem:[%s5590_s1 + $0x470] ss:$8 sps:$4 sm:$0xff]   ;;  %v3988_v38 = vld [vmem:[%s5590_s1 + $0x484] ss:$8 sps:$4 sm:$0xff]  }
  0xa7   : > { %1412 = vmatprep.subr.bf16.mxu0 %v3934_v4  ;;  %v523_v4 = vrot.slane %v521_v60, 1  ;;  %v4121_v60 = vld [vmem:[%s5591_s2 + $0x150] ss:$8 sps:$4 sm:$0xff]  }
  0xa8   : > { %v3995_v6 = vld [vmem:[%s5590_s1 + $0x4b0] ss:$8 sps:$4 sm:$0xff]  }
  0xa9   : > { %v524_v10 = vsel %vm512_vm2, %v519_v3, %v523_v4  ;;  %v3994_v3 = vld [vmem:[%s5590_s1 + $0x4a4] ss:$8 sps:$4 sm:$0xff]  }
  0xaa   : > { %1413 = vmatpush1.bf16.msra.mxu0 %v3932_v8  ;;  %v4887_v8 = vld [vmem:[#allocation2 + $0x30] sm:$0xff]  ;;  %954 = vmatmul.mubr.bf16.vlgmr.msra.gmra.mrb[0].mxu1 %v524_v10  ;;  %v3998_v10 = vld [vmem:[%s5590_s1 + $0x4c0] ss:$8 sps:$4 sm:$0xff]  }
  0xab   : > { %1414 = vmatprep.subr.bf16.mxu0 %v3937_v9  ;;  %v361_v9 = vpack.c.bf16 %v4887_v8, %v345_v62  ;;  %2356 = vmatpush1.bf16.msra.mxu1 %v4106_v37  ;;  %v3986_v62 = vld [vmem:[%s5590_s1 + $0x480] ss:$8 sps:$4 sm:$0xff]   ;;  %v4019_v37 = vld [vmem:[%s5590_s1 + $0x510] ss:$8 sps:$4 sm:$0xff]  }
  0xae   : > { %1415 = vmatpush1.bf16.msra.mxu0 %v3935_v12  ;;  %v3962_v12 = vld [vmem:[%s5590_s1 + $0x400] ss:$8 sps:$4 sm:$0xff]  }
  0xaf   : > { %1416 = vmatprep.subr.bf16.mxu0 %v3940_v13  ;;  %v444_v13 = vpack.c.bf16 %v436_v11, %v436_v11  ;;  %v4003_v11 = vld [vmem:[%s5590_s1 + $0x4d4] ss:$8 sps:$4 sm:$0xff]  }
  0xb1   : > { %v573_v20 = vshll.u32 %v444_v13, 16  ;;  %v4006_v13 = vld [vmem:[%s5590_s1 + $0x4e4] ss:$8 sps:$4 sm:$0xff]  }
  0xb2   : > { %1417 = vmatpush1.bf16.msra.mxu0 %v3938_v17  ;;  %v1462_v17 = vpack.c.bf16 %v4541_v22, %v1454_v5  ;;  %v3970_v22 = vld [vmem:[%s5590_s1 + $0x424] ss:$8 sps:$4 sm:$0xff]   ;;  %v3997_v5 = vld [vmem:[%s5590_s1 + $0x4b4] ss:$8 sps:$4 sm:$0xff]  }
  0xb3   : > { %1418 = vmatprep.subr.bf16.mxu0 %v3943_v18  ;;  %v443_v18 = vpack.c.bf16 %v435_v14, %v435_v14  ;;  %v1453_v14 = vld [vmem:[#allocation2] sm:$0xfc] }
  0xb6   : > { %1419 = vmatpush1.bf16.msra.mxu0 %v3941_v21  ;;  %v561_v21 = vshrl.u32 %v4713_v52, 16 }
  0xb7   : > { %1420 = vmatprep.subr.bf16.mxu0 %v3946_v24  ;;  %v565_v24 = vshll.u32 %v443_v18, 16  ;;  %v4267_v18 = vld [vmem:[#allocation2 + $0x20] sm:$0xff] }
  0xb8   : > { %v563_v30 = vor.u32 %v561_v21, %v523_v4  ;;  %v3992_v4 = vld [vmem:[%s5590_s1 + $0x4a0] ss:$8 sps:$4 sm:$0xff]   ;;  %v1461_v19 = vpack.c.bf16 %v4267_v18, %v1453_v14  ;;  %v1554_v18 = vrot.slane %v4533_v16, 1 }
  0xba   : > { %1421 = vmatpush1.bf16.msra.mxu0 %v3944_v27  ;;  %v575_v27 = vrot.slane %v573_v20, 1  ;;  %v4009_v20 = vld [vmem:[%s5590_s1 + $0x4f4] ss:$8 sps:$4 sm:$0xff]  }
  0xbb   : > { %1422 = vmatprep.subr.bf16.mxu0 %v3949_v28  ;;  %v1550_v28 = vrot.slane %v1462_v17, 1  ;;  %v4004_v17 = vld [vmem:[%s5590_s1 + $0x4e0] ss:$8 sps:$4 sm:$0xff]  }
  0xbe   : > { %1423 = vmatpush1.bf16.msra.mxu0 %v3947_v31  ;;  %v567_v31 = vrot.slane %v565_v24, 1  ;;  %v4007_v24 = vld [vmem:[%s5590_s1 + $0x4f0] ss:$8 sps:$4 sm:$0xff]  }
  0xbf   : > { %1424 = vmatprep.subr.bf16.mxu0 %v3952_v32  ;;  %v576_v32 = vsel %vm512_vm2, %v571_v26, %v575_v27  ;;  %v1548_v26 = vrot.slane %v4713_v52, 1  ;;  %v4015_v27 = vld [vmem:[%s5590_s1 + $0x504] ss:$8 sps:$4 sm:$0xff]   ;;  %v4021_v52 = vld [vmem:[%s5590_s1 + $0x514] ss:$8 sps:$4 sm:$0xff]  }
  0xc0   : > { %963 = vmatprep.mubr.bf16.mxu1 %v576_v32  ;;  %v568_v33 = vsel %vm512_vm2, %v563_v30, %v567_v31  ;;  %v1456_v30 = vld [vmem:[#allocation2 + $0x18] sm:$0xfc]  ;;  %v4013_v31 = vld [vmem:[%s5590_s1 + $0x500] ss:$8 sps:$4 sm:$0xff]  }
  0xc1   : > { %964 = vmatmul.mubr.bf16.gmra.mrb[4].mxu1 %v568_v33 }
  0xc2   : > { %1425 = vmatpush1.bf16.msra.mxu0 %v3950_v35  ;;  %v3973_v35 = vld [vmem:[%s5590_s1 + $0x434] ss:$8 sps:$4 sm:$0xff]  }
  0xc3   : > { %1426 = vmatprep.subr.bf16.mxu0 %v3955_v36  ;;  %v1552_v36 = vsel %vm1546_vm3, %v1550_v28, %v1551_v29  ;;  %v1457_v28 = vld [vmem:[#allocation2 + $0x80] sm:$0x3] }
  0xc4   : > { %v1465_v33 = vpack.c.bf16 %v1457_v28, %v1457_v28  ;;  %v4133_v28 = vld [vmem:[%s5591_s2 + $0x190] ss:$8 sps:$4 sm:$0xff]  }
  0xc6   : > { %1427 = vmatpush1.bf16.msra.mxu0 %v3953_v40  ;;  %v3971_v40 = vld [vmem:[%s5590_s1 + $0x430] ss:$8 sps:$4 sm:$0xff]   ;;  %v1559_v39 = vrot.slane %v1465_v33, 1  ;;  %v4138_v33 = vld [vmem:[%s5591_s2 + $0x1a4] ss:$8 sps:$4 sm:$0xff]  }
  0xc7   : > { %1428 = vmatprep.subr.bf16.mxu0 %v3958_v41  ;;  %v4111_v41 = vld [vmem:[%s5591_s2 + $0x114] ss:$8 sps:$4 sm:$0xff]  }
  0xc8   : > { %2357 = vmatprep.subr.bf16.mxu1 %v4111_v41 }
  0xc9   : > { %2358 = vmatpush1.bf16.msra.mxu1 %v4109_v44  ;;  %v4033_v44 = vld [vmem:[%s5590_s1 + $0x534] ss:$8 sps:$4 sm:$0xff]  }
  0xca   : > { %1429 = vmatpush1.bf16.msra.mxu0 %v3956_v50  ;;  %2359 = vmatprep.subr.bf16.mxu1 %v4114_v45  ;;  %v4117_v50 = vld [vmem:[%s5591_s2 + $0x134] ss:$8 sps:$4 sm:$0xff]  }
  0xcb   : > { %1430 = vmatprep.subr.bf16.mxu0 %v3961_v53  ;;  %v3982_v53 = vld [vmem:[%s5590_s1 + $0x464] ss:$8 sps:$4 sm:$0xff]  }
  0xcd   : > { %2360 = vmatpush1.bf16.msra.mxu1 %v4112_v49  ;;  %v4037_v49 = vld [vmem:[%s5590_s1 + $0x540] ss:$8 sps:$4 sm:$0xff]  }
  0xce   : > { %1431 = vmatpush1.bf16.msra.mxu0 %v3959_v61  ;;  %2361 = vmatprep.subr.bf16.mxu1 %v4117_v50  ;;  %v4126_v61 = vld [vmem:[%s5591_s2 + $0x164] ss:$8 sps:$4 sm:$0xff]   ;;  %v4045_v50 = vld [vmem:[%s5590_s1 + $0x554] ss:$8 sps:$4 sm:$0xff]  }
  0xcf   : > { %1895 = vmatprep.subr.bf16.mxu0 %v3964_v1  ;;  %v3989_v1 = vld [vmem:[%s5590_s1 + $0x490] ss:$8 sps:$4 sm:$0xff]  }
  0xd1   : > { %1433 = vmatmul.mubr.bf16.vlgmr.msra.gmra.mrb[0].mxu0 %v361_v9  ;;  %2362 = vmatpush1.bf16.msra.mxu1 %v4115_v54  ;;  %v4000_v9 = vld [vmem:[%s5590_s1 + $0x4c4] ss:$8 sps:$4 sm:$0xff]   ;;  %v4129_v54 = vld [vmem:[%s5591_s2 + $0x174] ss:$8 sps:$4 sm:$0xff]  }
  0xd2   : > { %1896 = vmatpush1.bf16.msra.mxu0 %v3962_v12  ;;  %1442 = vmatprep.mubr.bf16.mxu0 %v4493_v46  ;;  %v4001_v12 = vld [vmem:[%s5590_s1 + $0x4d0] ss:$8 sps:$4 sm:$0xff]   ;;  %v4135_v46 = vld [vmem:[%s5591_s2 + $0x194] ss:$8 sps:$4 sm:$0xff]  }
  0xd3   : > { %1897 = vmatprep.subr.bf16.mxu0 %v3967_v15  ;;  %2363 = vmatprep.subr.bf16.mxu1 %v4120_v55  ;;  %v1458_v15 = vld [vmem:[#allocation2 + $0x88] sm:$0x3]  ;;  %v4051_v55 = vld [vmem:[%s5590_s1 + $0x564] ss:$8 sps:$4 sm:$0xff]  }
  0xd4   : > { %v1466_v21 = vpack.c.bf16 %v1458_v15, %v1458_v15  ;;  %v4103_v15 = vld [vmem:[%s5590_s1 + $0x5f0] ss:$8 sps:$4 sm:$0xff]  }
  0xd5   : > { %2364 = vmatpush1.bf16.msra.mxu1 %v4118_v23  ;;  %v4055_v23 = vld [vmem:[%s5590_s1 + $0x570] ss:$8 sps:$4 sm:$0xff]  }
  0xd6   : > { %1898 = vmatpush1.bf16.msra.mxu0 %v3965_v25  ;;  %2365 = vmatprep.subr.bf16.mxu1 %v4123_v58  ;;  %v1547_v25 = vrot.slane %v1461_v19, 1  ;;  %v4063_v58 = vld [vmem:[%s5590_s1 + $0x584] ss:$8 sps:$4 sm:$0xff]  }
  0xd7   : > { %1899 = vmatprep.subr.bf16.mxu0 %v3970_v22  ;;  %v1561_v22 = vrot.slane %v1466_v21, 1 }
  0xd8   : > { %v1549_v32 = vsel %vm1546_vm3, %v1547_v25, %v1548_v26 }
  0xd9   : > { %1443 = vmatmul.mubr.bf16.gmra.mrb[4].mxu0 %v4533_v16  ;;  %2366 = vmatpush1.bf16.msra.mxu1 %v4121_v60  ;;  %v4067_v60 = vld [vmem:[%s5590_s1 + $0x590] ss:$8 sps:$4 sm:$0xff]   ;;  %v4132_v16 = vld [vmem:[%s5591_s2 + $0x184] ss:$8 sps:$4 sm:$0xff]  }
  0xda   : > { %1900 = vmatpush1.bf16.msra.mxu0 %v3968_v34  ;;  %1927 = vmatprep.mubr.bf16.mxu0 %v1552_v36  ;;  %v1562_v34 = vsel %vm1546_vm3, %v1551_v29, %v1561_v22  ;;  %v4025_v29 = vld [vmem:[%s5590_s1 + $0x520] ss:$8 sps:$4 sm:$0xff]  }
  0xdb   : > { %1901 = vmatprep.subr.bf16.mxu0 %v3973_v35  ;;  %2367 = vmatprep.subr.bf16.mxu1 %v4126_v61  ;;  %v4268_v35 = vld [vmem:[#allocation2 + $0x38] sm:$0xff]  ;;  %v4075_v61 = vld [vmem:[%s5590_s1 + $0x5a4] ss:$8 sps:$4 sm:$0xff]  }
  0xdc   : > { %v1464_v36 = vpack.c.bf16 %v4268_v35, %v1456_v30 }
  0xdd   : > { %2368 = vmatpush1.bf16.msra.mxu1 %v4124_v0  ;;  %v4079_v0 = vld [vmem:[%s5590_s1 + $0x5b0] ss:$8 sps:$4 sm:$0xff]  }
  0xde   : > { %1902 = vmatpush1.bf16.msra.mxu0 %v3971_v40  ;;  %v4027_v40 = vld [vmem:[%s5590_s1 + $0x524] ss:$8 sps:$4 sm:$0xff]   ;;  %v1556_v41 = vrot.slane %v1464_v36, 1  ;;  %2369 = vmatprep.subr.bf16.mxu1 %v4129_v54  ;;  %v4139_v36 = vld [vmem:[%s5591_s2 + $0x1b0] ss:$8 sps:$4 sm:$0xff]  }
  0xdf   : > { %1903 = vmatprep.subr.bf16.mxu0 %v3976_v42  ;;  %v1560_v42 = vsel %vm1546_vm3, %v1548_v26, %v1559_v39 }
  0xe0   : > { %v1558_v45 = vsel %vm1546_vm3, %v1556_v41, %v1557_v43  ;;  %v4144_v41 = vld [vmem:[%s5591_s2 + $0x1c4] ss:$8 sps:$4 sm:$0xff]  }
  0xe2   : > { %1904 = vmatpush1.bf16.msra.mxu0 %v3974_v47  ;;  %v4031_v47 = vld [vmem:[%s5590_s1 + $0x530] ss:$8 sps:$4 sm:$0xff]  }
  0xe3   : > { %1905 = vmatprep.subr.bf16.mxu0 %v3979_v48  ;;  %v4039_v48 = vld [vmem:[%s5590_s1 + $0x544] ss:$8 sps:$4 sm:$0xff]  }
  0xe6   : > { %1906 = vmatpush1.bf16.msra.mxu0 %v3977_v51  ;;  %v4043_v51 = vld [vmem:[%s5590_s1 + $0x550] ss:$8 sps:$4 sm:$0xff]  }
  0xe7   : > { %1907 = vmatprep.subr.bf16.mxu0 %v3982_v53  ;;  %v4127_v53 = vld [vmem:[%s5591_s2 + $0x170] ss:$8 sps:$4 sm:$0xff]  }
  0xe8   : > { %2370 = vmatpush1.bf16.msra.mxu1 %v4127_v53 }
  0xe9   : > { %2371 = vmatprep.subr.bf16.mxu1 %v4132_v16 }
  0xea   : > { %1908 = vmatpush1.bf16.msra.mxu0 %v3980_v56  ;;  %v4049_v56 = vld [vmem:[%s5590_s1 + $0x560] ss:$8 sps:$4 sm:$0xff]  }
  0xeb   : > { %1909 = vmatprep.subr.bf16.mxu0 %v3985_v57  ;;  %v4057_v57 = vld [vmem:[%s5590_s1 + $0x574] ss:$8 sps:$4 sm:$0xff]  }
  0xee   : > { %1910 = vmatpush1.bf16.msra.mxu0 %v3983_v59  ;;  %v4061_v59 = vld [vmem:[%s5590_s1 + $0x580] ss:$8 sps:$4 sm:$0xff]  }
  0xef   : > { %1911 = vmatprep.subr.bf16.mxu0 %v3988_v38  ;;  %v4069_v38 = vld [vmem:[%s5590_s1 + $0x594] ss:$8 sps:$4 sm:$0xff]  }
  0xf2   : > { %1912 = vmatpush1.bf16.msra.mxu0 %v3986_v62  ;;  %v4073_v62 = vld [vmem:[%s5590_s1 + $0x5a0] ss:$8 sps:$4 sm:$0xff]  }
  0xf3   : > { %1913 = vmatprep.subr.bf16.mxu0 %v3991_v63  ;;  %v4081_v63 = vld [vmem:[%s5590_s1 + $0x5b4] ss:$8 sps:$4 sm:$0xff]  }
  0xf6   : > { %1914 = vmatpush1.bf16.msra.mxu0 %v3989_v1  ;;  %v4087_v1 = vld [vmem:[%s5590_s1 + $0x5c4] ss:$8 sps:$4 sm:$0xff]  }
  0xf7   : > { %1915 = vmatprep.subr.bf16.mxu0 %v3994_v3  ;;  %v4085_v3 = vld [vmem:[%s5590_s1 + $0x5c0] ss:$8 sps:$4 sm:$0xff]  }
  0xfa   : > { %1916 = vmatpush1.bf16.msra.mxu0 %v3992_v4  ;;  %v4093_v4 = vld [vmem:[%s5590_s1 + $0x5d4] ss:$8 sps:$4 sm:$0xff]  }
  0xfb   : > { %1917 = vmatprep.subr.bf16.mxu0 %v3997_v5  ;;  %v4091_v5 = vld [vmem:[%s5590_s1 + $0x5d0] ss:$8 sps:$4 sm:$0xff]  }
  0xfe   : > { %1918 = vmatpush1.bf16.msra.mxu0 %v3995_v6  ;;  %v4099_v6 = vld [vmem:[%s5590_s1 + $0x5e4] ss:$8 sps:$4 sm:$0xff]  }
  0xff   : > { %1919 = vmatprep.subr.bf16.mxu0 %v4000_v9  ;;  %v1455_v9 = vld [vmem:[#allocation2 + $0x10] sm:$0xfc] }
 0x102   : > { %1920 = vmatpush1.bf16.msra.mxu0 %v3998_v10  ;;  %v1460_v10 = vld [vmem:[#allocation2 + $0x98] sm:$0x3] }
 0x103   : > { %1921 = vmatprep.subr.bf16.mxu0 %v4003_v11  ;;  %v4097_v11 = vld [vmem:[%s5590_s1 + $0x5e0] ss:$8 sps:$4 sm:$0xff]   ;;  %v1468_v14 = vpack.c.bf16 %v1460_v10, %v1460_v10 }
 0x105   : > { %v1565_v19 = vrot.slane %v1468_v14, 1 }
 0x106   : > { %1922 = vmatpush1.bf16.msra.mxu0 %v4001_v12  ;;  %v1463_v12 = vpack.c.bf16 %v4887_v8, %v1455_v9 }
 0x107   : > { %1923 = vmatprep.subr.bf16.mxu0 %v4006_v13  ;;  %v4105_v13 = vld [vmem:[%s5590_s1 + $0x5f4] ss:$8 sps:$4 sm:$0xff]  }
 0x10a   : > { %1924 = vmatpush1.bf16.msra.mxu0 %v4004_v17  ;;  %v1553_v17 = vrot.slane %v1463_v12, 1 }
 0x10b   : > { %1925 = vmatprep.subr.bf16.mxu0 %v4009_v20  ;;  %v1459_v20 = vld [vmem:[#allocation2 + $0x90] sm:$0x3] }
 0x10c   : > { %v1555_v8 = vsel %vm1546_vm3, %v1553_v17, %v1554_v18  ;;  %v1467_v21 = vpack.c.bf16 %v1459_v20, %v1459_v20 }
 0x10e   : > { %1926 = vmatpush1.bf16.msra.mxu0 %v4007_v24  ;;  %v1566_v24 = vsel %vm1546_vm3, %v1557_v43, %v1565_v19  ;;  %v1563_v25 = vrot.slane %v1467_v21, 1  ;;  %v4142_v43 = vld [vmem:[%s5591_s2 + $0x1c0] ss:$8 sps:$4 sm:$0xff]  }
 0x10f   : > { %1948 = vmatprep.subr.bf16.mxu0 %v4015_v27  ;;  %v4130_v27 = vld [vmem:[%s5591_s2 + $0x180] ss:$8 sps:$4 sm:$0xff]  }
 0x110   : > { %v1564_v26 = vsel %vm1546_vm3, %v1554_v18, %v1563_v25  ;;  %2372 = vmatpush1.bf16.msra.mxu1 %v4130_v27 }
 0x111   : > { %1928 = vmatmul.mubr.bf16.vlgmr.msra.gmra.mrb[0].mxu0 %v1549_v32  ;;  %2373 = vmatprep.subr.bf16.mxu1 %v4135_v46 }
 0x112   : > { %1949 = vmatpush1.bf16.msra.mxu0 %v4013_v31  ;;  %1937 = vmatprep.mubr.bf16.mxu0 %v1562_v34  ;;  %v4141_v34 = vld [vmem:[%s5591_s2 + $0x1b4] ss:$8 sps:$4 sm:$0xff]  }
 0x113   : > { %1950 = vmatprep.subr.bf16.mxu0 %v4021_v52  ;;  %v4136_v52 = vld [vmem:[%s5591_s2 + $0x1a0] ss:$8 sps:$4 sm:$0xff]  }
 0x114   : > { %2374 = vmatpush1.bf16.msra.mxu1 %v4133_v28 }
 0x115   : > { %2375 = vmatprep.subr.bf16.mxu1 %v4138_v33 }
 0x116   : > { %1951 = vmatpush1.bf16.msra.mxu0 %v4019_v37 }
 0x117   : > { %1952 = vmatprep.subr.bf16.mxu0 %v4027_v40 }
 0x118   : > { %2376 = vmatpush1.bf16.msra.mxu1 %v4136_v52 }
 0x119   : > { %1938 = vmatmul.mubr.bf16.gmra.mrb[4].mxu0 %v1560_v42  ;;  %2377 = vmatprep.subr.bf16.mxu1 %v4141_v34  ;;  %v4148_v42 = vld [vmem:[%s5591_s2 + $0x1e0] ss:$8 sps:$4 sm:$0xff]  }
 0x11a   : > { %1953 = vmatpush1.bf16.msra.mxu0 %v4025_v29  ;;  %1980 = vmatprep.mubr.bf16.mxu0 %v1558_v45  ;;  %v4147_v29 = vld [vmem:[%s5591_s2 + $0x1d4] ss:$8 sps:$4 sm:$0xff]  }
 0x11b   : > { %1954 = vmatprep.subr.bf16.mxu0 %v4033_v44  ;;  %v4151_v44 = vld [vmem:[%s5591_s2 + $0x1f0] ss:$8 sps:$4 sm:$0xff]   ;;  %v4153_v45 = vld [vmem:[%s5591_s2 + $0x1f4] ss:$8 sps:$4 sm:$0xff]  }
 0x11c   : > { %2378 = vmatpush1.bf16.msra.mxu1 %v4139_v36 }
 0x11d   : > { %2379 = vmatprep.subr.bf16.mxu1 %v4144_v41 }
 0x11e   : > { %1955 = vmatpush1.bf16.msra.mxu0 %v4031_v47  ;;  %v4156_v47 = vld [vmem:[%s5591_s2 + $0x4] ss:$8 sps:$4 sm:$0xff]  }
 0x11f   : > { %1956 = vmatprep.subr.bf16.mxu0 %v4039_v48 }
 0x120   : > { %2380 = vmatpush1.bf16.msra.mxu1 %v4142_v43  ;;  %v4154_v43 = vld [vmem:[%s5591_s2] ss:$8 sps:$4 sm:$0xff]  }
 0x121   : > { %2381 = vmatprep.subr.bf16.mxu1 %v4147_v29 }
 0x122   : > { %1957 = vmatpush1.bf16.msra.mxu0 %v4037_v49 }
 0x123   : > { %1958 = vmatprep.subr.bf16.mxu0 %v4045_v50 }
 0x124   : > { %2382 = vmatpush1.bf16.msra.mxu1 %v4145_v2 }
 0x125   : > { %2383 = vmatprep.subr.bf16.mxu1 %v4150_v7 }
 0x126   : > { %1959 = vmatpush1.bf16.msra.mxu0 %v4043_v51 }
 0x127   : > { %1960 = vmatprep.subr.bf16.mxu0 %v4051_v55 }
 0x128   : > { %2384 = vmatpush1.bf16.msra.mxu1 %v4148_v42  ;;  %v4159_v42 = vld [vmem:[%s5591_s2 + $0x14] ss:$8 sps:$4 sm:$0xff]  }
 0x129   : > { %2385 = vmatprep.subr.bf16.mxu1 %v4153_v45 }
 0x12a   : > { %1961 = vmatpush1.bf16.msra.mxu0 %v4049_v56 }
 0x12b   : > { %1962 = vmatprep.subr.bf16.mxu0 %v4057_v57 }
 0x12c   : > { %2386 = vmatpush1.bf16.msra.mxu1 %v4151_v44 }
 0x12d   : > { %2568 = vmatprep.subr.bf16.mxu1 %v4156_v47 }
 0x12e   : > { %1963 = vmatpush1.bf16.msra.mxu0 %v4055_v23 }
 0x12f   : > { %1964 = vmatprep.subr.bf16.mxu0 %v4063_v58 }
 0x132   : > { %1965 = vmatpush1.bf16.msra.mxu0 %v4061_v59 }
 0x133   : > { %1966 = vmatprep.subr.bf16.mxu0 %v4069_v38 }
 0x136   : > { %1967 = vmatpush1.bf16.msra.mxu0 %v4067_v60 }
 0x137   : > { %1968 = vmatprep.subr.bf16.mxu0 %v4075_v61 }
 0x13a   : > { %1969 = vmatpush1.bf16.msra.mxu0 %v4073_v62 }
 0x13b   : > { %1970 = vmatprep.subr.bf16.mxu0 %v4081_v63 }
 0x13e   : > { %1971 = vmatpush1.bf16.msra.mxu0 %v4079_v0 }
 0x13f   : > { %1972 = vmatprep.subr.bf16.mxu0 %v4087_v1 }
 0x142   : > { %1973 = vmatpush1.bf16.msra.mxu0 %v4085_v3 }
 0x143   : > { %1974 = vmatprep.subr.bf16.mxu0 %v4093_v4 }
 0x146   : > { %1975 = vmatpush1.bf16.msra.mxu0 %v4091_v5 }
 0x147   : > { %1976 = vmatprep.subr.bf16.mxu0 %v4099_v6 }
 0x14a   : > { %1977 = vmatpush1.bf16.msra.mxu0 %v4097_v11 }
 0x14b   : > { %1978 = vmatprep.subr.bf16.mxu0 %v4105_v13 }
 0x14e   : > { %1979 = vmatpush1.bf16.msra.mxu0 %v4103_v15 }
 0x151   : > { %1981 = vmatmul.mubr.bf16.vlgmr.msra.gmra.mrb[0].mxu0 %v1555_v8 }
 0x152   : > { %1990 = vmatprep.mubr.bf16.mxu0 %v1566_v24 }
 0x159   : > { %1991 = vmatmul.mubr.bf16.gmra.mrb[4].mxu0 %v1564_v26 }
 0x17d   : > { %v955_v22 = vpop.f32.mrb[0].mxu1 }
 0x17e   : > { %v957_v30 = vpop.f32.mrb[1].mxu1 }
 0x17f   : > { %v959_v31 = vpop.f32.mrb[2].mxu1 }
 0x180   : > { %v961_v32 = vpop.f32.mrb[3].mxu1 }
 0x194   : > { %v965_v35 = vpop.f32.mrb[4].mxu1 }
 0x195   : > { %v967_v37 = vpop.f32.mrb[5].mxu1 }
 0x196   : > { %v969_v39 = vpop.f32.mrb[6].mxu1 }
 0x197   : > { %v971_v40 = vpop.f32.mrb[7].mxu1 }
 0x224   : > { %v1982_v48 = vpop.f32.mrb[0].mxu0 }
 0x225   : > { %v3718_v49 = vadd.f32 %v1982_v48, %v955_v22  ;;  %v1984_v50 = vpop.f32.mrb[1].mxu0 }
 0x226   : > { %v3719_v51 = vadd.f32 %v1984_v50, %v957_v30  ;;  %v1986_v53 = vpop.f32.mrb[2].mxu0 }
 0x227   : > { %v2009_v54 = vmax.f32 %v3718_v49, 0.0  ;;  %v3720_v55 = vadd.f32 %v1986_v53, %v959_v31  ;;  %v1988_v56 = vpop.f32.mrb[3].mxu0  ;;  %v4162_v53 = vld [vmem:[%s5591_s2 + $0x24] ss:$8 sps:$4 sm:$0xff]  }
 0x228   : > { %v2010_v57 = vmax.f32 %v3719_v51, 0.0  ;;  %v3721_v23 = vadd.f32 %v1988_v56, %v961_v32  ;;  %v4157_v51 = vld [vmem:[%s5591_s2 + $0x10] ss:$8 sps:$4 sm:$0xff]  }
 0x229   : > { %v2032_v58 = vrot.slane %v2009_v54, 7  ;;  %v2011_v59 = vmax.f32 %v3720_v55, 0.0 }
 0x22a   : > { %v2033_v38 = vrot.slane %v2010_v57, 7  ;;  %v2012_v60 = vmax.f32 %v3721_v23, 0.0 }
 0x22b   : > { %2056 = vst [vmem:[#allocation3] sm:$0xfe] %v2032_v58  ;;  %v2034_v61 = vrot.slane %v2011_v59, 7  ;;  %v4160_v59 = vld [vmem:[%s5591_s2 + $0x20] ss:$8 sps:$4 sm:$0xff]  }
 0x22c   : > { %2057 = vst [vmem:[#allocation3 + $0x8] sm:$0xfe] %v2033_v38  ;;  %v2036_v62 = vrot.slane %v2012_v60, 7  ;;  %v1992_v63 = vpop.f32.mrb[4].mxu0  ;;  %v4165_v60 = vld [vmem:[%s5591_s2 + $0x34] ss:$8 sps:$4 sm:$0xff]  }
 0x22d   : > { %v5211_v0 = vsel %vm274_vm1, %v2032_v58, %v2034_v61  ;;  %v3722_v1 = vadd.f32 %v1992_v63, %v965_v35  ;;  %v1994_v3 = vpop.f32.mrb[5].mxu0  ;;  %v4163_v63 = vld [vmem:[%s5591_s2 + $0x30] ss:$8 sps:$4 sm:$0xff]  }
 0x22e   : > { %v5214_v4 = vsel %vm274_vm1, %v2033_v38, %v2036_v62  ;;  %v3723_v5 = vadd.f32 %v1994_v3, %v967_v37  ;;  %v1996_v6 = vpop.f32.mrb[6].mxu0  ;;  %v4166_v3 = vld [vmem:[%s5591_s2 + $0x40] ss:$8 sps:$4 sm:$0xff]  }
 0x22f   : > { %v2013_v9 = vmax.f32 %v3722_v1, 0.0  ;;  %v3724_v10 = vadd.f32 %v1996_v6, %v969_v39  ;;  %v1998_v11 = vpop.f32.mrb[7].mxu0  ;;  %v4168_v1 = vld [vmem:[%s5591_s2 + $0x44] ss:$8 sps:$4 sm:$0xff]   ;;  %v4169_v6 = vld [vmem:[%s5591_s2 + $0x50] ss:$8 sps:$4 sm:$0xff]  }
 0x230   : > { %v2014_v12 = vmax.f32 %v3723_v5, 0.0  ;;  %v3725_v13 = vadd.f32 %v1998_v11, %v971_v40  ;;  %v4171_v5 = vld [vmem:[%s5591_s2 + $0x54] ss:$8 sps:$4 sm:$0xff]  }
 0x231   : > { %v2038_v14 = vrot.slane %v2013_v9, 7  ;;  %v2015_v15 = vmax.f32 %v3724_v10, 0.0  ;;  %v4174_v9 = vld [vmem:[%s5591_s2 + $0x64] ss:$8 sps:$4 sm:$0xff]   ;;  %v4172_v10 = vld [vmem:[%s5591_s2 + $0x60] ss:$8 sps:$4 sm:$0xff]  }
 0x232   : > { %v2040_v17 = vrot.slane %v2014_v12, 7  ;;  %v2016_v18 = vmax.f32 %v3725_v13, 0.0  ;;  %v2110_v19 = vld [vmem:[#allocation3] sm:$0xfe]  ;;  %v4177_v11 = vld [vmem:[%s5591_s2 + $0x74] ss:$8 sps:$4 sm:$0xff]  }
 0x233   : > { %v2039_v20 = vsel %vm274_vm1, %v2034_v61, %v2038_v14  ;;  %v2042_v8 = vrot.slane %v2015_v15, 7  ;;  %v2111_v21 = vld [vmem:[#allocation3 + $0x8] sm:$0xfe]  ;;  %v2114_v24 = vpack.c.bf16 %v5211_v0, %v2110_v19  ;;  %v4175_v12 = vld [vmem:[%s5591_s2 + $0x70] ss:$8 sps:$4 sm:$0xff]  }
 0x234   : > { %v2041_v25 = vsel %vm274_vm1, %v2036_v62, %v2040_v17  ;;  %v2044_v26 = vrot.slane %v2016_v18, 7  ;;  %v2115_v16 = vpack.c.bf16 %v5214_v4, %v2111_v21  ;;  %v2067_v23 = vld [vmem:[#allocation3 + $0x8] sm:$0xff]  ;;  %v4183_v15 = vld [vmem:[%s5591_s2 + $0x94] ss:$8 sps:$4 sm:$0xff]  }
 0x235   : > { %v2043_v27 = vsel %vm274_vm1, %v2038_v14, %v2042_v8  ;;  %2064 = vst [vmem:[#allocation3 + $0x40] sm:$0x1] %v2042_v8  ;;  %v2154_v46 = vshll.u32 %v2114_v24, 16  ;;  %v2152_v34 = vshrl.u32 %v2114_v24, 16  ;;  %v2075_v62 = vpack.c.bf16 %v5214_v4, %v2067_v23  ;;  %v4180_v13 = vld [vmem:[%s5591_s2 + $0x84] ss:$8 sps:$4 sm:$0xff]  }
 0x236   : > { %v2045_v22 = vsel %vm274_vm1, %v2040_v17, %v2044_v26  ;;  %2065 = vst [vmem:[#allocation3 + $0x48] sm:$0x1] %v2044_v26  ;;  %v2166_v28 = vshll.u32 %v2115_v16, 16  ;;  %v5222_v30 = vpack.c.bf16 %v2043_v27, %v2039_v20  ;;  %v2164_v33 = vshrl.u32 %v2115_v16, 16  ;;  %v4178_v14 = vld [vmem:[%s5591_s2 + $0x80] ss:$8 sps:$4 sm:$0xff]  }
 0x237   : > { %v5224_v31 = vpack.c.bf16 %v2045_v22, %v2041_v25  ;;  %v2156_v32 = vrot.slane %v2154_v46, 1  ;;  %v4181_v17 = vld [vmem:[%s5591_s2 + $0x90] ss:$8 sps:$4 sm:$0xff]   ;;  %v4186_v18 = vld [vmem:[%s5591_s2 + $0xa4] ss:$8 sps:$4 sm:$0xff]  }
 0x238   : > { %v2168_v52 = vrot.slane %v2166_v28, 1  ;;  %v2159_v35 = vshll.u32 %v5222_v30, 16  ;;  %v2175_v56 = vshrl.u32 %v5222_v30, 16  ;;  %v4184_v19 = vld [vmem:[%s5591_s2 + $0xa0] ss:$8 sps:$4 sm:$0xff]  }
 0x239   : > { %v2171_v36 = vshll.u32 %v5224_v31, 16  ;;  %v2157_v39 = vor.u32 %v2156_v32, %v2152_v34  ;;  %v2183_v49 = vshrl.u32 %v5224_v31, 16  ;;  %v4189_v20 = vld [vmem:[%s5591_s2 + $0xb4] ss:$8 sps:$4 sm:$0xff]   ;;  %v4187_v8 = vld [vmem:[%s5591_s2 + $0xb0] ss:$8 sps:$4 sm:$0xff]  }
 0x23a   : > { %v2169_v37 = vor.u32 %v2168_v52, %v2164_v33  ;;  %v2161_v40 = vrot.slane %v2159_v35, 1  ;;  %v4192_v21 = vld [vmem:[%s5591_s2 + $0xc4] ss:$8 sps:$4 sm:$0xff]   ;;  %v4190_v24 = vld [vmem:[%s5591_s2 + $0xc0] ss:$8 sps:$4 sm:$0xff]  }
 0x23b   : > { %v2173_v41 = vrot.slane %v2171_v36, 1  ;;  %v4195_v25 = vld [vmem:[%s5591_s2 + $0xd4] ss:$8 sps:$4 sm:$0xff]   ;;  %v4193_v26 = vld [vmem:[%s5591_s2 + $0xd0] ss:$8 sps:$4 sm:$0xff]   ;;  %v2066_v32 = vld [vmem:[#allocation3] sm:$0xff] }
 0x23c   : > { %v2112_v29 = vld [vmem:[#allocation3 + $0x40] sm:$0x1]  ;;  %v2162_v45 = vsel %vm512_vm2, %v2157_v39, %v2161_v40  ;;  %v2177_v38 = vor.u32 %v2175_v56, %v2161_v40  ;;  %v4198_v16 = vld [vmem:[%s5591_s2 + $0xe4] ss:$8 sps:$4 sm:$0xff]   ;;  %v4201_v46 = vld [vmem:[%s5591_s2 + $0xf4] ss:$8 sps:$4 sm:$0xff]   ;;  %v2074_v52 = vpack.c.bf16 %v5211_v0, %v2066_v32 }
 0x23d   : > { %v2174_v2 = vsel %vm512_vm2, %v2169_v37, %v2173_v41  ;;  %v2113_v7 = vld [vmem:[#allocation3 + $0x48] sm:$0x1]  ;;  %v2116_v44 = vpack.c.bf16 %v2112_v29, %v2112_v29  ;;  %v2185_v54 = vor.u32 %v2183_v49, %v2173_v41  ;;  %v4199_v22 = vld [vmem:[%s5591_s2 + $0xf0] ss:$8 sps:$4 sm:$0xff]   ;;  %v4204_v28 = vld [vmem:[%s5591_s2 + $0x204] ss:$8 sps:$4 sm:$0xff]  }
 0x23e   : > { %2387 = vmatprep.mubr.bf16.mxu1 %v2174_v2  ;;  %v2117_v47 = vpack.c.bf16 %v2113_v7, %v2113_v7  ;;  %v4196_v27 = vld [vmem:[%s5591_s2 + $0xe0] ss:$8 sps:$4 sm:$0xff]   ;;  %v4207_v34 = vld [vmem:[%s5591_s2 + $0x214] ss:$8 sps:$4 sm:$0xff]   ;;  %v4205_v36 = vld [vmem:[%s5591_s2 + $0x210] ss:$8 sps:$4 sm:$0xff]  }
 0x23f   : > { %2388 = vmatmul.mubr.bf16.vlgmr.msra.gmra.mrb[8].mxu1 %v2162_v45  ;;  %v2179_v48 = vshll.u32 %v2116_v44, 16  ;;  %v4202_v33 = vld [vmem:[%s5591_s2 + $0x200] ss:$8 sps:$4 sm:$0xff]   ;;  %v4210_v37 = vld [vmem:[%s5591_s2 + $0x224] ss:$8 sps:$4 sm:$0xff]   ;;  %v2672_v40 = vrot.slane %v5224_v31, 1 }
 0x240   : > { %2569 = vmatpush1.bf16.msra.mxu1 %v4154_v43  ;;  %v2187_v50 = vshll.u32 %v2117_v47, 16  ;;  %v2622_v35 = vld [vmem:[#allocation3 + $0x8] sm:$0xfc]  ;;  %v4213_v29 = vld [vmem:[%s5591_s2 + $0x234] ss:$8 sps:$4 sm:$0xff]  }
 0x241   : > { %2570 = vmatprep.subr.bf16.mxu1 %v4159_v42  ;;  %v2181_v57 = vrot.slane %v2179_v48, 1  ;;  %v2626_v39 = vpack.c.bf16 %v5214_v4, %v2622_v35  ;;  %v4208_v41 = vld [vmem:[%s5591_s2 + $0x220] ss:$8 sps:$4 sm:$0xff]   ;;  %v4211_v4 = vld [vmem:[%s5591_s2 + $0x230] ss:$8 sps:$4 sm:$0xff]  }
 0x242   : > { %v2189_v55 = vrot.slane %v2187_v50, 1  ;;  %v4216_v7 = vld [vmem:[%s5591_s2 + $0x244] ss:$8 sps:$4 sm:$0xff]   ;;  %v4214_v42 = vld [vmem:[%s5591_s2 + $0x240] ss:$8 sps:$4 sm:$0xff]   ;;  %v2934_v35 = vld [vmem:[%s5592_s3 + $0xb8] sm:$0xff] }
 0x243   : > { %v2182_v61 = vsel %vm512_vm2, %v2177_v38, %v2181_v57  ;;  %v2671_v43 = vrot.slane %v2626_v39, 1  ;;  %v4219_v44 = vld [vmem:[%s5591_s2 + $0x254] ss:$8 sps:$4 sm:$0xff]   ;;  %v4217_v45 = vld [vmem:[%s5591_s2 + $0x250] ss:$8 sps:$4 sm:$0xff]  }
 0x244   : > { %v2190_v58 = vsel %vm512_vm2, %v2185_v54, %v2189_v55  ;;  %2571 = vmatpush1.bf16.msra.mxu1 %v4157_v51  ;;  %v4222_v47 = vld [vmem:[%s5591_s2 + $0x264] ss:$8 sps:$4 sm:$0xff]   ;;  %v4220_v48 = vld [vmem:[%s5591_s2 + $0x260] ss:$8 sps:$4 sm:$0xff]   ;;  %v4225_v49 = vld [vmem:[%s5591_s2 + $0x274] ss:$8 sps:$4 sm:$0xff]  }
 0x245   : > { %2397 = vmatprep.mubr.bf16.mxu1 %v2190_v58  ;;  %2572 = vmatprep.subr.bf16.mxu1 %v4162_v53  ;;  %v2673_v2 = vsel %vm1546_vm3, %v2671_v43, %v2672_v40  ;;  %v4223_v50 = vld [vmem:[%s5591_s2 + $0x270] ss:$8 sps:$4 sm:$0xff]   ;;  %v4228_v51 = vld [vmem:[%s5591_s2 + $0x284] ss:$8 sps:$4 sm:$0xff]   ;;  %v4226_v53 = vld [vmem:[%s5591_s2 + $0x280] ss:$8 sps:$4 sm:$0xff]  }
 0x246   : > { %v4231_v54 = vld [vmem:[%s5591_s2 + $0x294] ss:$8 sps:$4 sm:$0xff]   ;;  %v4229_v55 = vld [vmem:[%s5591_s2 + $0x290] ss:$8 sps:$4 sm:$0xff]   ;;  %v4234_v56 = vld [vmem:[%s5591_s2 + $0x2a4] ss:$8 sps:$4 sm:$0xff]  }
 0x247   : > { %2398 = vmatmul.mubr.bf16.gmra.mrb[12].mxu1 %v2182_v61  ;;  %v4232_v57 = vld [vmem:[%s5591_s2 + $0x2a0] ss:$8 sps:$4 sm:$0xff]   ;;  %v4237_v23 = vld [vmem:[%s5591_s2 + $0x2b4] ss:$8 sps:$4 sm:$0xff]   ;;  %v4235_v58 = vld [vmem:[%s5591_s2 + $0x2b0] ss:$8 sps:$4 sm:$0xff]  }
 0x248   : > { %2573 = vmatpush1.bf16.msra.mxu1 %v4160_v59  ;;  %2600 = vmatprep.mubr.bf16.mxu1 %v2075_v62  ;;  %v4240_v59 = vld [vmem:[%s5591_s2 + $0x2c4] ss:$8 sps:$4 sm:$0xff]   ;;  %v4238_v38 = vld [vmem:[%s5591_s2 + $0x2c0] ss:$8 sps:$4 sm:$0xff]   ;;  %v4241_v61 = vld [vmem:[%s5591_s2 + $0x2d0] ss:$8 sps:$4 sm:$0xff]  }
 0x249   : > { %2574 = vmatprep.subr.bf16.mxu1 %v4165_v60  ;;  %v4243_v60 = vld [vmem:[%s5591_s2 + $0x2d4] ss:$8 sps:$4 sm:$0xff]   ;;  %v4246_v62 = vld [vmem:[%s5591_s2 + $0x2e4] ss:$8 sps:$4 sm:$0xff]  }
 0x24a   : > { %v2917_v39 = vld [vmem:[%s5592_s3 + $0x30] sm:$0xff]  ;;  %v2935_v43 = vld [vmem:[%s5592_s3 + $0xc0] sm:$0xff] }
 0x24c   : > { %2575 = vmatpush1.bf16.msra.mxu1 %v4163_v63  ;;  %v4244_v63 = vld [vmem:[%s5591_s2 + $0x2e0] ss:$8 sps:$4 sm:$0xff]  }
 0x24d   : > { %2576 = vmatprep.subr.bf16.mxu1 %v4168_v1  ;;  %v2624_v1 = vld [vmem:[#allocation3 + $0x48] sm:$0x3] }
 0x250   : > { %2577 = vmatpush1.bf16.msra.mxu1 %v4166_v3  ;;  %v4249_v3 = vld [vmem:[%s5591_s2 + $0x2f4] ss:$8 sps:$4 sm:$0xff]  }
 0x251   : > { %2578 = vmatprep.subr.bf16.mxu1 %v4171_v5  ;;  %v2621_v5 = vld [vmem:[#allocation3] sm:$0xfc] }
 0x254   : > { %2579 = vmatpush1.bf16.msra.mxu1 %v4169_v6  ;;  %v2927_v6 = vld [vmem:[%s5592_s3 + $0x80] sm:$0xff] }
 0x255   : > { %2580 = vmatprep.subr.bf16.mxu1 %v4174_v9  ;;  %v2928_v9 = vld [vmem:[%s5592_s3 + $0x88] sm:$0xff] }
 0x258   : > { %2581 = vmatpush1.bf16.msra.mxu1 %v4172_v10  ;;  %v2628_v10 = vpack.c.bf16 %v2624_v1, %v2624_v1  ;;  %v4334_v1 = vmov 0  }
 0x259   : > { %2582 = vmatprep.subr.bf16.mxu1 %v4177_v11  ;;  %v4247_v11 = vld [vmem:[%s5591_s2 + $0x2f0] ss:$8 sps:$4 sm:$0xff]   ;;  %3817 = vset.pattern.permute.xlu0 %v4334_v1 }
 0x25c   : > { %2583 = vmatpush1.bf16.msra.mxu1 %v4175_v12  ;;  %v2625_v12 = vpack.c.bf16 %v5211_v0, %v2621_v5  ;;  %v2930_v0 = vld [vmem:[%s5592_s3 + $0x98] sm:$0xff] }
 0x25d   : > { %2584 = vmatprep.subr.bf16.mxu1 %v4180_v13  ;;  %v3686_v13 = vpack.c.bf16 %v2928_v9, %v2927_v6 }
 0x260   : > { %2585 = vmatpush1.bf16.msra.mxu1 %v4178_v14  ;;  %v2911_v14 = vld [vmem:[%s5592_s3] sm:$0xff] }
 0x261   : > { %2586 = vmatprep.subr.bf16.mxu1 %v4183_v15  ;;  %v2912_v15 = vld [vmem:[%s5592_s3 + $0x8] sm:$0xff] }
 0x264   : > { %2587 = vmatpush1.bf16.msra.mxu1 %v4181_v17  ;;  %v2669_v17 = vrot.slane %v5222_v30, 1 }
 0x265   : > { %2588 = vmatprep.subr.bf16.mxu1 %v4186_v18  ;;  %v2929_v18 = vld [vmem:[%s5592_s3 + $0x90] sm:$0xff] }
 0x268   : > { %2589 = vmatpush1.bf16.msra.mxu1 %v4184_v19  ;;  %v2676_v19 = vrot.slane %v2628_v10, 1 }
 0x269   : > { %2590 = vmatprep.subr.bf16.mxu1 %v4189_v20  ;;  %v2623_v20 = vld [vmem:[#allocation3 + $0x40] sm:$0x3] }
 0x26c   : > { %2591 = vmatpush1.bf16.msra.mxu1 %v4187_v8  ;;  %v2668_v8 = vrot.slane %v2625_v12, 1 }
 0x26d   : > { %2592 = vmatprep.subr.bf16.mxu1 %v4192_v21  ;;  %v3688_v21 = vpack.c.bf16 %v2912_v15, %v2911_v14 }
 0x270   : > { %2593 = vmatpush1.bf16.msra.mxu1 %v4190_v24  ;;  %v3690_v24 = vpack.c.bf16 %v2930_v0, %v2929_v18 }
 0x271   : > { %2594 = vmatprep.subr.bf16.mxu1 %v4195_v25  ;;  %v2913_v25 = vld [vmem:[%s5592_s3 + $0x10] sm:$0xff] }
 0x274   : > { %2595 = vmatpush1.bf16.msra.mxu1 %v4193_v26  ;;  %v2670_v26 = vsel %vm1546_vm3, %v2668_v8, %v2669_v17 }
 0x275   : > { %2596 = vmatprep.subr.bf16.mxu1 %v4198_v16  ;;  %v2627_v16 = vpack.c.bf16 %v2623_v20, %v2623_v20 }
 0x278   : > { %2597 = vmatpush1.bf16.msra.mxu1 %v4196_v27  ;;  %v2931_v27 = vld [vmem:[%s5592_s3 + $0xa0] sm:$0xff] }
 0x279   : > { %2598 = vmatprep.subr.bf16.mxu1 %v4201_v46  ;;  %v2932_v46 = vld [vmem:[%s5592_s3 + $0xa8] sm:$0xff] }
 0x27a   : > { %v3694_v32 = vpack.c.bf16 %v2932_v46, %v2931_v27 }
 0x27c   : > { %2599 = vmatpush1.bf16.msra.mxu1 %v4199_v22  ;;  %v2677_v22 = vsel %vm1546_vm3, %v2672_v40, %v2676_v19  ;;  %v2918_v40 = vld [vmem:[%s5592_s3 + $0x38] sm:$0xff] }
 0x27d   : > { %2842 = vmatprep.subr.bf16.mxu1 %v4204_v28 }
 0x27f   : > { %2601 = vmatmul.mubr.bf16.vlgmr.msra.gmra.mrb[8].mxu1 %v2074_v52  ;;  %v2916_v52 = vld [vmem:[%s5592_s3 + $0x28] sm:$0xff] }
 0x280   : > { %2610 = vmatprep.mubr.bf16.mxu1 %v5224_v31  ;;  %2843 = vmatpush1.bf16.msra.mxu1 %v4202_v33  ;;  %v2915_v33 = vld [vmem:[%s5592_s3 + $0x20] sm:$0xff]  ;;  %v2933_v31 = vld [vmem:[%s5592_s3 + $0xb0] sm:$0xff] }
 0x281   : > { %2844 = vmatprep.subr.bf16.mxu1 %v4207_v34  ;;  %v2674_v34 = vrot.slane %v2627_v16, 1 }
 0x284   : > { %2845 = vmatpush1.bf16.msra.mxu1 %v4205_v36  ;;  %v3696_v36 = vpack.c.bf16 %v2916_v52, %v2915_v33 }
 0x285   : > { %2846 = vmatprep.subr.bf16.mxu1 %v4210_v37  ;;  %v3698_v37 = vpack.c.bf16 %v2934_v35, %v2933_v31 }
 0x287   : > { %2611 = vmatmul.mubr.bf16.gmra.mrb[12].mxu1 %v5222_v30  ;;  %v2914_v30 = vld [vmem:[%s5592_s3 + $0x18] sm:$0xff] }
 0x288   : > { %2847 = vmatpush1.bf16.msra.mxu1 %v4208_v41  ;;  %2874 = vmatprep.mubr.bf16.mxu1 %v2673_v2  ;;  %v3692_v28 = vpack.c.bf16 %v2914_v30, %v2913_v25  ;;  %v2675_v41 = vsel %vm1546_vm3, %v2669_v17, %v2674_v34  ;;  %v3700_v2 = vpack.c.bf16 %v2918_v40, %v2917_v39 }
 0x289   : > { %2848 = vmatprep.subr.bf16.mxu1 %v4213_v29  ;;  %v2936_v29 = vld [vmem:[%s5592_s3 + $0xc8] sm:$0xff] }
 0x28c   : > { %2849 = vmatpush1.bf16.msra.mxu1 %v4211_v4  ;;  %v3702_v4 = vpack.c.bf16 %v2936_v29, %v2935_v43 }
 0x28d   : > { %2850 = vmatprep.subr.bf16.mxu1 %v4216_v7  ;;  %v2919_v7 = vld [vmem:[%s5592_s3 + $0x40] sm:$0xff] }
 0x290   : > { %2851 = vmatpush1.bf16.msra.mxu1 %v4214_v42  ;;  %v2920_v42 = vld [vmem:[%s5592_s3 + $0x48] sm:$0xff] }
 0x291   : > { %2852 = vmatprep.subr.bf16.mxu1 %v4219_v44  ;;  %v2937_v44 = vld [vmem:[%s5592_s3 + $0xd0] sm:$0xff] }
 0x294   : > { %2853 = vmatpush1.bf16.msra.mxu1 %v4217_v45  ;;  %v2938_v45 = vld [vmem:[%s5592_s3 + $0xd8] sm:$0xff] }
 0x295   : > { %2854 = vmatprep.subr.bf16.mxu1 %v4222_v47  ;;  %v3704_v47 = vpack.c.bf16 %v2920_v42, %v2919_v7 }
 0x298   : > { %2855 = vmatpush1.bf16.msra.mxu1 %v4220_v48  ;;  %v3706_v48 = vpack.c.bf16 %v2938_v45, %v2937_v44 }
 0x299   : > { %2856 = vmatprep.subr.bf16.mxu1 %v4225_v49  ;;  %v2921_v49 = vld [vmem:[%s5592_s3 + $0x50] sm:$0xff] }
 0x29c   : > { %2857 = vmatpush1.bf16.msra.mxu1 %v4223_v50  ;;  %v2922_v50 = vld [vmem:[%s5592_s3 + $0x58] sm:$0xff] }
 0x29d   : > { %2858 = vmatprep.subr.bf16.mxu1 %v4228_v51  ;;  %v2939_v51 = vld [vmem:[%s5592_s3 + $0xe0] sm:$0xff] }
 0x2a0   : > { %2859 = vmatpush1.bf16.msra.mxu1 %v4226_v53  ;;  %v2940_v53 = vld [vmem:[%s5592_s3 + $0xe8] sm:$0xff] }
 0x2a1   : > { %2860 = vmatprep.subr.bf16.mxu1 %v4231_v54  ;;  %v3708_v54 = vpack.c.bf16 %v2922_v50, %v2921_v49 }
 0x2a4   : > { %2861 = vmatpush1.bf16.msra.mxu1 %v4229_v55  ;;  %v3710_v55 = vpack.c.bf16 %v2940_v53, %v2939_v51 }
 0x2a5   : > { %2862 = vmatprep.subr.bf16.mxu1 %v4234_v56  ;;  %v2923_v56 = vld [vmem:[%s5592_s3 + $0x60] sm:$0xff] }
 0x2a8   : > { %2863 = vmatpush1.bf16.msra.mxu1 %v4232_v57  ;;  %v2924_v57 = vld [vmem:[%s5592_s3 + $0x68] sm:$0xff] }
 0x2a9   : > { %2864 = vmatprep.subr.bf16.mxu1 %v4237_v23  ;;  %v3712_v23 = vpack.c.bf16 %v2924_v57, %v2923_v56 }
 0x2ac   : > { %2865 = vmatpush1.bf16.msra.mxu1 %v4235_v58  ;;  %v2941_v58 = vld [vmem:[%s5592_s3 + $0xf0] sm:$0xff] }
 0x2ad   : > { %2866 = vmatprep.subr.bf16.mxu1 %v4240_v59  ;;  %v2942_v59 = vld [vmem:[%s5592_s3 + $0xf8] sm:$0xff] }
 0x2b0   : > { %2867 = vmatpush1.bf16.msra.mxu1 %v4238_v38  ;;  %v3714_v38 = vpack.c.bf16 %v2942_v59, %v2941_v58 }
 0x2b1   : > { %2868 = vmatprep.subr.bf16.mxu1 %v4243_v60  ;;  %v2925_v60 = vld [vmem:[%s5592_s3 + $0x70] sm:$0xff] }
 0x2b4   : > { %2869 = vmatpush1.bf16.msra.mxu1 %v4241_v61  ;;  %v2926_v61 = vld [vmem:[%s5592_s3 + $0x78] sm:$0xff] }
 0x2b5   : > { %2870 = vmatprep.subr.bf16.mxu1 %v4246_v62  ;;  %v3716_v62 = vpack.c.bf16 %v2926_v61, %v2925_v60 }
 0x2b8   : > { %2871 = vmatpush1.bf16.msra.mxu1 %v4244_v63  ;;  %v3630_v63 = vld [vmem:[#allocation4] ss:$0 sm:$0xff] }
 0x2b9   : > { %2872 = vmatprep.subr.bf16.mxu1 %v4249_v3  ;;  %2950 = vperm.xlu0 %3817, %v3630_v63  }
 0x2bc   : > { %2873 = vmatpush1.bf16.msra.mxu1 %v4247_v11 }
 0x2bd   : > { %3687 = vmatprep.subr.bf16.mxu1 %v3686_v13 }
 0x2bf   : > { %2875 = vmatmul.mubr.bf16.vlgmr.msra.gmra.mrb[8].mxu1 %v2670_v26 }
 0x2c0   : > { %2884 = vmatprep.mubr.bf16.mxu1 %v2677_v22  ;;  %3689 = vmatpush3.bf16.msra.mxu1 %v3688_v21 }
 0x2c1   : > { %3691 = vmatprep.subr.bf16.mxu1 %v3690_v24 }
 0x2c4   : > { %3693 = vmatpush3.bf16.msra.mxu1 %v3692_v28 }
 0x2c5   : > { %3695 = vmatprep.subr.bf16.mxu1 %v3694_v32 }
 0x2c7   : > { %2885 = vmatmul.mubr.bf16.gmra.mrb[12].mxu1 %v2675_v41 }
 0x2c8   : > { %3697 = vmatpush3.bf16.msra.mxu1 %v3696_v36 }
 0x2c9   : > { %3699 = vmatprep.subr.bf16.mxu1 %v3698_v37 }
 0x2cc   : > { %3701 = vmatpush3.bf16.msra.mxu1 %v3700_v2 }
 0x2cd   : > { %3703 = vmatprep.subr.bf16.mxu1 %v3702_v4 }
 0x2d0   : > { %3705 = vmatpush3.bf16.msra.mxu1 %v3704_v47 }
 0x2d1   : > { %3707 = vmatprep.subr.bf16.mxu1 %v3706_v48 }
 0x2d4   : > { %3709 = vmatpush3.bf16.msra.mxu1 %v3708_v54 }
 0x2d5   : > { %3711 = vmatprep.subr.bf16.mxu1 %v3710_v55 }
 0x2d8   : > { %3713 = vmatpush3.bf16.msra.mxu1 %v3712_v23 }
 0x2d9   : > { %3715 = vmatprep.subr.bf16.mxu1 %v3714_v38 }
 0x2dc   : > { %3717 = vmatpush3.bf16.msra.mxu1 %v3716_v62 }
 0x338   : > { %v2951_v25 = vpop.permute.xlu0 %2950 }
 0x392   : > { %v2876_v3 = vpop.f32.mrb[8].mxu1 }
 0x393   : > { %v2878_v5 = vpop.f32.mrb[9].mxu1  ;;  %v2903_v10 = vmax.f32 %v2876_v3, 0.0 }
 0x394   : > { %v2904_v6 = vmax.f32 %v2878_v5, 0.0  ;;  %v2880_v9 = vpop.f32.mrb[10].mxu1 }
 0x395   : > { %v2882_v11 = vpop.f32.mrb[11].mxu1  ;;  %v2905_v13 = vmax.f32 %v2880_v9, 0.0 }
 0x396   : > { %v2906_v12 = vmax.f32 %v2882_v11, 0.0  ;;  %3017 = vmatprep.mubr.f32.mxu1 %v2904_v6 }
 0x397   : > { %3018 = vmatmul.mubr.f32.vlgmr.msra.gmra.mrb[16].mxu1 %v2903_v10 }
 0x398   : > { %3022 = vmatprep.mubr.f32.mxu1 %v2906_v12 }
 0x39a   : > { %v2886_v14 = vpop.f32.mrb[12].mxu1 }
 0x39b   : > { %v2888_v15 = vpop.f32.mrb[13].mxu1  ;;  %3023 = vmatmul.mubr.f32.gmra.mrb[18].mxu1 %v2905_v13  ;;  %v2907_v0 = vmax.f32 %v2886_v14, 0.0 }
 0x39c   : > { %v2908_v17 = vmax.f32 %v2888_v15, 0.0  ;;  %v2890_v18 = vpop.f32.mrb[14].mxu1 }
 0x39d   : > { %v2892_v19 = vpop.f32.mrb[15].mxu1  ;;  %v2909_v8 = vmax.f32 %v2890_v18, 0.0 }
 0x39e   : > { %v2910_v20 = vmax.f32 %v2892_v19, 0.0  ;;  %3027 = vmatprep.mubr.f32.mxu1 %v2908_v17 }
 0x39f   : > { %3028 = vmatmul.mubr.f32.gmra.mrb[20].mxu1 %v2907_v0 }
 0x3a0   : > { %3032 = vmatprep.mubr.f32.mxu1 %v2910_v20 }
 0x3a3   : > { %3033 = vmatmul.mubr.f32.gmra.mrb[22].mxu1 %v2909_v8 }
 0x46a   : > { %v3674_v21 = vpop.f32.mrb[16].mxu1 }
 0x46b   : > { %v3675_v24 = vpop.f32.mrb[17].mxu1 }
 0x46c   : > { %v3676_v30 = vadd.f32 %v3675_v24, %v3674_v21 }
 0x46e   : > { %v3020_v26 = vadd.f32 %v3676_v30, %v2951_v25  ;;  %v3677_v16 = vpop.f32.mrb[18].mxu1 }
 0x46f   : > { %v3678_v27 = vpop.f32.mrb[19].mxu1 }
 0x470   : > { %v3631_v46 = vmul.f32 -1.442695, %v3020_v26  ;;  %v3679_v22 = vadd.f32 %v3678_v27, %v3677_v16 }
 0x472   : > { %4250 = vpow2.f32 %v3631_v46  ;;  %v3025_v28 = vadd.f32 %v3679_v22, %v2951_v25  ;;  %v3680_v32 = vpop.f32.mrb[20].mxu1 }
 0x473   : > { %v3681_v33 = vpop.f32.mrb[21].mxu1 }
 0x474   : > { %v3632_v52 = vmul.f32 -1.442695, %v3025_v28  ;;  %v3682_v34 = vadd.f32 %v3681_v33, %v3680_v32 }
 0x476   : > { %4252 = vpow2.f32 %v3632_v52  ;;  %v3030_v31 = vadd.f32 %v3682_v34, %v2951_v25  ;;  %v3683_v35 = vpop.f32.mrb[22].mxu1 }
 0x477   : > { %v3684_v36 = vpop.f32.mrb[23].mxu1 }
 0x478   : > { %v3633_v37 = vmul.f32 -1.442695, %v3030_v31  ;;  %v3685_v39 = vadd.f32 %v3684_v36, %v3683_v35 }
 0x47a   : > { %4254 = vpow2.f32 %v3633_v37  ;;  %v3035_v40 = vadd.f32 %v3685_v39, %v2951_v25 }
 0x47c   : > { %v4251_v41 = vpop.eup %4250  ;;  %v3634_v43 = vmul.f32 -1.442695, %v3035_v40 }
 0x47d   : > { %v3050_v29 = vadd.f32 1.0, %v4251_v41 }
 0x47e   : > { %4256 = vpow2.f32 %v3634_v43 }
 0x47f   : > { %4258 = vrcp.f32 %v3050_v29 }
 0x480   : > { %v4253_v2 = vpop.eup %4252 }
 0x481   : > { %v3051_v4 = vadd.f32 1.0, %v4253_v2 }
 0x483   : > { %4260 = vrcp.f32 %v3051_v4 }
 0x484   : > { %v4255_v7 = vpop.eup %4254 }
 0x485   : > { %v3052_v42 = vadd.f32 1.0, %v4255_v7 }
 0x487   : > { %4262 = vrcp.f32 %v3052_v42 }
 0x488   : > { %v4257_v44 = vpop.eup %4256 }
 0x489   : > { %v4259_v45 = vpop.eup %4258  ;;  %v3053_v47 = vadd.f32 1.0, %v4257_v44 }
 0x48a   : > { %3063 = vst.msk [vmem:[%s219_s9] sm:$0xff] %vm3062_vm5, %v4259_v45 }
 0x48b   : > { %4264 = vrcp.f32 %v3053_v47 }
 0x48d   : > { %v4261_v48 = vpop.eup %4260 }
 0x48e   : > { %3064 = vst.msk [vmem:[%s219_s9 + $0x8] sm:$0xff] %vm3062_vm5, %v4261_v48 }
 0x491   : > { %v4263_v49 = vpop.eup %4262 }
 0x492   : > { %3065 = vst.msk [vmem:[%s219_s9 + $0x10] sm:$0xff] %vm3062_vm5, %v4263_v49 }
 0x495   : > { %v4265_v50 = vpop.eup %4264 }
 0x496   : > { %3066 = vst.msk [vmem:[%s219_s9 + $0x18] sm:$0xff] %vm3062_vm5, %v4265_v50 }
 0x497   : > { %4282 = shalt.err (!%p4279_p3)
}
 0x498   : > { %s4283_s24 = scalar_lea.hbm %s5543_s14, 512  ;;  %s4287_s27 = scalar_lea.hbm %s5594_s5, 1024 }
 0x499   : > { %p4284_p4 = scmp.ne.s32.totalorder %s5543_s14, %s4283_s24  ;;  %p4288_p9 = scmp.lt.u32.totalorder %s5543_s14, %s5594_s5 }
 0x49a   : > { %p4289_p10 = scmp.lt.u32.totalorder %s4287_s27, %s4283_s24  ;;  %p4291_p12 = scmp.lt.u32.totalorder %s4283_s24, %s5543_s14 }
 0x49b   : > { %p4285_p7 = pnand %p4284_p4, %p4409_p5 }
 0x49c   : > { %p4290_p11 = por %p4289_p10, %p4288_p9 }
 0x49d   : > { %p4286_p8 = pneg %p4285_p7 }
 0x49e   : > { %p4292_p13 = por %p4291_p12, %p4290_p11 }
 0x4a0   : > { %p4293_p0 = pnand %p4292_p13, %p4286_p8 }
 0x4a2   : > { %4296 = shalt.err (!%p4293_p0)
}
 0x4a3   : > { %s4336_s8 = smov 128   ;;  %s4337_s9 = smov 8  }
 0x4a4   : > { %3774 = dma.vmem_to_hbm [thread:$0]  (%p4409_p5), %s5545_s11, 512, %s5543_s14, %s5548_s16, %s4336_s8, %s4336_s8, %s4337_s9  }
 0x4a5 PF: > { %p3780_p1 = scmp.ge.s32.totalorder %s4331_s23, 2  ;;  %s3096_s10 = sand.u32 1, %s4319_s20  }
 0x4a6   : > { %s3097_s12 = scalar_lea.sflag [#allocation6], %s3096_s10 }
 0x4a7   : > { %p3777_p2 = pnand %p3780_p1, %p4413_p6 }
 0x4a9   : > { %4314 = dma.done.wait (!%p3777_p2), %s3097_s12, 512  }
 0x4aa   : > { %4316 = vsyncadd (!%p3777_p2), %s3097_s12, 4294966784  ;;  %p17_p3 = scmp.ge.s32.totalorder %s4396_s25, 4   ;;  %s5597_s20 = smov %s4323_s21 }
 0x4ab   : > { %s5598_s21 = smov %s4327_s22  ;;  %s5599_s22 = smov %s4407_s28 }
 0x4ac   : > { %s5600_s23 = smov %s4396_s25  ;;  %19 = sbr.rel (!%p17_p3) target bundleno = 6 (0x6), region = 81 }
 0x4b3   :  { %3102 = vsyncpa [#allocation6], 1 }
 0x4b4   :  { %3104 = vsyncpa [#allocation6 + $0x1], 1 }

</bundles_post_ra>
